<compile_context>
chip_gen: v6e
topology: v6e:2x2x1
jax: 0.10.0
libtpu: 0.0.40
codegen_flags: <defaults>
</compile_context>

<pallas_src>
import functools

import jax
import jax.numpy as jnp
from jax import lax
from jax.experimental import pallas as pl
from jax.experimental.pallas import tpu as pltpu


def _leaky_relu(v, slope):
    return jnp.where(v > 0, v, slope * v)


# --------------------------------------------------------------------------
# Kernel 1: A^T reduction.  grid = (dst_blocks, src_blocks), src = reduction.
#   x_transform = dinv_dst * (A^T @ (dinv_src * x W_gcn^T)) + b_gcn
#   fitness     = sigmoid(A^T @ (x W_rel^T) + x W_root^T + b_rel)
# --------------------------------------------------------------------------
def _gcn_fitness_kernel(at_ref, rhsxw_ref, xrelT_ref, dinv_ref, bg_ref,
                        xrootb_ref, xt_out, fit_out, accx_ref, accf_ref):
    si = pl.program_id(1)

    @pl.when(si == 0)
    def _():
        accx_ref[...] = jnp.zeros_like(accx_ref)
        accf_ref[...] = jnp.zeros_like(accf_ref)

    at = at_ref[...].astype(jnp.float32)          # adjacency 0/1 -> exact cast
    accx_ref[...] += jnp.dot(at, rhsxw_ref[...],
                             preferred_element_type=jnp.float32)
    # (1, Bs) @ contract(Bs) with (Bt, Bs) -> (1, Bt): lane-dense fitness acc.
    accf_ref[...] += lax.dot_general(
        xrelT_ref[...], at, (((1,), (1,)), ((), ())),
        preferred_element_type=jnp.float32)

    @pl.when(si == pl.num_programs(1) - 1)
    def _():
        xt_out[...] = dinv_ref[...] * accx_ref[...] + bg_ref[...]
        fit_out[...] = jax.nn.sigmoid(accf_ref[...] + xrootb_ref[...])


# --------------------------------------------------------------------------
# Kernel 2: factored per-source softmax aggregation.
#   grid = (src_blocks, dst_blocks), dst = reduction.
#   num_k = A @ (e_key * xt),  den = A @ [e_key | e_query]  (all MXU)
#   xr_key/query = num / den ;  ker_error = sum_h |xr_key - xt_src|
# --------------------------------------------------------------------------
def _xr_kernel(a_ref, rhsk_ref, rhsq_ref, e2t_ref, xtsrc_ref,
               xrq_out, kerr_out, acck_ref, accq_ref, accd_ref):
    dj = pl.program_id(1)

    @pl.when(dj == 0)
    def _():
        acck_ref[...] = jnp.zeros_like(acck_ref)
        accq_ref[...] = jnp.zeros_like(accq_ref)
        accd_ref[...] = jnp.zeros_like(accd_ref)

    a = a_ref[...].astype(jnp.float32)                       # (Bs, Bt)
    acck_ref[...] += jnp.dot(a, rhsk_ref[...],
                             preferred_element_type=jnp.float32)
    accq_ref[...] += jnp.dot(a, rhsq_ref[...],
                             preferred_element_type=jnp.float32)
    accd_ref[...] += lax.dot_general(a, e2t_ref[...], (((1,), (1,)), ((), ())),
                                     preferred_element_type=jnp.float32)

    @pl.when(dj == pl.num_programs(1) - 1)
    def _():
        den = accd_ref[...]                                  # (Bs, 2)
        inv = jnp.where(den > 0, pl.reciprocal(den, approx=False), 0.0)
        xr_key = acck_ref[...] * inv[:, 0:1]
        xr_query = accq_ref[...] * inv[:, 1:2]
        xrq_out[...] = xr_query
        kerr_out[...] = jnp.sum(jnp.abs(xr_key - xtsrc_ref[...]),
                                axis=1, keepdims=True)


# --------------------------------------------------------------------------
# Kernel 3: score_sum[s] = sum_t A0[s,t] * (ker_error[s] - qe[s,t]), with
#   qe[s,t] = sum_h |xr_query[s,h] - x_transform[t,h]| and A0 = A w/o diagonal.
#   Streams A^T blocks ([t, s]) so the accumulator / output are lane-dense
#   (1, Bs).  grid = (src_blocks, dst_blocks), dst = reduction.
# --------------------------------------------------------------------------
def _redscore_kernel(at_ref, xt_ref, xrqT_ref, kerr_ref, fit_ref, out_ref,
                     acc_ref, *, H, lamb):
    si = pl.program_id(0)
    dj = pl.program_id(1)

    @pl.when(dj == 0)
    def _():
        acc_ref[...] = jnp.zeros_like(acc_ref)

    a = at_ref[...].astype(jnp.float32)                      # (Bt, Bs): [t, s]
    bt, bs = a.shape
    # zero self-loop (diagonal of A) entries in-kernel -> A0, no extra stream
    t_ids = lax.broadcasted_iota(jnp.int32, (bt, bs), 0) + dj * bt
    s_ids = lax.broadcasted_iota(jnp.int32, (bt, bs), 1) + si * bs
    a0 = jnp.where(t_ids == s_ids, 0.0, a)

    xt = xt_ref[...]                                         # (Bt, H)  dst
    xrqT = xrqT_ref[...]                                     # (H, Bs)  src

    # lane-dense per-feature L1 accumulation: never build a (Bt,Bs,H) temp.
    s_qe = jnp.zeros((bt, bs), jnp.float32)
    for h in range(H):                                       # static unroll
        s_qe = s_qe + jnp.abs(xt[:, h:h + 1] - xrqT[h:h + 1, :])

    colsum = jnp.sum(a0, axis=0, keepdims=True)              # (1, Bs)
    qe_dot = jnp.sum(a0 * s_qe, axis=0, keepdims=True)       # (1, Bs)
    acc_ref[...] += kerr_ref[...] * colsum - qe_dot

    @pl.when(dj == pl.num_programs(1) - 1)
    def _():
        out_ref[...] = fit_ref[...] - lamb * acc_ref[...]


# --------------------------------------------------------------------------
# Wrapper
# --------------------------------------------------------------------------
def redconv_forward(x, A, params, negative_slope=0.2, lamb=0.1, block=256):
    """RedConv forward on a dense adjacency A (self-loops on the diagonal)."""
    f32 = jnp.float32
    x = x.astype(f32)
    A = A.astype(f32)
    N, F = x.shape
    H = params["W_gcn"].shape[0]

    # ---- tiling: pad N to a lane multiple, no bs = N fallback --------------
    block = max(128, (int(block) // 128) * 128)
    Np = ((N + 127) // 128) * 128
    bs = block if Np % block == 0 else 128
    nb = Np // bs
    if Np != N:
        A = jnp.pad(A, ((0, Np - N), (0, Np - N)))
        x = jnp.pad(x, ((0, Np - N), (0, 0)))

    # ---- cheap O(N*H) precompute in plain XLA ------------------------------
    deg = jnp.sum(A, axis=0)[:, None]                        # in-degree (dst)
    dinv = jnp.where(deg > 0, 1.0 / jnp.sqrt(deg), 0.0)      # (Np, 1)
    xw = x @ params["W_gcn"].T.astype(f32)                   # (Np, H)
    rhs_xw = dinv * xw                                       # (Np, H)
    xrelT = (x @ params["W_rel"].T.astype(f32)).reshape(1, Np)
    xrootb = ((x @ params["W_root"].T.astype(f32)).reshape(1, Np)
              + params["b_rel"].astype(f32).reshape(1, 1))
    bg = params["b_gcn"].reshape(1, H).astype(f32)

    # N^2 adjacency operands streamed in bf16 (0/1 values are exact in bf16,
    # accumulation stays f32) -> halves the dominant HBM traffic; v7x-safe.
    A_bf = A.astype(jnp.bfloat16)
    AT_bf = A.T.astype(jnp.bfloat16)

    vmem_limit = int(min(max(4 * bs * bs * 2 + 6 * bs * bs * 4 + (2 << 20),
                             8 << 20), 40 << 20))
    cparams = pltpu.CompilerParams(
        dimension_semantics=("parallel", "arbitrary"),
        vmem_limit_bytes=vmem_limit)

    # ---- kernel 1: x_transform + fitness ------------------------------------
    xt, fit = pl.pallas_call(
        _gcn_fitness_kernel,
        grid=(nb, nb),
        in_specs=[
            pl.BlockSpec((bs, bs), lambda dj, si: (dj, si)),     # A^T
            pl.BlockSpec((bs, H), lambda dj, si: (si, 0)),       # dinv*xW (src)
            pl.BlockSpec((1, bs), lambda dj, si: (0, si)),       # x@W_rel^T (src)
            pl.BlockSpec((bs, 1), lambda dj, si: (dj, 0)),       # dinv (dst)
            pl.BlockSpec((1, H), lambda dj, si: (0, 0)),         # b_gcn
            pl.BlockSpec((1, bs), lambda dj, si: (0, dj)),       # x@W_root^T+b (dst)
        ],
        out_specs=[
            pl.BlockSpec((bs, H), lambda dj, si: (dj, 0)),       # x_transform
            pl.BlockSpec((1, bs), lambda dj, si: (0, dj)),       # fitness (lane-dense)
        ],
        out_shape=(jax.ShapeDtypeStruct((Np, H), f32),
                   jax.ShapeDtypeStruct((1, Np), f32)),
        scratch_shapes=[pltpu.VMEM((bs, H), f32),
                        pltpu.VMEM((1, bs), f32)],
        compiler_params=cparams,
    )(AT_bf, rhs_xw, xrelT, dinv, bg, xrootb)

    # ---- per-node scores, factored softmax weights (O(N*H), plain XLA) -----
    key_s = _leaky_relu(xt @ params["w_key"].T.astype(f32)
                        + params["b_key"].astype(f32), negative_slope)[:, 0]
    query_s = _leaky_relu(xt @ params["w_query"].T.astype(f32)
                          + params["b_query"].astype(f32), negative_slope)[:, 0]
    # Scores depend only on the dst node; softmax is over each source's
    # neighbours, so exp() is done once per node here (O(N) EUP work instead
    # of O(N^2) inside the kernel).  Global max keeps exp() <= 1.
    ek = jnp.exp(key_s - jnp.max(key_s))
    eq = jnp.exp(query_s - jnp.max(query_s))
    rhs2k = ek[:, None] * xt                                  # (Np, H)
    rhs2q = eq[:, None] * xt
    e2T = jnp.stack([ek, eq], axis=0)                         # (2, Np)

    # ---- kernel 2: xr_query + ker_error -------------------------------------
    xr_query, kerr = pl.pallas_call(
        _xr_kernel,
        grid=(nb, nb),
        in_specs=[
            pl.BlockSpec((bs, bs), lambda si, dj: (si, dj)),     # A
            pl.BlockSpec((bs, H), lambda si, dj: (dj, 0)),       # e_key*xt (dst)
            pl.BlockSpec((bs, H), lambda si, dj: (dj, 0)),       # e_query*xt (dst)
            pl.BlockSpec((2, bs), lambda si, dj: (0, dj)),       # [e_key; e_query]
            pl.BlockSpec((bs, H), lambda si, dj: (si, 0)),       # xt (src)
        ],
        out_specs=[
            pl.BlockSpec((bs, H), lambda si, dj: (si, 0)),
            pl.BlockSpec((bs, 1), lambda si, dj: (si, 0)),
        ],
        out_shape=(jax.ShapeDtypeStruct((Np, H), f32),           # xr_query
                   jax.ShapeDtypeStruct((Np, 1), f32)),          # ker_error
        scratch_shapes=[pltpu.VMEM((bs, H), f32),
                        pltpu.VMEM((bs, H), f32),
                        pltpu.VMEM((bs, 2), f32)],
        compiler_params=cparams,
    )(A_bf, rhs2k, rhs2q, e2T, xt)

    xrqT = xr_query.T                                         # (H, Np)
    kerr_row = kerr.reshape(1, Np)                            # (1, Np)

    # ---- kernel 3: per-feature L1 contraction + final score ----------------
    final = pl.pallas_call(
        functools.partial(_redscore_kernel, H=H, lamb=lamb),
        grid=(nb, nb),
        in_specs=[
            pl.BlockSpec((bs, bs), lambda si, dj: (dj, si)),     # A^T ([t, s])
            pl.BlockSpec((bs, H), lambda si, dj: (dj, 0)),       # xt (dst)
            pl.BlockSpec((H, bs), lambda si, dj: (0, si)),       # xr_query^T (src)
            pl.BlockSpec((1, bs), lambda si, dj: (0, si)),       # ker_error (src)
            pl.BlockSpec((1, bs), lambda si, dj: (0, si)),       # fitness (src)
        ],
        out_specs=pl.BlockSpec((1, bs), lambda si, dj: (0, si)),
        out_shape=jax.ShapeDtypeStruct((1, Np), f32),
        scratch_shapes=[pltpu.VMEM((1, bs), f32)],
        compiler_params=cparams,
    )(AT_bf, xt, xrqT, kerr_row, fit)

    return final[0, :N]


# ---------------- pure-JAX edge-list reference (mirrors the PyTorch code) ---
def redconv_ref(x, edge_index, params, negative_slope=0.2, lamb=0.1):
    N = x.shape[0]
    src, dst = edge_index[0], edge_index[1]
    E = src.shape[0]

    # GCNConv
    xw = x @ params["W_gcn"].T
    deg = jax.ops.segment_sum(jnp.ones((E,), jnp.float32), dst, num_segments=N)
    dinv = jnp.where(deg > 0, 1.0 / jnp.sqrt(deg), 0.0)
    norm = dinv[src] * dinv[dst]
    x_transform = jax.ops.segment_sum(norm[:, None] * xw[src], dst,
                                      num_segments=N) + params["b_gcn"]
    x_neighbor = x_transform[dst]

    def edge_softmax(s):   # softmax grouped by edge_index[0]
        mx = jax.ops.segment_max(s, src, num_segments=N)
        e = jnp.exp(s - mx[src])
        z = jax.ops.segment_sum(e, src, num_segments=N)
        return e / z[src]

    key_s = edge_softmax(_leaky_relu(x_neighbor @ params["w_key"].T
                                     + params["b_key"], negative_slope)[:, 0])
    query_s = edge_softmax(_leaky_relu(x_neighbor @ params["w_query"].T
                                       + params["b_query"], negative_slope)[:, 0])
    xr_key = jax.ops.segment_sum(x_neighbor * key_s[:, None], src, num_segments=N)
    xr_query = jax.ops.segment_sum(x_neighbor * query_s[:, None], src, num_segments=N)

    ker_error = jnp.sum(jnp.abs(xr_key[src] - x_transform[src]), axis=1)
    query_error = jnp.sum(jnp.abs(xr_query[src] - x_transform[dst]), axis=1)
    red_score = ker_error - query_error
    red_score = red_score.at[-N:].set(0.0)          # zero appended self-loop edges
    score_sum = jax.ops.segment_sum(red_score, src, num_segments=N)

    agg = jax.ops.segment_sum(x[src], dst, num_segments=N)
    fitness = jax.nn.sigmoid((agg @ params["W_rel"].T + params["b_rel"])[:, 0]
                             + (x @ params["W_root"].T)[:, 0])
    return fitness - lamb * score_sum


if __name__ == "__main__":
    key = jax.random.PRNGKey(0)
    N, F = 250, 32          # nodes, in_channels (N not a multiple of 128 ->
    H = F                   # exercises the padding path; hidden == in_channels)
    ks = jax.random.split(key, 10)

    x = jax.random.normal(ks[0], (N, F), jnp.float32)

    # simple ring-like graph with no self-loops; self-loops appended last
    # (matches add_remaining_self_loops + `red_score[-N:] = 0`)
    idx = jnp.arange(N)
    src = jnp.concatenate([idx, idx, idx]).astype(jnp.int32)
    dst = jnp.concatenate([(idx + 1) % N, (idx + 3) % N, idx]).astype(jnp.int32)
    edge_index = jnp.stack([src, dst])
    A = jnp.zeros((N, N), jnp.float32).at[src, dst].add(1.0)

    params = {
        "W_gcn":   0.2 * jax.random.normal(ks[1], (H, F), jnp.float32),
        "b_gcn":   0.1 * jax.random.normal(ks[2], (H,),   jnp.float32),
        "w_key":   0.2 * jax.random.normal(ks[3], (1, H), jnp.float32),
        "b_key":   0.1 * jax.random.normal(ks[4], (1,),   jnp.float32),
        "w_query": 0.2 * jax.random.normal(ks[5], (1, H), jnp.float32),
        "b_query": 0.1 * jax.random.normal(ks[6], (1,),   jnp.float32),
        "W_rel":   0.2 * jax.random.normal(ks[7], (1, F), jnp.float32),
        "b_rel":   0.1 * jax.random.normal(ks[8], (1,),   jnp.float32),
        "W_root":  0.2 * jax.random.normal(ks[9], (1, F), jnp.float32),
    }
    # TODO(synk): self.att = Linear(2*in_channels, 1) is never used in forward -> omitted.

    fwd = jax.jit(functools.partial(redconv_forward,
                                    negative_slope=0.2, lamb=0.1, block=128))
    out = jax.block_until_ready(fwd(x, A, params))
    ref = jax.block_until_ready(redconv_ref(x, edge_index, params,
                                            negative_slope=0.2, lamb=0.1))
    assert out.shape == (N,)
    assert jnp.allclose(out, ref, rtol=1e-3, atol=1e-3)
    print("KERNEL_OK")
</pallas_src>

<mosaic_0001>
module attributes {stable_mosaic.version = 11 : i64} {
  func.func @_gcn_fitness_kernel(%arg0: i32, %arg1: i32, %arg2: memref<128x128xbf16, #tpu.memory_space<vmem>>, %arg3: memref<128x32xf32, #tpu.memory_space<vmem>>, %arg4: memref<1x128xf32, #tpu.memory_space<vmem>>, %arg5: memref<128x1xf32, #tpu.memory_space<vmem>>, %arg6: memref<1x32xf32, #tpu.memory_space<vmem>>, %arg7: memref<1x128xf32, #tpu.memory_space<vmem>>, %arg8: memref<128x32xf32, #tpu.memory_space<vmem>>, %arg9: memref<1x128xf32, #tpu.memory_space<vmem>>, %arg10: memref<128x32xf32, #tpu.memory_space<vmem>>, %arg11: memref<1x128xf32, #tpu.memory_space<vmem>>) attributes {dimension_semantics = [#tpu.dimension_semantics<parallel>, #tpu.dimension_semantics<arbitrary>], iteration_bounds = array<i64: 2, 2>, scalar_prefetch = 0 : i64, scratch_operands = 2 : i64, tpu.core_type = #tpu.core_type<tc>, window_params = [{transform_indices = @transform_0, window_bounds = array<i64: 128, 128>}, {transform_indices = @transform_1, window_bounds = array<i64: 128, 32>}, {transform_indices = @transform_2, window_bounds = array<i64: 1, 128>}, {transform_indices = @transform_3, window_bounds = array<i64: 128, 1>}, {pipeline_mode = #tpu.pipeline_mode<synchronous>, transform_indices = @transform_4, window_bounds = array<i64: 1, 32>}, {transform_indices = @transform_5, window_bounds = array<i64: 1, 128>}, {transform_indices = @transform_6, window_bounds = array<i64: 128, 32>}, {transform_indices = @transform_7, window_bounds = array<i64: 1, 128>}]} {
    %c0_i32 = arith.constant 0 : i32
    %0 = arith.cmpi eq, %arg1, %c0_i32 : i32
    %1 = arith.extui %0 : i1 to i32
    %c0_i32_0 = arith.constant 0 : i32
    %2 = arith.cmpi ne, %1, %c0_i32_0 : i32
    scf.if %2 {
      %cst_16 = arith.constant 0.000000e+00 : f32
      %18 = vector.broadcast %cst_16 : f32 to vector<128x32xf32>
      %c0_17 = arith.constant 0 : index
      %c0_18 = arith.constant 0 : index
      %19 = vector.load %arg10[%c0_17, %c0_18] : memref<128x32xf32, #tpu.memory_space<vmem>>, vector<128x32xf32>
      tpu.vector_store %arg10[%c0_17, %c0_18], %18 {strides = array<i32>} : memref<128x32xf32, #tpu.memory_space<vmem>>, vector<128x32xf32>,
      %cst_19 = arith.constant 0.000000e+00 : f32
      %20 = vector.broadcast %cst_19 : f32 to vector<1x128xf32>
      %c0_20 = arith.constant 0 : index
      %c0_21 = arith.constant 0 : index
      %21 = vector.load %arg11[%c0_20, %c0_21] : memref<1x128xf32, #tpu.memory_space<vmem>>, vector<1x128xf32>
      tpu.vector_store %arg11[%c0_20, %c0_21], %20 {strides = array<i32>} : memref<1x128xf32, #tpu.memory_space<vmem>>, vector<1x128xf32>,
    } else {
    }
    %c0 = arith.constant 0 : index
    %c0_1 = arith.constant 0 : index
    %3 = vector.load %arg2[%c0, %c0_1] : memref<128x128xbf16, #tpu.memory_space<vmem>>, vector<128x128xbf16>
    %4 = arith.extf %3 : vector<128x128xbf16> to vector<128x128xf32>
    %c0_2 = arith.constant 0 : index
    %c0_3 = arith.constant 0 : index
    %5 = vector.load %arg10[%c0_2, %c0_3] : memref<128x32xf32, #tpu.memory_space<vmem>>, vector<128x32xf32>
    %c0_4 = arith.constant 0 : index
    %c0_5 = arith.constant 0 : index
    %6 = vector.load %arg3[%c0_4, %c0_5] : memref<128x32xf32, #tpu.memory_space<vmem>>, vector<128x32xf32>
    %cst = arith.constant dense<0.000000e+00> : vector<128x32xf32>
    %7 = tpu.matmul %4, %6, %cst {dimension_numbers = #tpu.dot_dimension_numbers<[1], [0], [0], [1], [0, 0, 1, 1], [], []>} : vector<128x128xf32>, vector<128x32xf32>, vector<128x32xf32> -> vector<128x32xf32>
    %8 = arith.addf %5, %7 : vector<128x32xf32>
    %c0_6 = arith.constant 0 : index
    %c0_7 = arith.constant 0 : index
    %9 = vector.load %arg10[%c0_6, %c0_7] : memref<128x32xf32, #tpu.memory_space<vmem>>, vector<128x32xf32>
    tpu.vector_store %arg10[%c0_6, %c0_7], %8 {strides = array<i32>} : memref<128x32xf32, #tpu.memory_space<vmem>>, vector<128x32xf32>,
    %c0_8 = arith.constant 0 : index
    %c0_9 = arith.constant 0 : index
    %10 = vector.load %arg11[%c0_8, %c0_9] : memref<1x128xf32, #tpu.memory_space<vmem>>, vector<1x128xf32>
    %c0_10 = arith.constant 0 : index
    %c0_11 = arith.constant 0 : index
    %11 = vector.load %arg4[%c0_10, %c0_11] : memref<1x128xf32, #tpu.memory_space<vmem>>, vector<1x128xf32>
    %cst_12 = arith.constant dense<0.000000e+00> : vector<1x128xf32>
    %12 = tpu.matmul %11, %4, %cst_12 {dimension_numbers = #tpu.dot_dimension_numbers<[1], [1], [0], [0], [0, 0, 1, 0], [], []>} : vector<1x128xf32>, vector<128x128xf32>, vector<1x128xf32> -> vector<1x128xf32>
    %13 = arith.addf %10, %12 : vector<1x128xf32>
    %c0_13 = arith.constant 0 : index
    %c0_14 = arith.constant 0 : index
    %14 = vector.load %arg11[%c0_13, %c0_14] : memref<1x128xf32, #tpu.memory_space<vmem>>, vector<1x128xf32>
    tpu.vector_store %arg11[%c0_13, %c0_14], %13 {strides = array<i32>} : memref<1x128xf32, #tpu.memory_space<vmem>>, vector<1x128xf32>,
    %c1_i32 = arith.constant 1 : i32
    %15 = arith.cmpi eq, %arg1, %c1_i32 : i32
    %16 = arith.extui %15 : i1 to i32
    %c0_i32_15 = arith.constant 0 : i32
    %17 = arith.cmpi ne, %16, %c0_i32_15 : i32
    scf.if %17 {
      %c0_16 = arith.constant 0 : index
      %c0_17 = arith.constant 0 : index
      %18 = vector.load %arg5[%c0_16, %c0_17] : memref<128x1xf32, #tpu.memory_space<vmem>>, vector<128x1xf32>
      %c0_18 = arith.constant 0 : index
      %c0_19 = arith.constant 0 : index
      %19 = vector.load %arg10[%c0_18, %c0_19] : memref<128x32xf32, #tpu.memory_space<vmem>>, vector<128x32xf32>
      %20 = vector.broadcast %18 : vector<128x1xf32> to vector<128x32xf32>
      %21 = arith.mulf %20, %19 : vector<128x32xf32>
      %c0_20 = arith.constant 0 : index
      %c0_21 = arith.constant 0 : index
      %22 = vector.load %arg6[%c0_20, %c0_21] : memref<1x32xf32, #tpu.memory_space<vmem>>, vector<1x32xf32>
      %23 = vector.broadcast %22 : vector<1x32xf32> to vector<128x32xf32>
      %24 = arith.addf %21, %23 : vector<128x32xf32>
      %c0_22 = arith.constant 0 : index
      %c0_23 = arith.constant 0 : index
      %25 = vector.load %arg8[%c0_22, %c0_23] : memref<128x32xf32, #tpu.memory_space<vmem>>, vector<128x32xf32>
      tpu.vector_store %arg8[%c0_22, %c0_23], %24 {strides = array<i32>} : memref<128x32xf32, #tpu.memory_space<vmem>>, vector<128x32xf32>,
      %c0_24 = arith.constant 0 : index
      %c0_25 = arith.constant 0 : index
      %26 = vector.load %arg11[%c0_24, %c0_25] : memref<1x128xf32, #tpu.memory_space<vmem>>, vector<1x128xf32>
      %c0_26 = arith.constant 0 : index
      %c0_27 = arith.constant 0 : index
      %27 = vector.load %arg7[%c0_26, %c0_27] : memref<1x128xf32, #tpu.memory_space<vmem>>, vector<1x128xf32>
      %28 = arith.addf %26, %27 : vector<1x128xf32>
      %29 = arith.negf %28 : vector<1x128xf32>
      %30 = math.exp %29 : vector<1x128xf32>
      %cst_28 = arith.constant 1.000000e+00 : f32
      %31 = vector.broadcast %cst_28 : f32 to vector<1x128xf32>
      %32 = arith.addf %31, %30 : vector<1x128xf32>
      %33 = arith.divf %31, %32 : vector<1x128xf32>
      %c0_29 = arith.constant 0 : index
      %c0_30 = arith.constant 0 : index
      %34 = vector.load %arg9[%c0_29, %c0_30] : memref<1x128xf32, #tpu.memory_space<vmem>>, vector<1x128xf32>
      tpu.vector_store %arg9[%c0_29, %c0_30], %33 {strides = array<i32>} : memref<1x128xf32, #tpu.memory_space<vmem>>, vector<1x128xf32>,
    } else {
    }
    return
  }
  func.func @transform_0(%arg0: i32, %arg1: i32) -> (i32, i32) {
    %c0_i32 = arith.constant 0 : i32
    return %arg0, %arg1 : i32, i32
  }
  func.func @transform_1(%arg0: i32, %arg1: i32) -> (i32, i32) {
    %c0_i32 = arith.constant 0 : i32
    %c0_i32_0 = arith.constant 0 : i32
    return %arg1, %c0_i32 : i32, i32
  }
  func.func @transform_2(%arg0: i32, %arg1: i32) -> (i32, i32) {
    %c0_i32 = arith.constant 0 : i32
    %c0_i32_0 = arith.constant 0 : i32
    return %c0_i32, %arg1 : i32, i32
  }
  func.func @transform_3(%arg0: i32, %arg1: i32) -> (i32, i32) {
    %c0_i32 = arith.constant 0 : i32
    %c0_i32_0 = arith.constant 0 : i32
    return %arg0, %c0_i32 : i32, i32
  }
  func.func @transform_4(%arg0: i32, %arg1: i32) -> (i32, i32) {
    %c0_i32 = arith.constant 0 : i32
    %c0_i32_0 = arith.constant 0 : i32
    %c0_i32_1 = arith.constant 0 : i32
    return %c0_i32, %c0_i32_0 : i32, i32
  }
  func.func @transform_5(%arg0: i32, %arg1: i32) -> (i32, i32) {
    %c0_i32 = arith.constant 0 : i32
    %c0_i32_0 = arith.constant 0 : i32
    return %c0_i32, %arg0 : i32, i32
  }
  func.func @transform_6(%arg0: i32, %arg1: i32) -> (i32, i32) {
    %c0_i32 = arith.constant 0 : i32
    %c0_i32_0 = arith.constant 0 : i32
    return %arg0, %c0_i32 : i32, i32
  }
  func.func @transform_7(%arg0: i32, %arg1: i32) -> (i32, i32) {
    %c0_i32 = arith.constant 0 : i32
    %c0_i32_0 = arith.constant 0 : i32
    return %c0_i32, %arg0 : i32, i32
  }
}

module attributes {stable_mosaic.version = 11 : i64} {
  func.func @_xr_kernel(%arg0: i32, %arg1: i32, %arg2: memref<128x128xbf16, #tpu.memory_space<vmem>>, %arg3: memref<128x32xf32, #tpu.memory_space<vmem>>, %arg4: memref<128x32xf32, #tpu.memory_space<vmem>>, %arg5: memref<2x128xf32, #tpu.memory_space<vmem>>, %arg6: memref<128x32xf32, #tpu.memory_space<vmem>>, %arg7: memref<128x32xf32, #tpu.memory_space<vmem>>, %arg8: memref<128x1xf32, #tpu.memory_space<vmem>>, %arg9: memref<128x32xf32, #tpu.memory_space<vmem>>, %arg10: memref<128x32xf32, #tpu.memory_space<vmem>>, %arg11: memref<128x2xf32, #tpu.memory_space<vmem>>) attributes {dimension_semantics = [#tpu.dimension_semantics<parallel>, #tpu.dimension_semantics<arbitrary>], iteration_bounds = array<i64: 2, 2>, scalar_prefetch = 0 : i64, scratch_operands = 3 : i64, tpu.core_type = #tpu.core_type<tc>, window_params = [{transform_indices = @transform_0, window_bounds = array<i64: 128, 128>}, {transform_indices = @transform_1, window_bounds = array<i64: 128, 32>}, {transform_indices = @transform_2, window_bounds = array<i64: 128, 32>}, {transform_indices = @transform_3, window_bounds = array<i64: 2, 128>}, {transform_indices = @transform_4, window_bounds = array<i64: 128, 32>}, {transform_indices = @transform_5, window_bounds = array<i64: 128, 32>}, {transform_indices = @transform_6, window_bounds = array<i64: 128, 1>}]} {
    %c0_i32 = arith.constant 0 : i32
    %0 = arith.cmpi eq, %arg1, %c0_i32 : i32
    %1 = arith.extui %0 : i1 to i32
    %c0_i32_0 = arith.constant 0 : i32
    %2 = arith.cmpi ne, %1, %c0_i32_0 : i32
    scf.if %2 {
      %cst_23 = arith.constant 0.000000e+00 : f32
      %23 = vector.broadcast %cst_23 : f32 to vector<128x32xf32>
      %c0_24 = arith.constant 0 : index
      %c0_25 = arith.constant 0 : index
      %24 = vector.load %arg9[%c0_24, %c0_25] : memref<128x32xf32, #tpu.memory_space<vmem>>, vector<128x32xf32>
      tpu.vector_store %arg9[%c0_24, %c0_25], %23 {strides = array<i32>} : memref<128x32xf32, #tpu.memory_space<vmem>>, vector<128x32xf32>,
      %cst_26 = arith.constant 0.000000e+00 : f32
      %25 = vector.broadcast %cst_26 : f32 to vector<128x32xf32>
      %c0_27 = arith.constant 0 : index
      %c0_28 = arith.constant 0 : index
      %26 = vector.load %arg10[%c0_27, %c0_28] : memref<128x32xf32, #tpu.memory_space<vmem>>, vector<128x32xf32>
      tpu.vector_store %arg10[%c0_27, %c0_28], %25 {strides = array<i32>} : memref<128x32xf32, #tpu.memory_space<vmem>>, vector<128x32xf32>,
      %cst_29 = arith.constant 0.000000e+00 : f32
      %27 = vector.broadcast %cst_29 : f32 to vector<128x2xf32>
      %c0_30 = arith.constant 0 : index
      %c0_31 = arith.constant 0 : index
      %28 = vector.load %arg11[%c0_30, %c0_31] : memref<128x2xf32, #tpu.memory_space<vmem>>, vector<128x2xf32>
      tpu.vector_store %arg11[%c0_30, %c0_31], %27 {strides = array<i32>} : memref<128x2xf32, #tpu.memory_space<vmem>>, vector<128x2xf32>,
    } else {
    }
    %c0 = arith.constant 0 : index
    %c0_1 = arith.constant 0 : index
    %3 = vector.load %arg2[%c0, %c0_1] : memref<128x128xbf16, #tpu.memory_space<vmem>>, vector<128x128xbf16>
    %4 = arith.extf %3 : vector<128x128xbf16> to vector<128x128xf32>
    %c0_2 = arith.constant 0 : index
    %c0_3 = arith.constant 0 : index
    %5 = vector.load %arg9[%c0_2, %c0_3] : memref<128x32xf32, #tpu.memory_space<vmem>>, vector<128x32xf32>
    %c0_4 = arith.constant 0 : index
    %c0_5 = arith.constant 0 : index
    %6 = vector.load %arg3[%c0_4, %c0_5] : memref<128x32xf32, #tpu.memory_space<vmem>>, vector<128x32xf32>
    %cst = arith.constant dense<0.000000e+00> : vector<128x32xf32>
    %7 = tpu.matmul %4, %6, %cst {dimension_numbers = #tpu.dot_dimension_numbers<[1], [0], [0], [1], [0, 0, 1, 1], [], []>} : vector<128x128xf32>, vector<128x32xf32>, vector<128x32xf32> -> vector<128x32xf32>
    %8 = arith.addf %5, %7 : vector<128x32xf32>
    %c0_6 = arith.constant 0 : index
    %c0_7 = arith.constant 0 : index
    %9 = vector.load %arg9[%c0_6, %c0_7] : memref<128x32xf32, #tpu.memory_space<vmem>>, vector<128x32xf32>
    tpu.vector_store %arg9[%c0_6, %c0_7], %8 {strides = array<i32>} : memref<128x32xf32, #tpu.memory_space<vmem>>, vector<128x32xf32>,
    %c0_8 = arith.constant 0 : index
    %c0_9 = arith.constant 0 : index
    %10 = vector.load %arg10[%c0_8, %c0_9] : memref<128x32xf32, #tpu.memory_space<vmem>>, vector<128x32xf32>
    %c0_10 = arith.constant 0 : index
    %c0_11 = arith.constant 0 : index
    %11 = vector.load %arg4[%c0_10, %c0_11] : memref<128x32xf32, #tpu.memory_space<vmem>>, vector<128x32xf32>
    %cst_12 = arith.constant dense<0.000000e+00> : vector<128x32xf32>
    %12 = tpu.matmul %4, %11, %cst_12 {dimension_numbers = #tpu.dot_dimension_numbers<[1], [0], [0], [1], [0, 0, 1, 1], [], []>} : vector<128x128xf32>, vector<128x32xf32>, vector<128x32xf32> -> vector<128x32xf32>
    %13 = arith.addf %10, %12 : vector<128x32xf32>
    %c0_13 = arith.constant 0 : index
    %c0_14 = arith.constant 0 : index
    %14 = vector.load %arg10[%c0_13, %c0_14] : memref<128x32xf32, #tpu.memory_space<vmem>>, vector<128x32xf32>
    tpu.vector_store %arg10[%c0_13, %c0_14], %13 {strides = array<i32>} : memref<128x32xf32, #tpu.memory_space<vmem>>, vector<128x32xf32>,
    %c0_15 = arith.constant 0 : index
    %c0_16 = arith.constant 0 : index
    %15 = vector.load %arg11[%c0_15, %c0_16] : memref<128x2xf32, #tpu.memory_space<vmem>>, vector<128x2xf32>
    %c0_17 = arith.constant 0 : index
    %c0_18 = arith.constant 0 : index
    %16 = vector.load %arg5[%c0_17, %c0_18] : memref<2x128xf32, #tpu.memory_space<vmem>>, vector<2x128xf32>
    %cst_19 = arith.constant dense<0.000000e+00> : vector<128x2xf32>
    %17 = tpu.matmul %4, %16, %cst_19 {dimension_numbers = #tpu.dot_dimension_numbers<[1], [1], [0], [0], [0, 0, 1, 0], [], []>} : vector<128x128xf32>, vector<2x128xf32>, vector<128x2xf32> -> vector<128x2xf32>
    %18 = arith.addf %15, %17 : vector<128x2xf32>
    %c0_20 = arith.constant 0 : index
    %c0_21 = arith.constant 0 : index
    %19 = vector.load %arg11[%c0_20, %c0_21] : memref<128x2xf32, #tpu.memory_space<vmem>>, vector<128x2xf32>
    tpu.vector_store %arg11[%c0_20, %c0_21], %18 {strides = array<i32>} : memref<128x2xf32, #tpu.memory_space<vmem>>, vector<128x2xf32>,
    %c1_i32 = arith.constant 1 : i32
    %20 = arith.cmpi eq, %arg1, %c1_i32 : i32
    %21 = arith.extui %20 : i1 to i32
    %c0_i32_22 = arith.constant 0 : i32
    %22 = arith.cmpi ne, %21, %c0_i32_22 : i32
    scf.if %22 {
      %c0_23 = arith.constant 0 : index
      %c0_24 = arith.constant 0 : index
      %23 = vector.load %arg11[%c0_23, %c0_24] : memref<128x2xf32, #tpu.memory_space<vmem>>, vector<128x2xf32>
      %cst_25 = arith.constant 0.000000e+00 : f32
      %24 = vector.broadcast %cst_25 : f32 to vector<128x2xf32>
      %25 = arith.cmpf ogt, %23, %24 : vector<128x2xf32>
      %26 = tpu.reciprocal %23 : vector<128x2xf32> -> vector<128x2xf32>
      %cst_26 = arith.constant 0.000000e+00 : f32
      %27 = vector.broadcast %cst_26 : f32 to vector<128x2xf32>
      %28 = arith.select %25, %26, %27 : vector<128x2xi1>, vector<128x2xf32>
      %c0_27 = arith.constant 0 : index
      %c0_28 = arith.constant 0 : index
      %29 = vector.load %arg9[%c0_27, %c0_28] : memref<128x32xf32, #tpu.memory_space<vmem>>, vector<128x32xf32>
      %30 = vector.extract_strided_slice %28 {offsets = [0, 0], sizes = [128, 1], strides = [1, 1]} : vector<128x2xf32> to vector<128x1xf32>
      %31 = vector.broadcast %30 : vector<128x1xf32> to vector<128x32xf32>
      %32 = arith.mulf %29, %31 : vector<128x32xf32>
      %c0_29 = arith.constant 0 : index
      %c0_30 = arith.constant 0 : index
      %33 = vector.load %arg10[%c0_29, %c0_30] : memref<128x32xf32, #tpu.memory_space<vmem>>, vector<128x32xf32>
      %34 = vector.extract_strided_slice %28 {offsets = [0, 1], sizes = [128, 1], strides = [1, 1]} : vector<128x2xf32> to vector<128x1xf32>
      %35 = vector.broadcast %34 : vector<128x1xf32> to vector<128x32xf32>
      %36 = arith.mulf %33, %35 : vector<128x32xf32>
      %c0_31 = arith.constant 0 : index
      %c0_32 = arith.constant 0 : index
      %37 = vector.load %arg7[%c0_31, %c0_32] : memref<128x32xf32, #tpu.memory_space<vmem>>, vector<128x32xf32>
      tpu.vector_store %arg7[%c0_31, %c0_32], %36 {strides = array<i32>} : memref<128x32xf32, #tpu.memory_space<vmem>>, vector<128x32xf32>,
      %c0_33 = arith.constant 0 : index
      %c0_34 = arith.constant 0 : index
      %38 = vector.load %arg6[%c0_33, %c0_34] : memref<128x32xf32, #tpu.memory_space<vmem>>, vector<128x32xf32>
      %39 = arith.subf %32, %38 : vector<128x32xf32>
      %40 = math.absf %39 : vector<128x32xf32>
      %cst_35 = arith.constant dense<0.000000e+00> : vector<128xf32>
      %41 = vector.multi_reduction <add>, %40, %cst_35 [1] : vector<128x32xf32> to vector<128xf32>
      %42 = vector.shape_cast %41 : vector<128xf32> to vector<128x1xf32>
      %c0_36 = arith.constant 0 : index
      %c0_37 = arith.constant 0 : index
      %43 = vector.load %arg8[%c0_36, %c0_37] : memref<128x1xf32, #tpu.memory_space<vmem>>, vector<128x1xf32>
      tpu.vector_store %arg8[%c0_36, %c0_37], %42 {strides = array<i32>} : memref<128x1xf32, #tpu.memory_space<vmem>>, vector<128x1xf32>,
    } else {
    }
    return
  }
  func.func @transform_0(%arg0: i32, %arg1: i32) -> (i32, i32) {
    %c0_i32 = arith.constant 0 : i32
    return %arg0, %arg1 : i32, i32
  }
  func.func @transform_1(%arg0: i32, %arg1: i32) -> (i32, i32) {
    %c0_i32 = arith.constant 0 : i32
    %c0_i32_0 = arith.constant 0 : i32
    return %arg1, %c0_i32 : i32, i32
  }
  func.func @transform_2(%arg0: i32, %arg1: i32) -> (i32, i32) {
    %c0_i32 = arith.constant 0 : i32
    %c0_i32_0 = arith.constant 0 : i32
    return %arg1, %c0_i32 : i32, i32
  }
  func.func @transform_3(%arg0: i32, %arg1: i32) -> (i32, i32) {
    %c0_i32 = arith.constant 0 : i32
    %c0_i32_0 = arith.constant 0 : i32
    return %c0_i32, %arg1 : i32, i32
  }
  func.func @transform_4(%arg0: i32, %arg1: i32) -> (i32, i32) {
    %c0_i32 = arith.constant 0 : i32
    %c0_i32_0 = arith.constant 0 : i32
    return %arg0, %c0_i32 : i32, i32
  }
  func.func @transform_5(%arg0: i32, %arg1: i32) -> (i32, i32) {
    %c0_i32 = arith.constant 0 : i32
    %c0_i32_0 = arith.constant 0 : i32
    return %arg0, %c0_i32 : i32, i32
  }
  func.func @transform_6(%arg0: i32, %arg1: i32) -> (i32, i32) {
    %c0_i32 = arith.constant 0 : i32
    %c0_i32_0 = arith.constant 0 : i32
    return %arg0, %c0_i32 : i32, i32
  }
}

module attributes {stable_mosaic.version = 11 : i64} {
  func.func @_redscore_kernel(%arg0: i32, %arg1: i32, %arg2: memref<128x128xbf16, #tpu.memory_space<vmem>>, %arg3: memref<128x32xf32, #tpu.memory_space<vmem>>, %arg4: memref<32x128xf32, #tpu.memory_space<vmem>>, %arg5: memref<1x128xf32, #tpu.memory_space<vmem>>, %arg6: memref<1x128xf32, #tpu.memory_space<vmem>>, %arg7: memref<1x128xf32, #tpu.memory_space<vmem>>, %arg8: memref<1x128xf32, #tpu.memory_space<vmem>>) attributes {dimension_semantics = [#tpu.dimension_semantics<parallel>, #tpu.dimension_semantics<arbitrary>], iteration_bounds = array<i64: 2, 2>, scalar_prefetch = 0 : i64, scratch_operands = 1 : i64, tpu.core_type = #tpu.core_type<tc>, window_params = [{transform_indices = @transform_0, window_bounds = array<i64: 128, 128>}, {transform_indices = @transform_1, window_bounds = array<i64: 128, 32>}, {transform_indices = @transform_2, window_bounds = array<i64: 32, 128>}, {transform_indices = @transform_3, window_bounds = array<i64: 1, 128>}, {transform_indices = @transform_4, window_bounds = array<i64: 1, 128>}, {transform_indices = @transform_5, window_bounds = array<i64: 1, 128>}]} {
    %c0_i32 = arith.constant 0 : i32
    %0 = arith.cmpi eq, %arg1, %c0_i32 : i32
    %1 = arith.extui %0 : i1 to i32
    %c0_i32_0 = arith.constant 0 : i32
    %2 = arith.cmpi ne, %1, %c0_i32_0 : i32
    scf.if %2 {
      %cst_17 = arith.constant 0.000000e+00 : f32
      %257 = vector.broadcast %cst_17 : f32 to vector<1x128xf32>
      %c0_18 = arith.constant 0 : index
      %c0_19 = arith.constant 0 : index
      %258 = vector.load %arg8[%c0_18, %c0_19] : memref<1x128xf32, #tpu.memory_space<vmem>>, vector<1x128xf32>
      tpu.vector_store %arg8[%c0_18, %c0_19], %257 {strides = array<i32>} : memref<1x128xf32, #tpu.memory_space<vmem>>, vector<1x128xf32>,
    } else {
    }
    %c0 = arith.constant 0 : index
    %c0_1 = arith.constant 0 : index
    %3 = vector.load %arg2[%c0, %c0_1] : memref<128x128xbf16, #tpu.memory_space<vmem>>, vector<128x128xbf16>
    %4 = arith.extf %3 : vector<128x128xbf16> to vector<128x128xf32>
    %5 = tpu.iota {dimensions = array<i32: 0>} : vector<128x128xi32>
    %c128_i32 = arith.constant 128 : i32
    %6 = arith.muli %arg1, %c128_i32 : i32
    %7 = vector.broadcast %6 : i32 to vector<128x128xi32>
    %8 = arith.addi %5, %7 : vector<128x128xi32>
    %9 = tpu.iota {dimensions = array<i32: 1>} : vector<128x128xi32>
    %c128_i32_2 = arith.constant 128 : i32
    %10 = arith.muli %arg0, %c128_i32_2 : i32
    %11 = vector.broadcast %10 : i32 to vector<128x128xi32>
    %12 = arith.addi %9, %11 : vector<128x128xi32>
    %13 = arith.cmpi eq, %8, %12 : vector<128x128xi32>
    %cst = arith.constant 0.000000e+00 : f32
    %14 = vector.broadcast %cst : f32 to vector<128x128xf32>
    %15 = arith.select %13, %14, %4 : vector<128x128xi1>, vector<128x128xf32>
    %c0_3 = arith.constant 0 : index
    %c0_4 = arith.constant 0 : index
    %16 = vector.load %arg3[%c0_3, %c0_4] : memref<128x32xf32, #tpu.memory_space<vmem>>, vector<128x32xf32>
    %c0_5 = arith.constant 0 : index
    %c0_6 = arith.constant 0 : index
    %17 = vector.load %arg4[%c0_5, %c0_6] : memref<32x128xf32, #tpu.memory_space<vmem>>, vector<32x128xf32>
    %cst_7 = arith.constant 0.000000e+00 : f32
    %18 = vector.broadcast %cst_7 : f32 to vector<128x128xf32>
    %19 = vector.extract_strided_slice %16 {offsets = [0, 0], sizes = [128, 1], strides = [1, 1]} : vector<128x32xf32> to vector<128x1xf32>
    %20 = vector.extract_strided_slice %17 {offsets = [0, 0], sizes = [1, 128], strides = [1, 1]} : vector<32x128xf32> to vector<1x128xf32>
    %21 = vector.broadcast %19 : vector<128x1xf32> to vector<128x128xf32>
    %22 = vector.broadcast %20 : vector<1x128xf32> to vector<128x128xf32>
    %23 = arith.subf %21, %22 : vector<128x128xf32>
    %24 = math.absf %23 : vector<128x128xf32>
    %25 = arith.addf %18, %24 : vector<128x128xf32>
    %26 = vector.extract_strided_slice %16 {offsets = [0, 1], sizes = [128, 1], strides = [1, 1]} : vector<128x32xf32> to vector<128x1xf32>
    %27 = vector.extract_strided_slice %17 {offsets = [1, 0], sizes = [1, 128], strides = [1, 1]} : vector<32x128xf32> to vector<1x128xf32>
    %28 = vector.broadcast %26 : vector<128x1xf32> to vector<128x128xf32>
    %29 = vector.broadcast %27 : vector<1x128xf32> to vector<128x128xf32>
    %30 = arith.subf %28, %29 : vector<128x128xf32>
    %31 = math.absf %30 : vector<128x128xf32>
    %32 = arith.addf %25, %31 : vector<128x128xf32>
    %33 = vector.extract_strided_slice %16 {offsets = [0, 2], sizes = [128, 1], strides = [1, 1]} : vector<128x32xf32> to vector<128x1xf32>
    %34 = vector.extract_strided_slice %17 {offsets = [2, 0], sizes = [1, 128], strides = [1, 1]} : vector<32x128xf32> to vector<1x128xf32>
    %35 = vector.broadcast %33 : vector<128x1xf32> to vector<128x128xf32>
    %36 = vector.broadcast %34 : vector<1x128xf32> to vector<128x128xf32>
    %37 = arith.subf %35, %36 : vector<128x128xf32>
    %38 = math.absf %37 : vector<128x128xf32>
    %39 = arith.addf %32, %38 : vector<128x128xf32>
    %40 = vector.extract_strided_slice %16 {offsets = [0, 3], sizes = [128, 1], strides = [1, 1]} : vector<128x32xf32> to vector<128x1xf32>
    %41 = vector.extract_strided_slice %17 {offsets = [3, 0], sizes = [1, 128], strides = [1, 1]} : vector<32x128xf32> to vector<1x128xf32>
    %42 = vector.broadcast %40 : vector<128x1xf32> to vector<128x128xf32>
    %43 = vector.broadcast %41 : vector<1x128xf32> to vector<128x128xf32>
    %44 = arith.subf %42, %43 : vector<128x128xf32>
    %45 = math.absf %44 : vector<128x128xf32>
    %46 = arith.addf %39, %45 : vector<128x128xf32>
    %47 = vector.extract_strided_slice %16 {offsets = [0, 4], sizes = [128, 1], strides = [1, 1]} : vector<128x32xf32> to vector<128x1xf32>
    %48 = vector.extract_strided_slice %17 {offsets = [4, 0], sizes = [1, 128], strides = [1, 1]} : vector<32x128xf32> to vector<1x128xf32>
    %49 = vector.broadcast %47 : vector<128x1xf32> to vector<128x128xf32>
    %50 = vector.broadcast %48 : vector<1x128xf32> to vector<128x128xf32>
    %51 = arith.subf %49, %50 : vector<128x128xf32>
    %52 = math.absf %51 : vector<128x128xf32>
    %53 = arith.addf %46, %52 : vector<128x128xf32>
    %54 = vector.extract_strided_slice %16 {offsets = [0, 5], sizes = [128, 1], strides = [1, 1]} : vector<128x32xf32> to vector<128x1xf32>
    %55 = vector.extract_strided_slice %17 {offsets = [5, 0], sizes = [1, 128], strides = [1, 1]} : vector<32x128xf32> to vector<1x128xf32>
    %56 = vector.broadcast %54 : vector<128x1xf32> to vector<128x128xf32>
    %57 = vector.broadcast %55 : vector<1x128xf32> to vector<128x128xf32>
    %58 = arith.subf %56, %57 : vector<128x128xf32>
    %59 = math.absf %58 : vector<128x128xf32>
    %60 = arith.addf %53, %59 : vector<128x128xf32>
    %61 = vector.extract_strided_slice %16 {offsets = [0, 6], sizes = [128, 1], strides = [1, 1]} : vector<128x32xf32> to vector<128x1xf32>
    %62 = vector.extract_strided_slice %17 {offsets = [6, 0], sizes = [1, 128], strides = [1, 1]} : vector<32x128xf32> to vector<1x128xf32>
    %63 = vector.broadcast %61 : vector<128x1xf32> to vector<128x128xf32>
    %64 = vector.broadcast %62 : vector<1x128xf32> to vector<128x128xf32>
    %65 = arith.subf %63, %64 : vector<128x128xf32>
    %66 = math.absf %65 : vector<128x128xf32>
    %67 = arith.addf %60, %66 : vector<128x128xf32>
    %68 = vector.extract_strided_slice %16 {offsets = [0, 7], sizes = [128, 1], strides = [1, 1]} : vector<128x32xf32> to vector<128x1xf32>
    %69 = vector.extract_strided_slice %17 {offsets = [7, 0], sizes = [1, 128], strides = [1, 1]} : vector<32x128xf32> to vector<1x128xf32>
    %70 = vector.broadcast %68 : vector<128x1xf32> to vector<128x128xf32>
    %71 = vector.broadcast %69 : vector<1x128xf32> to vector<128x128xf32>
    %72 = arith.subf %70, %71 : vector<128x128xf32>
    %73 = math.absf %72 : vector<128x128xf32>
    %74 = arith.addf %67, %73 : vector<128x128xf32>
    %75 = vector.extract_strided_slice %16 {offsets = [0, 8], sizes = [128, 1], strides = [1, 1]} : vector<128x32xf32> to vector<128x1xf32>
    %76 = vector.extract_strided_slice %17 {offsets = [8, 0], sizes = [1, 128], strides = [1, 1]} : vector<32x128xf32> to vector<1x128xf32>
    %77 = vector.broadcast %75 : vector<128x1xf32> to vector<128x128xf32>
    %78 = vector.broadcast %76 : vector<1x128xf32> to vector<128x128xf32>
    %79 = arith.subf %77, %78 : vector<128x128xf32>
    %80 = math.absf %79 : vector<128x128xf32>
    %81 = arith.addf %74, %80 : vector<128x128xf32>
    %82 = vector.extract_strided_slice %16 {offsets = [0, 9], sizes = [128, 1], strides = [1, 1]} : vector<128x32xf32> to vector<128x1xf32>
    %83 = vector.extract_strided_slice %17 {offsets = [9, 0], sizes = [1, 128], strides = [1, 1]} : vector<32x128xf32> to vector<1x128xf32>
    %84 = vector.broadcast %82 : vector<128x1xf32> to vector<128x128xf32>
    %85 = vector.broadcast %83 : vector<1x128xf32> to vector<128x128xf32>
    %86 = arith.subf %84, %85 : vector<128x128xf32>
    %87 = math.absf %86 : vector<128x128xf32>
    %88 = arith.addf %81, %87 : vector<128x128xf32>
    %89 = vector.extract_strided_slice %16 {offsets = [0, 10], sizes = [128, 1], strides = [1, 1]} : vector<128x32xf32> to vector<128x1xf32>
    %90 = vector.extract_strided_slice %17 {offsets = [10, 0], sizes = [1, 128], strides = [1, 1]} : vector<32x128xf32> to vector<1x128xf32>
    %91 = vector.broadcast %89 : vector<128x1xf32> to vector<128x128xf32>
    %92 = vector.broadcast %90 : vector<1x128xf32> to vector<128x128xf32>
    %93 = arith.subf %91, %92 : vector<128x128xf32>
    %94 = math.absf %93 : vector<128x128xf32>
    %95 = arith.addf %88, %94 : vector<128x128xf32>
    %96 = vector.extract_strided_slice %16 {offsets = [0, 11], sizes = [128, 1], strides = [1, 1]} : vector<128x32xf32> to vector<128x1xf32>
    %97 = vector.extract_strided_slice %17 {offsets = [11, 0], sizes = [1, 128], strides = [1, 1]} : vector<32x128xf32> to vector<1x128xf32>
    %98 = vector.broadcast %96 : vector<128x1xf32> to vector<128x128xf32>
    %99 = vector.broadcast %97 : vector<1x128xf32> to vector<128x128xf32>
    %100 = arith.subf %98, %99 : vector<128x128xf32>
    %101 = math.absf %100 : vector<128x128xf32>
    %102 = arith.addf %95, %101 : vector<128x128xf32>
    %103 = vector.extract_strided_slice %16 {offsets = [0, 12], sizes = [128, 1], strides = [1, 1]} : vector<128x32xf32> to vector<128x1xf32>
    %104 = vector.extract_strided_slice %17 {offsets = [12, 0], sizes = [1, 128], strides = [1, 1]} : vector<32x128xf32> to vector<1x128xf32>
    %105 = vector.broadcast %103 : vector<128x1xf32> to vector<128x128xf32>
    %106 = vector.broadcast %104 : vector<1x128xf32> to vector<128x128xf32>
    %107 = arith.subf %105, %106 : vector<128x128xf32>
    %108 = math.absf %107 : vector<128x128xf32>
    %109 = arith.addf %102, %108 : vector<128x128xf32>
    %110 = vector.extract_strided_slice %16 {offsets = [0, 13], sizes = [128, 1], strides = [1, 1]} : vector<128x32xf32> to vector<128x1xf32>
    %111 = vector.extract_strided_slice %17 {offsets = [13, 0], sizes = [1, 128], strides = [1, 1]} : vector<32x128xf32> to vector<1x128xf32>
    %112 = vector.broadcast %110 : vector<128x1xf32> to vector<128x128xf32>
    %113 = vector.broadcast %111 : vector<1x128xf32> to vector<128x128xf32>
    %114 = arith.subf %112, %113 : vector<128x128xf32>
    %115 = math.absf %114 : vector<128x128xf32>
    %116 = arith.addf %109, %115 : vector<128x128xf32>
    %117 = vector.extract_strided_slice %16 {offsets = [0, 14], sizes = [128, 1], strides = [1, 1]} : vector<128x32xf32> to vector<128x1xf32>
    %118 = vector.extract_strided_slice %17 {offsets = [14, 0], sizes = [1, 128], strides = [1, 1]} : vector<32x128xf32> to vector<1x128xf32>
    %119 = vector.broadcast %117 : vector<128x1xf32> to vector<128x128xf32>
    %120 = vector.broadcast %118 : vector<1x128xf32> to vector<128x128xf32>
    %121 = arith.subf %119, %120 : vector<128x128xf32>
    %122 = math.absf %121 : vector<128x128xf32>
    %123 = arith.addf %116, %122 : vector<128x128xf32>
    %124 = vector.extract_strided_slice %16 {offsets = [0, 15], sizes = [128, 1], strides = [1, 1]} : vector<128x32xf32> to vector<128x1xf32>
    %125 = vector.extract_strided_slice %17 {offsets = [15, 0], sizes = [1, 128], strides = [1, 1]} : vector<32x128xf32> to vector<1x128xf32>
    %126 = vector.broadcast %124 : vector<128x1xf32> to vector<128x128xf32>
    %127 = vector.broadcast %125 : vector<1x128xf32> to vector<128x128xf32>
    %128 = arith.subf %126, %127 : vector<128x128xf32>
    %129 = math.absf %128 : vector<128x128xf32>
    %130 = arith.addf %123, %129 : vector<128x128xf32>
    %131 = vector.extract_strided_slice %16 {offsets = [0, 16], sizes = [128, 1], strides = [1, 1]} : vector<128x32xf32> to vector<128x1xf32>
    %132 = vector.extract_strided_slice %17 {offsets = [16, 0], sizes = [1, 128], strides = [1, 1]} : vector<32x128xf32> to vector<1x128xf32>
    %133 = vector.broadcast %131 : vector<128x1xf32> to vector<128x128xf32>
    %134 = vector.broadcast %132 : vector<1x128xf32> to vector<128x128xf32>
    %135 = arith.subf %133, %134 : vector<128x128xf32>
    %136 = math.absf %135 : vector<128x128xf32>
    %137 = arith.addf %130, %136 : vector<128x128xf32>
    %138 = vector.extract_strided_slice %16 {offsets = [0, 17], sizes = [128, 1], strides = [1, 1]} : vector<128x32xf32> to vector<128x1xf32>
    %139 = vector.extract_strided_slice %17 {offsets = [17, 0], sizes = [1, 128], strides = [1, 1]} : vector<32x128xf32> to vector<1x128xf32>
    %140 = vector.broadcast %138 : vector<128x1xf32> to vector<128x128xf32>
    %141 = vector.broadcast %139 : vector<1x128xf32> to vector<128x128xf32>
    %142 = arith.subf %140, %141 : vector<128x128xf32>
    %143 = math.absf %142 : vector<128x128xf32>
    %144 = arith.addf %137, %143 : vector<128x128xf32>
    %145 = vector.extract_strided_slice %16 {offsets = [0, 18], sizes = [128, 1], strides = [1, 1]} : vector<128x32xf32> to vector<128x1xf32>
    %146 = vector.extract_strided_slice %17 {offsets = [18, 0], sizes = [1, 128], strides = [1, 1]} : vector<32x128xf32> to vector<1x128xf32>
    %147 = vector.broadcast %145 : vector<128x1xf32> to vector<128x128xf32>
    %148 = vector.broadcast %146 : vector<1x128xf32> to vector<128x128xf32>
    %149 = arith.subf %147, %148 : vector<128x128xf32>
    %150 = math.absf %149 : vector<128x128xf32>
    %151 = arith.addf %144, %150 : vector<128x128xf32>
    %152 = vector.extract_strided_slice %16 {offsets = [0, 19], sizes = [128, 1], strides = [1, 1]} : vector<128x32xf32> to vector<128x1xf32>
    %153 = vector.extract_strided_slice %17 {offsets = [19, 0], sizes = [1, 128], strides = [1, 1]} : vector<32x128xf32> to vector<1x128xf32>
    %154 = vector.broadcast %152 : vector<128x1xf32> to vector<128x128xf32>
    %155 = vector.broadcast %153 : vector<1x128xf32> to vector<128x128xf32>
    %156 = arith.subf %154, %155 : vector<128x128xf32>
    %157 = math.absf %156 : vector<128x128xf32>
    %158 = arith.addf %151, %157 : vector<128x128xf32>
    %159 = vector.extract_strided_slice %16 {offsets = [0, 20], sizes = [128, 1], strides = [1, 1]} : vector<128x32xf32> to vector<128x1xf32>
    %160 = vector.extract_strided_slice %17 {offsets = [20, 0], sizes = [1, 128], strides = [1, 1]} : vector<32x128xf32> to vector<1x128xf32>
    %161 = vector.broadcast %159 : vector<128x1xf32> to vector<128x128xf32>
    %162 = vector.broadcast %160 : vector<1x128xf32> to vector<128x128xf32>
    %163 = arith.subf %161, %162 : vector<128x128xf32>
    %164 = math.absf %163 : vector<128x128xf32>
    %165 = arith.addf %158, %164 : vector<128x128xf32>
    %166 = vector.extract_strided_slice %16 {offsets = [0, 21], sizes = [128, 1], strides = [1, 1]} : vector<128x32xf32> to vector<128x1xf32>
    %167 = vector.extract_strided_slice %17 {offsets = [21, 0], sizes = [1, 128], strides = [1, 1]} : vector<32x128xf32> to vector<1x128xf32>
    %168 = vector.broadcast %166 : vector<128x1xf32> to vector<128x128xf32>
    %169 = vector.broadcast %167 : vector<1x128xf32> to vector<128x128xf32>
    %170 = arith.subf %168, %169 : vector<128x128xf32>
    %171 = math.absf %170 : vector<128x128xf32>
    %172 = arith.addf %165, %171 : vector<128x128xf32>
    %173 = vector.extract_strided_slice %16 {offsets = [0, 22], sizes = [128, 1], strides = [1, 1]} : vector<128x32xf32> to vector<128x1xf32>
    %174 = vector.extract_strided_slice %17 {offsets = [22, 0], sizes = [1, 128], strides = [1, 1]} : vector<32x128xf32> to vector<1x128xf32>
    %175 = vector.broadcast %173 : vector<128x1xf32> to vector<128x128xf32>
    %176 = vector.broadcast %174 : vector<1x128xf32> to vector<128x128xf32>
    %177 = arith.subf %175, %176 : vector<128x128xf32>
    %178 = math.absf %177 : vector<128x128xf32>
    %179 = arith.addf %172, %178 : vector<128x128xf32>
    %180 = vector.extract_strided_slice %16 {offsets = [0, 23], sizes = [128, 1], strides = [1, 1]} : vector<128x32xf32> to vector<128x1xf32>
    %181 = vector.extract_strided_slice %17 {offsets = [23, 0], sizes = [1, 128], strides = [1, 1]} : vector<32x128xf32> to vector<1x128xf32>
    %182 = vector.broadcast %180 : vector<128x1xf32> to vector<128x128xf32>
    %183 = vector.broadcast %181 : vector<1x128xf32> to vector<128x128xf32>
    %184 = arith.subf %182, %183 : vector<128x128xf32>
    %185 = math.absf %184 : vector<128x128xf32>
    %186 = arith.addf %179, %185 : vector<128x128xf32>
    %187 = vector.extract_strided_slice %16 {offsets = [0, 24], sizes = [128, 1], strides = [1, 1]} : vector<128x32xf32> to vector<128x1xf32>
    %188 = vector.extract_strided_slice %17 {offsets = [24, 0], sizes = [1, 128], strides = [1, 1]} : vector<32x128xf32> to vector<1x128xf32>
    %189 = vector.broadcast %187 : vector<128x1xf32> to vector<128x128xf32>
    %190 = vector.broadcast %188 : vector<1x128xf32> to vector<128x128xf32>
    %191 = arith.subf %189, %190 : vector<128x128xf32>
    %192 = math.absf %191 : vector<128x128xf32>
    %193 = arith.addf %186, %192 : vector<128x128xf32>
    %194 = vector.extract_strided_slice %16 {offsets = [0, 25], sizes = [128, 1], strides = [1, 1]} : vector<128x32xf32> to vector<128x1xf32>
    %195 = vector.extract_strided_slice %17 {offsets = [25, 0], sizes = [1, 128], strides = [1, 1]} : vector<32x128xf32> to vector<1x128xf32>
    %196 = vector.broadcast %194 : vector<128x1xf32> to vector<128x128xf32>
    %197 = vector.broadcast %195 : vector<1x128xf32> to vector<128x128xf32>
    %198 = arith.subf %196, %197 : vector<128x128xf32>
    %199 = math.absf %198 : vector<128x128xf32>
    %200 = arith.addf %193, %199 : vector<128x128xf32>
    %201 = vector.extract_strided_slice %16 {offsets = [0, 26], sizes = [128, 1], strides = [1, 1]} : vector<128x32xf32> to vector<128x1xf32>
    %202 = vector.extract_strided_slice %17 {offsets = [26, 0], sizes = [1, 128], strides = [1, 1]} : vector<32x128xf32> to vector<1x128xf32>
    %203 = vector.broadcast %201 : vector<128x1xf32> to vector<128x128xf32>
    %204 = vector.broadcast %202 : vector<1x128xf32> to vector<128x128xf32>
    %205 = arith.subf %203, %204 : vector<128x128xf32>
    %206 = math.absf %205 : vector<128x128xf32>
    %207 = arith.addf %200, %206 : vector<128x128xf32>
    %208 = vector.extract_strided_slice %16 {offsets = [0, 27], sizes = [128, 1], strides = [1, 1]} : vector<128x32xf32> to vector<128x1xf32>
    %209 = vector.extract_strided_slice %17 {offsets = [27, 0], sizes = [1, 128], strides = [1, 1]} : vector<32x128xf32> to vector<1x128xf32>
    %210 = vector.broadcast %208 : vector<128x1xf32> to vector<128x128xf32>
    %211 = vector.broadcast %209 : vector<1x128xf32> to vector<128x128xf32>
    %212 = arith.subf %210, %211 : vector<128x128xf32>
    %213 = math.absf %212 : vector<128x128xf32>
    %214 = arith.addf %207, %213 : vector<128x128xf32>
    %215 = vector.extract_strided_slice %16 {offsets = [0, 28], sizes = [128, 1], strides = [1, 1]} : vector<128x32xf32> to vector<128x1xf32>
    %216 = vector.extract_strided_slice %17 {offsets = [28, 0], sizes = [1, 128], strides = [1, 1]} : vector<32x128xf32> to vector<1x128xf32>
    %217 = vector.broadcast %215 : vector<128x1xf32> to vector<128x128xf32>
    %218 = vector.broadcast %216 : vector<1x128xf32> to vector<128x128xf32>
    %219 = arith.subf %217, %218 : vector<128x128xf32>
    %220 = math.absf %219 : vector<128x128xf32>
    %221 = arith.addf %214, %220 : vector<128x128xf32>
    %222 = vector.extract_strided_slice %16 {offsets = [0, 29], sizes = [128, 1], strides = [1, 1]} : vector<128x32xf32> to vector<128x1xf32>
    %223 = vector.extract_strided_slice %17 {offsets = [29, 0], sizes = [1, 128], strides = [1, 1]} : vector<32x128xf32> to vector<1x128xf32>
    %224 = vector.broadcast %222 : vector<128x1xf32> to vector<128x128xf32>
    %225 = vector.broadcast %223 : vector<1x128xf32> to vector<128x128xf32>
    %226 = arith.subf %224, %225 : vector<128x128xf32>
    %227 = math.absf %226 : vector<128x128xf32>
    %228 = arith.addf %221, %227 : vector<128x128xf32>
    %229 = vector.extract_strided_slice %16 {offsets = [0, 30], sizes = [128, 1], strides = [1, 1]} : vector<128x32xf32> to vector<128x1xf32>
    %230 = vector.extract_strided_slice %17 {offsets = [30, 0], sizes = [1, 128], strides = [1, 1]} : vector<32x128xf32> to vector<1x128xf32>
    %231 = vector.broadcast %229 : vector<128x1xf32> to vector<128x128xf32>
    %232 = vector.broadcast %230 : vector<1x128xf32> to vector<128x128xf32>
    %233 = arith.subf %231, %232 : vector<128x128xf32>
    %234 = math.absf %233 : vector<128x128xf32>
    %235 = arith.addf %228, %234 : vector<128x128xf32>
    %236 = vector.extract_strided_slice %16 {offsets = [0, 31], sizes = [128, 1], strides = [1, 1]} : vector<128x32xf32> to vector<128x1xf32>
    %237 = vector.extract_strided_slice %17 {offsets = [31, 0], sizes = [1, 128], strides = [1, 1]} : vector<32x128xf32> to vector<1x128xf32>
    %238 = vector.broadcast %236 : vector<128x1xf32> to vector<128x128xf32>
    %239 = vector.broadcast %237 : vector<1x128xf32> to vector<128x128xf32>
    %240 = arith.subf %238, %239 : vector<128x128xf32>
    %241 = math.absf %240 : vector<128x128xf32>
    %242 = arith.addf %235, %241 : vector<128x128xf32>
    %cst_8 = arith.constant dense<0.000000e+00> : vector<128xf32>
    %243 = vector.multi_reduction <add>, %15, %cst_8 [0] : vector<128x128xf32> to vector<128xf32>
    %244 = vector.shape_cast %243 : vector<128xf32> to vector<1x128xf32>
    %245 = arith.mulf %15, %242 : vector<128x128xf32>
    %cst_9 = arith.constant dense<0.000000e+00> : vector<128xf32>
    %246 = vector.multi_reduction <add>, %245, %cst_9 [0] : vector<128x128xf32> to vector<128xf32>
    %247 = vector.shape_cast %246 : vector<128xf32> to vector<1x128xf32>
    %c0_10 = arith.constant 0 : index
    %c0_11 = arith.constant 0 : index
    %248 = vector.load %arg8[%c0_10, %c0_11] : memref<1x128xf32, #tpu.memory_space<vmem>>, vector<1x128xf32>
    %c0_12 = arith.constant 0 : index
    %c0_13 = arith.constant 0 : index
    %249 = vector.load %arg5[%c0_12, %c0_13] : memref<1x128xf32, #tpu.memory_space<vmem>>, vector<1x128xf32>
    %250 = arith.mulf %249, %244 : vector<1x128xf32>
    %251 = arith.subf %250, %247 : vector<1x128xf32>
    %252 = arith.addf %248, %251 : vector<1x128xf32>
    %c0_14 = arith.constant 0 : index
    %c0_15 = arith.constant 0 : index
    %253 = vector.load %arg8[%c0_14, %c0_15] : memref<1x128xf32, #tpu.memory_space<vmem>>, vector<1x128xf32>
    tpu.vector_store %arg8[%c0_14, %c0_15], %252 {strides = array<i32>} : memref<1x128xf32, #tpu.memory_space<vmem>>, vector<1x128xf32>,
    %c1_i32 = arith.constant 1 : i32
    %254 = arith.cmpi eq, %arg1, %c1_i32 : i32
    %255 = arith.extui %254 : i1 to i32
    %c0_i32_16 = arith.constant 0 : i32
    %256 = arith.cmpi ne, %255, %c0_i32_16 : i32
    scf.if %256 {
      %c0_17 = arith.constant 0 : index
      %c0_18 = arith.constant 0 : index
      %257 = vector.load %arg6[%c0_17, %c0_18] : memref<1x128xf32, #tpu.memory_space<vmem>>, vector<1x128xf32>
      %c0_19 = arith.constant 0 : index
      %c0_20 = arith.constant 0 : index
      %258 = vector.load %arg8[%c0_19, %c0_20] : memref<1x128xf32, #tpu.memory_space<vmem>>, vector<1x128xf32>
      %cst_21 = arith.constant 1.000000e-01 : f32
      %259 = vector.broadcast %cst_21 : f32 to vector<1x128xf32>
      %260 = arith.mulf %259, %258 : vector<1x128xf32>
      %261 = arith.subf %257, %260 : vector<1x128xf32>
      %c0_22 = arith.constant 0 : index
      %c0_23 = arith.constant 0 : index
      %262 = vector.load %arg7[%c0_22, %c0_23] : memref<1x128xf32, #tpu.memory_space<vmem>>, vector<1x128xf32>
      tpu.vector_store %arg7[%c0_22, %c0_23], %261 {strides = array<i32>} : memref<1x128xf32, #tpu.memory_space<vmem>>, vector<1x128xf32>,
    } else {
    }
    return
  }
  func.func @transform_0(%arg0: i32, %arg1: i32) -> (i32, i32) {
    %c0_i32 = arith.constant 0 : i32
    return %arg1, %arg0 : i32, i32
  }
  func.func @transform_1(%arg0: i32, %arg1: i32) -> (i32, i32) {
    %c0_i32 = arith.constant 0 : i32
    %c0_i32_0 = arith.constant 0 : i32
    return %arg1, %c0_i32 : i32, i32
  }
  func.func @transform_2(%arg0: i32, %arg1: i32) -> (i32, i32) {
    %c0_i32 = arith.constant 0 : i32
    %c0_i32_0 = arith.constant 0 : i32
    return %c0_i32, %arg0 : i32, i32
  }
  func.func @transform_3(%arg0: i32, %arg1: i32) -> (i32, i32) {
    %c0_i32 = arith.constant 0 : i32
    %c0_i32_0 = arith.constant 0 : i32
    return %c0_i32, %arg0 : i32, i32
  }
  func.func @transform_4(%arg0: i32, %arg1: i32) -> (i32, i32) {
    %c0_i32 = arith.constant 0 : i32
    %c0_i32_0 = arith.constant 0 : i32
    return %c0_i32, %arg0 : i32, i32
  }
  func.func @transform_5(%arg0: i32, %arg1: i32) -> (i32, i32) {
    %c0_i32 = arith.constant 0 : i32
    %c0_i32_0 = arith.constant 0 : i32
    return %c0_i32, %arg0 : i32, i32
  }
}

</mosaic_0001>

<bundles_post_ra>
// kernel: redconv_forward.3
= control target key start
LH: loop header
LB: loop body
LE: loop exit
PB: predicated region body
PF: predicated region fallthrough
CT: control target
= control target key end

     0   :  { %s1852_s0 = inlined_call_operand.vmem [shape: bf16[256,256], index: 0, kind: input, shape index: {}]   ;;  %s1853_s1 = inlined_call_operand.vmem [shape: f32[256,32], index: 1, kind: input, shape index: {}]   ;;  %s1854_s2 = inlined_call_operand.vmem [shape: f32[1,256], index: 2, kind: input, shape index: {}]   ;;  %s1855_s3 = inlined_call_operand.vmem [shape: f32[256,1], index: 3, kind: input, shape index: {}]   ;;  %s1856_s4 = inlined_call_operand.vmem [shape: f32[1,32], index: 4, kind: input, shape index: {}]   ;;  %s1857_s5 = inlined_call_operand.vmem [shape: f32[1,256], index: 5, kind: input, shape index: {}]   ;;  %s1858_s6 = inlined_call_operand.vmem [shape: f32[256,32], index: 6, kind: output, shape index: {0}]   ;;  %s1859_s7 = inlined_call_operand.vmem [shape: f32[1,256], index: 7, kind: output, shape index: {1}]  }
   0x1   :  { %1862 = sst [smem:[#allocation7_spill]] %s1852_s0 }
   0x2   :  { %1863 = sst [smem:[#allocation8_spill]] %s1853_s1 }
   0x3   :  { %s1512_s24 = smov 0   ;;  %s1514_s25 = smov 0  }
   0x4   :  { %s1516_s26 = smov 0   ;;  %s1518_s27 = smov 0  }
   0x5   :  { %s1520_s28 = smov 0   ;;  %s1522_s29 = smov 0  }
   0x6   :  { %s1524_s30 = smov 0  }
   0x7 LB: > { %s27_s8 = sadd.s32 1, %s1458_s28  ;;  %s30_s9 = sadd.s32 1, %s1462_s29  ;;  %s1466_s30 = sphi %s1524_s30, %s18_s30   ;;  %s1462_s29 = sphi %s1522_s29, %s1876_s29   ;;  %s1458_s28 = sphi %s1520_s28, %s1875_s28   ;;  %s1454_s27 = sphi %s1518_s27, %s1874_s27   ;;  %s1450_s26 = sphi %s1516_s26, %s1873_s26   ;;  %s1446_s25 = sphi %s1514_s25, %s1872_s25   ;;  %s1442_s24 = sphi %s1512_s24, %s1871_s24  }
   0x8   : > { %p28_p0 = scmp.ge.s32.totalorder %s27_s8, 2  ;;  %p46_p1 = scmp.ne.s32.totalorder %s1446_s25, %s1442_s24 }
   0x9   : > { %p47_p2 = scmp.eq.s32.totalorder %s1466_s30, 0  ;;  %s39_s13 = sadd.s32 1, %s1446_s25 }
   0xa   : > { %s1878_s8 = smov (%p28_p0, %s27_s8), 0  ;;  %s1880_s9 = smov (!%p28_p0, %s30_s9), %s1462_s29 }
   0xb   : > { %1864 = sst [smem:[#allocation5_spill]] %s1878_s8  ;;  %p48_p3 = por %p47_p2, %p46_p1 }
   0xc   : > { %p32_p4 = scmp.ge.s32.totalorder %s1880_s9, 2  ;;  %s35_s10 = ssub.s32 %s1458_s28, %s1878_s8 }
   0xd   : > { %p1147_p6 = scmp.ge.s32.totalorder %s1466_s30, 4 }
   0xe   : > { %s1882_s9 = smov (%p32_p4, %s1880_s9), 0 }
   0xf   : > { %1865 = sst [smem:[#allocation6_spill]] %s1882_s9  ;;  %s34_s11 = ssub.s32 %s1462_s29, %s1882_s9 }
  0x10   : > { %s36_s12 = sor.u32 %s35_s10, %s34_s11  ;;  %252 = sbr.rel (%p1147_p6) target bundleno = 41 (0x29), region = 20 }
  0x11   : > { %p37_p5 = scmp.eq.s32.totalorder %s36_s12, 0 }
  0x13   : > { %s1563_s14 = scalar_select %p37_p5, %s1446_s25, %s39_s13  }
  0x15   : > { %255 = sbr.rel (!%p48_p3) target bundleno = 41 (0x29), region = 24  ;;  %s257_s15 = sand.u32 (%p48_p3), 1, %s1446_s25  }
  0x16   : > { %s1166_s16 = sshll.u32 (%p48_p3), %s1462_s29, 5  ;;  %s1148_s17 = sshll.u32 (%p48_p3), %s257_s15, 6 }
  0x17   : > { %s262_s18 = sadd.s32 (%p48_p3), %s1458_s28, %s1166_s16  ;;  %s1866_s0 = sld [smem:[#allocation7_spill]] (%p48_p3) }
  0x18   : > { %s1151_s19 = sshll.u32 (%p48_p3), %s262_s18, 2  ;;  %s259_s23 = scalar_lea.vmem (%p48_p3), [#allocation4], %s1148_s17 }
  0x1d   : > { %s1572_s22 = scalar_lea.vmem %s1866_s0, %s1151_s19 }
  0x1e   : > { %v281_v0 = vld [vmem:[%s1572_s22] sm:$0xf]  ;;  %v283_v1 = vld [vmem:[%s1572_s22 + $0x8] sm:$0xf]  ;;  %v285_v2 = vld [vmem:[%s1572_s22 + $0x10] sm:$0xf] }
  0x1f   : > { %282 = vst [vmem:[%s259_s23] sm:$0xf] %v281_v0  ;;  %284 = vst [vmem:[%s259_s23 + $0x4] sm:$0xf] %v283_v1  ;;  %v287_v3 = vld [vmem:[%s1572_s22 + $0x18] sm:$0xf] }
  0x20   : > { %286 = vst [vmem:[%s259_s23 + $0x8] sm:$0xf] %v285_v2  ;;  %v289_v4 = vld [vmem:[%s1572_s22 + $0x20] sm:$0xf]  ;;  %v291_v5 = vld [vmem:[%s1572_s22 + $0x28] sm:$0xf] }
  0x21   : > { %288 = vst [vmem:[%s259_s23 + $0xc] sm:$0xf] %v287_v3  ;;  %290 = vst [vmem:[%s259_s23 + $0x10] sm:$0xf] %v289_v4  ;;  %v293_v6 = vld [vmem:[%s1572_s22 + $0x30] sm:$0xf] }
  0x22   : > { %292 = vst [vmem:[%s259_s23 + $0x14] sm:$0xf] %v291_v5  ;;  %v295_v7 = vld [vmem:[%s1572_s22 + $0x38] sm:$0xf]  ;;  %v297_v8 = vld [vmem:[%s1572_s22 + $0x40] sm:$0xf] }
  0x23   : > { %294 = vst [vmem:[%s259_s23 + $0x18] sm:$0xf] %v293_v6  ;;  %296 = vst [vmem:[%s259_s23 + $0x1c] sm:$0xf] %v295_v7  ;;  %v299_v9 = vld [vmem:[%s1572_s22 + $0x48] sm:$0xf] }
  0x24   : > { %298 = vst [vmem:[%s259_s23 + $0x20] sm:$0xf] %v297_v8  ;;  %v301_v10 = vld [vmem:[%s1572_s22 + $0x50] sm:$0xf]  ;;  %v303_v11 = vld [vmem:[%s1572_s22 + $0x58] sm:$0xf] }
  0x25   : > { %300 = vst [vmem:[%s259_s23 + $0x24] sm:$0xf] %v299_v9  ;;  %302 = vst [vmem:[%s259_s23 + $0x28] sm:$0xf] %v301_v10  ;;  %v305_v12 = vld [vmem:[%s1572_s22 + $0x60] sm:$0xf] }
  0x26   : > { %304 = vst [vmem:[%s259_s23 + $0x2c] sm:$0xf] %v303_v11  ;;  %v307_v13 = vld [vmem:[%s1572_s22 + $0x68] sm:$0xf]  ;;  %v309_v14 = vld [vmem:[%s1572_s22 + $0x70] sm:$0xf] }
  0x27   : > { %306 = vst [vmem:[%s259_s23 + $0x30] sm:$0xf] %v305_v12  ;;  %308 = vst [vmem:[%s259_s23 + $0x34] sm:$0xf] %v307_v13  ;;  %v311_v15 = vld [vmem:[%s1572_s22 + $0x78] sm:$0xf] }
  0x28   : > { %310 = vst [vmem:[%s259_s23 + $0x38] sm:$0xf] %v309_v14  ;;  %312 = vst [vmem:[%s259_s23 + $0x3c] sm:$0xf] %v311_v15 }
  0x29 PF: > { %p1152_p7 = scmp.ge.s32.totalorder %s1466_s30, 1  ;;  %p397_p8 = scmp.lt.s32.totalorder %s1466_s30, 5 }
  0x2b   : > { %p398_p9 = pnand %p1152_p7, %p397_p8 }
  0x2c   : > { %s404_s10 = sand.u32 (!%p398_p9), 1, %s1442_s24   ;;  %s1154_s11 = sshll.u32 (!%p398_p9), %s1450_s26, 4 }
  0x2d   : > { %401 = sbr.rel (%p398_p9) target bundleno = 493 (0x1ed), region = 81  ;;  %s1153_s12 = sshll.u32 (!%p398_p9), %s404_s10, 6 }
  0x2e   : > { %p456_p10 = scmp.lt.s32.totalorder (!%p398_p9), %s1154_s11, 31  ;;  %p461_p11 = scmp.lt.s32.totalorder (!%p398_p9), %s1450_s26, 1 }
  0x2f   : > { %s1156_s16 = sshll.u32 (!%p398_p9), %s1454_s27, 4  ;;  %s1867_s1 = sld [smem:[#allocation8_spill]] (!%p398_p9) }
  0x30   : > { %p465_p12 = scmp.lt.s32.totalorder (!%p398_p9), %s1156_s16, 31  ;;  %p470_p13 = scmp.lt.s32.totalorder (!%p398_p9), %s1454_s27, 1 }
  0x31   : > { %s1630_s8 = scalar_lea.vmem (!%p398_p9), [#allocation4], %s1153_s12  ;;  %p1160_p0 = scmp.ne.s32.totalorder (!%p398_p9), %s1450_s26, 0 }
  0x32   : > { %s1884_s11 = smov (!%p456_p10, %s1154_s11), 31  ;;  %s1886_s16 = smov (!%p465_p12, %s1156_s16), 31 }
  0x33   : > { %s1596_s13 = scalar_select %p461_p11, %s1450_s26, 1 }
  0x34   : > { %s1155_s15 = sshll.u32 %s1884_s11, 3  ;;  %s1888_s27 = smov (!%p470_p13, %s1454_s27), 1 }
  0x35   : > { %s1602_s19 = scalar_lea.vmem %s1867_s1, %s1155_s15  ;;  %s1157_s24 = sshll.u32 %s1886_s16, 3 }
  0x36   : > { %s1615_s11 = scalar_lea.vmem %s1855_s3, %s1157_s24  ;;  %s472_s18 = scalar_lea.vmem %s1857_s5, %s1888_s27 }
  0x37   : > { %s1624_s21 = scalar_lea.vmem %s1858_s6, %s1157_s24  ;;  %s481_s9 = scalar_lea.vmem %s1859_s7, %s1888_s27 }
  0x38   : > { %485 = sbr.rel (%p1160_p0) target bundleno = 71 (0x47), region = 89 }
  0x3d   : > { %vm486_vm0 = vcmask 261120   ;;  %v1468_v16 = vmov 0.0  }
  0x3e   : > { %487 = vst.msk [vmem:[#allocation2] sm:$0xff] %vm486_vm0, %v1468_v16  ;;  %488 = vst.msk [vmem:[#allocation2 + $0x8] sm:$0xff] %vm486_vm0, %v1468_v16 }
  0x3f   : > { %489 = vst.msk [vmem:[#allocation2 + $0x10] sm:$0xff] %vm486_vm0, %v1468_v16  ;;  %490 = vst.msk [vmem:[#allocation2 + $0x18] sm:$0xff] %vm486_vm0, %v1468_v16 }
  0x40   : > { %491 = vst.msk [vmem:[#allocation2 + $0x20] sm:$0xff] %vm486_vm0, %v1468_v16  ;;  %492 = vst.msk [vmem:[#allocation2 + $0x28] sm:$0xff] %vm486_vm0, %v1468_v16 }
  0x41   : > { %493 = vst.msk [vmem:[#allocation2 + $0x30] sm:$0xff] %vm486_vm0, %v1468_v16  ;;  %494 = vst.msk [vmem:[#allocation2 + $0x38] sm:$0xff] %vm486_vm0, %v1468_v16 }
  0x42   : > { %495 = vst.msk [vmem:[#allocation2 + $0x40] sm:$0xff] %vm486_vm0, %v1468_v16  ;;  %496 = vst.msk [vmem:[#allocation2 + $0x48] sm:$0xff] %vm486_vm0, %v1468_v16 }
  0x43   : > { %497 = vst.msk [vmem:[#allocation2 + $0x50] sm:$0xff] %vm486_vm0, %v1468_v16  ;;  %498 = vst.msk [vmem:[#allocation2 + $0x58] sm:$0xff] %vm486_vm0, %v1468_v16 }
  0x44   : > { %499 = vst.msk [vmem:[#allocation2 + $0x60] sm:$0xff] %vm486_vm0, %v1468_v16  ;;  %500 = vst.msk [vmem:[#allocation2 + $0x68] sm:$0xff] %vm486_vm0, %v1468_v16 }
  0x45   : > { %501 = vst.msk [vmem:[#allocation2 + $0x70] sm:$0xff] %vm486_vm0, %v1468_v16  ;;  %502 = vst.msk [vmem:[#allocation2 + $0x78] sm:$0xff] %vm486_vm0, %v1468_v16 }
  0x46   : > { %503 = vst [vmem:[#allocation3] sm:$0x1] %v1468_v16 }
  0x47 PF: > { %v567_v17 = vld [vmem:[%s1602_s19 + $0x78] sm:$0xff]  ;;  %v566_v19 = vld [vmem:[%s1602_s19 + $0x70] sm:$0xff]  ;;  %v1469_v20 = vmov 0.0   ;;  %v565_v22 = vld [vmem:[%s1602_s19 + $0x68] sm:$0xff]  ;;  %vm1470_vm1 = vmmov 0   ;;  %vm729_vm2 = vcmask 261120  }
  0x48   : > { %v1651_v18 = vld [vmem:[%s1630_s8 + $0x38] sm:$0xff]   ;;  %1255 = vmatprep.subr.mxu0 %v567_v17  ;;  %1311 = vmatprep.subr.mxu1 %v1469_v20  ;;  %v1664_v25 = vld [vmem:[%s1630_s8 + $0x30] sm:$0xff]   ;;  %v1668_v27 = vld [vmem:[%s1630_s8] sm:$0xff]   ;;  %p1161_p1 = scmp.ne.s32.totalorder %s1450_s26, 1 }
  0x49   : > { %v1198_v21 = vunpack.c.h.bf16 %v1651_v18  ;;  %1256 = vmatpush3.msra.mxu0 %v567_v17  ;;  %1343 = vmatprep.mubr.msk.f32.mxu1 %vm1470_vm1, %v1469_v20  ;;  %v1197_v23 = vunpack.c.l.bf16 %v1651_v18  ;;  %v564_v24 = vld [vmem:[%s1602_s19 + $0x60] sm:$0xff]  ;;  %v563_v26 = vld [vmem:[%s1602_s19 + $0x58] sm:$0xff]  ;;  %v1194_v28 = vunpack.c.h.bf16 %v1664_v25  ;;  %v1169_v29 = vunpack.c.l.bf16 %v1668_v27  ;;  %v562_v30 = vld [vmem:[%s1602_s19 + $0x50] sm:$0xff] }
  0x4a   : > { %1257 = vmatprep.subr.mxu0 %v566_v19  ;;  %v561_v31 = vld [vmem:[%s1602_s19 + $0x48] sm:$0xff]  ;;  %v1193_v32 = vunpack.c.l.bf16 %v1664_v25  ;;  %v560_v33 = vld [vmem:[%s1602_s19 + $0x40] sm:$0xff]  ;;  %v559_v35 = vld [vmem:[%s1602_s19 + $0x38] sm:$0xff]  ;;  %v1170_v50 = vunpack.c.h.bf16 %v1668_v27 }
  0x4b   : > { %1312 = vmatpush3.xpose.msra.mxu1 %v1198_v21  ;;  %1258 = vmatpush3.msra.mxu0 %v566_v19  ;;  %v1685_v34 = vld [vmem:[%s1630_s8 + $0x28] sm:$0xff]   ;;  %v556_v40 = vld [vmem:[%s1602_s19 + $0x20] sm:$0xff]  ;;  %v555_v42 = vld [vmem:[%s1602_s19 + $0x18] sm:$0xff] }
  0x4c   : > { %1313 = vmatprep.subr.mxu1 %v1469_v20  ;;  %1259 = vmatprep.subr.mxu0 %v565_v22  ;;  %v1190_v36 = vunpack.c.h.bf16 %v1685_v34  ;;  %v558_v37 = vld [vmem:[%s1602_s19 + $0x30] sm:$0xff]  ;;  %v557_v38 = vld [vmem:[%s1602_s19 + $0x28] sm:$0xff]  ;;  %v1189_v39 = vunpack.c.l.bf16 %v1685_v34  ;;  %v552_v48 = vld [vmem:[%s1602_s19] sm:$0xff] }
  0x4d   : > { %1260 = vmatpush3.msra.mxu0 %v565_v22  ;;  %1287 = vmatprep.mubr.f32.mxu0 %v1169_v29  ;;  %v1202_v41 = vld [vmem:[%s1630_s8 + $0x20] sm:$0xff]   ;;  %v554_v44 = vld [vmem:[%s1602_s19 + $0x10] sm:$0xff]  ;;  %v1201_v49 = vld [vmem:[%s1630_s8 + $0x18] sm:$0xff]  }
  0x4e   : > { %1261 = vmatprep.subr.mxu0 %v564_v24  ;;  %v1186_v43 = vunpack.c.h.bf16 %v1202_v41  ;;  %v553_v45 = vld [vmem:[%s1602_s19 + $0x8] sm:$0xff]  ;;  %v1185_v46 = vunpack.c.l.bf16 %v1202_v41  ;;  %v1182_v52 = vunpack.c.h.bf16 %v1201_v49  ;;  %v1200_v53 = vld [vmem:[%s1630_s8 + $0x10] sm:$0xff]   ;;  %v1181_v56 = vunpack.c.l.bf16 %v1201_v49  ;;  %v536_v61 = vld [vmem:[#allocation2] sm:$0xff] }
  0x4f   : > { %1314 = vmatpush3.xpose.msra.mxu1 %v1197_v23  ;;  %1262 = vmatpush3.msra.mxu0 %v564_v24  ;;  %v1199_v47 = vld [vmem:[%s1630_s8 + $0x8] sm:$0xff]   ;;  %v1177_v55 = vunpack.c.l.bf16 %v1200_v53  ;;  %v1178_v57 = vunpack.c.h.bf16 %v1200_v53  ;;  %s1868_s8 = scalar_lea.vmem %s1854_s2, %s1596_s13  ;;  %v539_v0 = vld [vmem:[#allocation2 + $0x18] sm:$0xff]  ;;  %v540_v9 = vld [vmem:[#allocation2 + $0x20] sm:$0xff] }
  0x50   : > { %1315 = vmatprep.subr.mxu1 %v1469_v20  ;;  %1263 = vmatprep.subr.mxu0 %v563_v26  ;;  %v1173_v51 = vunpack.c.l.bf16 %v1199_v47  ;;  %v1174_v54 = vunpack.c.h.bf16 %v1199_v47  ;;  %v747_v58 = vld [vmem:[%s1868_s8] sm:$0x1]  ;;  %v537_v59 = vld [vmem:[#allocation2 + $0x8] sm:$0xff]  ;;  %v538_v3 = vld [vmem:[#allocation2 + $0x10] sm:$0xff] }
  0x51   : > { %1264 = vmatpush3.msra.mxu0 %v563_v26  ;;  %v541_v6 = vld [vmem:[#allocation2 + $0x28] sm:$0xff]  ;;  %v543_v12 = vld [vmem:[#allocation2 + $0x38] sm:$0xff]  ;;  %v542_v15 = vld [vmem:[#allocation2 + $0x30] sm:$0xff] }
  0x52   : > { %1265 = vmatprep.subr.mxu0 %v562_v30  ;;  %v545_v18 = vld [vmem:[#allocation2 + $0x48] sm:$0xff]  ;;  %v547_v24 = vld [vmem:[#allocation2 + $0x58] sm:$0xff]  ;;  %v546_v27 = vld [vmem:[#allocation2 + $0x50] sm:$0xff] }
  0x53   : > { %1316 = vmatpush3.xpose.msra.mxu1 %v1194_v28  ;;  %1266 = vmatpush3.msra.mxu0 %v562_v30  ;;  %v549_v30 = vld [vmem:[#allocation2 + $0x68] sm:$0xff] }
  0x54   : > { %1317 = vmatprep.subr.mxu1 %v1469_v20  ;;  %1267 = vmatprep.subr.mxu0 %v561_v31 }
  0x55   : > { %1268 = vmatpush3.msra.mxu0 %v561_v31 }
  0x56   : > { %1269 = vmatprep.subr.mxu0 %v560_v33 }
  0x57   : > { %1318 = vmatpush3.xpose.msra.mxu1 %v1193_v32  ;;  %1270 = vmatpush3.msra.mxu0 %v560_v33  ;;  %v548_v33 = vld [vmem:[#allocation2 + $0x60] sm:$0xff] }
  0x58   : > { %1319 = vmatprep.subr.mxu1 %v1469_v20  ;;  %1271 = vmatprep.subr.mxu0 %v559_v35 }
  0x59   : > { %1272 = vmatpush3.msra.mxu0 %v559_v35 }
  0x5a   : > { %1273 = vmatprep.subr.mxu0 %v558_v37 }
  0x5b   : > { %1320 = vmatpush3.xpose.msra.mxu1 %v1190_v36  ;;  %1274 = vmatpush3.msra.mxu0 %v558_v37 }
  0x5c   : > { %1321 = vmatprep.subr.mxu1 %v1469_v20  ;;  %1275 = vmatprep.subr.mxu0 %v557_v38 }
  0x5d   : > { %1276 = vmatpush3.msra.mxu0 %v557_v38 }
  0x5e   : > { %1277 = vmatprep.subr.mxu0 %v556_v40 }
  0x5f   : > { %1322 = vmatpush3.xpose.msra.mxu1 %v1189_v39  ;;  %1278 = vmatpush3.msra.mxu0 %v556_v40 }
  0x60   : > { %1323 = vmatprep.subr.mxu1 %v1469_v20  ;;  %1279 = vmatprep.subr.mxu0 %v555_v42 }
  0x61   : > { %1280 = vmatpush3.msra.mxu0 %v555_v42 }
  0x62   : > { %1281 = vmatprep.subr.mxu0 %v554_v44 }
  0x63   : > { %1324 = vmatpush3.xpose.msra.mxu1 %v1186_v43  ;;  %1282 = vmatpush3.msra.mxu0 %v554_v44 }
  0x64   : > { %1325 = vmatprep.subr.mxu1 %v1469_v20  ;;  %1283 = vmatprep.subr.mxu0 %v553_v45 }
  0x65   : > { %1284 = vmatpush3.msra.mxu0 %v553_v45 }
  0x66   : > { %1285 = vmatprep.subr.mxu0 %v552_v48 }
  0x67   : > { %1326 = vmatpush3.xpose.msra.mxu1 %v1185_v46  ;;  %1286 = vmatpush3.msra.mxu0 %v552_v48 }
  0x68   : > { %1327 = vmatprep.subr.mxu1 %v1469_v20  ;;  %1288 = vmatmul.mubr.f32.vlgmr.msra.gmra.mxu0 %v1170_v50 }
  0x69   : > { %1290 = vmatprep.mubr.f32.mxu0 %v1173_v51 }
  0x6b   : > { %1328 = vmatpush3.xpose.msra.mxu1 %v1182_v52 }
  0x6c   : > { %1329 = vmatprep.subr.mxu1 %v1469_v20  ;;  %1291 = vmatmul.mubr.f32.gmra.mxu0 %v1174_v54 }
  0x6d   : > { %1293 = vmatprep.mubr.f32.mxu0 %v1177_v55 }
  0x6f   : > { %1330 = vmatpush3.xpose.msra.mxu1 %v1181_v56 }
  0x70   : > { %1331 = vmatprep.subr.mxu1 %v1469_v20  ;;  %1294 = vmatmul.mubr.f32.gmra.mxu0 %v1178_v57 }
  0x71   : > { %1296 = vmatprep.mubr.f32.mxu0 %v1181_v56 }
  0x73   : > { %1332 = vmatpush3.xpose.msra.mxu1 %v1178_v57 }
  0x74   : > { %1333 = vmatprep.subr.mxu1 %v1469_v20  ;;  %1297 = vmatmul.mubr.f32.gmra.mxu0 %v1182_v52 }
  0x75   : > { %1299 = vmatprep.mubr.f32.mxu0 %v1185_v46 }
  0x77   : > { %1334 = vmatpush3.xpose.msra.mxu1 %v1177_v55 }
  0x78   : > { %1335 = vmatprep.subr.mxu1 %v1469_v20  ;;  %1300 = vmatmul.mubr.f32.gmra.mxu0 %v1186_v43  ;;  %v746_v43 = vld [vmem:[#allocation3] sm:$0x1] }
  0x79   : > { %1302 = vmatprep.mubr.f32.mxu0 %v1189_v39  ;;  %v550_v39 = vld [vmem:[#allocation2 + $0x70] sm:$0xff] }
  0x7b   : > { %1336 = vmatpush3.xpose.msra.mxu1 %v1174_v54 }
  0x7c   : > { %1337 = vmatprep.subr.mxu1 %v1469_v20  ;;  %1303 = vmatmul.mubr.f32.gmra.mxu0 %v1190_v36  ;;  %v551_v36 = vld [vmem:[#allocation2 + $0x78] sm:$0xff] }
  0x7d   : > { %1305 = vmatprep.mubr.f32.mxu0 %v1193_v32 }
  0x7f   : > { %1338 = vmatpush3.xpose.msra.mxu1 %v1173_v51 }
  0x80   : > { %1339 = vmatprep.subr.mxu1 %v1469_v20  ;;  %1306 = vmatmul.mubr.f32.gmra.mxu0 %v1194_v28 }
  0x81   : > { %1308 = vmatprep.mubr.f32.mxu0 %v1197_v23 }
  0x83   : > { %1340 = vmatpush3.xpose.msra.mxu1 %v1170_v50 }
  0x84   : > { %1341 = vmatprep.subr.mxu1 %v1469_v20  ;;  %1309 = vmatmul.mubr.f32.gmra.mxu0 %v1198_v21  ;;  %v544_v21 = vld [vmem:[#allocation2 + $0x40] sm:$0xff] }
  0x87   : > { %1342 = vmatpush3.xpose.msra.mxu1 %v1169_v29 }
  0x8a   : > { %1344 = vmatmul.mubr.f32.vlgmr.msra.gmra.mxu1 %v747_v58 }
 0x128   : > { %v1289_v60 = vpop.f32.mrf.mxu0 }
 0x129   : > { %v714_v62 = vadd.f32 %v1289_v60, %v537_v59 }
 0x12a   : > { %v634_v63 = vpop.f32.mrf.mxu0 }
 0x12b   : > { %731 = vst.msk [vmem:[#allocation2 + $0x8] sm:$0xff] %vm729_vm2, %v714_v62  ;;  %v713_v1 = vadd.f32 %v634_v63, %v536_v61 }
 0x12c   : > { %v1292_v2 = vpop.f32.mrf.mxu0 }
 0x12d   : > { %730 = vst.msk [vmem:[#allocation2] sm:$0xff] %vm729_vm2, %v713_v1  ;;  %v716_v4 = vadd.f32 %v1292_v2, %v539_v0 }
 0x12e   : > { %v644_v5 = vpop.f32.mrf.mxu0 }
 0x12f   : > { %733 = vst.msk [vmem:[#allocation2 + $0x18] sm:$0xff] %vm729_vm2, %v716_v4  ;;  %v715_v7 = vadd.f32 %v644_v5, %v538_v3 }
 0x130   : > { %v1295_v8 = vpop.f32.mrf.mxu0 }
 0x131   : > { %732 = vst.msk [vmem:[#allocation2 + $0x10] sm:$0xff] %vm729_vm2, %v715_v7  ;;  %v718_v10 = vadd.f32 %v1295_v8, %v541_v6 }
 0x132   : > { %v654_v11 = vpop.f32.mrf.mxu0 }
 0x133   : > { %735 = vst.msk [vmem:[#allocation2 + $0x28] sm:$0xff] %vm729_vm2, %v718_v10  ;;  %v717_v13 = vadd.f32 %v654_v11, %v540_v9 }
 0x134   : > { %v1298_v14 = vpop.f32.mrf.mxu0 }
 0x135   : > { %734 = vst.msk [vmem:[#allocation2 + $0x20] sm:$0xff] %vm729_vm2, %v717_v13  ;;  %v720_v16 = vadd.f32 %v1298_v14, %v543_v12 }
 0x136   : > { %v664_v17 = vpop.f32.mrf.mxu0 }
 0x137   : > { %737 = vst.msk [vmem:[#allocation2 + $0x38] sm:$0xff] %vm729_vm2, %v720_v16  ;;  %v719_v19 = vadd.f32 %v664_v17, %v542_v15 }
 0x138   : > { %v1301_v20 = vpop.f32.mrf.mxu0 }
 0x139   : > { %736 = vst.msk [vmem:[#allocation2 + $0x30] sm:$0xff] %vm729_vm2, %v719_v19  ;;  %v722_v22 = vadd.f32 %v1301_v20, %v545_v18 }
 0x13a   : > { %v674_v23 = vpop.f32.mrf.mxu0 }
 0x13b   : > { %739 = vst.msk [vmem:[#allocation2 + $0x48] sm:$0xff] %vm729_vm2, %v722_v22  ;;  %v721_v25 = vadd.f32 %v674_v23, %v544_v21 }
 0x13c   : > { %v1304_v26 = vpop.f32.mrf.mxu0 }
 0x13d   : > { %738 = vst.msk [vmem:[#allocation2 + $0x40] sm:$0xff] %vm729_vm2, %v721_v25  ;;  %v724_v28 = vadd.f32 %v1304_v26, %v547_v24 }
 0x13e   : > { %v684_v29 = vpop.f32.mrf.mxu0 }
 0x13f   : > { %741 = vst.msk [vmem:[#allocation2 + $0x58] sm:$0xff] %vm729_vm2, %v724_v28  ;;  %v723_v31 = vadd.f32 %v684_v29, %v546_v27 }
 0x140   : > { %v1307_v32 = vpop.f32.mrf.mxu0 }
 0x141   : > { %740 = vst.msk [vmem:[#allocation2 + $0x50] sm:$0xff] %vm729_vm2, %v723_v31  ;;  %v726_v34 = vadd.f32 %v1307_v32, %v549_v30 }
 0x142   : > { %v694_v35 = vpop.f32.mrf.mxu0 }
 0x143   : > { %743 = vst.msk [vmem:[#allocation2 + $0x68] sm:$0xff] %vm729_vm2, %v726_v34  ;;  %v725_v37 = vadd.f32 %v694_v35, %v548_v33 }
 0x144   : > { %v1310_v38 = vpop.f32.mrf.mxu0 }
 0x145   : > { %742 = vst.msk [vmem:[#allocation2 + $0x60] sm:$0xff] %vm729_vm2, %v725_v37  ;;  %v728_v40 = vadd.f32 %v1310_v38, %v551_v36 }
 0x146   : > { %v704_v41 = vpop.f32.mrf.mxu0 }
 0x147   : > { %745 = vst.msk [vmem:[#allocation2 + $0x78] sm:$0xff] %vm729_vm2, %v728_v40  ;;  %v727_v42 = vadd.f32 %v704_v41, %v550_v39 }
 0x149   : > { %744 = vst.msk [vmem:[#allocation2 + $0x70] sm:$0xff] %vm729_vm2, %v727_v42  ;;  %823 = sbr.rel (%p1161_p1) target bundleno = 493 (0x1ed), region = 93 }
 0x14a   : > { %v814_v44 = vpop.f32.mrf.mxu1 }
 0x14b   : > { %v818_v45 = vadd.f32 %v814_v44, %v746_v43 }
 0x14c   : > { %v1345_v46 = vpop.f32.mrf.mxu1 }
 0x14d   : > { %819 = vst [vmem:[#allocation3] sm:$0x1] %v818_v45 }
 0x14e   : > { %v826_v47 = vld [vmem:[%s1615_s11 + $0x10] sm:$0xff]  ;;  %v824_v48 = vld [vmem:[%s1615_s11] sm:$0xff]  ;;  %v1471_v49 = vmov 0   ;;  %v827_v50 = vld [vmem:[%s1615_s11 + $0x18] sm:$0xff] }
 0x14f   : > { %1407 = vset.pattern.permute.xlu1 %v1471_v49  ;;  %1406 = vset.pattern.permute.xlu0 %v1471_v49  ;;  %v825_v51 = vld [vmem:[%s1615_s11 + $0x8] sm:$0xff]  ;;  %v828_v53 = vld [vmem:[%s1615_s11 + $0x20] sm:$0xff]  ;;  %v831_v57 = vld [vmem:[%s1615_s11 + $0x38] sm:$0xff] }
 0x150   : > { %868 = vperm.xlu1 %1407, %v826_v47   ;;  %858 = vperm.xlu0 %1406, %v824_v48   ;;  %v829_v52 = vld [vmem:[%s1615_s11 + $0x28] sm:$0xff]  ;;  %v992_v55 = vld [vmem:[%s472_s18] sm:$0x1]  ;;  %v830_v58 = vld [vmem:[%s1615_s11 + $0x30] sm:$0xff] }
 0x151   : > { %v833_v60 = vld [vmem:[%s1615_s11 + $0x48] sm:$0xff]  ;;  %v832_v61 = vld [vmem:[%s1615_s11 + $0x40] sm:$0xff]  ;;  %v835_v62 = vld [vmem:[%s1615_s11 + $0x58] sm:$0xff] }
 0x152   : > { %v834_v63 = vld [vmem:[%s1615_s11 + $0x50] sm:$0xff]  ;;  %v837_v0 = vld [vmem:[%s1615_s11 + $0x68] sm:$0xff]  ;;  %v836_v1 = vld [vmem:[%s1615_s11 + $0x60] sm:$0xff] }
 0x153   : > { %v839_v3 = vld [vmem:[%s1615_s11 + $0x78] sm:$0xff]  ;;  %v838_v4 = vld [vmem:[%s1615_s11 + $0x70] sm:$0xff]  ;;  %v840_v8 = vld [vmem:[#allocation2] sm:$0xff] }
 0x154   : > { %873 = vperm.xlu1 %1407, %v827_v50   ;;  %863 = vperm.xlu0 %1406, %v825_v51   ;;  %v991_v54 = vld [vmem:[#allocation3] sm:$0x1]  ;;  %v842_v7 = vld [vmem:[#allocation2 + $0x10] sm:$0xff]  ;;  %v843_v14 = vld [vmem:[#allocation2 + $0x18] sm:$0xff] }
 0x155   : > { %v993_v56 = vadd.f32 %v992_v55, %v991_v54  ;;  %v1781_v9 = vld [vmem:[%s1856_s4] ss:$0 sm:$0xff]  ;;  %v841_v15 = vld [vmem:[#allocation2 + $0x8] sm:$0xff]  ;;  %v847_v30 = vld [vmem:[#allocation2 + $0x38] sm:$0xff] }
 0x156   : > { %v845_v22 = vld [vmem:[#allocation2 + $0x28] sm:$0xff]  ;;  %v844_v23 = vld [vmem:[#allocation2 + $0x20] sm:$0xff]  ;;  %v846_v31 = vld [vmem:[#allocation2 + $0x30] sm:$0xff] }
 0x157   : > { %v1163_v59 = vmul.f32 -1.442695, %v993_v56  ;;  %v849_v38 = vld [vmem:[#allocation2 + $0x48] sm:$0xff]  ;;  %v848_v39 = vld [vmem:[#allocation2 + $0x40] sm:$0xff]  ;;  %v851_v46 = vld [vmem:[#allocation2 + $0x58] sm:$0xff] }
 0x158   : > { %883 = vperm.xlu1 %1407, %v829_v52   ;;  %878 = vperm.xlu0 %1406, %v828_v53   ;;  %v850_v47 = vld [vmem:[#allocation2 + $0x50] sm:$0xff]  ;;  %v853_v54 = vld [vmem:[#allocation2 + $0x68] sm:$0xff]  ;;  %v852_v55 = vld [vmem:[#allocation2 + $0x60] sm:$0xff] }
 0x159   : > { %1408 = vpow2.f32 %v1163_v59 }
 0x15c   : > { %893 = vperm.xlu1 %1407, %v831_v57   ;;  %888 = vperm.xlu0 %1406, %v830_v58  }
 0x160   : > { %903 = vperm.xlu1 %1407, %v833_v60   ;;  %898 = vperm.xlu0 %1406, %v832_v61  }
 0x164   : > { %913 = vperm.xlu1 %1407, %v835_v62   ;;  %908 = vperm.xlu0 %1406, %v834_v63   ;;  %v855_v62 = vld [vmem:[#allocation2 + $0x78] sm:$0xff]  ;;  %v854_v63 = vld [vmem:[#allocation2 + $0x70] sm:$0xff] }
 0x166   : > { %v1409_v2 = vpop.eup %1408 }
 0x167   : > { %v997_v5 = vadd.f32 1.0, %v1409_v2 }
 0x168   : > { %923 = vperm.xlu1 %1407, %v837_v0   ;;  %918 = vperm.xlu0 %1406, %v836_v1  }
 0x169   : > { %1410 = vrcp.f32 %v997_v5 }
 0x16c   : > { %933 = vperm.xlu1 %1407, %v839_v3   ;;  %928 = vperm.xlu0 %1406, %v838_v4  }
 0x176   : > { %v1411_v6 = vpop.eup %1410 }
 0x177   : > { %1000 = vst [vmem:[%s481_s9] sm:$0x1] %v1411_v6 }
 0x1cb   : > { %v869_v10 = vpop.permute.xlu1 %868  ;;  %v859_v11 = vpop.permute.xlu0 %858 }
 0x1cc   : > { %v938_v12 = vmul.f32 %v869_v10, %v842_v7  ;;  %v936_v13 = vmul.f32 %v859_v11, %v840_v8 }
 0x1ce   : > { %v961_v16 = vadd.f32 %v1781_v9, %v938_v12  ;;  %v959_v17 = vadd.f32 %v1781_v9, %v936_v13 }
 0x1cf   : > { %v874_v18 = vpop.permute.xlu1 %873  ;;  %v864_v19 = vpop.permute.xlu0 %863 }
 0x1d0   : > { %977 = vst.msk [vmem:[%s1624_s21 + $0x10] sm:$0xff] %vm729_vm2, %v961_v16  ;;  %975 = vst.msk [vmem:[%s1624_s21] sm:$0xff] %vm729_vm2, %v959_v17  ;;  %v939_v20 = vmul.f32 %v874_v18, %v843_v14  ;;  %v937_v21 = vmul.f32 %v864_v19, %v841_v15 }
 0x1d2   : > { %v962_v24 = vadd.f32 %v1781_v9, %v939_v20  ;;  %v960_v25 = vadd.f32 %v1781_v9, %v937_v21 }
 0x1d3   : > { %v884_v26 = vpop.permute.xlu1 %883  ;;  %v879_v27 = vpop.permute.xlu0 %878 }
 0x1d4   : > { %978 = vst.msk [vmem:[%s1624_s21 + $0x18] sm:$0xff] %vm729_vm2, %v962_v24  ;;  %976 = vst.msk [vmem:[%s1624_s21 + $0x8] sm:$0xff] %vm729_vm2, %v960_v25  ;;  %v941_v28 = vmul.f32 %v884_v26, %v845_v22  ;;  %v940_v29 = vmul.f32 %v879_v27, %v844_v23 }
 0x1d6   : > { %v964_v32 = vadd.f32 %v1781_v9, %v941_v28  ;;  %v963_v33 = vadd.f32 %v1781_v9, %v940_v29 }
 0x1d7   : > { %v894_v34 = vpop.permute.xlu1 %893  ;;  %v889_v35 = vpop.permute.xlu0 %888 }
 0x1d8   : > { %980 = vst.msk [vmem:[%s1624_s21 + $0x28] sm:$0xff] %vm729_vm2, %v964_v32  ;;  %979 = vst.msk [vmem:[%s1624_s21 + $0x20] sm:$0xff] %vm729_vm2, %v963_v33  ;;  %v943_v36 = vmul.f32 %v894_v34, %v847_v30  ;;  %v942_v37 = vmul.f32 %v889_v35, %v846_v31 }
 0x1da   : > { %v966_v40 = vadd.f32 %v1781_v9, %v943_v36  ;;  %v965_v41 = vadd.f32 %v1781_v9, %v942_v37 }
 0x1db   : > { %v904_v42 = vpop.permute.xlu1 %903  ;;  %v899_v43 = vpop.permute.xlu0 %898 }
 0x1dc   : > { %982 = vst.msk [vmem:[%s1624_s21 + $0x38] sm:$0xff] %vm729_vm2, %v966_v40  ;;  %981 = vst.msk [vmem:[%s1624_s21 + $0x30] sm:$0xff] %vm729_vm2, %v965_v41  ;;  %v945_v44 = vmul.f32 %v904_v42, %v849_v38  ;;  %v944_v45 = vmul.f32 %v899_v43, %v848_v39 }
 0x1de   : > { %v968_v48 = vadd.f32 %v1781_v9, %v945_v44  ;;  %v967_v49 = vadd.f32 %v1781_v9, %v944_v45 }
 0x1df   : > { %v914_v50 = vpop.permute.xlu1 %913  ;;  %v909_v51 = vpop.permute.xlu0 %908 }
 0x1e0   : > { %984 = vst.msk [vmem:[%s1624_s21 + $0x48] sm:$0xff] %vm729_vm2, %v968_v48  ;;  %983 = vst.msk [vmem:[%s1624_s21 + $0x40] sm:$0xff] %vm729_vm2, %v967_v49  ;;  %v947_v52 = vmul.f32 %v914_v50, %v851_v46  ;;  %v946_v53 = vmul.f32 %v909_v51, %v850_v47 }
 0x1e2   : > { %v970_v56 = vadd.f32 %v1781_v9, %v947_v52  ;;  %v969_v57 = vadd.f32 %v1781_v9, %v946_v53 }
 0x1e3   : > { %v924_v58 = vpop.permute.xlu1 %923  ;;  %v919_v59 = vpop.permute.xlu0 %918 }
 0x1e4   : > { %986 = vst.msk [vmem:[%s1624_s21 + $0x58] sm:$0xff] %vm729_vm2, %v970_v56  ;;  %985 = vst.msk [vmem:[%s1624_s21 + $0x50] sm:$0xff] %vm729_vm2, %v969_v57  ;;  %v949_v60 = vmul.f32 %v924_v58, %v853_v54  ;;  %v948_v61 = vmul.f32 %v919_v59, %v852_v55 }
 0x1e6   : > { %v972_v0 = vadd.f32 %v1781_v9, %v949_v60  ;;  %v971_v1 = vadd.f32 %v1781_v9, %v948_v61 }
 0x1e7   : > { %v934_v2 = vpop.permute.xlu1 %933  ;;  %v929_v3 = vpop.permute.xlu0 %928 }
 0x1e8   : > { %988 = vst.msk [vmem:[%s1624_s21 + $0x68] sm:$0xff] %vm729_vm2, %v972_v0  ;;  %987 = vst.msk [vmem:[%s1624_s21 + $0x60] sm:$0xff] %vm729_vm2, %v971_v1  ;;  %v951_v4 = vmul.f32 %v934_v2, %v855_v62  ;;  %v950_v5 = vmul.f32 %v929_v3, %v854_v63 }
 0x1ea   : > { %v974_v6 = vadd.f32 %v1781_v9, %v951_v4  ;;  %v973_v7 = vadd.f32 %v1781_v9, %v950_v5 }
 0x1ec   : > { %990 = vst.msk [vmem:[%s1624_s21 + $0x78] sm:$0xff] %vm729_vm2, %v974_v6  ;;  %989 = vst.msk [vmem:[%s1624_s21 + $0x70] sm:$0xff] %vm729_vm2, %v973_v7 }
 0x1ed PF: > { %s18_s30 = sadd.s32 1, %s1466_s30   ;;  %s1869_s9 = sld [smem:[#allocation5_spill]] }
 0x1ee   : > { %p15_p2 = scmp.ge.s32.totalorder %s18_s30, 6   ;;  %s1870_s23 = sld [smem:[#allocation6_spill]] }
 0x1ef   : > { %s1871_s24 = smov %s1446_s25  ;;  %s1872_s25 = smov %s1563_s14 }
 0x1f0   : > { %s1873_s26 = smov %s1458_s28  ;;  %s1874_s27 = smov %s1462_s29 }
 0x1f1   :  { %17 = sbr.rel (!%p15_p2) target bundleno = 7 (0x7), region = 152 }
 0x1f3   : > { %s1875_s28 = smov %s1869_s9 }
 0x1f4   : > { %s1876_s29 = smov %s1870_s23 }

// kernel: redconv_forward.4
= control target key start
LH: loop header
LB: loop body
LE: loop exit
PB: predicated region body
PF: predicated region fallthrough
CT: control target
= control target key end

     0   :  { %s2612_s0 = inlined_call_operand.vmem [shape: bf16[256,256], index: 0, kind: input, shape index: {}]   ;;  %s2613_s1 = inlined_call_operand.vmem [shape: f32[256,32], index: 1, kind: input, shape index: {}]   ;;  %s2614_s2 = inlined_call_operand.vmem [shape: f32[256,32], index: 2, kind: input, shape index: {}]   ;;  %s2615_s3 = inlined_call_operand.vmem [shape: f32[2,256], index: 3, kind: input, shape index: {}]   ;;  %s2616_s4 = inlined_call_operand.vmem [shape: f32[256,32], index: 4, kind: input, shape index: {}]   ;;  %s2617_s5 = inlined_call_operand.vmem [shape: f32[256,32], index: 5, kind: output, shape index: {0}]   ;;  %s2618_s6 = inlined_call_operand.vmem [shape: f32[256,1], index: 6, kind: output, shape index: {1}]  }
   0x1   :  { %2619 = sst [smem:[#allocation6_spill]] %s2612_s0 }
   0x2   :  { %2620 = sst [smem:[#allocation7_spill]] %s2613_s1 }
   0x3   :  { %s2209_s21 = smov 0   ;;  %s2211_s22 = smov 0  }
   0x4   :  { %s2213_s23 = smov 0   ;;  %s2215_s24 = smov 0  }
   0x5   :  { %s2217_s25 = smov 0   ;;  %s2219_s26 = smov 0  }
   0x6   :  { %s2221_s27 = smov 0  }
   0x7 LB: > { %s26_s28 = sadd.s32 1, %s2161_s25  ;;  %s29_s29 = sadd.s32 1, %s2165_s26  ;;  %s2169_s27 = sphi %s2221_s27, %s17_s27   ;;  %s2165_s26 = sphi %s2219_s26, %s2628_s26   ;;  %s2161_s25 = sphi %s2217_s25, %s2627_s25   ;;  %s2157_s24 = sphi %s2215_s24, %s2626_s24   ;;  %s2153_s23 = sphi %s2213_s23, %s2625_s23   ;;  %s2149_s22 = sphi %s2211_s22, %s2624_s22   ;;  %s2145_s21 = sphi %s2209_s21, %s2623_s21  }
   0x8   : > { %p27_p0 = scmp.ge.s32.totalorder %s26_s28, 2  ;;  %p45_p1 = scmp.ne.s32.totalorder %s2149_s22, %s2145_s21 }
   0x9   : > { %p46_p2 = scmp.eq.s32.totalorder %s2169_s27, 0  ;;  %s38_s9 = sadd.s32 1, %s2149_s22 }
   0xa   : > { %s2630_s28 = smov (%p27_p0, %s26_s28), 0  ;;  %s2632_s29 = smov (!%p27_p0, %s29_s29), %s2165_s26 }
   0xb   : > { %p47_p3 = por %p46_p2, %p45_p1  ;;  %p31_p4 = scmp.ge.s32.totalorder %s2632_s29, 2 }
   0xc   : > { %s34_s30 = ssub.s32 %s2161_s25, %s2630_s28  ;;  %p1737_p6 = scmp.ge.s32.totalorder %s2169_s27, 4 }
   0xd   : > { %s2634_s29 = smov (%p31_p4, %s2632_s29), 0 }
   0xe   : > { %s33_s7 = ssub.s32 %s2165_s26, %s2634_s29  ;;  %227 = sbr.rel (%p1737_p6) target bundleno = 39 (0x27), region = 16 }
   0xf   : > { %s35_s8 = sor.u32 %s34_s30, %s33_s7 }
  0x10   : > { %p36_p5 = scmp.eq.s32.totalorder %s35_s8, 0 }
  0x12   : > { %s2260_s10 = scalar_select %p36_p5, %s2149_s22, %s38_s9  }
  0x13   : > { %230 = sbr.rel (!%p47_p3) target bundleno = 39 (0x27), region = 20  ;;  %s232_s11 = sand.u32 (%p47_p3), 1, %s2149_s22  }
  0x14   : > { %s1759_s12 = sshll.u32 (%p47_p3), %s2165_s26, 5  ;;  %s1738_s13 = sshll.u32 (%p47_p3), %s232_s11, 6 }
  0x15   : > { %s237_s14 = sadd.s32 (%p47_p3), %s2161_s25, %s1759_s12  ;;  %s2621_s0 = sld [smem:[#allocation6_spill]] (%p47_p3) }
  0x16   : > { %s1741_s15 = sshll.u32 (%p47_p3), %s237_s14, 2  ;;  %s234_s19 = scalar_lea.vmem (%p47_p3), [#allocation5], %s1738_s13 }
  0x1b   : > { %s2269_s18 = scalar_lea.vmem %s2621_s0, %s1741_s15 }
  0x1c   : > { %v256_v0 = vld [vmem:[%s2269_s18] sm:$0xf]  ;;  %v258_v1 = vld [vmem:[%s2269_s18 + $0x8] sm:$0xf]  ;;  %v260_v2 = vld [vmem:[%s2269_s18 + $0x10] sm:$0xf] }
  0x1d   : > { %257 = vst [vmem:[%s234_s19] sm:$0xf] %v256_v0  ;;  %259 = vst [vmem:[%s234_s19 + $0x4] sm:$0xf] %v258_v1  ;;  %v262_v3 = vld [vmem:[%s2269_s18 + $0x18] sm:$0xf] }
  0x1e   : > { %261 = vst [vmem:[%s234_s19 + $0x8] sm:$0xf] %v260_v2  ;;  %v264_v4 = vld [vmem:[%s2269_s18 + $0x20] sm:$0xf]  ;;  %v266_v5 = vld [vmem:[%s2269_s18 + $0x28] sm:$0xf] }
  0x1f   : > { %263 = vst [vmem:[%s234_s19 + $0xc] sm:$0xf] %v262_v3  ;;  %265 = vst [vmem:[%s234_s19 + $0x10] sm:$0xf] %v264_v4  ;;  %v268_v6 = vld [vmem:[%s2269_s18 + $0x30] sm:$0xf] }
  0x20   : > { %267 = vst [vmem:[%s234_s19 + $0x14] sm:$0xf] %v266_v5  ;;  %v270_v7 = vld [vmem:[%s2269_s18 + $0x38] sm:$0xf]  ;;  %v272_v8 = vld [vmem:[%s2269_s18 + $0x40] sm:$0xf] }
  0x21   : > { %269 = vst [vmem:[%s234_s19 + $0x18] sm:$0xf] %v268_v6  ;;  %271 = vst [vmem:[%s234_s19 + $0x1c] sm:$0xf] %v270_v7  ;;  %v274_v9 = vld [vmem:[%s2269_s18 + $0x48] sm:$0xf] }
  0x22   : > { %273 = vst [vmem:[%s234_s19 + $0x20] sm:$0xf] %v272_v8  ;;  %v276_v10 = vld [vmem:[%s2269_s18 + $0x50] sm:$0xf]  ;;  %v278_v11 = vld [vmem:[%s2269_s18 + $0x58] sm:$0xf] }
  0x23   : > { %275 = vst [vmem:[%s234_s19 + $0x24] sm:$0xf] %v274_v9  ;;  %277 = vst [vmem:[%s234_s19 + $0x28] sm:$0xf] %v276_v10  ;;  %v280_v12 = vld [vmem:[%s2269_s18 + $0x60] sm:$0xf] }
  0x24   : > { %279 = vst [vmem:[%s234_s19 + $0x2c] sm:$0xf] %v278_v11  ;;  %v282_v13 = vld [vmem:[%s2269_s18 + $0x68] sm:$0xf]  ;;  %v284_v14 = vld [vmem:[%s2269_s18 + $0x70] sm:$0xf] }
  0x25   : > { %281 = vst [vmem:[%s234_s19 + $0x30] sm:$0xf] %v280_v12  ;;  %283 = vst [vmem:[%s234_s19 + $0x34] sm:$0xf] %v282_v13  ;;  %v286_v15 = vld [vmem:[%s2269_s18 + $0x78] sm:$0xf] }
  0x26   : > { %285 = vst [vmem:[%s234_s19 + $0x38] sm:$0xf] %v284_v14  ;;  %287 = vst [vmem:[%s234_s19 + $0x3c] sm:$0xf] %v286_v15 }
  0x27 PF: > { %p1742_p7 = scmp.ge.s32.totalorder %s2169_s27, 1  ;;  %p376_p8 = scmp.lt.s32.totalorder %s2169_s27, 5 }
  0x29   : > { %p377_p9 = pnand %p1742_p7, %p376_p8 }
  0x2a   : > { %s383_s20 = sand.u32 (!%p377_p9), 1, %s2145_s21   ;;  %s1744_s30 = sshll.u32 (!%p377_p9), %s2153_s23, 4 }
  0x2b   : > { %380 = sbr.rel (%p377_p9) target bundleno = 690 (0x2b2), region = 77  ;;  %s1743_s7 = sshll.u32 (!%p377_p9), %s383_s20, 6 }
  0x2c   : > { %p438_p10 = scmp.lt.s32.totalorder (!%p377_p9), %s1744_s30, 31  ;;  %p449_p11 = scmp.lt.s32.totalorder (!%p377_p9), %s2153_s23, 1 }
  0x2d   : > { %s1749_s11 = sshll.u32 (!%p377_p9), %s2157_s24, 4  ;;  %s2622_s1 = sld [smem:[#allocation7_spill]] (!%p377_p9) }
  0x2e   : > { %p454_p12 = scmp.lt.s32.totalorder (!%p377_p9), %s1749_s11, 31  ;;  %s2324_s21 = scalar_lea.vmem (!%p377_p9), [#allocation5], %s1743_s7 }
  0x2f   : > { %p1755_p13 = scmp.ne.s32.totalorder (!%p377_p9), %s2153_s23, 0 }
  0x30   : > { %s2636_s30 = smov (!%p438_p10, %s1744_s30), 31  ;;  %s2638_s11 = smov (!%p454_p12, %s1749_s11), 31 }
  0x31   : > { %s450_s8 = scalar_select %p449_p11, %s2153_s23, 1 }
  0x32   : > { %s1745_s9 = sshll.u32 %s2636_s30, 3  ;;  %s1750_s30 = sshll.u32 %s2638_s11, 3 }
  0x33   : > { %s2297_s14 = scalar_lea.vmem %s2622_s1, %s1745_s9  ;;  %s2302_s17 = scalar_lea.vmem %s2614_s2, %s1745_s9 }
  0x34   : > { %s1748_s18 = sshll.u32 %s450_s8, 1  ;;  %s2312_s12 = scalar_lea.vmem %s2616_s4, %s1750_s30 }
  0x35   : > { %s2307_s20 = scalar_lea.vmem %s2615_s3, %s1748_s18  ;;  %s2317_s15 = scalar_lea.vmem %s2617_s5, %s1750_s30 }
  0x36   : > { %s2322_s16 = scalar_lea.vmem %s2618_s6, %s1750_s30  ;;  %474 = sbr.rel (%p1755_p13) target bundleno = 84 (0x54), region = 85 }
  0x3b   : > { %vm475_vm0 = vcmask 261120   ;;  %vm508_vm1 = vcmask 15360   ;;  %v2171_v16 = vmov 0.0  }
  0x3c   : > { %476 = vst.msk [vmem:[#allocation2] sm:$0xff] %vm475_vm0, %v2171_v16  ;;  %477 = vst.msk [vmem:[#allocation2 + $0x8] sm:$0xff] %vm475_vm0, %v2171_v16 }
  0x3d   : > { %478 = vst.msk [vmem:[#allocation2 + $0x10] sm:$0xff] %vm475_vm0, %v2171_v16  ;;  %479 = vst.msk [vmem:[#allocation2 + $0x18] sm:$0xff] %vm475_vm0, %v2171_v16 }
  0x3e   : > { %480 = vst.msk [vmem:[#allocation2 + $0x20] sm:$0xff] %vm475_vm0, %v2171_v16  ;;  %481 = vst.msk [vmem:[#allocation2 + $0x28] sm:$0xff] %vm475_vm0, %v2171_v16 }
  0x3f   : > { %482 = vst.msk [vmem:[#allocation2 + $0x30] sm:$0xff] %vm475_vm0, %v2171_v16  ;;  %483 = vst.msk [vmem:[#allocation2 + $0x38] sm:$0xff] %vm475_vm0, %v2171_v16 }
  0x40   : > { %484 = vst.msk [vmem:[#allocation2 + $0x40] sm:$0xff] %vm475_vm0, %v2171_v16  ;;  %485 = vst.msk [vmem:[#allocation2 + $0x48] sm:$0xff] %vm475_vm0, %v2171_v16 }
  0x41   : > { %486 = vst.msk [vmem:[#allocation2 + $0x50] sm:$0xff] %vm475_vm0, %v2171_v16  ;;  %487 = vst.msk [vmem:[#allocation2 + $0x58] sm:$0xff] %vm475_vm0, %v2171_v16 }
  0x42   : > { %488 = vst.msk [vmem:[#allocation2 + $0x60] sm:$0xff] %vm475_vm0, %v2171_v16  ;;  %489 = vst.msk [vmem:[#allocation2 + $0x68] sm:$0xff] %vm475_vm0, %v2171_v16 }
  0x43   : > { %490 = vst.msk [vmem:[#allocation2 + $0x70] sm:$0xff] %vm475_vm0, %v2171_v16  ;;  %491 = vst.msk [vmem:[#allocation2 + $0x78] sm:$0xff] %vm475_vm0, %v2171_v16 }
  0x44   : > { %492 = vst.msk [vmem:[#allocation3] sm:$0xff] %vm475_vm0, %v2171_v16  ;;  %493 = vst.msk [vmem:[#allocation3 + $0x8] sm:$0xff] %vm475_vm0, %v2171_v16 }
  0x45   : > { %494 = vst.msk [vmem:[#allocation3 + $0x10] sm:$0xff] %vm475_vm0, %v2171_v16  ;;  %495 = vst.msk [vmem:[#allocation3 + $0x18] sm:$0xff] %vm475_vm0, %v2171_v16 }
  0x46   : > { %496 = vst.msk [vmem:[#allocation3 + $0x20] sm:$0xff] %vm475_vm0, %v2171_v16  ;;  %497 = vst.msk [vmem:[#allocation3 + $0x28] sm:$0xff] %vm475_vm0, %v2171_v16 }
  0x47   : > { %498 = vst.msk [vmem:[#allocation3 + $0x30] sm:$0xff] %vm475_vm0, %v2171_v16  ;;  %499 = vst.msk [vmem:[#allocation3 + $0x38] sm:$0xff] %vm475_vm0, %v2171_v16 }
  0x48   : > { %500 = vst.msk [vmem:[#allocation3 + $0x40] sm:$0xff] %vm475_vm0, %v2171_v16  ;;  %501 = vst.msk [vmem:[#allocation3 + $0x48] sm:$0xff] %vm475_vm0, %v2171_v16 }
  0x49   : > { %502 = vst.msk [vmem:[#allocation3 + $0x50] sm:$0xff] %vm475_vm0, %v2171_v16  ;;  %503 = vst.msk [vmem:[#allocation3 + $0x58] sm:$0xff] %vm475_vm0, %v2171_v16 }
  0x4a   : > { %504 = vst.msk [vmem:[#allocation3 + $0x60] sm:$0xff] %vm475_vm0, %v2171_v16  ;;  %505 = vst.msk [vmem:[#allocation3 + $0x68] sm:$0xff] %vm475_vm0, %v2171_v16 }
  0x4b   : > { %506 = vst.msk [vmem:[#allocation3 + $0x70] sm:$0xff] %vm475_vm0, %v2171_v16  ;;  %507 = vst.msk [vmem:[#allocation3 + $0x78] sm:$0xff] %vm475_vm0, %v2171_v16 }
  0x4c   : > { %509 = vst.msk [vmem:[#allocation4] sm:$0xff] %vm508_vm1, %v2171_v16  ;;  %510 = vst.msk [vmem:[#allocation4 + $0x8] sm:$0xff] %vm508_vm1, %v2171_v16 }
  0x4d   : > { %511 = vst.msk [vmem:[#allocation4 + $0x10] sm:$0xff] %vm508_vm1, %v2171_v16  ;;  %512 = vst.msk [vmem:[#allocation4 + $0x18] sm:$0xff] %vm508_vm1, %v2171_v16 }
  0x4e   : > { %513 = vst.msk [vmem:[#allocation4 + $0x20] sm:$0xff] %vm508_vm1, %v2171_v16  ;;  %514 = vst.msk [vmem:[#allocation4 + $0x28] sm:$0xff] %vm508_vm1, %v2171_v16 }
  0x4f   : > { %515 = vst.msk [vmem:[#allocation4 + $0x30] sm:$0xff] %vm508_vm1, %v2171_v16  ;;  %516 = vst.msk [vmem:[#allocation4 + $0x38] sm:$0xff] %vm508_vm1, %v2171_v16 }
  0x50   : > { %517 = vst.msk [vmem:[#allocation4 + $0x40] sm:$0xff] %vm508_vm1, %v2171_v16  ;;  %518 = vst.msk [vmem:[#allocation4 + $0x48] sm:$0xff] %vm508_vm1, %v2171_v16 }
  0x51   : > { %519 = vst.msk [vmem:[#allocation4 + $0x50] sm:$0xff] %vm508_vm1, %v2171_v16  ;;  %520 = vst.msk [vmem:[#allocation4 + $0x58] sm:$0xff] %vm508_vm1, %v2171_v16 }
  0x52   : > { %521 = vst.msk [vmem:[#allocation4 + $0x60] sm:$0xff] %vm508_vm1, %v2171_v16  ;;  %522 = vst.msk [vmem:[#allocation4 + $0x68] sm:$0xff] %vm508_vm1, %v2171_v16 }
  0x53   : > { %523 = vst.msk [vmem:[#allocation4 + $0x70] sm:$0xff] %vm508_vm1, %v2171_v16  ;;  %524 = vst.msk [vmem:[#allocation4 + $0x78] sm:$0xff] %vm508_vm1, %v2171_v16 }
  0x54 PF: > { %v588_v17 = vld [vmem:[%s2297_s14 + $0x78] sm:$0xff]  ;;  %v587_v19 = vld [vmem:[%s2297_s14 + $0x70] sm:$0xff]  ;;  %v586_v21 = vld [vmem:[%s2297_s14 + $0x68] sm:$0xff]  ;;  %vm750_vm2 = vcmask 261120   ;;  %vm1154_vm3 = vcmask 15360   ;;  %p1756_p0 = scmp.ne.s32.totalorder %s2153_s23, 1 }
  0x55   : > { %v798_v18 = vld [vmem:[%s2302_s17 + $0x78] sm:$0xff]  ;;  %1880 = vmatprep.subr.mxu0 %v588_v17  ;;  %v797_v20 = vld [vmem:[%s2302_s17 + $0x70] sm:$0xff]  ;;  %v796_v22 = vld [vmem:[%s2302_s17 + $0x68] sm:$0xff] }
  0x56   : > { %1936 = vmatprep.subr.mxu1 %v798_v18  ;;  %1881 = vmatpush3.msra.mxu0 %v588_v17  ;;  %v585_v23 = vld [vmem:[%s2297_s14 + $0x60] sm:$0xff]  ;;  %v584_v25 = vld [vmem:[%s2297_s14 + $0x58] sm:$0xff]  ;;  %v583_v27 = vld [vmem:[%s2297_s14 + $0x50] sm:$0xff] }
  0x57   : > { %1937 = vmatpush3.msra.mxu1 %v798_v18  ;;  %1882 = vmatprep.subr.mxu0 %v587_v19  ;;  %v795_v24 = vld [vmem:[%s2302_s17 + $0x60] sm:$0xff]  ;;  %v794_v26 = vld [vmem:[%s2302_s17 + $0x58] sm:$0xff]  ;;  %v793_v28 = vld [vmem:[%s2302_s17 + $0x50] sm:$0xff] }
  0x58   : > { %1938 = vmatprep.subr.mxu1 %v797_v20  ;;  %1883 = vmatpush3.msra.mxu0 %v587_v19  ;;  %v582_v29 = vld [vmem:[%s2297_s14 + $0x48] sm:$0xff]  ;;  %v581_v31 = vld [vmem:[%s2297_s14 + $0x40] sm:$0xff]  ;;  %v580_v33 = vld [vmem:[%s2297_s14 + $0x38] sm:$0xff] }
  0x59   : > { %1939 = vmatpush3.msra.mxu1 %v797_v20  ;;  %1884 = vmatprep.subr.mxu0 %v586_v21  ;;  %v792_v30 = vld [vmem:[%s2302_s17 + $0x48] sm:$0xff]  ;;  %v791_v32 = vld [vmem:[%s2302_s17 + $0x40] sm:$0xff]  ;;  %v790_v34 = vld [vmem:[%s2302_s17 + $0x38] sm:$0xff] }
  0x5a   : > { %1940 = vmatprep.subr.mxu1 %v796_v22  ;;  %1885 = vmatpush3.msra.mxu0 %v586_v21  ;;  %v579_v35 = vld [vmem:[%s2297_s14 + $0x30] sm:$0xff]  ;;  %v578_v37 = vld [vmem:[%s2297_s14 + $0x28] sm:$0xff]  ;;  %v577_v39 = vld [vmem:[%s2297_s14 + $0x20] sm:$0xff] }
  0x5b   : > { %1941 = vmatpush3.msra.mxu1 %v796_v22  ;;  %1886 = vmatprep.subr.mxu0 %v585_v23  ;;  %v789_v36 = vld [vmem:[%s2302_s17 + $0x30] sm:$0xff]  ;;  %v788_v38 = vld [vmem:[%s2302_s17 + $0x28] sm:$0xff]  ;;  %v787_v40 = vld [vmem:[%s2302_s17 + $0x20] sm:$0xff] }
  0x5c   : > { %1942 = vmatprep.subr.mxu1 %v795_v24  ;;  %1887 = vmatpush3.msra.mxu0 %v585_v23  ;;  %v576_v41 = vld [vmem:[%s2297_s14 + $0x18] sm:$0xff]  ;;  %v575_v43 = vld [vmem:[%s2297_s14 + $0x10] sm:$0xff]  ;;  %v1761_v45 = vld [vmem:[%s2324_s21] sm:$0xff]  }
  0x5d   : > { %1943 = vmatpush3.msra.mxu1 %v795_v24  ;;  %1888 = vmatprep.subr.mxu0 %v584_v25  ;;  %v786_v42 = vld [vmem:[%s2302_s17 + $0x18] sm:$0xff]  ;;  %v785_v44 = vld [vmem:[%s2302_s17 + $0x10] sm:$0xff]  ;;  %v574_v46 = vld [vmem:[%s2297_s14 + $0x8] sm:$0xff]  ;;  %v2408_v50 = vunpack.c.l.bf16 %v1761_v45  ;;  %v2410_v51 = vunpack.c.h.bf16 %v1761_v45 }
  0x5e   : > { %1944 = vmatprep.subr.mxu1 %v794_v26  ;;  %1889 = vmatpush3.msra.mxu0 %v584_v25  ;;  %v784_v47 = vld [vmem:[%s2302_s17 + $0x8] sm:$0xff]  ;;  %v573_v48 = vld [vmem:[%s2297_s14] sm:$0xff]  ;;  %v1793_v54 = vld [vmem:[%s2324_s21 + $0x10] sm:$0xff]  }
  0x5f   : > { %1945 = vmatpush3.msra.mxu1 %v794_v26  ;;  %1890 = vmatprep.subr.mxu0 %v583_v27  ;;  %v783_v49 = vld [vmem:[%s2302_s17] sm:$0xff]  ;;  %v1792_v52 = vld [vmem:[%s2324_s21 + $0x8] sm:$0xff]   ;;  %v1770_v57 = vunpack.c.l.bf16 %v1793_v54  ;;  %v1794_v58 = vld [vmem:[%s2324_s21 + $0x18] sm:$0xff]   ;;  %v1771_v59 = vunpack.c.h.bf16 %v1793_v54 }
  0x60   : > { %1946 = vmatprep.subr.mxu1 %v793_v28  ;;  %1891 = vmatpush3.msra.mxu0 %v583_v27  ;;  %v992_v53 = vld [vmem:[%s2307_s20] sm:$0x3]  ;;  %v1766_v55 = vunpack.c.l.bf16 %v1792_v52  ;;  %v1767_v56 = vunpack.c.h.bf16 %v1792_v52  ;;  %v1774_v60 = vunpack.c.l.bf16 %v1794_v58  ;;  %v1775_v62 = vunpack.c.h.bf16 %v1794_v58  ;;  %v1796_v0 = vld [vmem:[%s2324_s21 + $0x28] sm:$0xff]   ;;  %v1797_v3 = vld [vmem:[%s2324_s21 + $0x30] sm:$0xff]  }
  0x61   : > { %1947 = vmatpush3.msra.mxu1 %v793_v28  ;;  %1892 = vmatprep.subr.mxu0 %v582_v29  ;;  %v1795_v61 = vld [vmem:[%s2324_s21 + $0x20] sm:$0xff]   ;;  %v1782_v2 = vunpack.c.l.bf16 %v1796_v0  ;;  %v1783_v4 = vunpack.c.h.bf16 %v1796_v0  ;;  %v1786_v5 = vunpack.c.l.bf16 %v1797_v3  ;;  %v1798_v6 = vld [vmem:[%s2324_s21 + $0x38] sm:$0xff]   ;;  %v1787_v7 = vunpack.c.h.bf16 %v1797_v3  ;;  %v558_v10 = vld [vmem:[#allocation2 + $0x8] sm:$0xff] }
  0x62   : > { %1948 = vmatprep.subr.mxu1 %v792_v30  ;;  %1893 = vmatpush3.msra.mxu0 %v582_v29  ;;  %v1778_v63 = vunpack.c.l.bf16 %v1795_v61  ;;  %v1779_v1 = vunpack.c.h.bf16 %v1795_v61  ;;  %v1790_v8 = vunpack.c.l.bf16 %v1798_v6  ;;  %v1791_v9 = vunpack.c.h.bf16 %v1798_v6  ;;  %v768_v11 = vld [vmem:[#allocation3 + $0x8] sm:$0xff]  ;;  %v557_v14 = vld [vmem:[#allocation2] sm:$0xff]  ;;  %v560_v20 = vld [vmem:[#allocation2 + $0x18] sm:$0xff] }
  0x63   : > { %1949 = vmatpush3.msra.mxu1 %v792_v30  ;;  %1894 = vmatprep.subr.mxu0 %v581_v31  ;;  %v767_v15 = vld [vmem:[#allocation3] sm:$0xff]  ;;  %v770_v21 = vld [vmem:[#allocation3 + $0x18] sm:$0xff]  ;;  %v559_v26 = vld [vmem:[#allocation2 + $0x10] sm:$0xff] }
  0x64   : > { %1950 = vmatprep.subr.mxu1 %v791_v32  ;;  %1895 = vmatpush3.msra.mxu0 %v581_v31  ;;  %v769_v27 = vld [vmem:[#allocation3 + $0x10] sm:$0xff]  ;;  %v774_v45 = vld [vmem:[#allocation3 + $0x38] sm:$0xff] }
  0x65   : > { %1951 = vmatpush3.msra.mxu1 %v791_v32  ;;  %1896 = vmatprep.subr.mxu0 %v580_v33  ;;  %v562_v32 = vld [vmem:[#allocation2 + $0x28] sm:$0xff] }
  0x66   : > { %1952 = vmatprep.subr.mxu1 %v790_v34  ;;  %1897 = vmatpush3.msra.mxu0 %v580_v33  ;;  %v772_v33 = vld [vmem:[#allocation3 + $0x28] sm:$0xff] }
  0x67   : > { %1953 = vmatpush3.msra.mxu1 %v790_v34  ;;  %1898 = vmatprep.subr.mxu0 %v579_v35 }
  0x68   : > { %1954 = vmatprep.subr.mxu1 %v789_v36  ;;  %1899 = vmatpush3.msra.mxu0 %v579_v35 }
  0x69   : > { %1955 = vmatpush3.msra.mxu1 %v789_v36  ;;  %1900 = vmatprep.subr.mxu0 %v578_v37 }
  0x6a   : > { %1956 = vmatprep.subr.mxu1 %v788_v38  ;;  %1901 = vmatpush3.msra.mxu0 %v578_v37 }
  0x6b   : > { %1957 = vmatpush3.msra.mxu1 %v788_v38  ;;  %1902 = vmatprep.subr.mxu0 %v577_v39  ;;  %v561_v38 = vld [vmem:[#allocation2 + $0x20] sm:$0xff] }
  0x6c   : > { %1958 = vmatprep.subr.mxu1 %v787_v40  ;;  %1903 = vmatpush3.msra.mxu0 %v577_v39  ;;  %v771_v39 = vld [vmem:[#allocation3 + $0x20] sm:$0xff] }
  0x6d   : > { %1959 = vmatpush3.msra.mxu1 %v787_v40  ;;  %1904 = vmatprep.subr.mxu0 %v576_v41 }
  0x6e   : > { %1960 = vmatprep.subr.mxu1 %v786_v42  ;;  %1905 = vmatpush3.msra.mxu0 %v576_v41 }
  0x6f   : > { %1961 = vmatpush3.msra.mxu1 %v786_v42  ;;  %1906 = vmatprep.subr.mxu0 %v575_v43 }
  0x70   : > { %1962 = vmatprep.subr.mxu1 %v785_v44  ;;  %1907 = vmatpush3.msra.mxu0 %v575_v43 }
  0x71   : > { %1963 = vmatpush3.msra.mxu1 %v785_v44  ;;  %1908 = vmatprep.subr.mxu0 %v574_v46  ;;  %v564_v44 = vld [vmem:[#allocation2 + $0x38] sm:$0xff] }
  0x72   : > { %1964 = vmatprep.subr.mxu1 %v784_v47  ;;  %1909 = vmatpush3.msra.mxu0 %v574_v46 }
  0x73   : > { %1965 = vmatpush3.msra.mxu1 %v784_v47  ;;  %1910 = vmatprep.subr.mxu0 %v573_v48 }
  0x74   : > { %1966 = vmatprep.subr.mxu1 %v783_v49  ;;  %1911 = vmatpush3.msra.mxu0 %v573_v48 }
  0x75   : > { %1912 = vmatprep.mubr.f32.mxu0 %v2408_v50  ;;  %1967 = vmatpush3.msra.mxu1 %v783_v49 }
  0x76   : > { %1968 = vmatprep.mubr.f32.mxu1 %v2408_v50  ;;  %1913 = vmatmul.mubr.f32.vlgmr.msra.gmra.mxu0 %v2410_v51 }
  0x77   : > { %1969 = vmatmul.mubr.f32.vlgmr.msra.gmra.mxu1 %v2410_v51  ;;  %1992 = vmatprep.subr.mxu0 %v992_v53 }
  0x78   : > { %2018 = vmatprep.subr.mxu1 %v992_v53  ;;  %1993 = vmatpush3.xpose.msra.mxu0 %v992_v53 }
  0x79   : > { %2019 = vmatpush3.xpose.msra.mxu1 %v992_v53  ;;  %1915 = vmatprep.mubr.f32.mxu0 %v1766_v55 }
  0x7a   : > { %1971 = vmatprep.mubr.f32.mxu1 %v1766_v55  ;;  %1916 = vmatmul.mubr.f32.gmra.mxu0 %v1767_v56 }
  0x7b   : > { %1972 = vmatmul.mubr.f32.gmra.mxu1 %v1767_v56  ;;  %1918 = vmatprep.mubr.f32.mxu0 %v1770_v57 }
  0x7c   : > { %1974 = vmatprep.mubr.f32.mxu1 %v1770_v57 }
  0x7e   : > { %1919 = vmatmul.mubr.f32.gmra.mxu0 %v1771_v59 }
  0x7f   : > { %1975 = vmatmul.mubr.f32.gmra.mxu1 %v1771_v59  ;;  %1921 = vmatprep.mubr.f32.mxu0 %v1774_v60 }
  0x80   : > { %1977 = vmatprep.mubr.f32.mxu1 %v1774_v60 }
  0x82   : > { %1922 = vmatmul.mubr.f32.gmra.mxu0 %v1775_v62 }
  0x83   : > { %1978 = vmatmul.mubr.f32.gmra.mxu1 %v1775_v62  ;;  %1924 = vmatprep.mubr.f32.mxu0 %v1778_v63 }
  0x84   : > { %1980 = vmatprep.mubr.f32.mxu1 %v1778_v63 }
  0x86   : > { %1925 = vmatmul.mubr.f32.gmra.mxu0 %v1779_v1 }
  0x87   : > { %1981 = vmatmul.mubr.f32.gmra.mxu1 %v1779_v1  ;;  %1927 = vmatprep.mubr.f32.mxu0 %v1782_v2 }
  0x88   : > { %1983 = vmatprep.mubr.f32.mxu1 %v1782_v2 }
  0x8a   : > { %1928 = vmatmul.mubr.f32.gmra.mxu0 %v1783_v4 }
  0x8b   : > { %1984 = vmatmul.mubr.f32.gmra.mxu1 %v1783_v4  ;;  %1930 = vmatprep.mubr.f32.mxu0 %v1786_v5 }
  0x8c   : > { %1986 = vmatprep.mubr.f32.mxu1 %v1786_v5 }
  0x8e   : > { %1931 = vmatmul.mubr.f32.gmra.mxu0 %v1787_v7 }
  0x8f   : > { %1987 = vmatmul.mubr.f32.gmra.mxu1 %v1787_v7  ;;  %1933 = vmatprep.mubr.f32.mxu0 %v1790_v8 }
  0x90   : > { %1989 = vmatprep.mubr.f32.mxu1 %v1790_v8 }
  0x92   : > { %1934 = vmatmul.mubr.f32.gmra.mxu0 %v1791_v9 }
  0x93   : > { %1990 = vmatmul.mubr.f32.gmra.mxu1 %v1791_v9  ;;  %1994 = vmatprep.mubr.f32.mxu0 %v2408_v50  ;;  %v563_v50 = vld [vmem:[#allocation2 + $0x30] sm:$0xff] }
  0x94   : > { %2006 = vmatprep.mubr.f32.mxu1 %v1778_v63  ;;  %v775_v63 = vld [vmem:[#allocation3 + $0x40] sm:$0xff] }
  0x96   : > { %1995 = vmatmul.mubr.f32.vlgmr.msra.gmra.mxu0 %v2410_v51  ;;  %v773_v51 = vld [vmem:[#allocation3 + $0x30] sm:$0xff] }
  0x97   : > { %2007 = vmatmul.mubr.f32.vlgmr.msra.gmra.mxu1 %v1779_v1  ;;  %1997 = vmatprep.mubr.f32.mxu0 %v1766_v55 }
  0x98   : > { %2009 = vmatprep.mubr.f32.mxu1 %v1782_v2 }
  0x9a   : > { %1998 = vmatmul.mubr.f32.gmra.mxu0 %v1767_v56  ;;  %v566_v56 = vld [vmem:[#allocation2 + $0x48] sm:$0xff] }
  0x9b   : > { %2010 = vmatmul.mubr.f32.gmra.mxu1 %v1783_v4  ;;  %2000 = vmatprep.mubr.f32.mxu0 %v1770_v57  ;;  %v776_v57 = vld [vmem:[#allocation3 + $0x48] sm:$0xff]  ;;  %v568_v4 = vld [vmem:[#allocation2 + $0x58] sm:$0xff] }
  0x9c   : > { %2012 = vmatprep.mubr.f32.mxu1 %v1786_v5  ;;  %v778_v5 = vld [vmem:[#allocation3 + $0x58] sm:$0xff] }
  0x9e   : > { %2001 = vmatmul.mubr.f32.gmra.mxu0 %v1771_v59 }
  0x9f   : > { %2013 = vmatmul.mubr.f32.gmra.mxu1 %v1787_v7  ;;  %2003 = vmatprep.mubr.f32.mxu0 %v1774_v60 }
  0xa0   : > { %2015 = vmatprep.mubr.f32.mxu1 %v1790_v8 }
  0xa2   : > { %2004 = vmatmul.mubr.f32.gmra.mxu0 %v1775_v62  ;;  %v565_v62 = vld [vmem:[#allocation2 + $0x40] sm:$0xff] }
  0xa3   : > { %2016 = vmatmul.mubr.f32.gmra.mxu1 %v1791_v9 }
 0x136   : > { %v1914_v12 = vpop.f32.mrf.mxu0 }
 0x137   : > { %v1970_v13 = vpop.f32.mrf.mxu1  ;;  %v735_v16 = vadd.f32 %v1914_v12, %v558_v10  ;;  %v567_v10 = vld [vmem:[#allocation2 + $0x50] sm:$0xff] }
 0x138   : > { %v945_v17 = vadd.f32 %v1970_v13, %v768_v11  ;;  %v655_v18 = vpop.f32.mrf.mxu0  ;;  %v777_v11 = vld [vmem:[#allocation3 + $0x50] sm:$0xff] }
 0x139   : > { %v865_v19 = vpop.f32.mrf.mxu1  ;;  %752 = vst.msk [vmem:[#allocation2 + $0x8] sm:$0xff] %vm750_vm2, %v735_v16  ;;  %v734_v22 = vadd.f32 %v655_v18, %v557_v14  ;;  %v570_v16 = vld [vmem:[#allocation2 + $0x68] sm:$0xff] }
 0x13a   : > { %961 = vst.msk [vmem:[#allocation3 + $0x8] sm:$0xff] %vm750_vm2, %v945_v17  ;;  %v944_v23 = vadd.f32 %v865_v19, %v767_v15  ;;  %v1917_v24 = vpop.f32.mrf.mxu0  ;;  %v780_v17 = vld [vmem:[#allocation3 + $0x68] sm:$0xff] }
 0x13b   : > { %v1973_v25 = vpop.f32.mrf.mxu1  ;;  %751 = vst.msk [vmem:[#allocation2] sm:$0xff] %vm750_vm2, %v734_v22  ;;  %v737_v28 = vadd.f32 %v1917_v24, %v560_v20  ;;  %v569_v22 = vld [vmem:[#allocation2 + $0x60] sm:$0xff] }
 0x13c   : > { %960 = vst.msk [vmem:[#allocation3] sm:$0xff] %vm750_vm2, %v944_v23  ;;  %v947_v29 = vadd.f32 %v1973_v25, %v770_v21  ;;  %v665_v30 = vpop.f32.mrf.mxu0  ;;  %v779_v23 = vld [vmem:[#allocation3 + $0x60] sm:$0xff] }
 0x13d   : > { %v875_v31 = vpop.f32.mrf.mxu1  ;;  %754 = vst.msk [vmem:[#allocation2 + $0x18] sm:$0xff] %vm750_vm2, %v737_v28  ;;  %v736_v34 = vadd.f32 %v665_v30, %v559_v26  ;;  %v572_v28 = vld [vmem:[#allocation2 + $0x78] sm:$0xff] }
 0x13e   : > { %963 = vst.msk [vmem:[#allocation3 + $0x18] sm:$0xff] %vm750_vm2, %v947_v29  ;;  %v946_v35 = vadd.f32 %v875_v31, %v769_v27  ;;  %v1920_v36 = vpop.f32.mrf.mxu0  ;;  %v782_v29 = vld [vmem:[#allocation3 + $0x78] sm:$0xff] }
 0x13f   : > { %v1976_v37 = vpop.f32.mrf.mxu1  ;;  %753 = vst.msk [vmem:[#allocation2 + $0x10] sm:$0xff] %vm750_vm2, %v736_v34  ;;  %v739_v40 = vadd.f32 %v1920_v36, %v562_v32  ;;  %v571_v34 = vld [vmem:[#allocation2 + $0x70] sm:$0xff] }
 0x140   : > { %962 = vst.msk [vmem:[#allocation3 + $0x10] sm:$0xff] %vm750_vm2, %v946_v35  ;;  %v949_v41 = vadd.f32 %v1976_v37, %v772_v33  ;;  %v675_v42 = vpop.f32.mrf.mxu0  ;;  %v781_v35 = vld [vmem:[#allocation3 + $0x70] sm:$0xff] }
 0x141   : > { %v885_v43 = vpop.f32.mrf.mxu1  ;;  %756 = vst.msk [vmem:[#allocation2 + $0x28] sm:$0xff] %vm750_vm2, %v739_v40  ;;  %v738_v46 = vadd.f32 %v675_v42, %v561_v38  ;;  %v977_v40 = vld [vmem:[#allocation4 + $0x8] sm:$0xff] }
 0x142   : > { %965 = vst.msk [vmem:[#allocation3 + $0x28] sm:$0xff] %vm750_vm2, %v949_v41  ;;  %v948_v47 = vadd.f32 %v885_v43, %v771_v39  ;;  %v1923_v48 = vpop.f32.mrf.mxu0  ;;  %v985_v41 = vld [vmem:[#allocation4 + $0x48] sm:$0xff] }
 0x143   : > { %v1979_v49 = vpop.f32.mrf.mxu1  ;;  %755 = vst.msk [vmem:[#allocation2 + $0x20] sm:$0xff] %vm750_vm2, %v738_v46  ;;  %v741_v52 = vadd.f32 %v1923_v48, %v564_v44  ;;  %v976_v46 = vld [vmem:[#allocation4] sm:$0xff] }
 0x144   : > { %964 = vst.msk [vmem:[#allocation3 + $0x20] sm:$0xff] %vm750_vm2, %v948_v47  ;;  %v951_v53 = vadd.f32 %v1979_v49, %v774_v45  ;;  %v685_v54 = vpop.f32.mrf.mxu0  ;;  %v984_v47 = vld [vmem:[#allocation4 + $0x40] sm:$0xff] }
 0x145   : > { %v895_v55 = vpop.f32.mrf.mxu1  ;;  %758 = vst.msk [vmem:[#allocation2 + $0x38] sm:$0xff] %vm750_vm2, %v741_v52  ;;  %v740_v58 = vadd.f32 %v685_v54, %v563_v50  ;;  %v979_v52 = vld [vmem:[#allocation4 + $0x18] sm:$0xff] }
 0x146   : > { %967 = vst.msk [vmem:[#allocation3 + $0x38] sm:$0xff] %vm750_vm2, %v951_v53  ;;  %v950_v59 = vadd.f32 %v895_v55, %v773_v51  ;;  %v1926_v60 = vpop.f32.mrf.mxu0  ;;  %v987_v53 = vld [vmem:[#allocation4 + $0x58] sm:$0xff] }
 0x147   : > { %v1982_v61 = vpop.f32.mrf.mxu1  ;;  %757 = vst.msk [vmem:[#allocation2 + $0x30] sm:$0xff] %vm750_vm2, %v740_v58  ;;  %v743_v0 = vadd.f32 %v1926_v60, %v566_v56  ;;  %v978_v58 = vld [vmem:[#allocation4 + $0x10] sm:$0xff] }
 0x148   : > { %966 = vst.msk [vmem:[#allocation3 + $0x30] sm:$0xff] %vm750_vm2, %v950_v59  ;;  %v953_v1 = vadd.f32 %v1982_v61, %v776_v57  ;;  %v695_v2 = vpop.f32.mrf.mxu0  ;;  %v986_v59 = vld [vmem:[#allocation4 + $0x50] sm:$0xff] }
 0x149   : > { %v905_v3 = vpop.f32.mrf.mxu1  ;;  %760 = vst.msk [vmem:[#allocation2 + $0x48] sm:$0xff] %vm750_vm2, %v743_v0  ;;  %v742_v6 = vadd.f32 %v695_v2, %v565_v62  ;;  %v981_v0 = vld [vmem:[#allocation4 + $0x28] sm:$0xff] }
 0x14a   : > { %969 = vst.msk [vmem:[#allocation3 + $0x48] sm:$0xff] %vm750_vm2, %v953_v1  ;;  %v952_v7 = vadd.f32 %v905_v3, %v775_v63  ;;  %v1929_v8 = vpop.f32.mrf.mxu0  ;;  %v989_v1 = vld [vmem:[#allocation4 + $0x68] sm:$0xff] }
 0x14b   : > { %v1985_v9 = vpop.f32.mrf.mxu1  ;;  %759 = vst.msk [vmem:[#allocation2 + $0x40] sm:$0xff] %vm750_vm2, %v742_v6  ;;  %v745_v12 = vadd.f32 %v1929_v8, %v568_v4  ;;  %v980_v6 = vld [vmem:[#allocation4 + $0x20] sm:$0xff] }
 0x14c   : > { %968 = vst.msk [vmem:[#allocation3 + $0x40] sm:$0xff] %vm750_vm2, %v952_v7  ;;  %v955_v13 = vadd.f32 %v1985_v9, %v778_v5  ;;  %v705_v14 = vpop.f32.mrf.mxu0  ;;  %v988_v7 = vld [vmem:[#allocation4 + $0x60] sm:$0xff] }
 0x14d   : > { %v915_v15 = vpop.f32.mrf.mxu1  ;;  %762 = vst.msk [vmem:[#allocation2 + $0x58] sm:$0xff] %vm750_vm2, %v745_v12  ;;  %v744_v18 = vadd.f32 %v705_v14, %v567_v10  ;;  %v983_v12 = vld [vmem:[#allocation4 + $0x38] sm:$0xff] }
 0x14e   : > { %971 = vst.msk [vmem:[#allocation3 + $0x58] sm:$0xff] %vm750_vm2, %v955_v13  ;;  %v954_v19 = vadd.f32 %v915_v15, %v777_v11  ;;  %v1932_v20 = vpop.f32.mrf.mxu0  ;;  %v991_v13 = vld [vmem:[#allocation4 + $0x78] sm:$0xff] }
 0x14f   : > { %v1988_v21 = vpop.f32.mrf.mxu1  ;;  %761 = vst.msk [vmem:[#allocation2 + $0x50] sm:$0xff] %vm750_vm2, %v744_v18  ;;  %v747_v24 = vadd.f32 %v1932_v20, %v570_v16  ;;  %v982_v18 = vld [vmem:[#allocation4 + $0x30] sm:$0xff] }
 0x150   : > { %970 = vst.msk [vmem:[#allocation3 + $0x50] sm:$0xff] %vm750_vm2, %v954_v19  ;;  %v957_v25 = vadd.f32 %v1988_v21, %v780_v17  ;;  %v715_v26 = vpop.f32.mrf.mxu0  ;;  %v990_v19 = vld [vmem:[#allocation4 + $0x70] sm:$0xff] }
 0x151   : > { %v925_v27 = vpop.f32.mrf.mxu1  ;;  %764 = vst.msk [vmem:[#allocation2 + $0x68] sm:$0xff] %vm750_vm2, %v747_v24  ;;  %v746_v30 = vadd.f32 %v715_v26, %v569_v22 }
 0x152   : > { %973 = vst.msk [vmem:[#allocation3 + $0x68] sm:$0xff] %vm750_vm2, %v957_v25  ;;  %v956_v31 = vadd.f32 %v925_v27, %v779_v23  ;;  %v1935_v32 = vpop.f32.mrf.mxu0 }
 0x153   : > { %v1991_v33 = vpop.f32.mrf.mxu1  ;;  %763 = vst.msk [vmem:[#allocation2 + $0x60] sm:$0xff] %vm750_vm2, %v746_v30  ;;  %v749_v36 = vadd.f32 %v1935_v32, %v572_v28 }
 0x154   : > { %972 = vst.msk [vmem:[#allocation3 + $0x60] sm:$0xff] %vm750_vm2, %v956_v31  ;;  %v959_v37 = vadd.f32 %v1991_v33, %v782_v29  ;;  %v725_v38 = vpop.f32.mrf.mxu0 }
 0x155   : > { %v935_v39 = vpop.f32.mrf.mxu1  ;;  %766 = vst.msk [vmem:[#allocation2 + $0x78] sm:$0xff] %vm750_vm2, %v749_v36  ;;  %v748_v42 = vadd.f32 %v725_v38, %v571_v34 }
 0x156   : > { %975 = vst.msk [vmem:[#allocation3 + $0x78] sm:$0xff] %vm750_vm2, %v959_v37  ;;  %v958_v43 = vadd.f32 %v935_v39, %v781_v35  ;;  %v1996_v44 = vpop.f32.mrf.mxu0 }
 0x157   : > { %v2008_v45 = vpop.f32.mrf.mxu1  ;;  %765 = vst.msk [vmem:[#allocation2 + $0x70] sm:$0xff] %vm750_vm2, %v748_v42  ;;  %v1139_v48 = vadd.f32 %v1996_v44, %v977_v40 }
 0x158   : > { %974 = vst.msk [vmem:[#allocation3 + $0x70] sm:$0xff] %vm750_vm2, %v958_v43  ;;  %v1147_v49 = vadd.f32 %v2008_v45, %v985_v41  ;;  %v1059_v50 = vpop.f32.mrf.mxu0 }
 0x159   : > { %v1099_v51 = vpop.f32.mrf.mxu1  ;;  %1156 = vst.msk [vmem:[#allocation4 + $0x8] sm:$0xff] %vm1154_vm3, %v1139_v48  ;;  %v1138_v54 = vadd.f32 %v1059_v50, %v976_v46 }
 0x15a   : > { %1164 = vst.msk [vmem:[#allocation4 + $0x48] sm:$0xff] %vm1154_vm3, %v1147_v49  ;;  %v1146_v55 = vadd.f32 %v1099_v51, %v984_v47  ;;  %v1999_v56 = vpop.f32.mrf.mxu0 }
 0x15b   : > { %v2011_v57 = vpop.f32.mrf.mxu1  ;;  %1155 = vst.msk [vmem:[#allocation4] sm:$0xff] %vm1154_vm3, %v1138_v54  ;;  %v1141_v60 = vadd.f32 %v1999_v56, %v979_v52 }
 0x15c   : > { %1163 = vst.msk [vmem:[#allocation4 + $0x40] sm:$0xff] %vm1154_vm3, %v1146_v55  ;;  %v1149_v61 = vadd.f32 %v2011_v57, %v987_v53  ;;  %v1069_v62 = vpop.f32.mrf.mxu0 }
 0x15d   : > { %v1109_v63 = vpop.f32.mrf.mxu1  ;;  %1158 = vst.msk [vmem:[#allocation4 + $0x18] sm:$0xff] %vm1154_vm3, %v1141_v60  ;;  %v1140_v2 = vadd.f32 %v1069_v62, %v978_v58 }
 0x15e   : > { %1166 = vst.msk [vmem:[#allocation4 + $0x58] sm:$0xff] %vm1154_vm3, %v1149_v61  ;;  %v1148_v3 = vadd.f32 %v1109_v63, %v986_v59  ;;  %v2002_v4 = vpop.f32.mrf.mxu0 }
 0x15f   : > { %v2014_v5 = vpop.f32.mrf.mxu1  ;;  %1157 = vst.msk [vmem:[#allocation4 + $0x10] sm:$0xff] %vm1154_vm3, %v1140_v2  ;;  %v1143_v8 = vadd.f32 %v2002_v4, %v981_v0 }
 0x160   : > { %1165 = vst.msk [vmem:[#allocation4 + $0x50] sm:$0xff] %vm1154_vm3, %v1148_v3  ;;  %v1151_v9 = vadd.f32 %v2014_v5, %v989_v1  ;;  %v1079_v10 = vpop.f32.mrf.mxu0 }
 0x161   : > { %v1119_v11 = vpop.f32.mrf.mxu1  ;;  %1160 = vst.msk [vmem:[#allocation4 + $0x28] sm:$0xff] %vm1154_vm3, %v1143_v8  ;;  %v1142_v14 = vadd.f32 %v1079_v10, %v980_v6 }
 0x162   : > { %1168 = vst.msk [vmem:[#allocation4 + $0x68] sm:$0xff] %vm1154_vm3, %v1151_v9  ;;  %v1150_v15 = vadd.f32 %v1119_v11, %v988_v7  ;;  %v2005_v16 = vpop.f32.mrf.mxu0 }
 0x163   : > { %v2017_v17 = vpop.f32.mrf.mxu1  ;;  %1159 = vst.msk [vmem:[#allocation4 + $0x20] sm:$0xff] %vm1154_vm3, %v1142_v14  ;;  %v1145_v20 = vadd.f32 %v2005_v16, %v983_v12 }
 0x164   : > { %1167 = vst.msk [vmem:[#allocation4 + $0x60] sm:$0xff] %vm1154_vm3, %v1150_v15  ;;  %v1153_v21 = vadd.f32 %v2017_v17, %v991_v13  ;;  %v1089_v22 = vpop.f32.mrf.mxu0  ;;  %1174 = sbr.rel (%p1756_p0) target bundleno = 690 (0x2b2), region = 89 }
 0x165   : > { %v1129_v23 = vpop.f32.mrf.mxu1  ;;  %1162 = vst.msk [vmem:[#allocation4 + $0x38] sm:$0xff] %vm1154_vm3, %v1145_v20  ;;  %v1144_v24 = vadd.f32 %v1089_v22, %v982_v18 }
 0x166   : > { %1170 = vst.msk [vmem:[#allocation4 + $0x78] sm:$0xff] %vm1154_vm3, %v1153_v21  ;;  %v1152_v25 = vadd.f32 %v1129_v23, %v990_v19 }
 0x167   : > { %1161 = vst.msk [vmem:[#allocation4 + $0x30] sm:$0xff] %vm1154_vm3, %v1144_v24 }
 0x168   : > { %1169 = vst.msk [vmem:[#allocation4 + $0x70] sm:$0xff] %vm1154_vm3, %v1152_v25 }
 0x169   : > { %v1177_v26 = vld [vmem:[#allocation4 + $0x10] sm:$0xff]  ;;  %v1175_v27 = vld [vmem:[#allocation4] sm:$0xff]  ;;  %v1178_v28 = vld [vmem:[#allocation4 + $0x18] sm:$0xff]  ;;  %v2172_v29 = vmov 0   ;;  %v2173_v11 = vmov 1  }
 0x16a   : > { %2080 = vset.pattern.permute.xlu1 %v2172_v29  ;;  %2079 = vset.pattern.permute.xlu0 %v2172_v29  ;;  %2083 = vrcp.f32 %v1177_v26  ;;  %v1176_v30 = vld [vmem:[#allocation4 + $0x8] sm:$0xff]  ;;  %v1179_v32 = vld [vmem:[#allocation4 + $0x20] sm:$0xff]  ;;  %vm1193_vm4 = vcmp.gt.f32.partialorder %v1177_v26, 0.0  ;;  %vm1191_vm5 = vcmp.gt.f32.partialorder %v1175_v27, 0.0  ;;  %vm1194_vm6 = vcmp.gt.f32.partialorder %v1178_v28, 0.0  ;;  %v1186_v38 = vld [vmem:[#allocation4 + $0x58] sm:$0xff] }
 0x16b   : > { %2085 = vrcp.f32 %v1175_v27  ;;  %v1180_v31 = vld [vmem:[#allocation4 + $0x28] sm:$0xff]  ;;  %v1183_v36 = vld [vmem:[#allocation4 + $0x40] sm:$0xff]  ;;  %vm1192_vm7 = vcmp.gt.f32.partialorder %v1176_v30, 0.0  ;;  %v1185_v41 = vld [vmem:[#allocation4 + $0x50] sm:$0xff]  ;;  %vm1195_vm9 = vcmp.gt.f32.partialorder %v1179_v32, 0.0  ;;  %vm1202_vm14 = vcmp.gt.f32.partialorder %v1186_v38, 0.0 }
 0x16c   : > { %2087 = vrcp.f32 %v1178_v28  ;;  %v1182_v33 = vld [vmem:[#allocation4 + $0x38] sm:$0xff]  ;;  %v1184_v35 = vld [vmem:[#allocation4 + $0x48] sm:$0xff]  ;;  %vm1196_vm8 = vcmp.gt.f32.partialorder %v1180_v31, 0.0  ;;  %v1187_v50 = vld [vmem:[#allocation4 + $0x60] sm:$0xff]  ;;  %vm1199_vm13 = vcmp.gt.f32.partialorder %v1183_v36, 0.0  ;;  %vm1201_vm15 = vcmp.gt.f32.partialorder %v1185_v41, 0.0 }
 0x16d   : > { %2089 = vrcp.f32 %v1176_v30  ;;  %v1188_v48 = vld [vmem:[#allocation4 + $0x68] sm:$0xff]  ;;  %vm1198_vm10 = vcmp.gt.f32.partialorder %v1182_v33, 0.0  ;;  %v1190_v54 = vld [vmem:[#allocation4 + $0x78] sm:$0xff]  ;;  %vm1200_vm12 = vcmp.gt.f32.partialorder %v1184_v35, 0.0  ;;  %vm1203_vm1 = vcmp.gt.f32.partialorder %v1187_v50, 0.0  ;;  %v1241_v12 = vld [vmem:[#allocation2 + $0x10] sm:$0xff] }
 0x16e   : > { %2091 = vrcp.f32 %v1180_v31  ;;  %v1181_v34 = vld [vmem:[#allocation4 + $0x30] sm:$0xff]  ;;  %vm1204_vm0 = vcmp.gt.f32.partialorder %v1188_v48, 0.0  ;;  %vm1206_vm3 = vcmp.gt.f32.partialorder %v1190_v54, 0.0  ;;  %v1239_v13 = vld [vmem:[#allocation2] sm:$0xff]  ;;  %v1242_v19 = vld [vmem:[#allocation2 + $0x18] sm:$0xff] }
 0x16f   : > { %2093 = vrcp.f32 %v1179_v32  ;;  %vm1197_vm11 = vcmp.gt.f32.partialorder %v1181_v34, 0.0  ;;  %v1189_v56 = vld [vmem:[#allocation4 + $0x70] sm:$0xff]  ;;  %v1463_v16 = vld [vmem:[%s2312_s12] sm:$0xff]  ;;  %v1240_v20 = vld [vmem:[#allocation2 + $0x8] sm:$0xff] }
 0x170   : > { %2095 = vrcp.f32 %v1182_v33  ;;  %v1465_v21 = vld [vmem:[%s2312_s12 + $0x10] sm:$0xff]  ;;  %v1466_v24 = vld [vmem:[%s2312_s12 + $0x18] sm:$0xff]  ;;  %v1464_v27 = vld [vmem:[%s2312_s12 + $0x8] sm:$0xff] }
 0x171   : > { %2097 = vrcp.f32 %v1181_v34  ;;  %v1244_v29 = vld [vmem:[#allocation2 + $0x28] sm:$0xff]  ;;  %v1243_v32 = vld [vmem:[#allocation2 + $0x20] sm:$0xff] }
 0x172   : > { %2099 = vrcp.f32 %v1184_v35 }
 0x173   : > { %2101 = vrcp.f32 %v1183_v36 }
 0x174   : > { %2103 = vrcp.f32 %v1186_v38 }
 0x175   : > { %2105 = vrcp.f32 %v1185_v41  ;;  %v1467_v41 = vld [vmem:[%s2312_s12 + $0x20] sm:$0xff] }
 0x176   : > { %2107 = vrcp.f32 %v1188_v48 }
 0x177   : > { %v2084_v37 = vpop.eup %2083  ;;  %2109 = vrcp.f32 %v1187_v50 }
 0x178   : > { %v2086_v39 = vpop.eup %2085  ;;  %v2475_v40 = vsel %vm1193_vm4, %v2084_v37, 0.0  ;;  %2111 = vrcp.f32 %v1190_v54  ;;  %vm1205_vm4 = vcmp.gt.f32.partialorder %v1189_v56, 0.0  ;;  %v1468_v37 = vld [vmem:[%s2312_s12 + $0x28] sm:$0xff] }
 0x179   : > { %v2088_v42 = vpop.eup %2087  ;;  %1267 = vperm.xlu1 %2080, %v2475_v40   ;;  %v2478_v43 = vsel %vm1191_vm5, %v2086_v39, 0.0  ;;  %2113 = vrcp.f32 %v1189_v56  ;;  %v1469_v56 = vld [vmem:[%s2312_s12 + $0x30] sm:$0xff]  ;;  %vm1559_vm5 = vcmask 7168  }
 0x17a   : > { %v2090_v44 = vpop.eup %2089  ;;  %1257 = vperm.xlu0 %2079, %v2478_v43   ;;  %v2481_v45 = vsel %vm1194_vm6, %v2088_v42, 0.0 }
 0x17b   : > { %v2092_v46 = vpop.eup %2091  ;;  %v1224_v47 = vsel %vm1192_vm7, %v2090_v44, 0.0 }
 0x17c   : > { %v2094_v49 = vpop.eup %2093  ;;  %v1228_v51 = vsel %vm1196_vm8, %v2092_v46, 0.0 }
 0x17d   : > { %1272 = vperm.xlu1 %2080, %v2481_v45   ;;  %v2096_v52 = vpop.eup %2095  ;;  %v1227_v53 = vsel %vm1195_vm9, %v2094_v49, 0.0 }
 0x17e   : > { %1262 = vperm.xlu0 %2079, %v1224_v47   ;;  %v2098_v55 = vpop.eup %2097  ;;  %v1230_v57 = vsel %vm1198_vm10, %v2096_v52, 0.0 }
 0x17f   : > { %v2100_v58 = vpop.eup %2099  ;;  %v1229_v59 = vsel %vm1197_vm11, %v2098_v55, 0.0 }
 0x180   : > { %v2102_v60 = vpop.eup %2101  ;;  %v1232_v61 = vsel %vm1200_vm12, %v2100_v58, 0.0  ;;  %v1248_v58 = vld [vmem:[#allocation2 + $0x48] sm:$0xff] }
 0x181   : > { %1282 = vperm.xlu1 %2080, %v1228_v51   ;;  %v2104_v62 = vpop.eup %2103  ;;  %v1231_v63 = vsel %vm1199_vm13, %v2102_v60, 0.0 }
 0x182   : > { %1277 = vperm.xlu0 %2079, %v1227_v53   ;;  %v2106_v0 = vpop.eup %2105  ;;  %v1234_v1 = vsel %vm1202_vm14, %v2104_v62, 0.0 }
 0x183   : > { %v2108_v2 = vpop.eup %2107  ;;  %v1233_v3 = vsel %vm1201_vm15, %v2106_v0, 0.0 }
 0x184   : > { %v2110_v4 = vpop.eup %2109  ;;  %v1236_v5 = vsel %vm1204_vm0, %v2108_v2, 0.0 }
 0x185   : > { %1292 = vperm.xlu1 %2080, %v1230_v57   ;;  %v2112_v6 = vpop.eup %2111  ;;  %v1235_v7 = vsel %vm1203_vm1, %v2110_v4, 0.0 }
 0x186   : > { %1287 = vperm.xlu0 %2079, %v1229_v59   ;;  %v2114_v8 = vpop.eup %2113  ;;  %v2484_v9 = vsel %vm1206_vm3, %v2112_v6, 0.0  ;;  %v1471_v6 = vld [vmem:[%s2312_s12 + $0x40] sm:$0xff] }
 0x187   : > { %v2486_v10 = vsel %vm1205_vm4, %v2114_v8, 0.0  ;;  %v1250_v8 = vld [vmem:[#allocation2 + $0x58] sm:$0xff] }
 0x189   : > { %1302 = vperm.xlu1 %2080, %v1232_v61  }
 0x18a   : > { %1297 = vperm.xlu0 %2079, %v1231_v63  }
 0x18d   : > { %1312 = vperm.xlu1 %2080, %v1234_v1  }
 0x18e   : > { %1307 = vperm.xlu0 %2079, %v1233_v3  }
 0x191   : > { %1322 = vperm.xlu1 %2080, %v1236_v5  }
 0x192   : > { %1317 = vperm.xlu0 %2079, %v1235_v7  }
 0x195   : > { %1332 = vperm.xlu1 %2080, %v2484_v9  }
 0x196   : > { %1327 = vperm.xlu0 %2079, %v2486_v10  }
 0x199   : > { %2082 = vset.pattern.permute.xlu1 %v2173_v11 }
 0x19a   : > { %1372 = vperm.xlu1 %2082, %v1224_v47   ;;  %2081 = vset.pattern.permute.xlu0 %v2173_v11  ;;  %v1245_v47 = vld [vmem:[#allocation2 + $0x30] sm:$0xff] }
 0x19b   : > { %1368 = vperm.xlu0 %2081, %v2478_v43   ;;  %v1246_v43 = vld [vmem:[#allocation2 + $0x38] sm:$0xff] }
 0x19e   : > { %1376 = vperm.xlu1 %2082, %v2475_v40  }
 0x19f   : > { %1380 = vperm.xlu0 %2081, %v2481_v45  }
 0x1a2   : > { %1384 = vperm.xlu1 %2082, %v1227_v53  }
 0x1a3   : > { %1388 = vperm.xlu0 %2081, %v1228_v51   ;;  %v1470_v51 = vld [vmem:[%s2312_s12 + $0x38] sm:$0xff] }
 0x1a6   : > { %1392 = vperm.xlu1 %2082, %v1229_v59  }
 0x1a7   : > { %1396 = vperm.xlu0 %2081, %v1230_v57  }
 0x1aa   : > { %1400 = vperm.xlu1 %2082, %v1231_v63  }
 0x1ab   : > { %1404 = vperm.xlu0 %2081, %v1232_v61   ;;  %v1247_v61 = vld [vmem:[#allocation2 + $0x40] sm:$0xff] }
 0x1ae   : > { %1412 = vperm.xlu1 %2082, %v1234_v1   ;;  %v1472_v1 = vld [vmem:[%s2312_s12 + $0x48] sm:$0xff] }
 0x1af   : > { %1408 = vperm.xlu0 %2081, %v1233_v3  }
 0x1b2   : > { %1416 = vperm.xlu1 %2082, %v1235_v7  }
 0x1b3   : > { %1420 = vperm.xlu0 %2081, %v1236_v5  }
 0x1f4   : > { %v1268_v14 = vpop.permute.xlu1 %1267 }
 0x1f5   : > { %v1258_v15 = vpop.permute.xlu0 %1257  ;;  %v1337_v17 = vmul.f32 %v1268_v14, %v1241_v12  ;;  %v1249_v12 = vld [vmem:[#allocation2 + $0x50] sm:$0xff] }
 0x1f6   : > { %v1335_v18 = vmul.f32 %v1258_v15, %v1239_v13 }
 0x1f7   : > { %v1481_v31 = vsub.f32 %v1337_v17, %v1465_v21  ;;  %v1474_v17 = vld [vmem:[%s2312_s12 + $0x58] sm:$0xff] }
 0x1f8   : > { %v1273_v22 = vpop.permute.xlu1 %1272  ;;  %v1479_v23 = vsub.f32 %v1335_v18, %v1463_v16 }
 0x1f9   : > { %v1338_v25 = vmul.f32 %v1273_v22, %v1242_v19  ;;  %v1263_v26 = vpop.permute.xlu0 %1262  ;;  %v1497_v45 = vand.u32 2147483647, %v1481_v31  ;;  %v1473_v22 = vld [vmem:[%s2312_s12 + $0x50] sm:$0xff]  ;;  %v1476_v31 = vld [vmem:[%s2312_s12 + $0x68] sm:$0xff] }
 0x1fa   : > { %v1336_v28 = vmul.f32 %v1263_v26, %v1240_v20  ;;  %v1495_v30 = vand.u32 2147483647, %v1479_v23  ;;  %v1251_v26 = vld [vmem:[#allocation2 + $0x60] sm:$0xff] }
 0x1fb   : > { %v1482_v33 = vsub.f32 %v1338_v25, %v1466_v24  ;;  %v1517_v59 = vsel %vm750_vm2, %v1497_v45, 0.0  ;;  %v1252_v24 = vld [vmem:[#allocation2 + $0x68] sm:$0xff]  ;;  %v1478_v45 = vld [vmem:[%s2312_s12 + $0x78] sm:$0xff] }
 0x1fc   : > { %v1283_v34 = vpop.permute.xlu1 %1282  ;;  %v1511_v35 = vsel %vm750_vm2, %v1495_v30, 0.0  ;;  %v1480_v36 = vsub.f32 %v1336_v28, %v1464_v27 }
 0x1fd   : > { %v1340_v38 = vmul.f32 %v1283_v34, %v1244_v29  ;;  %1512 = vadd.xlane.f32.xlu1 %v1511_v35  ;;  %v1278_v39 = vpop.permute.xlu0 %1277  ;;  %v1498_v40 = vand.u32 2147483647, %v1482_v33 }
 0x1fe   : > { %v1339_v42 = vmul.f32 %v1278_v39, %v1243_v32  ;;  %v1496_v44 = vand.u32 2147483647, %v1480_v36  ;;  %v1475_v36 = vld [vmem:[%s2312_s12 + $0x60] sm:$0xff] }
 0x1ff   : > { %v1520_v46 = vsel %vm750_vm2, %v1498_v40, 0.0  ;;  %v1484_v48 = vsub.f32 %v1340_v38, %v1468_v37  ;;  %v1254_v38 = vld [vmem:[#allocation2 + $0x78] sm:$0xff]  ;;  %v1253_v40 = vld [vmem:[#allocation2 + $0x70] sm:$0xff] }
 0x200   : > { %v1293_v49 = vpop.permute.xlu1 %1292  ;;  %v1514_v50 = vsel %vm750_vm2, %v1496_v44, 0.0  ;;  %v1483_v52 = vsub.f32 %v1339_v42, %v1467_v41 }
 0x201   : > { %v1342_v53 = vmul.f32 %v1293_v49, %v1246_v43  ;;  %1521 = vadd.xlane.f32.xlu1 %v1520_v46  ;;  %1515 = vadd.xlane.f32.xlu0 %v1514_v50  ;;  %v1288_v54 = vpop.permute.xlu0 %1287  ;;  %v1500_v55 = vand.u32 2147483647, %v1484_v48  ;;  %v1477_v50 = vld [vmem:[%s2312_s12 + $0x70] sm:$0xff] }
 0x202   : > { %v1341_v57 = vmul.f32 %v1288_v54, %v1245_v47  ;;  %v1499_v0 = vand.u32 2147483647, %v1483_v52  ;;  %v1352_v54 = vld [vmem:[#allocation3 + $0x8] sm:$0xff] }
 0x203   : > { %v1526_v60 = vsel %vm750_vm2, %v1500_v55, 0.0  ;;  %v1486_v62 = vsub.f32 %v1342_v53, %v1470_v51 }
 0x204   : > { %v1303_v63 = vpop.permute.xlu1 %1302  ;;  %v1485_v2 = vsub.f32 %v1341_v57, %v1469_v56  ;;  %v1523_v15 = vsel %vm750_vm2, %v1499_v0, 0.0 }
 0x205   : > { %v1344_v3 = vmul.f32 %v1303_v63, %v1248_v58  ;;  %1527 = vadd.xlane.f32.xlu1 %v1526_v60  ;;  %1518 = vadd.xlane.f32.xlu0 %v1517_v59  ;;  %v1298_v4 = vpop.permute.xlu0 %1297  ;;  %v1502_v5 = vand.u32 2147483647, %v1486_v62  ;;  %v1351_v58 = vld [vmem:[#allocation3] sm:$0xff] }
 0x206   : > { %v1343_v7 = vmul.f32 %v1298_v4, %v1247_v61  ;;  %v1501_v16 = vand.u32 2147483647, %v1485_v2  ;;  %v1354_v4 = vld [vmem:[#allocation3 + $0x18] sm:$0xff] }
 0x207   : > { %v1532_v11 = vsel %vm750_vm2, %v1502_v5, 0.0  ;;  %v1488_v13 = vsub.f32 %v1344_v3, %v1472_v1  ;;  %v1353_v1 = vld [vmem:[#allocation3 + $0x10] sm:$0xff] }
 0x208   : > { %v1313_v14 = vpop.permute.xlu1 %1312  ;;  %v1487_v18 = vsub.f32 %v1343_v7, %v1471_v6  ;;  %v1529_v29 = vsel %vm750_vm2, %v1501_v16, 0.0 }
 0x209   : > { %v1346_v19 = vmul.f32 %v1313_v14, %v1250_v8  ;;  %1533 = vadd.xlane.f32.xlu1 %v1532_v11  ;;  %1524 = vadd.xlane.f32.xlu0 %v1523_v15  ;;  %v1308_v20 = vpop.permute.xlu0 %1307  ;;  %v1504_v21 = vand.u32 2147483647, %v1488_v13  ;;  %v1355_v11 = vld [vmem:[#allocation3 + $0x20] sm:$0xff]  ;;  %v1356_v13 = vld [vmem:[#allocation3 + $0x28] sm:$0xff] }
 0x20a   : > { %v1345_v23 = vmul.f32 %v1308_v20, %v1249_v12  ;;  %v1503_v30 = vand.u32 2147483647, %v1487_v18  ;;  %v1357_v18 = vld [vmem:[#allocation3 + $0x30] sm:$0xff] }
 0x20b   : > { %v1538_v25 = vsel %vm750_vm2, %v1504_v21, 0.0  ;;  %v1490_v27 = vsub.f32 %v1346_v19, %v1474_v17  ;;  %v1358_v19 = vld [vmem:[#allocation3 + $0x38] sm:$0xff] }
 0x20c   : > { %v1323_v28 = vpop.permute.xlu1 %1322  ;;  %v1489_v32 = vsub.f32 %v1345_v23, %v1473_v22  ;;  %v1535_v43 = vsel %vm750_vm2, %v1503_v30, 0.0  ;;  %v1362_v30 = vld [vmem:[#allocation3 + $0x58] sm:$0xff] }
 0x20d   : > { %v1348_v33 = vmul.f32 %v1323_v28, %v1252_v24  ;;  %1539 = vadd.xlane.f32.xlu1 %v1538_v25  ;;  %1530 = vadd.xlane.f32.xlu0 %v1529_v29  ;;  %v1318_v34 = vpop.permute.xlu0 %1317  ;;  %v1506_v35 = vand.u32 2147483647, %v1490_v27  ;;  %v1359_v24 = vld [vmem:[#allocation3 + $0x40] sm:$0xff]  ;;  %v1360_v25 = vld [vmem:[#allocation3 + $0x48] sm:$0xff] }
 0x20e   : > { %v1347_v37 = vmul.f32 %v1318_v34, %v1251_v26  ;;  %v1505_v44 = vand.u32 2147483647, %v1489_v32 }
 0x20f   : > { %v1544_v39 = vsel %vm750_vm2, %v1506_v35, 0.0  ;;  %v1492_v41 = vsub.f32 %v1348_v33, %v1476_v31  ;;  %v1361_v31 = vld [vmem:[#allocation3 + $0x50] sm:$0xff] }
 0x210   : > { %v1333_v42 = vpop.permute.xlu1 %1332  ;;  %v1491_v46 = vsub.f32 %v1347_v37, %v1475_v36  ;;  %v1541_v55 = vsel %vm750_vm2, %v1505_v44, 0.0  ;;  %v1363_v36 = vld [vmem:[#allocation3 + $0x60] sm:$0xff]  ;;  %v1364_v37 = vld [vmem:[#allocation3 + $0x68] sm:$0xff] }
 0x211   : > { %v1350_v47 = vmul.f32 %v1333_v42, %v1254_v38  ;;  %1545 = vadd.xlane.f32.xlu1 %v1544_v39  ;;  %1536 = vadd.xlane.f32.xlu0 %v1535_v43  ;;  %v1328_v48 = vpop.permute.xlu0 %1327  ;;  %v1508_v49 = vand.u32 2147483647, %v1492_v41 }
 0x212   : > { %v1349_v51 = vmul.f32 %v1328_v48, %v1253_v40  ;;  %v1507_v56 = vand.u32 2147483647, %v1491_v46 }
 0x213   : > { %v1550_v52 = vsel %vm750_vm2, %v1508_v49, 0.0  ;;  %v1494_v53 = vsub.f32 %v1350_v47, %v1478_v45 }
 0x214   : > { %v1493_v57 = vsub.f32 %v1349_v51, %v1477_v50  ;;  %v1547_v2 = vsel %vm750_vm2, %v1507_v56, 0.0 }
 0x215   : > { %1551 = vadd.xlane.f32.xlu1 %v1550_v52  ;;  %1542 = vadd.xlane.f32.xlu0 %v1541_v55  ;;  %v1510_v59 = vand.u32 2147483647, %v1494_v53  ;;  %v1373_v60 = vpop.permute.xlu1 %1372  ;;  %v1365_v55 = vld [vmem:[#allocation3 + $0x70] sm:$0xff] }
 0x216   : > { %v1432_v61 = vmul.f32 %v1373_v60, %v1352_v54  ;;  %v1369_v62 = vpop.permute.xlu0 %1368  ;;  %v1509_v3 = vand.u32 2147483647, %v1493_v57 }
 0x217   : > { %v1556_v63 = vsel %vm750_vm2, %v1510_v59, 0.0  ;;  %v1431_v0 = vmul.f32 %v1369_v62, %v1351_v58  ;;  %v1366_v59 = vld [vmem:[#allocation3 + $0x78] sm:$0xff] }
 0x218   : > { %1448 = vst.msk [vmem:[%s2317_s15 + $0x8] sm:$0xff] %vm750_vm2, %v1432_v61  ;;  %v1553_v12 = vsel %vm750_vm2, %v1509_v3, 0.0 }
 0x219   : > { %1557 = vadd.xlane.f32.xlu1 %v1556_v63  ;;  %1548 = vadd.xlane.f32.xlu0 %v1547_v2  ;;  %1447 = vst.msk [vmem:[%s2317_s15] sm:$0xff] %vm750_vm2, %v1431_v0  ;;  %v1377_v5 = vpop.permute.xlu1 %1376 }
 0x21a   : > { %v1433_v6 = vmul.f32 %v1377_v5, %v1353_v1  ;;  %v1381_v7 = vpop.permute.xlu0 %1380 }
 0x21b   : > { %v1434_v8 = vmul.f32 %v1381_v7, %v1354_v4 }
 0x21c   : > { %1449 = vst.msk [vmem:[%s2317_s15 + $0x10] sm:$0xff] %vm750_vm2, %v1433_v6 }
 0x21d   : > { %1554 = vadd.xlane.f32.xlu0 %v1553_v12  ;;  %1450 = vst.msk [vmem:[%s2317_s15 + $0x18] sm:$0xff] %vm750_vm2, %v1434_v8  ;;  %v1385_v14 = vpop.permute.xlu1 %1384 }
 0x21e   : > { %v1435_v15 = vmul.f32 %v1385_v14, %v1355_v11  ;;  %v1389_v16 = vpop.permute.xlu0 %1388 }
 0x21f   : > { %v1436_v17 = vmul.f32 %v1389_v16, %v1356_v13 }
 0x220   : > { %1451 = vst.msk [vmem:[%s2317_s15 + $0x20] sm:$0xff] %vm750_vm2, %v1435_v15 }
 0x221   : > { %1452 = vst.msk [vmem:[%s2317_s15 + $0x28] sm:$0xff] %vm750_vm2, %v1436_v17  ;;  %v1393_v20 = vpop.permute.xlu1 %1392 }
 0x222   : > { %v1437_v21 = vmul.f32 %v1393_v20, %v1357_v18  ;;  %v1397_v22 = vpop.permute.xlu0 %1396 }
 0x223   : > { %v1438_v23 = vmul.f32 %v1397_v22, %v1358_v19 }
 0x224   : > { %1453 = vst.msk [vmem:[%s2317_s15 + $0x30] sm:$0xff] %vm750_vm2, %v1437_v21 }
 0x225   : > { %1454 = vst.msk [vmem:[%s2317_s15 + $0x38] sm:$0xff] %vm750_vm2, %v1438_v23  ;;  %v1401_v26 = vpop.permute.xlu1 %1400 }
 0x226   : > { %v1439_v27 = vmul.f32 %v1401_v26, %v1359_v24  ;;  %v1405_v28 = vpop.permute.xlu0 %1404 }
 0x227   : > { %v1440_v29 = vmul.f32 %v1405_v28, %v1360_v25 }
 0x228   : > { %1455 = vst.msk [vmem:[%s2317_s15 + $0x40] sm:$0xff] %vm750_vm2, %v1439_v27 }
 0x229   : > { %1456 = vst.msk [vmem:[%s2317_s15 + $0x48] sm:$0xff] %vm750_vm2, %v1440_v29  ;;  %v1413_v32 = vpop.permute.xlu1 %1412 }
 0x22a   : > { %1424 = vperm.xlu1 %2082, %v2486_v10   ;;  %v1442_v33 = vmul.f32 %v1413_v32, %v1362_v30  ;;  %v1409_v34 = vpop.permute.xlu0 %1408 }
 0x22b   : > { %v1441_v35 = vmul.f32 %v1409_v34, %v1361_v31 }
 0x22c   : > { %1458 = vst.msk [vmem:[%s2317_s15 + $0x58] sm:$0xff] %vm750_vm2, %v1442_v33 }
 0x22d   : > { %1457 = vst.msk [vmem:[%s2317_s15 + $0x50] sm:$0xff] %vm750_vm2, %v1441_v35  ;;  %v1417_v38 = vpop.permute.xlu1 %1416 }
 0x22e   : > { %v1443_v39 = vmul.f32 %v1417_v38, %v1363_v36  ;;  %v1421_v40 = vpop.permute.xlu0 %1420 }
 0x22f   : > { %v1444_v41 = vmul.f32 %v1421_v40, %v1364_v37 }
 0x230   : > { %1459 = vst.msk [vmem:[%s2317_s15 + $0x60] sm:$0xff] %vm750_vm2, %v1443_v39 }
 0x231   : > { %1460 = vst.msk [vmem:[%s2317_s15 + $0x68] sm:$0xff] %vm750_vm2, %v1444_v41 }
 0x233   : > { %1428 = vperm.xlu0 %2081, %v2484_v9  }
 0x286   : > { %v1513_v10 = vpop.xlane.xlu1 %1512 }
 0x287   : > { %1560 = vst.msk [vmem:[%s2322_s16] sm:$0xff] %vm1559_vm5, %v1513_v10 }
 0x28a   : > { %v1522_v42 = vpop.xlane.xlu1 %1521  ;;  %v1516_v43 = vpop.xlane.xlu0 %1515 }
 0x28b   : > { %1563 = vst.msk [vmem:[%s2322_s16 + $0x18] sm:$0xff] %vm1559_vm5, %v1522_v42  ;;  %1561 = vst.msk [vmem:[%s2322_s16 + $0x8] sm:$0xff] %vm1559_vm5, %v1516_v43 }
 0x28e   : > { %v1528_v44 = vpop.xlane.xlu1 %1527  ;;  %v1519_v45 = vpop.xlane.xlu0 %1518 }
 0x28f   : > { %1565 = vst.msk [vmem:[%s2322_s16 + $0x28] sm:$0xff] %vm1559_vm5, %v1528_v44  ;;  %1562 = vst.msk [vmem:[%s2322_s16 + $0x10] sm:$0xff] %vm1559_vm5, %v1519_v45 }
 0x292   : > { %v1534_v9 = vpop.xlane.xlu1 %1533  ;;  %v1525_v46 = vpop.xlane.xlu0 %1524 }
 0x293   : > { %1567 = vst.msk [vmem:[%s2322_s16 + $0x38] sm:$0xff] %vm1559_vm5, %v1534_v9  ;;  %1564 = vst.msk [vmem:[%s2322_s16 + $0x20] sm:$0xff] %vm1559_vm5, %v1525_v46 }
 0x296   : > { %v1540_v47 = vpop.xlane.xlu1 %1539  ;;  %v1531_v48 = vpop.xlane.xlu0 %1530 }
 0x297   : > { %1569 = vst.msk [vmem:[%s2322_s16 + $0x48] sm:$0xff] %vm1559_vm5, %v1540_v47  ;;  %1566 = vst.msk [vmem:[%s2322_s16 + $0x30] sm:$0xff] %vm1559_vm5, %v1531_v48 }
 0x29a   : > { %v1546_v49 = vpop.xlane.xlu1 %1545  ;;  %v1537_v50 = vpop.xlane.xlu0 %1536 }
 0x29b   : > { %1571 = vst.msk [vmem:[%s2322_s16 + $0x58] sm:$0xff] %vm1559_vm5, %v1546_v49  ;;  %1568 = vst.msk [vmem:[%s2322_s16 + $0x40] sm:$0xff] %vm1559_vm5, %v1537_v50 }
 0x29e   : > { %v1552_v51 = vpop.xlane.xlu1 %1551  ;;  %v1543_v52 = vpop.xlane.xlu0 %1542 }
 0x29f   : > { %1573 = vst.msk [vmem:[%s2322_s16 + $0x68] sm:$0xff] %vm1559_vm5, %v1552_v51  ;;  %1570 = vst.msk [vmem:[%s2322_s16 + $0x50] sm:$0xff] %vm1559_vm5, %v1543_v52 }
 0x2a2   : > { %v1558_v53 = vpop.xlane.xlu1 %1557  ;;  %v1549_v54 = vpop.xlane.xlu0 %1548 }
 0x2a3   : > { %1575 = vst.msk [vmem:[%s2322_s16 + $0x78] sm:$0xff] %vm1559_vm5, %v1558_v53  ;;  %1572 = vst.msk [vmem:[%s2322_s16 + $0x60] sm:$0xff] %vm1559_vm5, %v1549_v54 }
 0x2a6   : > { %v1425_v56 = vpop.permute.xlu1 %1424  ;;  %v1555_v57 = vpop.xlane.xlu0 %1554 }
 0x2a7   : > { %v1445_v58 = vmul.f32 %v1425_v56, %v1365_v55  ;;  %1574 = vst.msk [vmem:[%s2322_s16 + $0x70] sm:$0xff] %vm1559_vm5, %v1555_v57 }
 0x2a9   : > { %1461 = vst.msk [vmem:[%s2317_s15 + $0x70] sm:$0xff] %vm750_vm2, %v1445_v58 }
 0x2ae   : > { %v1429_v60 = vpop.permute.xlu0 %1428 }
 0x2af   : > { %v1446_v61 = vmul.f32 %v1429_v60, %v1366_v59 }
 0x2b1   : > { %1462 = vst.msk [vmem:[%s2317_s15 + $0x78] sm:$0xff] %vm750_vm2, %v1446_v61 }
 0x2b2 PF: > { %s17_s27 = sadd.s32 1, %s2169_s27   ;;  %s2623_s21 = smov %s2149_s22 }
 0x2b3   : > { %p14_p1 = scmp.ge.s32.totalorder %s17_s27, 6   ;;  %s2624_s22 = smov %s2260_s10 }
 0x2b4   : > { %s2625_s23 = smov %s2161_s25  ;;  %s2626_s24 = smov %s2165_s26 }
 0x2b5   : > { %s2627_s25 = smov %s2630_s28  ;;  %s2628_s26 = smov %s2634_s29 }
 0x2b6   :  { %16 = sbr.rel (!%p14_p1) target bundleno = 7 (0x7), region = 148 }

// kernel: redconv_forward.5
= control target key start
LH: loop header
LB: loop body
LE: loop exit
PB: predicated region body
PF: predicated region fallthrough
CT: control target
= control target key end

     0   :  { %s8867_s0 = inlined_call_operand.vmem [shape: bf16[256,256], index: 0, kind: input, shape index: {}]   ;;  %s8868_s1 = inlined_call_operand.vmem [shape: f32[256,32], index: 1, kind: input, shape index: {}]   ;;  %s8869_s2 = inlined_call_operand.vmem [shape: f32[32,256], index: 2, kind: input, shape index: {}]   ;;  %s8870_s3 = inlined_call_operand.vmem [shape: f32[1,256], index: 3, kind: input, shape index: {}]   ;;  %s8871_s4 = inlined_call_operand.vmem [shape: f32[1,256], index: 4, kind: input, shape index: {}]   ;;  %s8872_s5 = inlined_call_operand.hbm [shape: f32[1,256], index: 5, kind: output, shape index: {}]  }
   0x1   :  { %8949 = sst [smem:[#allocation306_spill]] %s8867_s0 }
   0x2   :  { %8950 = sst [smem:[#allocation307_spill]] %s8869_s2 }
   0x3   :  { %10 = vsyncpa [#allocation6], 0 }
   0x4   :  { %12 = vsyncpa [#allocation6 + $0x1], 0  ;;  %s5012_s18 = smov 0   ;;  %s5014_s19 = smov 0  }
   0x5   :  { %s5016_s20 = smov 0   ;;  %s5018_s21 = smov 0  }
   0x6   :  { %s5020_s22 = smov 0   ;;  %s5022_s23 = smov 0  }
   0x7   :  { %s5024_s24 = smov 0   ;;  %s5026_s25 = smov 0  }
   0x8   :  { %s5028_s26 = smov 0   ;;  %s5030_s27 = smov 0  }
   0x9 LB: > { %8951 = sst [smem:[#allocation8_spill]] %s4926_s22  ;;  %s4525_s28 = sadd.s32 4294967295, %s4946_s27   ;;  %s4946_s27 = sphi %s5030_s27, %s18_s27   ;;  %s4942_s26 = sphi %s5028_s26, %s9819_s26   ;;  %s4938_s25 = sphi %s5026_s25, %s9818_s25   ;;  %s4934_s24 = sphi %s5024_s24, %s9817_s24   ;;  %s4930_s23 = sphi %s5022_s23, %s9816_s23   ;;  %s4926_s22 = sphi %s5020_s22, %s9815_s22   ;;  %s4922_s21 = sphi %s5018_s21, %s9814_s21   ;;  %s4918_s20 = sphi %s5016_s20, %s9822_s20   ;;  %s4914_s19 = sphi %s5014_s19, %s9821_s19   ;;  %s4910_s18 = sphi %s5012_s18, %s9820_s18  }
   0xa   : > { %8952 = sst [smem:[#allocation9_spill]] %s4938_s25  ;;  %s4526_s29 = sadd.s32 4294967294, %s4946_s27  }
   0xb   : > { %8953 = sst [smem:[#allocation10_spill]] %s4942_s26  ;;  %s27_s30 = sadd.s32 1, %s4938_s25 }
   0xc   : > { %s30_s6 = sadd.s32 1, %s4942_s26  ;;  %p28_p0 = scmp.ge.s32.totalorder %s27_s30, 2 }
   0xd   : > { %s39_s7 = sadd.s32 1, %s4926_s22  ;;  %p46_p1 = scmp.ne.s32.totalorder %s4926_s22, %s4922_s21 }
   0xe   : > { %p47_p2 = scmp.eq.s32.totalorder %s4946_s27, 0  ;;  %s9824_s30 = smov (%p28_p0, %s27_s30), 0 }
   0xf   : > { %8954 = sst [smem:[#allocation11_spill]] %s9824_s30  ;;  %s9826_s6 = smov (!%p28_p0, %s30_s6), %s4942_s26 }
  0x10   : > { %s34_s8 = ssub.s32 %s4938_s25, %s9824_s30  ;;  %p5075_p3 = por %p47_p2, %p46_p1 }
  0x11   : > { %p32_p4 = scmp.ge.s32.totalorder %s9826_s6, 2  ;;  %s91_s10 = sadd.s32 1, %s4918_s20 }
  0x12   : > { %p98_p5 = scmp.ne.s32.totalorder %s4918_s20, %s4914_s19  ;;  %p180_p6 = scmp.eq.s32.totalorder %s4525_s28, 3 }
  0x13   : > { %s9828_s6 = smov (%p32_p4, %s9826_s6), 0  ;;  %p185_p9 = scmp.ne.s32.totalorder %s4914_s19, %s4910_s18 }
  0x14   : > { %8956 = sst [smem:[#allocation12_spill]] %s9828_s6  ;;  %p5084_p7 = por %p98_p5, %p47_p2 }
  0x15   : > { %p5088_p8 = por %p180_p6, %p98_p5  ;;  %s35_s13 = ssub.s32 %s4942_s26, %s9828_s6 }
  0x16   : > { %s36_s14 = sor.u32 %s35_s13, %s34_s8  ;;  %p89_p10 = scmp.eq.s32.totalorder %s35_s13, 0 }
  0x17   : > { %p37_p11 = scmp.eq.s32.totalorder %s36_s14, 0  ;;  %p186_p12 = scmp.eq.s32.totalorder %s4526_s29, 3 }
  0x18   : > { %s5097_s15 = scalar_select %p89_p10, %s4918_s20, %s91_s10  }
  0x19   : > { %s5100_s16 = scalar_select %p37_p11, %s4926_s22, %s39_s7  }
  0x1a   : > { %p5102_p13 = por %p186_p12, %p185_p9  ;;  %p4528_p0 = scmp.ge.s32.totalorder %s4946_s27, 4 }
  0x1b   : > { %8959 = sst [smem:[#allocation13_spill]] %s5100_s16 }
  0x1c   : > { %202 = sbr.rel (%p4528_p0) target bundleno = 65 (0x41), region = 16 }
  0x21   : > { %205 = sbr.rel (!%p5075_p3) target bundleno = 53 (0x35), region = 20  ;;  %s207_s28 = sand.u32 (%p5075_p3), 1, %s4926_s22  }
  0x22   : > { %s4547_s8 = sshll.u32 (%p5075_p3), %s4938_s25, 5  ;;  %s4529_s29 = sshll.u32 (%p5075_p3), %s207_s28, 6 }
  0x23   : > { %s212_s10 = sadd.s32 (%p5075_p3), %s4942_s26, %s4547_s8  ;;  %s8961_s0 = sld [smem:[#allocation306_spill]] (%p5075_p3) }
  0x24   : > { %s4532_s13 = sshll.u32 (%p5075_p3), %s212_s10, 2  ;;  %s209_s9 = scalar_lea.vmem (%p5075_p3), [#allocation3], %s4529_s29 }
  0x29   : > { %s5115_s6 = scalar_lea.vmem %s8961_s0, %s4532_s13 }
  0x2a   : > { %v231_v0 = vld [vmem:[%s5115_s6] sm:$0xf]  ;;  %v233_v1 = vld [vmem:[%s5115_s6 + $0x8] sm:$0xf]  ;;  %v235_v2 = vld [vmem:[%s5115_s6 + $0x10] sm:$0xf] }
  0x2b   : > { %232 = vst [vmem:[%s209_s9] sm:$0xf] %v231_v0  ;;  %234 = vst [vmem:[%s209_s9 + $0x4] sm:$0xf] %v233_v1  ;;  %v237_v3 = vld [vmem:[%s5115_s6 + $0x18] sm:$0xf] }
  0x2c   : > { %236 = vst [vmem:[%s209_s9 + $0x8] sm:$0xf] %v235_v2  ;;  %v239_v4 = vld [vmem:[%s5115_s6 + $0x20] sm:$0xf]  ;;  %v241_v5 = vld [vmem:[%s5115_s6 + $0x28] sm:$0xf] }
  0x2d   : > { %238 = vst [vmem:[%s209_s9 + $0xc] sm:$0xf] %v237_v3  ;;  %240 = vst [vmem:[%s209_s9 + $0x10] sm:$0xf] %v239_v4  ;;  %v243_v6 = vld [vmem:[%s5115_s6 + $0x30] sm:$0xf] }
  0x2e   : > { %242 = vst [vmem:[%s209_s9 + $0x14] sm:$0xf] %v241_v5  ;;  %v245_v7 = vld [vmem:[%s5115_s6 + $0x38] sm:$0xf]  ;;  %v247_v8 = vld [vmem:[%s5115_s6 + $0x40] sm:$0xf] }
  0x2f   : > { %244 = vst [vmem:[%s209_s9 + $0x18] sm:$0xf] %v243_v6  ;;  %246 = vst [vmem:[%s209_s9 + $0x1c] sm:$0xf] %v245_v7  ;;  %v249_v9 = vld [vmem:[%s5115_s6 + $0x48] sm:$0xf] }
  0x30   : > { %248 = vst [vmem:[%s209_s9 + $0x20] sm:$0xf] %v247_v8  ;;  %v251_v10 = vld [vmem:[%s5115_s6 + $0x50] sm:$0xf]  ;;  %v253_v11 = vld [vmem:[%s5115_s6 + $0x58] sm:$0xf] }
  0x31   : > { %250 = vst [vmem:[%s209_s9 + $0x24] sm:$0xf] %v249_v9  ;;  %252 = vst [vmem:[%s209_s9 + $0x28] sm:$0xf] %v251_v10  ;;  %v255_v12 = vld [vmem:[%s5115_s6 + $0x60] sm:$0xf] }
  0x32   : > { %254 = vst [vmem:[%s209_s9 + $0x2c] sm:$0xf] %v253_v11  ;;  %v257_v13 = vld [vmem:[%s5115_s6 + $0x68] sm:$0xf]  ;;  %v259_v14 = vld [vmem:[%s5115_s6 + $0x70] sm:$0xf] }
  0x33   : > { %256 = vst [vmem:[%s209_s9 + $0x30] sm:$0xf] %v255_v12  ;;  %258 = vst [vmem:[%s209_s9 + $0x34] sm:$0xf] %v257_v13  ;;  %v261_v15 = vld [vmem:[%s5115_s6 + $0x78] sm:$0xf] }
  0x34   : > { %260 = vst [vmem:[%s209_s9 + $0x38] sm:$0xf] %v259_v14  ;;  %262 = vst [vmem:[%s209_s9 + $0x3c] sm:$0xf] %v261_v15 }
  0x35 PF: > { %327 = sbr.rel (!%p5084_p7) target bundleno = 65 (0x41), region = 65  ;;  %s329_s28 = sand.u32 (%p5084_p7), 1, %s4918_s20  }
  0x36   : > { %s4534_s8 = sshll.u32 (%p5084_p7), %s4942_s26, 3  ;;  %s4533_s29 = sshll.u32 (%p5084_p7), %s329_s28, 5 }
  0x37   : > { %s8962_s2 = sld [smem:[#allocation307_spill]] (%p5084_p7)  ;;  %s331_s14 = scalar_lea.vmem (%p5084_p7), [#allocation4], %s4533_s29 }
  0x3d   : > { %s333_s7 = scalar_lea.vmem %s8962_s2, %s4534_s8 }
  0x3e   : > { %v368_v16 = vld [vmem:[%s333_s7] sm:$0xff]  ;;  %v370_v17 = vld [vmem:[%s333_s7 + $0x10] sm:$0xff] }
  0x3f   : > { %v372_v18 = vld [vmem:[%s333_s7 + $0x20] sm:$0xff]  ;;  %369 = vst [vmem:[%s331_s14] sm:$0xff] %v368_v16  ;;  %371 = vst [vmem:[%s331_s14 + $0x8] sm:$0xff] %v370_v17  ;;  %v374_v19 = vld [vmem:[%s333_s7 + $0x30] sm:$0xff] }
  0x40   : > { %373 = vst [vmem:[%s331_s14 + $0x10] sm:$0xff] %v372_v18  ;;  %375 = vst [vmem:[%s331_s14 + $0x18] sm:$0xff] %v374_v19 }
  0x41 PF: > { %p4535_p1 = scmp.ge.s32.totalorder %s4946_s27, 1  ;;  %p392_p2 = scmp.lt.s32.totalorder %s4946_s27, 5 }
  0x43   : > { %p393_p3 = pnand %p4535_p1, %p392_p2 }
  0x45   : > { %396 = sbr.rel (%p393_p3) target bundleno = 1418 (0x58a), region = 111 }
  0x4a   : > { %s399_s6 = sand.u32 1, %s4922_s21   ;;  %s5144_s11 = sand.u32 1, %s4914_s19  }
  0x4b   : > { %s4536_s9 = sshll.u32 %s399_s6, 6  ;;  %s4537_s28 = sshll.u32 %s5144_s11, 5 }
  0x4c   : > { %s4538_s8 = sshll.u32 %s4930_s23, 4  ;;  %p454_p5 = scmp.lt.s32.totalorder %s4934_s24, 1 }
  0x4d   : > { %p449_p4 = scmp.lt.s32.totalorder %s4538_s8, 31  ;;  %s5165_s25 = scalar_lea.vmem [#allocation3], %s4536_s9 }
  0x4e   : > { %s5150_s29 = scalar_select %p454_p5, %s4934_s24, 1 }
  0x4f   : > { %s9830_s8 = smov (!%p449_p4, %s4538_s8), 31  ;;  %s5167_s16 = scalar_lea.vmem [#allocation4], %s4537_s28 }
  0x50   : > { %s4539_s10 = sshll.u32 %s9830_s8, 3  ;;  %s456_s2 = scalar_lea.vmem %s8870_s3, %s5150_s29 }
  0x51   : > { %s5155_s14 = scalar_lea.vmem %s8868_s1, %s4539_s10  ;;  %s459_s26 = scalar_lea.vmem %s8871_s4, %s5150_s29 }
  0x52   : > { %s446_s22 = scalar_lea.vmem [#allocation5], %s5144_s11  ;;  %p4540_p6 = scmp.ne.s32.totalorder %s4930_s23, 0 }
  0x54   : > { %463 = sbr.rel (%p4540_p6) target bundleno = 91 (0x5b), region = 123 }
  0x59   : > { %v4948_v20 = vmov 0.0  }
  0x5a   : > { %464 = vst [vmem:[#allocation2] sm:$0x1] %v4948_v20 }
  0x5b PF: > { %v5172_v21 = vld [vmem:[%s5155_s14 + $0x10] sm:$0xff]  ;;  %v5175_v22 = vld [vmem:[%s5155_s14] sm:$0xff]  ;;  %v4949_v23 = vmov 0   ;;  %v5180_v24 = vld [vmem:[%s5155_s14 + $0x18] sm:$0xff]  ;;  %v4950_v38 = vmov 1   ;;  %v4951_v39 = vmov 2  }
  0x5c   : > { %4708 = vset.pattern.permute.xlu1 %v4949_v23  ;;  %4707 = vset.pattern.permute.xlu0 %v4949_v23  ;;  %v5183_v25 = vld [vmem:[%s5155_s14 + $0x8] sm:$0xff]  ;;  %v5191_v27 = vld [vmem:[%s5155_s14 + $0x20] sm:$0xff]  ;;  %v5196_v28 = vld [vmem:[%s5155_s14 + $0x38] sm:$0xff]  ;;  %v4952_v40 = vmov 3   ;;  %v4953_v44 = vmov 4   ;;  %v4954_v59 = vmov 5  }
  0x5d   : > { %601 = vperm.xlu1 %4708, %v5172_v21   ;;  %591 = vperm.xlu0 %4707, %v5175_v22   ;;  %v5188_v26 = vld [vmem:[%s5155_s14 + $0x28] sm:$0xff]  ;;  %v5199_v29 = vld [vmem:[%s5155_s14 + $0x30] sm:$0xff]  ;;  %v5207_v31 = vld [vmem:[%s5155_s14 + $0x40] sm:$0xff]  ;;  %v4955_v13 = vmov 6   ;;  %s4541_s0 = sshll.u32 %s4930_s23, 7  ;;  %s4542_s30 = sshll.u32 %s4934_s24, 7 }
  0x5e   : > { %v5204_v30 = vld [vmem:[%s5155_s14 + $0x48] sm:$0xff]  ;;  %v5212_v32 = vld [vmem:[%s5155_s14 + $0x58] sm:$0xff]  ;;  %v5215_v33 = vld [vmem:[%s5155_s14 + $0x50] sm:$0xff]  ;;  %p4543_p7 = scmp.ne.s32.totalorder %s4930_s23, 1 }
  0x5f   : > { %v5220_v34 = vld [vmem:[%s5155_s14 + $0x68] sm:$0xff]  ;;  %v5223_v35 = vld [vmem:[%s5155_s14 + $0x60] sm:$0xff]  ;;  %v5228_v36 = vld [vmem:[%s5155_s14 + $0x78] sm:$0xff] }
  0x60   : > { %v5231_v37 = vld [vmem:[%s5155_s14 + $0x70] sm:$0xff] }
  0x61   : > { %606 = vperm.xlu1 %4708, %v5180_v24   ;;  %596 = vperm.xlu0 %4707, %v5183_v25  }
  0x65   : > { %616 = vperm.xlu1 %4708, %v5188_v26   ;;  %611 = vperm.xlu0 %4707, %v5191_v27  }
  0x69   : > { %626 = vperm.xlu1 %4708, %v5196_v28   ;;  %621 = vperm.xlu0 %4707, %v5199_v29  }
  0x6d   : > { %636 = vperm.xlu1 %4708, %v5204_v30   ;;  %631 = vperm.xlu0 %4707, %v5207_v31  }
  0x71   : > { %646 = vperm.xlu1 %4708, %v5212_v32   ;;  %641 = vperm.xlu0 %4707, %v5215_v33  }
  0x75   : > { %656 = vperm.xlu1 %4708, %v5220_v34   ;;  %651 = vperm.xlu0 %4707, %v5223_v35  }
  0x79   : > { %666 = vperm.xlu1 %4708, %v5228_v36   ;;  %661 = vperm.xlu0 %4707, %v5231_v37  }
  0x7d   : > { %4710 = vset.pattern.permute.xlu1 %v4950_v38  ;;  %4709 = vset.pattern.permute.xlu0 %v4950_v38 }
  0x7e   : > { %726 = vperm.xlu1 %4710, %v5183_v25   ;;  %722 = vperm.xlu0 %4709, %v5175_v22  }
  0x82   : > { %730 = vperm.xlu1 %4710, %v5172_v21   ;;  %734 = vperm.xlu0 %4709, %v5180_v24  }
  0x86   : > { %738 = vperm.xlu1 %4710, %v5191_v27   ;;  %742 = vperm.xlu0 %4709, %v5188_v26  }
  0x8a   : > { %746 = vperm.xlu1 %4710, %v5199_v29   ;;  %750 = vperm.xlu0 %4709, %v5196_v28  }
  0x8e   : > { %754 = vperm.xlu1 %4710, %v5207_v31   ;;  %758 = vperm.xlu0 %4709, %v5204_v30  }
  0x92   : > { %762 = vperm.xlu1 %4710, %v5215_v33   ;;  %766 = vperm.xlu0 %4709, %v5212_v32  }
  0x96   : > { %770 = vperm.xlu1 %4710, %v5223_v35   ;;  %774 = vperm.xlu0 %4709, %v5220_v34  }
  0x9a   : > { %778 = vperm.xlu1 %4710, %v5231_v37   ;;  %782 = vperm.xlu0 %4709, %v5228_v36  }
  0x9e   : > { %4711 = vset.pattern.permute.xlu1 %v4951_v39  ;;  %4712 = vset.pattern.permute.xlu0 %v4951_v39 }
  0x9f   : > { %838 = vperm.xlu1 %4711, %v5175_v22   ;;  %842 = vperm.xlu0 %4712, %v5183_v25  }
  0xa3   : > { %846 = vperm.xlu1 %4711, %v5172_v21   ;;  %854 = vperm.xlu0 %4712, %v5191_v27  }
  0xa7   : > { %850 = vperm.xlu1 %4711, %v5180_v24   ;;  %862 = vperm.xlu0 %4712, %v5199_v29  }
  0xab   : > { %858 = vperm.xlu1 %4711, %v5188_v26   ;;  %870 = vperm.xlu0 %4712, %v5207_v31  }
  0xaf   : > { %866 = vperm.xlu1 %4711, %v5196_v28   ;;  %878 = vperm.xlu0 %4712, %v5215_v33  }
  0xb3   : > { %874 = vperm.xlu1 %4711, %v5204_v30   ;;  %886 = vperm.xlu0 %4712, %v5223_v35  }
  0xb7   : > { %882 = vperm.xlu1 %4711, %v5212_v32   ;;  %894 = vperm.xlu0 %4712, %v5231_v37  }
  0xbb   : > { %890 = vperm.xlu1 %4711, %v5220_v34   ;;  %4713 = vset.pattern.permute.xlu0 %v4952_v40 }
  0xbc   : > { %954 = vperm.xlu0 %4713, %v5175_v22  }
  0xbf   : > { %898 = vperm.xlu1 %4711, %v5228_v36  }
  0xc0   : > { %966 = vperm.xlu0 %4713, %v5180_v24  }
  0xc3   : > { %4714 = vset.pattern.permute.xlu1 %v4952_v40 }
  0xc4   : > { %958 = vperm.xlu1 %4714, %v5183_v25   ;;  %974 = vperm.xlu0 %4713, %v5188_v26  }
  0xc8   : > { %962 = vperm.xlu1 %4714, %v5172_v21   ;;  %982 = vperm.xlu0 %4713, %v5196_v28  }
  0xcc   : > { %970 = vperm.xlu1 %4714, %v5191_v27   ;;  %990 = vperm.xlu0 %4713, %v5204_v30  }
  0xd0   : > { %978 = vperm.xlu1 %4714, %v5199_v29   ;;  %998 = vperm.xlu0 %4713, %v5212_v32  }
  0xd4   : > { %986 = vperm.xlu1 %4714, %v5207_v31   ;;  %1006 = vperm.xlu0 %4713, %v5220_v34  }
  0xd8   : > { %v5279_v41 = vpop.permute.xlu1 %601  ;;  %994 = vperm.xlu1 %4714, %v5215_v33   ;;  %1014 = vperm.xlu0 %4713, %v5228_v36   ;;  %v5283_v42 = vpop.permute.xlu0 %591 }
  0xdc   : > { %v5285_v43 = vpop.permute.xlu1 %606  ;;  %1002 = vperm.xlu1 %4714, %v5223_v35   ;;  %4716 = vset.pattern.permute.xlu0 %v4953_v44  ;;  %v5288_v45 = vpop.permute.xlu0 %596 }
  0xdd   : > { %1074 = vperm.xlu0 %4716, %v5183_v25  }
  0xe0   : > { %v5291_v46 = vpop.permute.xlu1 %616  ;;  %1010 = vperm.xlu1 %4714, %v5231_v37   ;;  %v5294_v47 = vpop.permute.xlu0 %611 }
  0xe1   : > { %1086 = vperm.xlu0 %4716, %v5191_v27  }
  0xe4   : > { %v5297_v48 = vpop.permute.xlu1 %626  ;;  %4715 = vset.pattern.permute.xlu1 %v4953_v44  ;;  %v5299_v49 = vpop.permute.xlu0 %621 }
  0xe5   : > { %1070 = vperm.xlu1 %4715, %v5175_v22   ;;  %1094 = vperm.xlu0 %4716, %v5199_v29  }
  0xe8   : > { %v5303_v50 = vpop.permute.xlu1 %636  ;;  %v5305_v51 = vpop.permute.xlu0 %631 }
  0xe9   : > { %1078 = vperm.xlu1 %4715, %v5172_v21   ;;  %1102 = vperm.xlu0 %4716, %v5207_v31  }
  0xec   : > { %v5309_v52 = vpop.permute.xlu1 %646  ;;  %v5311_v53 = vpop.permute.xlu0 %641 }
  0xed   : > { %1082 = vperm.xlu1 %4715, %v5180_v24   ;;  %1110 = vperm.xlu0 %4716, %v5215_v33  }
  0xf0   : > { %v5315_v54 = vpop.permute.xlu1 %656  ;;  %v5317_v55 = vpop.permute.xlu0 %651 }
  0xf1   : > { %1090 = vperm.xlu1 %4715, %v5188_v26   ;;  %1118 = vperm.xlu0 %4716, %v5223_v35  }
  0xf4   : > { %v5321_v56 = vpop.permute.xlu1 %666  ;;  %v5323_v57 = vpop.permute.xlu0 %661 }
  0xf5   : > { %1098 = vperm.xlu1 %4715, %v5196_v28   ;;  %1126 = vperm.xlu0 %4716, %v5231_v37  }
  0xf9   : > { %v5327_v58 = vpop.permute.xlu1 %726  ;;  %1106 = vperm.xlu1 %4715, %v5204_v30   ;;  %4717 = vset.pattern.permute.xlu0 %v4954_v59  ;;  %v5330_v60 = vpop.permute.xlu0 %722 }
  0xfa   : > { %1186 = vperm.xlu0 %4717, %v5175_v22  }
  0xfd   : > { %v5333_v61 = vpop.permute.xlu1 %730  ;;  %1114 = vperm.xlu1 %4715, %v5212_v32   ;;  %v5336_v62 = vpop.permute.xlu0 %734 }
  0xfe   : > { %1198 = vperm.xlu0 %4717, %v5180_v24  }
 0x101   : > { %v5339_v63 = vpop.permute.xlu1 %738  ;;  %1122 = vperm.xlu1 %4715, %v5220_v34   ;;  %v5342_v0 = vpop.permute.xlu0 %742 }
 0x102   : > { %1206 = vperm.xlu0 %4717, %v5188_v26  }
 0x105   : > { %v5345_v1 = vpop.permute.xlu1 %746  ;;  %1130 = vperm.xlu1 %4715, %v5228_v36   ;;  %v5348_v2 = vpop.permute.xlu0 %750 }
 0x106   : > { %1214 = vperm.xlu0 %4717, %v5196_v28  }
 0x109   : > { %v5351_v3 = vpop.permute.xlu1 %754  ;;  %4718 = vset.pattern.permute.xlu1 %v4954_v59  ;;  %v5353_v4 = vpop.permute.xlu0 %758 }
 0x10a   : > { %1190 = vperm.xlu1 %4718, %v5183_v25   ;;  %1222 = vperm.xlu0 %4717, %v5204_v30  }
 0x10d   : > { %v5357_v5 = vpop.permute.xlu1 %762  ;;  %v5359_v6 = vpop.permute.xlu0 %766 }
 0x10e   : > { %1194 = vperm.xlu1 %4718, %v5172_v21   ;;  %1230 = vperm.xlu0 %4717, %v5212_v32  }
 0x111   : > { %v5363_v7 = vpop.permute.xlu1 %770  ;;  %v5365_v8 = vpop.permute.xlu0 %774 }
 0x112   : > { %1202 = vperm.xlu1 %4718, %v5191_v27   ;;  %1238 = vperm.xlu0 %4717, %v5220_v34  }
 0x115   : > { %v5369_v9 = vpop.permute.xlu1 %778  ;;  %v5371_v10 = vpop.permute.xlu0 %782 }
 0x116   : > { %1210 = vperm.xlu1 %4718, %v5199_v29   ;;  %1246 = vperm.xlu0 %4717, %v5228_v36  }
 0x11a   : > { %1218 = vperm.xlu1 %4718, %v5207_v31   ;;  %v5376_v11 = vpop.permute.xlu1 %838  ;;  %v5378_v12 = vpop.permute.xlu0 %842  ;;  %4720 = vset.pattern.permute.xlu0 %v4955_v13 }
 0x11b   : > { %1306 = vperm.xlu0 %4720, %v5183_v25  }
 0x11e   : > { %1226 = vperm.xlu1 %4718, %v5215_v33   ;;  %v5382_v14 = vpop.permute.xlu1 %846  ;;  %v5384_v15 = vpop.permute.xlu0 %854 }
 0x11f   : > { %1318 = vperm.xlu0 %4720, %v5191_v27  }
 0x122   : > { %1234 = vperm.xlu1 %4718, %v5223_v35   ;;  %v5388_v16 = vpop.permute.xlu1 %850  ;;  %v5390_v17 = vpop.permute.xlu0 %862 }
 0x123   : > { %1326 = vperm.xlu0 %4720, %v5199_v29  }
 0x126   : > { %1242 = vperm.xlu1 %4718, %v5231_v37   ;;  %v5394_v18 = vpop.permute.xlu1 %858  ;;  %v5396_v19 = vpop.permute.xlu0 %870 }
 0x127   : > { %8963 = vst [vmem:[#allocation14_spill] sm:$0xff] %v5394_v18  ;;  %8964 = vst [vmem:[#allocation15_spill] sm:$0xff] %v5396_v19  ;;  %1334 = vperm.xlu0 %4720, %v5207_v31  }
 0x12a   : > { %4719 = vset.pattern.permute.xlu1 %v4955_v13  ;;  %v5399_v20 = vpop.permute.xlu1 %866  ;;  %v5401_v23 = vpop.permute.xlu0 %878 }
 0x12b   : > { %8965 = vst [vmem:[#allocation16_spill] sm:$0xff] %v5399_v20  ;;  %8966 = vst [vmem:[#allocation17_spill] sm:$0xff] %v5401_v23  ;;  %1302 = vperm.xlu1 %4719, %v5175_v22   ;;  %1342 = vperm.xlu0 %4720, %v5215_v33   ;;  %v4960_v20 = vmov 11  }
 0x12e   : > { %v5405_v38 = vpop.permute.xlu1 %874  ;;  %v5407_v39 = vpop.permute.xlu0 %886 }
 0x12f   : > { %8967 = vst [vmem:[#allocation18_spill] sm:$0xff] %v5405_v38  ;;  %8968 = vst [vmem:[#allocation19_spill] sm:$0xff] %v5407_v39  ;;  %1310 = vperm.xlu1 %4719, %v5172_v21   ;;  %1350 = vperm.xlu0 %4720, %v5223_v35   ;;  %v4956_v38 = vmov 7  }
 0x132   : > { %v5411_v40 = vpop.permute.xlu1 %882  ;;  %v5413_v44 = vpop.permute.xlu0 %894 }
 0x133   : > { %8969 = vst [vmem:[#allocation20_spill] sm:$0xff] %v5411_v40  ;;  %8970 = vst [vmem:[#allocation21_spill] sm:$0xff] %v5413_v44  ;;  %1314 = vperm.xlu1 %4719, %v5180_v24   ;;  %1358 = vperm.xlu0 %4720, %v5231_v37  }
 0x136   : > { %v5417_v59 = vpop.permute.xlu1 %890 }
 0x137   : > { %8971 = vst [vmem:[#allocation22_spill] sm:$0xff] %v5417_v59  ;;  %1322 = vperm.xlu1 %4719, %v5188_v26   ;;  %v5420_v13 = vpop.permute.xlu0 %954  ;;  %4721 = vset.pattern.permute.xlu0 %v4956_v38 }
 0x138   : > { %8972 = vst [vmem:[#allocation23_spill] sm:$0xff] %v5420_v13  ;;  %1418 = vperm.xlu0 %4721, %v5175_v22  }
 0x13a   : > { %v5423_v39 = vpop.permute.xlu1 %898 }
 0x13b   : > { %8973 = vst [vmem:[#allocation24_spill] sm:$0xff] %v5423_v39  ;;  %1330 = vperm.xlu1 %4719, %v5196_v28   ;;  %v5426_v40 = vpop.permute.xlu0 %966 }
 0x13c   : > { %8974 = vst [vmem:[#allocation25_spill] sm:$0xff] %v5426_v40  ;;  %1430 = vperm.xlu0 %4721, %v5180_v24  }
 0x13f   : > { %1338 = vperm.xlu1 %4719, %v5204_v30   ;;  %v5430_v44 = vpop.permute.xlu1 %958  ;;  %v5432_v59 = vpop.permute.xlu0 %974 }
 0x140   : > { %8975 = vst [vmem:[#allocation26_spill] sm:$0xff] %v5430_v44  ;;  %8976 = vst [vmem:[#allocation27_spill] sm:$0xff] %v5432_v59  ;;  %1438 = vperm.xlu0 %4721, %v5188_v26  }
 0x143   : > { %1346 = vperm.xlu1 %4719, %v5212_v32   ;;  %v5436_v13 = vpop.permute.xlu1 %962  ;;  %v5438_v23 = vpop.permute.xlu0 %982 }
 0x144   : > { %8977 = vst [vmem:[#allocation28_spill] sm:$0xff] %v5436_v13  ;;  %8978 = vst [vmem:[#allocation29_spill] sm:$0xff] %v5438_v23  ;;  %1446 = vperm.xlu0 %4721, %v5196_v28  }
 0x147   : > { %1354 = vperm.xlu1 %4719, %v5220_v34   ;;  %v5442_v40 = vpop.permute.xlu1 %970  ;;  %v5444_v39 = vpop.permute.xlu0 %990 }
 0x148   : > { %8979 = vst [vmem:[#allocation30_spill] sm:$0xff] %v5442_v40  ;;  %8980 = vst [vmem:[#allocation31_spill] sm:$0xff] %v5444_v39  ;;  %1454 = vperm.xlu0 %4721, %v5204_v30  }
 0x14b   : > { %1362 = vperm.xlu1 %4719, %v5228_v36   ;;  %v5448_v59 = vpop.permute.xlu1 %978  ;;  %v5450_v44 = vpop.permute.xlu0 %998 }
 0x14c   : > { %8981 = vst [vmem:[#allocation32_spill] sm:$0xff] %v5448_v59  ;;  %8982 = vst [vmem:[#allocation33_spill] sm:$0xff] %v5450_v44  ;;  %1462 = vperm.xlu0 %4721, %v5212_v32  }
 0x14f   : > { %4722 = vset.pattern.permute.xlu1 %v4956_v38  ;;  %v5453_v23 = vpop.permute.xlu1 %986  ;;  %v5455_v13 = vpop.permute.xlu0 %1006 }
 0x150   : > { %8983 = vst [vmem:[#allocation34_spill] sm:$0xff] %v5453_v23  ;;  %8984 = vst [vmem:[#allocation35_spill] sm:$0xff] %v5455_v13  ;;  %1422 = vperm.xlu1 %4722, %v5183_v25   ;;  %1470 = vperm.xlu0 %4721, %v5220_v34   ;;  %v4957_v23 = vmov 8  }
 0x153   : > { %v5459_v39 = vpop.permute.xlu1 %994  ;;  %v5461_v40 = vpop.permute.xlu0 %1014 }
 0x154   : > { %8985 = vst [vmem:[#allocation36_spill] sm:$0xff] %v5459_v39  ;;  %8986 = vst [vmem:[#allocation37_spill] sm:$0xff] %v5461_v40  ;;  %1426 = vperm.xlu1 %4722, %v5172_v21   ;;  %1478 = vperm.xlu0 %4721, %v5228_v36  }
 0x157   : > { %v5465_v44 = vpop.permute.xlu1 %1002 }
 0x158   : > { %8987 = vst [vmem:[#allocation38_spill] sm:$0xff] %v5465_v44  ;;  %1434 = vperm.xlu1 %4722, %v5191_v27   ;;  %v5468_v38 = vpop.permute.xlu0 %1074  ;;  %4724 = vset.pattern.permute.xlu0 %v4957_v23 }
 0x159   : > { %8988 = vst [vmem:[#allocation39_spill] sm:$0xff] %v5468_v38  ;;  %1538 = vperm.xlu0 %4724, %v5183_v25  }
 0x15b   : > { %v5471_v13 = vpop.permute.xlu1 %1010 }
 0x15c   : > { %8989 = vst [vmem:[#allocation40_spill] sm:$0xff] %v5471_v13  ;;  %1442 = vperm.xlu1 %4722, %v5199_v29   ;;  %v5474_v39 = vpop.permute.xlu0 %1086 }
 0x15d   : > { %8990 = vst [vmem:[#allocation41_spill] sm:$0xff] %v5474_v39  ;;  %1550 = vperm.xlu0 %4724, %v5191_v27  }
 0x160   : > { %1450 = vperm.xlu1 %4722, %v5207_v31   ;;  %v5478_v40 = vpop.permute.xlu1 %1070  ;;  %v5480_v44 = vpop.permute.xlu0 %1094 }
 0x161   : > { %8991 = vst [vmem:[#allocation42_spill] sm:$0xff] %v5478_v40  ;;  %8992 = vst [vmem:[#allocation43_spill] sm:$0xff] %v5480_v44  ;;  %1558 = vperm.xlu0 %4724, %v5199_v29  }
 0x164   : > { %1458 = vperm.xlu1 %4722, %v5215_v33   ;;  %v5484_v38 = vpop.permute.xlu1 %1078  ;;  %v5486_v59 = vpop.permute.xlu0 %1102 }
 0x165   : > { %8993 = vst [vmem:[#allocation44_spill] sm:$0xff] %v5484_v38  ;;  %8994 = vst [vmem:[#allocation45_spill] sm:$0xff] %v5486_v59  ;;  %1566 = vperm.xlu0 %4724, %v5207_v31  }
 0x168   : > { %1466 = vperm.xlu1 %4722, %v5223_v35   ;;  %v5490_v39 = vpop.permute.xlu1 %1082  ;;  %v5492_v13 = vpop.permute.xlu0 %1110 }
 0x169   : > { %8995 = vst [vmem:[#allocation46_spill] sm:$0xff] %v5490_v39  ;;  %8996 = vst [vmem:[#allocation47_spill] sm:$0xff] %v5492_v13  ;;  %1574 = vperm.xlu0 %4724, %v5215_v33  }
 0x16c   : > { %1474 = vperm.xlu1 %4722, %v5231_v37   ;;  %v5496_v44 = vpop.permute.xlu1 %1090  ;;  %v5498_v40 = vpop.permute.xlu0 %1118 }
 0x16d   : > { %8997 = vst [vmem:[#allocation48_spill] sm:$0xff] %v5496_v44  ;;  %8998 = vst [vmem:[#allocation49_spill] sm:$0xff] %v5498_v40  ;;  %1582 = vperm.xlu0 %4724, %v5223_v35   ;;  %v4958_v44 = vmov 9  }
 0x170   : > { %4723 = vset.pattern.permute.xlu1 %v4957_v23  ;;  %v5501_v59 = vpop.permute.xlu1 %1098  ;;  %v5503_v38 = vpop.permute.xlu0 %1126 }
 0x171   : > { %8999 = vst [vmem:[#allocation50_spill] sm:$0xff] %v5501_v59  ;;  %9000 = vst [vmem:[#allocation51_spill] sm:$0xff] %v5503_v38  ;;  %1534 = vperm.xlu1 %4723, %v5175_v22   ;;  %1590 = vperm.xlu0 %4724, %v5231_v37  }
 0x174   : > { %v5507_v13 = vpop.permute.xlu1 %1106 }
 0x175   : > { %9001 = vst [vmem:[#allocation52_spill] sm:$0xff] %v5507_v13  ;;  %1542 = vperm.xlu1 %4723, %v5172_v21   ;;  %v5510_v39 = vpop.permute.xlu0 %1186  ;;  %4725 = vset.pattern.permute.xlu0 %v4958_v44 }
 0x176   : > { %9002 = vst [vmem:[#allocation53_spill] sm:$0xff] %v5510_v39  ;;  %1650 = vperm.xlu0 %4725, %v5175_v22  }
 0x178   : > { %v5513_v40 = vpop.permute.xlu1 %1114 }
 0x179   : > { %9003 = vst [vmem:[#allocation54_spill] sm:$0xff] %v5513_v40  ;;  %1546 = vperm.xlu1 %4723, %v5180_v24   ;;  %v5516_v23 = vpop.permute.xlu0 %1198 }
 0x17a   : > { %9004 = vst [vmem:[#allocation55_spill] sm:$0xff] %v5516_v23  ;;  %1662 = vperm.xlu0 %4725, %v5180_v24  }
 0x17c   : > { %v5519_v38 = vpop.permute.xlu1 %1122 }
 0x17d   : > { %9005 = vst [vmem:[#allocation56_spill] sm:$0xff] %v5519_v38  ;;  %1554 = vperm.xlu1 %4723, %v5188_v26   ;;  %v5522_v13 = vpop.permute.xlu0 %1206 }
 0x17e   : > { %9006 = vst [vmem:[#allocation57_spill] sm:$0xff] %v5522_v13  ;;  %1670 = vperm.xlu0 %4725, %v5188_v26  }
 0x180   : > { %v5525_v39 = vpop.permute.xlu1 %1130 }
 0x181   : > { %9007 = vst [vmem:[#allocation58_spill] sm:$0xff] %v5525_v39  ;;  %1562 = vperm.xlu1 %4723, %v5196_v28   ;;  %v5528_v59 = vpop.permute.xlu0 %1214 }
 0x182   : > { %9008 = vst [vmem:[#allocation59_spill] sm:$0xff] %v5528_v59  ;;  %1678 = vperm.xlu0 %4725, %v5196_v28  }
 0x185   : > { %1570 = vperm.xlu1 %4723, %v5204_v30   ;;  %v5532_v23 = vpop.permute.xlu1 %1190  ;;  %v5534_v40 = vpop.permute.xlu0 %1222 }
 0x186   : > { %9009 = vst [vmem:[#allocation60_spill] sm:$0xff] %v5532_v23  ;;  %9010 = vst [vmem:[#allocation61_spill] sm:$0xff] %v5534_v40  ;;  %1686 = vperm.xlu0 %4725, %v5204_v30  }
 0x189   : > { %1578 = vperm.xlu1 %4723, %v5212_v32   ;;  %v5538_v13 = vpop.permute.xlu1 %1194  ;;  %v5540_v38 = vpop.permute.xlu0 %1230 }
 0x18a   : > { %9011 = vst [vmem:[#allocation62_spill] sm:$0xff] %v5538_v13  ;;  %9012 = vst [vmem:[#allocation63_spill] sm:$0xff] %v5540_v38  ;;  %1694 = vperm.xlu0 %4725, %v5212_v32  }
 0x18d   : > { %1586 = vperm.xlu1 %4723, %v5220_v34   ;;  %v5544_v59 = vpop.permute.xlu1 %1202  ;;  %v5546_v39 = vpop.permute.xlu0 %1238 }
 0x18e   : > { %9013 = vst [vmem:[#allocation64_spill] sm:$0xff] %v5544_v59  ;;  %9014 = vst [vmem:[#allocation65_spill] sm:$0xff] %v5546_v39  ;;  %1702 = vperm.xlu0 %4725, %v5220_v34   ;;  %v4959_v59 = vmov 10  }
 0x191   : > { %1594 = vperm.xlu1 %4723, %v5228_v36   ;;  %v5550_v40 = vpop.permute.xlu1 %1210  ;;  %v5552_v23 = vpop.permute.xlu0 %1246 }
 0x192   : > { %9015 = vst [vmem:[#allocation66_spill] sm:$0xff] %v5550_v40  ;;  %9016 = vst [vmem:[#allocation67_spill] sm:$0xff] %v5552_v23  ;;  %1710 = vperm.xlu0 %4725, %v5228_v36  }
 0x195   : > { %4726 = vset.pattern.permute.xlu1 %v4958_v44  ;;  %v5555_v38 = vpop.permute.xlu1 %1218 }
 0x196   : > { %9017 = vst [vmem:[#allocation68_spill] sm:$0xff] %v5555_v38  ;;  %1654 = vperm.xlu1 %4726, %v5183_v25   ;;  %v5558_v13 = vpop.permute.xlu0 %1306  ;;  %4728 = vset.pattern.permute.xlu0 %v4959_v59 }
 0x197   : > { %9018 = vst [vmem:[#allocation69_spill] sm:$0xff] %v5558_v13  ;;  %1770 = vperm.xlu0 %4728, %v5183_v25  }
 0x199   : > { %v5561_v39 = vpop.permute.xlu1 %1226 }
 0x19a   : > { %9019 = vst [vmem:[#allocation70_spill] sm:$0xff] %v5561_v39  ;;  %1658 = vperm.xlu1 %4726, %v5172_v21   ;;  %v5564_v40 = vpop.permute.xlu0 %1318 }
 0x19b   : > { %9020 = vst [vmem:[#allocation71_spill] sm:$0xff] %v5564_v40  ;;  %1782 = vperm.xlu0 %4728, %v5191_v27  }
 0x19d   : > { %v5567_v23 = vpop.permute.xlu1 %1234 }
 0x19e   : > { %9021 = vst [vmem:[#allocation72_spill] sm:$0xff] %v5567_v23  ;;  %1666 = vperm.xlu1 %4726, %v5191_v27   ;;  %v5570_v44 = vpop.permute.xlu0 %1326 }
 0x19f   : > { %9022 = vst [vmem:[#allocation73_spill] sm:$0xff] %v5570_v44  ;;  %1790 = vperm.xlu0 %4728, %v5199_v29  }
 0x1a1   : > { %v5573_v13 = vpop.permute.xlu1 %1242 }
 0x1a2   : > { %9023 = vst [vmem:[#allocation74_spill] sm:$0xff] %v5573_v13  ;;  %1674 = vperm.xlu1 %4726, %v5199_v29   ;;  %v5576_v38 = vpop.permute.xlu0 %1334 }
 0x1a3   : > { %9024 = vst [vmem:[#allocation75_spill] sm:$0xff] %v5576_v38  ;;  %1798 = vperm.xlu0 %4728, %v5207_v31  }
 0x1a6   : > { %1682 = vperm.xlu1 %4726, %v5207_v31   ;;  %v5580_v40 = vpop.permute.xlu1 %1302  ;;  %v5582_v39 = vpop.permute.xlu0 %1342 }
 0x1a7   : > { %9025 = vst [vmem:[#allocation76_spill] sm:$0xff] %v5580_v40  ;;  %9026 = vst [vmem:[#allocation77_spill] sm:$0xff] %v5582_v39  ;;  %1806 = vperm.xlu0 %4728, %v5215_v33  }
 0x1aa   : > { %1690 = vperm.xlu1 %4726, %v5215_v33   ;;  %v5586_v44 = vpop.permute.xlu1 %1310  ;;  %v5588_v23 = vpop.permute.xlu0 %1350 }
 0x1ab   : > { %9027 = vst [vmem:[#allocation78_spill] sm:$0xff] %v5586_v44  ;;  %9028 = vst [vmem:[#allocation79_spill] sm:$0xff] %v5588_v23  ;;  %1814 = vperm.xlu0 %4728, %v5223_v35   ;;  %v4961_v44 = vmov 12  }
 0x1ae   : > { %1698 = vperm.xlu1 %4726, %v5223_v35   ;;  %v5592_v38 = vpop.permute.xlu1 %1314  ;;  %v5594_v13 = vpop.permute.xlu0 %1358 }
 0x1af   : > { %9029 = vst [vmem:[#allocation80_spill] sm:$0xff] %v5592_v38  ;;  %9030 = vst [vmem:[#allocation81_spill] sm:$0xff] %v5594_v13  ;;  %1822 = vperm.xlu0 %4728, %v5231_v37  }
 0x1b2   : > { %1706 = vperm.xlu1 %4726, %v5231_v37   ;;  %v5598_v39 = vpop.permute.xlu1 %1322 }
 0x1b3   : > { %9031 = vst [vmem:[#allocation82_spill] sm:$0xff] %v5598_v39  ;;  %v5600_v40 = vpop.permute.xlu0 %1418  ;;  %4729 = vset.pattern.permute.xlu0 %v4960_v20 }
 0x1b4   : > { %9032 = vst [vmem:[#allocation83_spill] sm:$0xff] %v5600_v40  ;;  %1882 = vperm.xlu0 %4729, %v5175_v22  }
 0x1b6   : > { %4727 = vset.pattern.permute.xlu1 %v4959_v59  ;;  %v5603_v23 = vpop.permute.xlu1 %1330 }
 0x1b7   : > { %9033 = vst [vmem:[#allocation84_spill] sm:$0xff] %v5603_v23  ;;  %1766 = vperm.xlu1 %4727, %v5175_v22   ;;  %v5606_v38 = vpop.permute.xlu0 %1430 }
 0x1b8   : > { %9034 = vst [vmem:[#allocation85_spill] sm:$0xff] %v5606_v38  ;;  %1894 = vperm.xlu0 %4729, %v5180_v24  }
 0x1ba   : > { %v5609_v13 = vpop.permute.xlu1 %1338 }
 0x1bb   : > { %9035 = vst [vmem:[#allocation86_spill] sm:$0xff] %v5609_v13  ;;  %1774 = vperm.xlu1 %4727, %v5172_v21   ;;  %v5612_v39 = vpop.permute.xlu0 %1438 }
 0x1bc   : > { %9036 = vst [vmem:[#allocation87_spill] sm:$0xff] %v5612_v39  ;;  %1902 = vperm.xlu0 %4729, %v5188_v26  }
 0x1be   : > { %v5615_v40 = vpop.permute.xlu1 %1346 }
 0x1bf   : > { %9037 = vst [vmem:[#allocation88_spill] sm:$0xff] %v5615_v40  ;;  %1778 = vperm.xlu1 %4727, %v5180_v24   ;;  %v5618_v59 = vpop.permute.xlu0 %1446 }
 0x1c0   : > { %9038 = vst [vmem:[#allocation89_spill] sm:$0xff] %v5618_v59  ;;  %1910 = vperm.xlu0 %4729, %v5196_v28  }
 0x1c2   : > { %v5621_v23 = vpop.permute.xlu1 %1354 }
 0x1c3   : > { %9039 = vst [vmem:[#allocation90_spill] sm:$0xff] %v5621_v23  ;;  %1786 = vperm.xlu1 %4727, %v5188_v26   ;;  %v5624_v38 = vpop.permute.xlu0 %1454 }
 0x1c4   : > { %9040 = vst [vmem:[#allocation91_spill] sm:$0xff] %v5624_v38  ;;  %1918 = vperm.xlu0 %4729, %v5204_v30  }
 0x1c6   : > { %v5627_v13 = vpop.permute.xlu1 %1362 }
 0x1c7   : > { %9041 = vst [vmem:[#allocation92_spill] sm:$0xff] %v5627_v13  ;;  %1794 = vperm.xlu1 %4727, %v5196_v28   ;;  %v5630_v39 = vpop.permute.xlu0 %1462 }
 0x1c8   : > { %9042 = vst [vmem:[#allocation93_spill] sm:$0xff] %v5630_v39  ;;  %1926 = vperm.xlu0 %4729, %v5212_v32  }
 0x1cb   : > { %1802 = vperm.xlu1 %4727, %v5204_v30   ;;  %v5634_v59 = vpop.permute.xlu1 %1422  ;;  %v5636_v40 = vpop.permute.xlu0 %1470 }
 0x1cc   : > { %9043 = vst [vmem:[#allocation94_spill] sm:$0xff] %v5634_v59  ;;  %9044 = vst [vmem:[#allocation95_spill] sm:$0xff] %v5636_v40  ;;  %1934 = vperm.xlu0 %4729, %v5220_v34  }
 0x1cf   : > { %1810 = vperm.xlu1 %4727, %v5212_v32   ;;  %v5640_v38 = vpop.permute.xlu1 %1426  ;;  %v5642_v23 = vpop.permute.xlu0 %1478 }
 0x1d0   : > { %9045 = vst [vmem:[#allocation96_spill] sm:$0xff] %v5640_v38  ;;  %9046 = vst [vmem:[#allocation97_spill] sm:$0xff] %v5642_v23  ;;  %1942 = vperm.xlu0 %4729, %v5228_v36  }
 0x1d3   : > { %1818 = vperm.xlu1 %4727, %v5220_v34   ;;  %v5646_v39 = vpop.permute.xlu1 %1434 }
 0x1d4   : > { %9047 = vst [vmem:[#allocation98_spill] sm:$0xff] %v5646_v39  ;;  %v5648_v13 = vpop.permute.xlu0 %1538  ;;  %4732 = vset.pattern.permute.xlu0 %v4961_v44 }
 0x1d5   : > { %9048 = vst [vmem:[#allocation99_spill] sm:$0xff] %v5648_v13  ;;  %2002 = vperm.xlu0 %4732, %v5183_v25  }
 0x1d7   : > { %1826 = vperm.xlu1 %4727, %v5228_v36   ;;  %v5652_v40 = vpop.permute.xlu1 %1442 }
 0x1d8   : > { %9049 = vst [vmem:[#allocation100_spill] sm:$0xff] %v5652_v40  ;;  %v5654_v59 = vpop.permute.xlu0 %1550 }
 0x1d9   : > { %9050 = vst [vmem:[#allocation101_spill] sm:$0xff] %v5654_v59  ;;  %2014 = vperm.xlu0 %4732, %v5191_v27  }
 0x1db   : > { %4730 = vset.pattern.permute.xlu1 %v4960_v20  ;;  %v5657_v23 = vpop.permute.xlu1 %1450 }
 0x1dc   : > { %9051 = vst [vmem:[#allocation102_spill] sm:$0xff] %v5657_v23  ;;  %1886 = vperm.xlu1 %4730, %v5183_v25   ;;  %v5660_v39 = vpop.permute.xlu0 %1558 }
 0x1dd   : > { %9052 = vst [vmem:[#allocation103_spill] sm:$0xff] %v5660_v39  ;;  %2022 = vperm.xlu0 %4732, %v5199_v29  }
 0x1df   : > { %v5663_v13 = vpop.permute.xlu1 %1458 }
 0x1e0   : > { %9053 = vst [vmem:[#allocation104_spill] sm:$0xff] %v5663_v13  ;;  %1890 = vperm.xlu1 %4730, %v5172_v21   ;;  %v5666_v38 = vpop.permute.xlu0 %1566 }
 0x1e1   : > { %9054 = vst [vmem:[#allocation105_spill] sm:$0xff] %v5666_v38  ;;  %2030 = vperm.xlu0 %4732, %v5207_v31  }
 0x1e3   : > { %v5669_v59 = vpop.permute.xlu1 %1466 }
 0x1e4   : > { %9055 = vst [vmem:[#allocation106_spill] sm:$0xff] %v5669_v59  ;;  %1898 = vperm.xlu1 %4730, %v5191_v27   ;;  %v5672_v20 = vpop.permute.xlu0 %1574 }
 0x1e5   : > { %9056 = vst [vmem:[#allocation107_spill] sm:$0xff] %v5672_v20  ;;  %2038 = vperm.xlu0 %4732, %v5215_v33  }
 0x1e7   : > { %v5675_v23 = vpop.permute.xlu1 %1474 }
 0x1e8   : > { %9057 = vst [vmem:[#allocation108_spill] sm:$0xff] %v5675_v23  ;;  %1906 = vperm.xlu1 %4730, %v5199_v29   ;;  %v5678_v39 = vpop.permute.xlu0 %1582  ;;  %v4962_v23 = vmov 13  }
 0x1e9   : > { %9058 = vst [vmem:[#allocation109_spill] sm:$0xff] %v5678_v39  ;;  %2046 = vperm.xlu0 %4732, %v5223_v35  }
 0x1ec   : > { %1914 = vperm.xlu1 %4730, %v5207_v31   ;;  %v5682_v38 = vpop.permute.xlu1 %1534  ;;  %v5684_v13 = vpop.permute.xlu0 %1590 }
 0x1ed   : > { %9059 = vst [vmem:[#allocation110_spill] sm:$0xff] %v5682_v38  ;;  %9060 = vst [vmem:[#allocation111_spill] sm:$0xff] %v5684_v13  ;;  %2054 = vperm.xlu0 %4732, %v5231_v37  }
 0x1f0   : > { %1922 = vperm.xlu1 %4730, %v5215_v33   ;;  %v5688_v20 = vpop.permute.xlu1 %1542 }
 0x1f1   : > { %9061 = vst [vmem:[#allocation112_spill] sm:$0xff] %v5688_v20  ;;  %v5690_v59 = vpop.permute.xlu0 %1650  ;;  %4733 = vset.pattern.permute.xlu0 %v4962_v23 }
 0x1f2   : > { %9062 = vst [vmem:[#allocation113_spill] sm:$0xff] %v5690_v59  ;;  %2114 = vperm.xlu0 %4733, %v5175_v22  }
 0x1f4   : > { %1930 = vperm.xlu1 %4730, %v5223_v35   ;;  %v5694_v39 = vpop.permute.xlu1 %1546 }
 0x1f5   : > { %9063 = vst [vmem:[#allocation114_spill] sm:$0xff] %v5694_v39  ;;  %v5696_v40 = vpop.permute.xlu0 %1662 }
 0x1f6   : > { %9064 = vst [vmem:[#allocation115_spill] sm:$0xff] %v5696_v40  ;;  %2126 = vperm.xlu0 %4733, %v5180_v24  }
 0x1f8   : > { %1938 = vperm.xlu1 %4730, %v5231_v37   ;;  %v5700_v13 = vpop.permute.xlu1 %1554 }
 0x1f9   : > { %9065 = vst [vmem:[#allocation116_spill] sm:$0xff] %v5700_v13  ;;  %v5702_v38 = vpop.permute.xlu0 %1670 }
 0x1fa   : > { %9066 = vst [vmem:[#allocation117_spill] sm:$0xff] %v5702_v38  ;;  %2134 = vperm.xlu0 %4733, %v5188_v26  }
 0x1fc   : > { %4731 = vset.pattern.permute.xlu1 %v4961_v44  ;;  %v5705_v59 = vpop.permute.xlu1 %1562 }
 0x1fd   : > { %9067 = vst [vmem:[#allocation118_spill] sm:$0xff] %v5705_v59  ;;  %1998 = vperm.xlu1 %4731, %v5175_v22   ;;  %v5708_v20 = vpop.permute.xlu0 %1678 }
 0x1fe   : > { %9068 = vst [vmem:[#allocation119_spill] sm:$0xff] %v5708_v20  ;;  %2142 = vperm.xlu0 %4733, %v5196_v28  }
 0x200   : > { %v5711_v40 = vpop.permute.xlu1 %1570 }
 0x201   : > { %9069 = vst [vmem:[#allocation120_spill] sm:$0xff] %v5711_v40  ;;  %2006 = vperm.xlu1 %4731, %v5172_v21   ;;  %v5714_v39 = vpop.permute.xlu0 %1686 }
 0x202   : > { %9070 = vst [vmem:[#allocation121_spill] sm:$0xff] %v5714_v39  ;;  %2150 = vperm.xlu0 %4733, %v5204_v30  }
 0x204   : > { %v5717_v38 = vpop.permute.xlu1 %1578 }
 0x205   : > { %9071 = vst [vmem:[#allocation122_spill] sm:$0xff] %v5717_v38  ;;  %2010 = vperm.xlu1 %4731, %v5180_v24   ;;  %v5720_v44 = vpop.permute.xlu0 %1694 }
 0x206   : > { %9072 = vst [vmem:[#allocation123_spill] sm:$0xff] %v5720_v44  ;;  %2158 = vperm.xlu0 %4733, %v5212_v32  }
 0x208   : > { %v5723_v59 = vpop.permute.xlu1 %1586 }
 0x209   : > { %9073 = vst [vmem:[#allocation124_spill] sm:$0xff] %v5723_v59  ;;  %2018 = vperm.xlu1 %4731, %v5188_v26   ;;  %v5726_v20 = vpop.permute.xlu0 %1702  ;;  %v4963_v59 = vmov 14  }
 0x20a   : > { %9074 = vst [vmem:[#allocation125_spill] sm:$0xff] %v5726_v20  ;;  %2166 = vperm.xlu0 %4733, %v5220_v34  }
 0x20c   : > { %v5729_v40 = vpop.permute.xlu1 %1594 }
 0x20d   : > { %9075 = vst [vmem:[#allocation126_spill] sm:$0xff] %v5729_v40  ;;  %2026 = vperm.xlu1 %4731, %v5196_v28   ;;  %v5732_v39 = vpop.permute.xlu0 %1710 }
 0x20e   : > { %9076 = vst [vmem:[#allocation127_spill] sm:$0xff] %v5732_v39  ;;  %2174 = vperm.xlu0 %4733, %v5228_v36  }
 0x211   : > { %2034 = vperm.xlu1 %4731, %v5204_v30   ;;  %v5736_v44 = vpop.permute.xlu1 %1654 }
 0x212   : > { %9077 = vst [vmem:[#allocation128_spill] sm:$0xff] %v5736_v44  ;;  %v5738_v38 = vpop.permute.xlu0 %1770  ;;  %4736 = vset.pattern.permute.xlu0 %v4963_v59 }
 0x213   : > { %9078 = vst [vmem:[#allocation129_spill] sm:$0xff] %v5738_v38  ;;  %2234 = vperm.xlu0 %4736, %v5183_v25  }
 0x215   : > { %2042 = vperm.xlu1 %4731, %v5212_v32   ;;  %v5742_v20 = vpop.permute.xlu1 %1658 }
 0x216   : > { %9079 = vst [vmem:[#allocation130_spill] sm:$0xff] %v5742_v20  ;;  %v5744_v40 = vpop.permute.xlu0 %1782 }
 0x217   : > { %9080 = vst [vmem:[#allocation131_spill] sm:$0xff] %v5744_v40  ;;  %2246 = vperm.xlu0 %4736, %v5191_v27  }
 0x219   : > { %2050 = vperm.xlu1 %4731, %v5220_v34   ;;  %v5748_v39 = vpop.permute.xlu1 %1666 }
 0x21a   : > { %9081 = vst [vmem:[#allocation132_spill] sm:$0xff] %v5748_v39  ;;  %v5750_v13 = vpop.permute.xlu0 %1790 }
 0x21b   : > { %9082 = vst [vmem:[#allocation133_spill] sm:$0xff] %v5750_v13  ;;  %2254 = vperm.xlu0 %4736, %v5199_v29  }
 0x21d   : > { %2058 = vperm.xlu1 %4731, %v5228_v36   ;;  %v5754_v38 = vpop.permute.xlu1 %1674 }
 0x21e   : > { %9083 = vst [vmem:[#allocation134_spill] sm:$0xff] %v5754_v38  ;;  %v5756_v44 = vpop.permute.xlu0 %1798 }
 0x21f   : > { %9084 = vst [vmem:[#allocation135_spill] sm:$0xff] %v5756_v44  ;;  %2262 = vperm.xlu0 %4736, %v5207_v31  }
 0x221   : > { %4734 = vset.pattern.permute.xlu1 %v4962_v23  ;;  %v5759_v40 = vpop.permute.xlu1 %1682 }
 0x222   : > { %9085 = vst [vmem:[#allocation136_spill] sm:$0xff] %v5759_v40  ;;  %2118 = vperm.xlu1 %4734, %v5183_v25   ;;  %v5762_v20 = vpop.permute.xlu0 %1806 }
 0x223   : > { %9086 = vst [vmem:[#allocation137_spill] sm:$0xff] %v5762_v20  ;;  %2270 = vperm.xlu0 %4736, %v5215_v33  }
 0x225   : > { %v5765_v13 = vpop.permute.xlu1 %1690 }
 0x226   : > { %9087 = vst [vmem:[#allocation138_spill] sm:$0xff] %v5765_v13  ;;  %2122 = vperm.xlu1 %4734, %v5172_v21   ;;  %v5768_v39 = vpop.permute.xlu0 %1814  ;;  %v4964_v13 = vmov 15  }
 0x227   : > { %9088 = vst [vmem:[#allocation139_spill] sm:$0xff] %v5768_v39  ;;  %2278 = vperm.xlu0 %4736, %v5223_v35  }
 0x229   : > { %v5771_v44 = vpop.permute.xlu1 %1698 }
 0x22a   : > { %9089 = vst [vmem:[#allocation140_spill] sm:$0xff] %v5771_v44  ;;  %2130 = vperm.xlu1 %4734, %v5191_v27   ;;  %v5774_v23 = vpop.permute.xlu0 %1822 }
 0x22b   : > { %9090 = vst [vmem:[#allocation141_spill] sm:$0xff] %v5774_v23  ;;  %2286 = vperm.xlu0 %4736, %v5231_v37  }
 0x22d   : > { %v5777_v40 = vpop.permute.xlu1 %1706 }
 0x22e   : > { %9091 = vst [vmem:[#allocation142_spill] sm:$0xff] %v5777_v40  ;;  %2138 = vperm.xlu1 %4734, %v5199_v29  }
 0x22f   : > { %v5780_v20 = vpop.permute.xlu0 %1882  ;;  %4737 = vset.pattern.permute.xlu0 %v4964_v13 }
 0x230   : > { %9092 = vst [vmem:[#allocation143_spill] sm:$0xff] %v5780_v20  ;;  %2346 = vperm.xlu0 %4737, %v5175_v22  }
 0x232   : > { %2146 = vperm.xlu1 %4734, %v5207_v31   ;;  %v5784_v39 = vpop.permute.xlu1 %1766 }
 0x233   : > { %9093 = vst [vmem:[#allocation144_spill] sm:$0xff] %v5784_v39  ;;  %v5786_v44 = vpop.permute.xlu0 %1894 }
 0x234   : > { %9094 = vst [vmem:[#allocation145_spill] sm:$0xff] %v5786_v44  ;;  %2358 = vperm.xlu0 %4737, %v5180_v24  }
 0x236   : > { %2154 = vperm.xlu1 %4734, %v5215_v33   ;;  %v5790_v23 = vpop.permute.xlu1 %1774 }
 0x237   : > { %9095 = vst [vmem:[#allocation146_spill] sm:$0xff] %v5790_v23  ;;  %v5792_v40 = vpop.permute.xlu0 %1902 }
 0x238   : > { %9096 = vst [vmem:[#allocation147_spill] sm:$0xff] %v5792_v40  ;;  %2366 = vperm.xlu0 %4737, %v5188_v26  }
 0x23a   : > { %2162 = vperm.xlu1 %4734, %v5223_v35   ;;  %v5796_v20 = vpop.permute.xlu1 %1778 }
 0x23b   : > { %9097 = vst [vmem:[#allocation148_spill] sm:$0xff] %v5796_v20  ;;  %v5798_v38 = vpop.permute.xlu0 %1910 }
 0x23c   : > { %9098 = vst [vmem:[#allocation149_spill] sm:$0xff] %v5798_v38  ;;  %2374 = vperm.xlu0 %4737, %v5196_v28  }
 0x23e   : > { %2170 = vperm.xlu1 %4734, %v5231_v37   ;;  %v5802_v44 = vpop.permute.xlu1 %1786 }
 0x23f   : > { %9099 = vst [vmem:[#allocation150_spill] sm:$0xff] %v5802_v44  ;;  %v5804_v39 = vpop.permute.xlu0 %1918 }
 0x240   : > { %9100 = vst [vmem:[#allocation151_spill] sm:$0xff] %v5804_v39  ;;  %2382 = vperm.xlu0 %4737, %v5204_v30  }
 0x242   : > { %4735 = vset.pattern.permute.xlu1 %v4963_v59  ;;  %v5807_v40 = vpop.permute.xlu1 %1794 }
 0x243   : > { %9101 = vst [vmem:[#allocation152_spill] sm:$0xff] %v5807_v40  ;;  %2230 = vperm.xlu1 %4735, %v5175_v22   ;;  %v5810_v23 = vpop.permute.xlu0 %1926  ;;  %v8881_v40 = vmov 19  }
 0x244   : > { %9102 = vst [vmem:[#allocation153_spill] sm:$0xff] %v5810_v23  ;;  %2390 = vperm.xlu0 %4737, %v5212_v32  }
 0x246   : > { %v5813_v38 = vpop.permute.xlu1 %1802 }
 0x247   : > { %9103 = vst [vmem:[#allocation154_spill] sm:$0xff] %v5813_v38  ;;  %2238 = vperm.xlu1 %4735, %v5172_v21   ;;  %v5816_v20 = vpop.permute.xlu0 %1934  ;;  %v8878_v38 = vmov 16  }
 0x248   : > { %9104 = vst [vmem:[#allocation155_spill] sm:$0xff] %v5816_v20  ;;  %2398 = vperm.xlu0 %4737, %v5220_v34   ;;  %v5960_v20 = vld [vmem:[%s5155_s14 + $0x78] sm:$0xff] }
 0x249   : > { %9144 = vst [vmem:[#allocation194_spill] sm:$0xff] %v5960_v20 }
 0x24a   : > { %v5819_v39 = vpop.permute.xlu1 %1810 }
 0x24b   : > { %9105 = vst [vmem:[#allocation156_spill] sm:$0xff] %v5819_v39  ;;  %2242 = vperm.xlu1 %4735, %v5180_v24   ;;  %v5822_v59 = vpop.permute.xlu0 %1942 }
 0x24c   : > { %9106 = vst [vmem:[#allocation157_spill] sm:$0xff] %v5822_v59  ;;  %2406 = vperm.xlu0 %4737, %v5228_v36  }
 0x24e   : > { %v5825_v22 = vpop.permute.xlu1 %1818 }
 0x24f   : > { %9107 = vst [vmem:[#allocation158_spill] sm:$0xff] %v5825_v22  ;;  %2250 = vperm.xlu1 %4735, %v5188_v26   ;;  %v8880_v22 = vmov 18  }
 0x250   : > { %v5828_v23 = vpop.permute.xlu0 %2002  ;;  %4740 = vset.pattern.permute.xlu0 %v8878_v38 }
 0x251   : > { %9108 = vst [vmem:[#allocation159_spill] sm:$0xff] %v5828_v23  ;;  %2466 = vperm.xlu0 %4740, %v5183_v25  }
 0x252   : > { %v5831_v21 = vpop.permute.xlu1 %1826 }
 0x253   : > { %9109 = vst [vmem:[#allocation160_spill] sm:$0xff] %v5831_v21  ;;  %2258 = vperm.xlu1 %4735, %v5196_v28  }
 0x254   : > { %v5835_v24 = vpop.permute.xlu0 %2014 }
 0x255   : > { %9110 = vst [vmem:[#allocation161_spill] sm:$0xff] %v5835_v24  ;;  %2478 = vperm.xlu0 %4740, %v5191_v27  }
 0x257   : > { %2266 = vperm.xlu1 %4735, %v5204_v30   ;;  %v5839_v59 = vpop.permute.xlu1 %1886 }
 0x258   : > { %9111 = vst [vmem:[#allocation162_spill] sm:$0xff] %v5839_v59  ;;  %v5841_v26 = vpop.permute.xlu0 %2022  ;;  %v5950_v59 = vld [vmem:[%s5155_s14 + $0x68] sm:$0xff] }
 0x259   : > { %9112 = vst [vmem:[#allocation163_spill] sm:$0xff] %v5841_v26  ;;  %2486 = vperm.xlu0 %4740, %v5199_v29   ;;  %v5918_v26 = vld [vmem:[%s5155_s14 + $0x50] sm:$0xff]  ;;  %9140 = vst [vmem:[#allocation191_spill] sm:$0xff] %v5950_v59 }
 0x25b   : > { %2274 = vperm.xlu1 %4735, %v5212_v32   ;;  %v5845_v38 = vpop.permute.xlu1 %1890 }
 0x25c   : > { %9113 = vst [vmem:[#allocation164_spill] sm:$0xff] %v5845_v38  ;;  %v5847_v23 = vpop.permute.xlu0 %2030  ;;  %v5938_v38 = vld [vmem:[%s5155_s14 + $0x58] sm:$0xff] }
 0x25d   : > { %9114 = vst [vmem:[#allocation165_spill] sm:$0xff] %v5847_v23  ;;  %2494 = vperm.xlu0 %4740, %v5207_v31   ;;  %v5906_v23 = vld [vmem:[%s5155_s14 + $0x40] sm:$0xff]  ;;  %9137 = vst [vmem:[#allocation188_spill] sm:$0xff] %v5938_v38 }
 0x25f   : > { %2282 = vperm.xlu1 %4735, %v5220_v34   ;;  %v5851_v27 = vpop.permute.xlu1 %1898  ;;  %v5871_v34 = vld [vmem:[%s5155_s14 + $0x10] sm:$0xff] }
 0x260   : > { %9115 = vst [vmem:[#allocation166_spill] sm:$0xff] %v5851_v27  ;;  %v5853_v28 = vpop.permute.xlu0 %2038 }
 0x261   : > { %9116 = vst [vmem:[#allocation167_spill] sm:$0xff] %v5853_v28  ;;  %2502 = vperm.xlu0 %4740, %v5215_v33   ;;  %v5902_v28 = vld [vmem:[%s5155_s14 + $0x28] sm:$0xff] }
 0x262   : > { %9128 = vst [vmem:[#allocation179_spill] sm:$0xff] %v5902_v28 }
 0x263   : > { %2290 = vperm.xlu1 %4735, %v5228_v36   ;;  %v5857_v29 = vpop.permute.xlu1 %1906 }
 0x264   : > { %9117 = vst [vmem:[#allocation168_spill] sm:$0xff] %v5857_v29  ;;  %v5859_v30 = vpop.permute.xlu0 %2046  ;;  %v5926_v29 = vld [vmem:[%s5155_s14 + $0x48] sm:$0xff] }
 0x265   : > { %9118 = vst [vmem:[#allocation169_spill] sm:$0xff] %v5859_v30  ;;  %2510 = vperm.xlu0 %4740, %v5223_v35   ;;  %v8879_v35 = vmov 17   ;;  %9134 = vst [vmem:[#allocation185_spill] sm:$0xff] %v5926_v29 }
 0x267   : > { %4738 = vset.pattern.permute.xlu1 %v4964_v13  ;;  %v5862_v31 = vpop.permute.xlu1 %1914  ;;  %v5880_v13 = vld [vmem:[%s5155_s14] sm:$0xff] }
 0x268   : > { %9119 = vst [vmem:[#allocation170_spill] sm:$0xff] %v5862_v31  ;;  %2350 = vperm.xlu1 %4738, %v5183_v25   ;;  %v5865_v32 = vpop.permute.xlu0 %2054 }
 0x269   : > { %9120 = vst [vmem:[#allocation171_spill] sm:$0xff] %v5865_v32  ;;  %2518 = vperm.xlu0 %4740, %v5231_v37   ;;  %v5884_v37 = vld [vmem:[%s5155_s14 + $0x20] sm:$0xff] }
 0x26b   : > { %v5868_v33 = vpop.permute.xlu1 %1922 }
 0x26c   : > { %9121 = vst [vmem:[#allocation172_spill] sm:$0xff] %v5868_v33  ;;  %2354 = vperm.xlu1 %4738, %v5871_v34   ;;  %v5914_v33 = vld [vmem:[%s5155_s14 + $0x38] sm:$0xff] }
 0x26d   : > { %v5874_v36 = vpop.permute.xlu0 %2114  ;;  %4741 = vset.pattern.permute.xlu0 %v8879_v35  ;;  %v5896_v35 = vld [vmem:[%s5155_s14 + $0x30] sm:$0xff]  ;;  %9131 = vst [vmem:[#allocation182_spill] sm:$0xff] %v5914_v33 }
 0x26e   : > { %9122 = vst [vmem:[#allocation173_spill] sm:$0xff] %v5874_v36  ;;  %2578 = vperm.xlu0 %4741, %v5880_v13   ;;  %v5892_v36 = vld [vmem:[%s5155_s14 + $0x18] sm:$0xff] }
 0x26f   : > { %v5877_v25 = vpop.permute.xlu1 %1930  ;;  %9126 = vst [vmem:[#allocation177_spill] sm:$0xff] %v5892_v36 }
 0x270   : > { %9123 = vst [vmem:[#allocation174_spill] sm:$0xff] %v5877_v25  ;;  %2362 = vperm.xlu1 %4738, %v5884_v37  }
 0x271   : > { %v5887_v32 = vpop.permute.xlu0 %2126 }
 0x272   : > { %9124 = vst [vmem:[#allocation175_spill] sm:$0xff] %v5887_v32  ;;  %2590 = vperm.xlu0 %4741, %v5892_v36  }
 0x273   : > { %v5889_v30 = vpop.permute.xlu1 %1938 }
 0x274   : > { %9125 = vst [vmem:[#allocation176_spill] sm:$0xff] %v5889_v30  ;;  %2370 = vperm.xlu1 %4738, %v5896_v35  }
 0x275   : > { %v5899_v25 = vpop.permute.xlu0 %2134 }
 0x276   : > { %9127 = vst [vmem:[#allocation178_spill] sm:$0xff] %v5899_v25  ;;  %2598 = vperm.xlu0 %4741, %v5902_v28  }
 0x278   : > { %2378 = vperm.xlu1 %4738, %v5906_v23   ;;  %v5909_v32 = vpop.permute.xlu1 %1998 }
 0x279   : > { %9129 = vst [vmem:[#allocation180_spill] sm:$0xff] %v5909_v32  ;;  %v5911_v30 = vpop.permute.xlu0 %2142  ;;  %v5930_v32 = vld [vmem:[%s5155_s14 + $0x60] sm:$0xff] }
 0x27a   : > { %9130 = vst [vmem:[#allocation181_spill] sm:$0xff] %v5911_v30  ;;  %2606 = vperm.xlu0 %4741, %v5914_v33  }
 0x27c   : > { %2386 = vperm.xlu1 %4738, %v5918_v26   ;;  %v5921_v25 = vpop.permute.xlu1 %2006 }
 0x27d   : > { %9132 = vst [vmem:[#allocation183_spill] sm:$0xff] %v5921_v25  ;;  %v5923_v31 = vpop.permute.xlu0 %2150  ;;  %v5942_v25 = vld [vmem:[%s5155_s14 + $0x70] sm:$0xff] }
 0x27e   : > { %9133 = vst [vmem:[#allocation184_spill] sm:$0xff] %v5923_v31  ;;  %2614 = vperm.xlu0 %4741, %v5926_v29  }
 0x280   : > { %2394 = vperm.xlu1 %4738, %v5930_v32   ;;  %v5933_v30 = vpop.permute.xlu1 %2010 }
 0x281   : > { %9135 = vst [vmem:[#allocation186_spill] sm:$0xff] %v5933_v30  ;;  %v5935_v24 = vpop.permute.xlu0 %2158  ;;  %v9141_v30 = vmov 16  }
 0x282   : > { %9136 = vst [vmem:[#allocation187_spill] sm:$0xff] %v5935_v24  ;;  %2622 = vperm.xlu0 %4741, %v5938_v38  }
 0x284   : > { %2402 = vperm.xlu1 %4738, %v5942_v25   ;;  %v5945_v31 = vpop.permute.xlu1 %2018 }
 0x285   : > { %9138 = vst [vmem:[#allocation189_spill] sm:$0xff] %v5945_v31  ;;  %v5947_v27 = vpop.permute.xlu0 %2166 }
 0x286   : > { %9139 = vst [vmem:[#allocation190_spill] sm:$0xff] %v5947_v27  ;;  %2630 = vperm.xlu0 %4741, %v5950_v59  }
 0x288   : > { %4739 = vset.pattern.permute.xlu1 %v9141_v30  ;;  %v5954_v24 = vpop.permute.xlu1 %2026 }
 0x289   : > { %9142 = vst [vmem:[#allocation192_spill] sm:$0xff] %v5954_v24  ;;  %2462 = vperm.xlu1 %4739, %v5880_v13   ;;  %v5957_v21 = vpop.permute.xlu0 %2174  ;;  %v5972_v24 = vld [vmem:[%s5155_s14 + $0x8] sm:$0xff] }
 0x28a   : > { %9143 = vst [vmem:[#allocation193_spill] sm:$0xff] %v5957_v21  ;;  %2638 = vperm.xlu0 %4741, %v5960_v20   ;;  %9148 = vst [vmem:[#allocation198_spill] sm:$0xff] %v5972_v24 }
 0x28c   : > { %v5963_v31 = vpop.permute.xlu1 %2034 }
 0x28d   : > { %9145 = vst [vmem:[#allocation195_spill] sm:$0xff] %v5963_v31  ;;  %2470 = vperm.xlu1 %4739, %v5871_v34  }
 0x28e   : > { %v5966_v27 = vpop.permute.xlu0 %2234  ;;  %4744 = vset.pattern.permute.xlu0 %v8880_v22 }
 0x28f   : > { %9146 = vst [vmem:[#allocation196_spill] sm:$0xff] %v5966_v27  ;;  %2698 = vperm.xlu0 %4744, %v5972_v24  }
 0x290   : > { %v5969_v30 = vpop.permute.xlu1 %2042 }
 0x291   : > { %9147 = vst [vmem:[#allocation197_spill] sm:$0xff] %v5969_v30  ;;  %2474 = vperm.xlu1 %4739, %v5892_v36  }
 0x292   : > { %v5976_v21 = vpop.permute.xlu0 %2246 }
 0x293   : > { %9149 = vst [vmem:[#allocation199_spill] sm:$0xff] %v5976_v21  ;;  %2710 = vperm.xlu0 %4744, %v5884_v37  }
 0x294   : > { %v5978_v39 = vpop.permute.xlu1 %2050 }
 0x295   : > { %9150 = vst [vmem:[#allocation200_spill] sm:$0xff] %v5978_v39  ;;  %2482 = vperm.xlu1 %4739, %v5902_v28  }
 0x296   : > { %v5982_v27 = vpop.permute.xlu0 %2254 }
 0x297   : > { %9151 = vst [vmem:[#allocation201_spill] sm:$0xff] %v5982_v27  ;;  %2718 = vperm.xlu0 %4744, %v5896_v35  }
 0x298   : > { %v5984_v31 = vpop.permute.xlu1 %2058 }
 0x299   : > { %9152 = vst [vmem:[#allocation202_spill] sm:$0xff] %v5984_v31  ;;  %2490 = vperm.xlu1 %4739, %v5914_v33  }
 0x29a   : > { %v5988_v22 = vpop.permute.xlu0 %2262 }
 0x29b   : > { %9153 = vst [vmem:[#allocation203_spill] sm:$0xff] %v5988_v22  ;;  %2726 = vperm.xlu0 %4744, %v5906_v23  }
 0x29d   : > { %2498 = vperm.xlu1 %4739, %v5926_v29   ;;  %v5992_v21 = vpop.permute.xlu1 %2118 }
 0x29e   : > { %9154 = vst [vmem:[#allocation204_spill] sm:$0xff] %v5992_v21  ;;  %v5994_v39 = vpop.permute.xlu0 %2270 }
 0x29f   : > { %9155 = vst [vmem:[#allocation205_spill] sm:$0xff] %v5994_v39  ;;  %2734 = vperm.xlu0 %4744, %v5918_v26  }
 0x2a1   : > { %2506 = vperm.xlu1 %4739, %v5938_v38   ;;  %v5998_v27 = vpop.permute.xlu1 %2122 }
 0x2a2   : > { %9156 = vst [vmem:[#allocation206_spill] sm:$0xff] %v5998_v27  ;;  %v6000_v31 = vpop.permute.xlu0 %2278 }
 0x2a3   : > { %9157 = vst [vmem:[#allocation207_spill] sm:$0xff] %v6000_v31  ;;  %2742 = vperm.xlu0 %4744, %v5930_v32   ;;  %v9162_v31 = vmov 17  }
 0x2a5   : > { %2514 = vperm.xlu1 %4739, %v5950_v59   ;;  %v6004_v22 = vpop.permute.xlu1 %2130 }
 0x2a6   : > { %9158 = vst [vmem:[#allocation208_spill] sm:$0xff] %v6004_v22  ;;  %v6006_v30 = vpop.permute.xlu0 %2286 }
 0x2a7   : > { %9159 = vst [vmem:[#allocation209_spill] sm:$0xff] %v6006_v30  ;;  %2750 = vperm.xlu0 %4744, %v5942_v25  }
 0x2a9   : > { %2522 = vperm.xlu1 %4739, %v5960_v20   ;;  %v6010_v39 = vpop.permute.xlu1 %2138 }
 0x2aa   : > { %9160 = vst [vmem:[#allocation210_spill] sm:$0xff] %v6010_v39 }
 0x2ab   : > { %v6012_v21 = vpop.permute.xlu0 %2346  ;;  %4745 = vset.pattern.permute.xlu0 %v8881_v40 }
 0x2ac   : > { %9161 = vst [vmem:[#allocation211_spill] sm:$0xff] %v6012_v21  ;;  %2810 = vperm.xlu0 %4745, %v5880_v13  }
 0x2ad   : > { %4742 = vset.pattern.permute.xlu1 %v9162_v31  ;;  %v6016_v27 = vpop.permute.xlu1 %2146 }
 0x2ae   : > { %9163 = vst [vmem:[#allocation212_spill] sm:$0xff] %v6016_v27  ;;  %2582 = vperm.xlu1 %4742, %v5972_v24   ;;  %v8882_v27 = vmov 20  }
 0x2af   : > { %v6020_v30 = vpop.permute.xlu0 %2358 }
 0x2b0   : > { %9164 = vst [vmem:[#allocation213_spill] sm:$0xff] %v6020_v30  ;;  %2822 = vperm.xlu0 %4745, %v5892_v36  }
 0x2b1   : > { %v6022_v22 = vpop.permute.xlu1 %2154 }
 0x2b2   : > { %9165 = vst [vmem:[#allocation214_spill] sm:$0xff] %v6022_v22  ;;  %2586 = vperm.xlu1 %4742, %v5871_v34  }
 0x2b3   : > { %v6026_v21 = vpop.permute.xlu0 %2366 }
 0x2b4   : > { %9166 = vst [vmem:[#allocation215_spill] sm:$0xff] %v6026_v21  ;;  %2830 = vperm.xlu0 %4745, %v5902_v28  }
 0x2b5   : > { %v6028_v39 = vpop.permute.xlu1 %2162 }
 0x2b6   : > { %9167 = vst [vmem:[#allocation216_spill] sm:$0xff] %v6028_v39  ;;  %2594 = vperm.xlu1 %4742, %v5884_v37  }
 0x2b7   : > { %v6032_v31 = vpop.permute.xlu0 %2374 }
 0x2b8   : > { %9168 = vst [vmem:[#allocation217_spill] sm:$0xff] %v6032_v31  ;;  %2838 = vperm.xlu0 %4745, %v5914_v33  }
 0x2b9   : > { %v6034_v40 = vpop.permute.xlu1 %2170 }
 0x2ba   : > { %9169 = vst [vmem:[#allocation218_spill] sm:$0xff] %v6034_v40  ;;  %2602 = vperm.xlu1 %4742, %v5896_v35  }
 0x2bb   : > { %v6038_v30 = vpop.permute.xlu0 %2382 }
 0x2bc   : > { %9170 = vst [vmem:[#allocation219_spill] sm:$0xff] %v6038_v30  ;;  %2846 = vperm.xlu0 %4745, %v5926_v29  }
 0x2be   : > { %2610 = vperm.xlu1 %4742, %v5906_v23   ;;  %v6042_v21 = vpop.permute.xlu1 %2230 }
 0x2bf   : > { %9171 = vst [vmem:[#allocation220_spill] sm:$0xff] %v6042_v21  ;;  %v6044_v39 = vpop.permute.xlu0 %2390 }
 0x2c0   : > { %9172 = vst [vmem:[#allocation221_spill] sm:$0xff] %v6044_v39  ;;  %2854 = vperm.xlu0 %4745, %v5938_v38  }
 0x2c2   : > { %2618 = vperm.xlu1 %4742, %v5918_v26   ;;  %v6048_v31 = vpop.permute.xlu1 %2238 }
 0x2c3   : > { %9173 = vst [vmem:[#allocation222_spill] sm:$0xff] %v6048_v31  ;;  %v6050_v40 = vpop.permute.xlu0 %2398 }
 0x2c4   : > { %9174 = vst [vmem:[#allocation223_spill] sm:$0xff] %v6050_v40  ;;  %2862 = vperm.xlu0 %4745, %v5950_v59   ;;  %v9179_v40 = vmov 18  }
 0x2c6   : > { %2626 = vperm.xlu1 %4742, %v5930_v32   ;;  %v6054_v30 = vpop.permute.xlu1 %2242 }
 0x2c7   : > { %9175 = vst [vmem:[#allocation224_spill] sm:$0xff] %v6054_v30  ;;  %v6056_v22 = vpop.permute.xlu0 %2406 }
 0x2c8   : > { %9176 = vst [vmem:[#allocation225_spill] sm:$0xff] %v6056_v22  ;;  %2870 = vperm.xlu0 %4745, %v5960_v20  }
 0x2ca   : > { %2634 = vperm.xlu1 %4742, %v5942_v25   ;;  %v6060_v39 = vpop.permute.xlu1 %2250 }
 0x2cb   : > { %9177 = vst [vmem:[#allocation226_spill] sm:$0xff] %v6060_v39 }
 0x2cc   : > { %v6062_v21 = vpop.permute.xlu0 %2466  ;;  %4748 = vset.pattern.permute.xlu0 %v8882_v27 }
 0x2cd   : > { %9178 = vst [vmem:[#allocation227_spill] sm:$0xff] %v6062_v21  ;;  %2930 = vperm.xlu0 %4748, %v5972_v24  }
 0x2ce   : > { %4743 = vset.pattern.permute.xlu1 %v9179_v40  ;;  %v6066_v31 = vpop.permute.xlu1 %2258 }
 0x2cf   : > { %9180 = vst [vmem:[#allocation228_spill] sm:$0xff] %v6066_v31  ;;  %2694 = vperm.xlu1 %4743, %v5880_v13  }
 0x2d0   : > { %v6070_v22 = vpop.permute.xlu0 %2478 }
 0x2d1   : > { %9181 = vst [vmem:[#allocation229_spill] sm:$0xff] %v6070_v22  ;;  %2942 = vperm.xlu0 %4748, %v5884_v37  }
 0x2d2   : > { %v6072_v30 = vpop.permute.xlu1 %2266 }
 0x2d3   : > { %9182 = vst [vmem:[#allocation230_spill] sm:$0xff] %v6072_v30  ;;  %2702 = vperm.xlu1 %4743, %v5871_v34  }
 0x2d4   : > { %v6076_v21 = vpop.permute.xlu0 %2486 }
 0x2d5   : > { %9183 = vst [vmem:[#allocation231_spill] sm:$0xff] %v6076_v21  ;;  %2950 = vperm.xlu0 %4748, %v5896_v35  }
 0x2d6   : > { %v6078_v39 = vpop.permute.xlu1 %2274 }
 0x2d7   : > { %9184 = vst [vmem:[#allocation232_spill] sm:$0xff] %v6078_v39  ;;  %2706 = vperm.xlu1 %4743, %v5892_v36   ;;  %v8883_v39 = vmov 21  }
 0x2d8   : > { %v6082_v40 = vpop.permute.xlu0 %2494 }
 0x2d9   : > { %9185 = vst [vmem:[#allocation233_spill] sm:$0xff] %v6082_v40  ;;  %2958 = vperm.xlu0 %4748, %v5906_v23  }
 0x2da   : > { %v6084_v27 = vpop.permute.xlu1 %2282 }
 0x2db   : > { %9186 = vst [vmem:[#allocation234_spill] sm:$0xff] %v6084_v27  ;;  %2714 = vperm.xlu1 %4743, %v5902_v28  }
 0x2dc   : > { %v6088_v22 = vpop.permute.xlu0 %2502 }
 0x2dd   : > { %9187 = vst [vmem:[#allocation235_spill] sm:$0xff] %v6088_v22  ;;  %2966 = vperm.xlu0 %4748, %v5918_v26  }
 0x2de   : > { %v6090_v30 = vpop.permute.xlu1 %2290 }
 0x2df   : > { %9188 = vst [vmem:[#allocation236_spill] sm:$0xff] %v6090_v30  ;;  %2722 = vperm.xlu1 %4743, %v5914_v33  }
 0x2e0   : > { %v6094_v21 = vpop.permute.xlu0 %2510 }
 0x2e1   : > { %9189 = vst [vmem:[#allocation237_spill] sm:$0xff] %v6094_v21  ;;  %2974 = vperm.xlu0 %4748, %v5930_v32  }
 0x2e3   : > { %2730 = vperm.xlu1 %4743, %v5926_v29   ;;  %v6098_v40 = vpop.permute.xlu1 %2350 }
 0x2e4   : > { %9190 = vst [vmem:[#allocation238_spill] sm:$0xff] %v6098_v40  ;;  %v6100_v27 = vpop.permute.xlu0 %2518 }
 0x2e5   : > { %9191 = vst [vmem:[#allocation239_spill] sm:$0xff] %v6100_v27  ;;  %2982 = vperm.xlu0 %4748, %v5942_v25  }
 0x2e7   : > { %2738 = vperm.xlu1 %4743, %v5938_v38   ;;  %v6104_v22 = vpop.permute.xlu1 %2354 }
 0x2e8   : > { %9192 = vst [vmem:[#allocation240_spill] sm:$0xff] %v6104_v22 }
 0x2e9   : > { %v6106_v30 = vpop.permute.xlu0 %2578  ;;  %4749 = vset.pattern.permute.xlu0 %v8883_v39 }
 0x2ea   : > { %9193 = vst [vmem:[#allocation241_spill] sm:$0xff] %v6106_v30  ;;  %3042 = vperm.xlu0 %4749, %v5880_v13   ;;  %v9198_v30 = vmov 19  }
 0x2eb   : > { %2746 = vperm.xlu1 %4743, %v5950_v59   ;;  %v6110_v21 = vpop.permute.xlu1 %2362 }
 0x2ec   : > { %9194 = vst [vmem:[#allocation242_spill] sm:$0xff] %v6110_v21 }
 0x2ed   : > { %v6113_v40 = vpop.permute.xlu0 %2590 }
 0x2ee   : > { %9195 = vst [vmem:[#allocation243_spill] sm:$0xff] %v6113_v40  ;;  %3054 = vperm.xlu0 %4749, %v5892_v36  }
 0x2ef   : > { %2754 = vperm.xlu1 %4743, %v5960_v20   ;;  %v6116_v27 = vpop.permute.xlu1 %2370 }
 0x2f0   : > { %9196 = vst [vmem:[#allocation244_spill] sm:$0xff] %v6116_v27 }
 0x2f1   : > { %v6119_v22 = vpop.permute.xlu0 %2598 }
 0x2f2   : > { %9197 = vst [vmem:[#allocation245_spill] sm:$0xff] %v6119_v22  ;;  %3062 = vperm.xlu0 %4749, %v5902_v28  }
 0x2f3   : > { %4746 = vset.pattern.permute.xlu1 %v9198_v30  ;;  %v6122_v31 = vpop.permute.xlu1 %2378 }
 0x2f4   : > { %9199 = vst [vmem:[#allocation246_spill] sm:$0xff] %v6122_v31  ;;  %2814 = vperm.xlu1 %4746, %v5972_v24  }
 0x2f5   : > { %v6126_v39 = vpop.permute.xlu0 %2606 }
 0x2f6   : > { %9200 = vst [vmem:[#allocation247_spill] sm:$0xff] %v6126_v39  ;;  %3070 = vperm.xlu0 %4749, %v5914_v33  }
 0x2f7   : > { %v6128_v21 = vpop.permute.xlu1 %2386 }
 0x2f8   : > { %9201 = vst [vmem:[#allocation248_spill] sm:$0xff] %v6128_v21  ;;  %2818 = vperm.xlu1 %4746, %v5871_v34   ;;  %v8884_v21 = vmov 22  }
 0x2f9   : > { %v6132_v40 = vpop.permute.xlu0 %2614 }
 0x2fa   : > { %9202 = vst [vmem:[#allocation249_spill] sm:$0xff] %v6132_v40  ;;  %3078 = vperm.xlu0 %4749, %v5926_v29  }
 0x2fb   : > { %v6134_v27 = vpop.permute.xlu1 %2394 }
 0x2fc   : > { %9203 = vst [vmem:[#allocation250_spill] sm:$0xff] %v6134_v27  ;;  %2826 = vperm.xlu1 %4746, %v5884_v37  }
 0x2fd   : > { %v6138_v30 = vpop.permute.xlu0 %2622 }
 0x2fe   : > { %9204 = vst [vmem:[#allocation251_spill] sm:$0xff] %v6138_v30  ;;  %3086 = vperm.xlu0 %4749, %v5938_v38  }
 0x2ff   : > { %v6140_v22 = vpop.permute.xlu1 %2402 }
 0x300   : > { %9205 = vst [vmem:[#allocation252_spill] sm:$0xff] %v6140_v22  ;;  %2834 = vperm.xlu1 %4746, %v5896_v35  }
 0x301   : > { %v6144_v39 = vpop.permute.xlu0 %2630 }
 0x302   : > { %9206 = vst [vmem:[#allocation253_spill] sm:$0xff] %v6144_v39  ;;  %3094 = vperm.xlu0 %4749, %v5950_v59  }
 0x304   : > { %2842 = vperm.xlu1 %4746, %v5906_v23   ;;  %v6148_v40 = vpop.permute.xlu1 %2462 }
 0x305   : > { %9207 = vst [vmem:[#allocation254_spill] sm:$0xff] %v6148_v40  ;;  %v6150_v27 = vpop.permute.xlu0 %2638 }
 0x306   : > { %9208 = vst [vmem:[#allocation255_spill] sm:$0xff] %v6150_v27  ;;  %3102 = vperm.xlu0 %4749, %v5960_v20  }
 0x308   : > { %2850 = vperm.xlu1 %4746, %v5918_v26   ;;  %v6154_v30 = vpop.permute.xlu1 %2470 }
 0x309   : > { %9209 = vst [vmem:[#allocation256_spill] sm:$0xff] %v6154_v30 }
 0x30a   : > { %v6156_v22 = vpop.permute.xlu0 %2698  ;;  %4752 = vset.pattern.permute.xlu0 %v8884_v21 }
 0x30b   : > { %9210 = vst [vmem:[#allocation257_spill] sm:$0xff] %v6156_v22  ;;  %3162 = vperm.xlu0 %4752, %v5972_v24   ;;  %v9215_v22 = vmov 20  }
 0x30c   : > { %2858 = vperm.xlu1 %4746, %v5930_v32   ;;  %v6160_v39 = vpop.permute.xlu1 %2474 }
 0x30d   : > { %9211 = vst [vmem:[#allocation258_spill] sm:$0xff] %v6160_v39 }
 0x30e   : > { %v6163_v40 = vpop.permute.xlu0 %2710 }
 0x30f   : > { %9212 = vst [vmem:[#allocation259_spill] sm:$0xff] %v6163_v40  ;;  %3174 = vperm.xlu0 %4752, %v5884_v37  }
 0x310   : > { %2866 = vperm.xlu1 %4746, %v5942_v25   ;;  %v6166_v27 = vpop.permute.xlu1 %2482 }
 0x311   : > { %9213 = vst [vmem:[#allocation260_spill] sm:$0xff] %v6166_v27 }
 0x312   : > { %v6169_v30 = vpop.permute.xlu0 %2718 }
 0x313   : > { %9214 = vst [vmem:[#allocation261_spill] sm:$0xff] %v6169_v30  ;;  %3182 = vperm.xlu0 %4752, %v5896_v35  }
 0x314   : > { %4747 = vset.pattern.permute.xlu1 %v9215_v22  ;;  %v6172_v31 = vpop.permute.xlu1 %2490 }
 0x315   : > { %9216 = vst [vmem:[#allocation262_spill] sm:$0xff] %v6172_v31  ;;  %2926 = vperm.xlu1 %4747, %v5880_v13  }
 0x316   : > { %v6176_v21 = vpop.permute.xlu0 %2726 }
 0x317   : > { %9217 = vst [vmem:[#allocation263_spill] sm:$0xff] %v6176_v21  ;;  %3190 = vperm.xlu0 %4752, %v5906_v23  }
 0x318   : > { %v6178_v39 = vpop.permute.xlu1 %2498 }
 0x319   : > { %9218 = vst [vmem:[#allocation264_spill] sm:$0xff] %v6178_v39  ;;  %2934 = vperm.xlu1 %4747, %v5871_v34  }
 0x31a   : > { %v6182_v40 = vpop.permute.xlu0 %2734 }
 0x31b   : > { %9219 = vst [vmem:[#allocation265_spill] sm:$0xff] %v6182_v40  ;;  %3198 = vperm.xlu0 %4752, %v5918_v26   ;;  %v8885_v40 = vmov 23  }
 0x31c   : > { %v6184_v27 = vpop.permute.xlu1 %2506 }
 0x31d   : > { %9220 = vst [vmem:[#allocation266_spill] sm:$0xff] %v6184_v27  ;;  %2938 = vperm.xlu1 %4747, %v5892_v36  }
 0x31e   : > { %v6188_v22 = vpop.permute.xlu0 %2742 }
 0x31f   : > { %9221 = vst [vmem:[#allocation267_spill] sm:$0xff] %v6188_v22  ;;  %3206 = vperm.xlu0 %4752, %v5930_v32  }
 0x320   : > { %v6190_v30 = vpop.permute.xlu1 %2514 }
 0x321   : > { %9222 = vst [vmem:[#allocation268_spill] sm:$0xff] %v6190_v30  ;;  %2946 = vperm.xlu1 %4747, %v5902_v28  }
 0x322   : > { %v6194_v21 = vpop.permute.xlu0 %2750 }
 0x323   : > { %9223 = vst [vmem:[#allocation269_spill] sm:$0xff] %v6194_v21  ;;  %3214 = vperm.xlu0 %4752, %v5942_v25  }
 0x324   : > { %v6196_v39 = vpop.permute.xlu1 %2522 }
 0x325   : > { %9224 = vst [vmem:[#allocation270_spill] sm:$0xff] %v6196_v39  ;;  %2954 = vperm.xlu1 %4747, %v5914_v33  }
 0x327   : > { %4753 = vset.pattern.permute.xlu0 %v8885_v40  ;;  %v6201_v27 = vpop.permute.xlu0 %2810 }
 0x328   : > { %9225 = vst [vmem:[#allocation271_spill] sm:$0xff] %v6201_v27  ;;  %3274 = vperm.xlu0 %4753, %v5880_v13  }
 0x329   : > { %2962 = vperm.xlu1 %4747, %v5926_v29   ;;  %v6204_v22 = vpop.permute.xlu1 %2582 }
 0x32a   : > { %9226 = vst [vmem:[#allocation272_spill] sm:$0xff] %v6204_v22 }
 0x32b   : > { %v6207_v30 = vpop.permute.xlu0 %2822 }
 0x32c   : > { %9227 = vst [vmem:[#allocation273_spill] sm:$0xff] %v6207_v30  ;;  %3286 = vperm.xlu0 %4753, %v5892_v36  }
 0x32d   : > { %2970 = vperm.xlu1 %4747, %v5938_v38   ;;  %v6210_v21 = vpop.permute.xlu1 %2586 }
 0x32e   : > { %9228 = vst [vmem:[#allocation274_spill] sm:$0xff] %v6210_v21  ;;  %v9234_v21 = vmov 21  }
 0x32f   : > { %v6213_v39 = vpop.permute.xlu0 %2830 }
 0x330   : > { %9229 = vst [vmem:[#allocation275_spill] sm:$0xff] %v6213_v39  ;;  %3294 = vperm.xlu0 %4753, %v5902_v28  }
 0x331   : > { %2978 = vperm.xlu1 %4747, %v5950_v59   ;;  %v6216_v40 = vpop.permute.xlu1 %2594 }
 0x332   : > { %9230 = vst [vmem:[#allocation276_spill] sm:$0xff] %v6216_v40  ;;  %v8886_v40 = vlaneseq }
 0x333   : > { %v6219_v27 = vpop.permute.xlu0 %2838 }
 0x334   : > { %9231 = vst [vmem:[#allocation277_spill] sm:$0xff] %v6219_v27  ;;  %3302 = vperm.xlu0 %4753, %v5914_v33  }
 0x335   : > { %2986 = vperm.xlu1 %4747, %v5960_v20   ;;  %v6222_v22 = vpop.permute.xlu1 %2602 }
 0x336   : > { %9232 = vst [vmem:[#allocation278_spill] sm:$0xff] %v6222_v22 }
 0x337   : > { %v6225_v30 = vpop.permute.xlu0 %2846 }
 0x338   : > { %9233 = vst [vmem:[#allocation279_spill] sm:$0xff] %v6225_v30  ;;  %3310 = vperm.xlu0 %4753, %v5926_v29   ;;  %v6239_v30 = vshrl.u32 %v8886_v40, 7 }
 0x339   : > { %4750 = vset.pattern.permute.xlu1 %v9234_v21  ;;  %v6228_v39 = vpop.permute.xlu1 %2610 }
 0x33a   : > { %9235 = vst [vmem:[#allocation280_spill] sm:$0xff] %v6228_v39  ;;  %3046 = vperm.xlu1 %4750, %v5972_v24   ;;  %9238 = vst [vmem:[#allocation283_spill] sm:$0xff] %v6239_v30  ;;  %v6248_v39 = vsub.s32 0, %v6239_v30  ;;  %v6308_v29 = vsub.s32 4, %v6239_v30 }
 0x33b   : > { %v6232_v31 = vpop.permute.xlu0 %2854 }
 0x33c   : > { %9236 = vst [vmem:[#allocation281_spill] sm:$0xff] %v6232_v31  ;;  %3318 = vperm.xlu0 %4753, %v5938_v38   ;;  %9241 = vst [vmem:[#allocation286_spill] sm:$0xff] %v6248_v39  ;;  %v6251_v31 = vld [vmem:[%s5167_s16] sm:$0xff] }
 0x33d   : > { %v6234_v27 = vpop.permute.xlu1 %2618  ;;  %v6261_v40 = vrot.slane %v6251_v31, %v6248_v39  ;;  %9250 = vst [vmem:[#allocation295_spill] sm:$0xff] %v6308_v29 }
 0x33e   : > { %9237 = vst [vmem:[#allocation282_spill] sm:$0xff] %v6234_v27  ;;  %3050 = vperm.xlu1 %4750, %v5871_v34  }
 0x33f   : > { %v6241_v22 = vpop.permute.xlu0 %2862  ;;  %v673_v39 = vsub.f32 %v5283_v42, %v6261_v40  ;;  %v680_v42 = vsub.f32 %v5297_v48, %v6261_v40  ;;  %v685_v36 = vsub.f32 %v5317_v55, %v6261_v40 }
 0x340   : > { %9239 = vst [vmem:[#allocation284_spill] sm:$0xff] %v6241_v22  ;;  %3326 = vperm.xlu0 %4753, %v5950_v59   ;;  %v6264_v22 = vsub.s32 1, %v6239_v30 }
 0x341   : > { %v6243_v21 = vpop.permute.xlu1 %2626  ;;  %v6326_v19 = vand.u32 2147483647, %v680_v42 }
 0x342   : > { %9240 = vst [vmem:[#allocation285_spill] sm:$0xff] %v6243_v21  ;;  %3058 = vperm.xlu1 %4750, %v5884_v37   ;;  %9244 = vst [vmem:[#allocation289_spill] sm:$0xff] %v6264_v22  ;;  %v8893_v21 = vmov 24  }
 0x343   : > { %v6253_v27 = vpop.permute.xlu0 %2870 }
 0x344   : > { %9242 = vst [vmem:[#allocation287_spill] sm:$0xff] %v6253_v27  ;;  %3334 = vperm.xlu0 %4753, %v5960_v20   ;;  %v6279_v20 = vrot.slane %v6251_v31, %v6264_v22  ;;  %v679_v22 = vsub.f32 %v5299_v49, %v6261_v40 }
 0x345   : > { %v6255_v44 = vpop.permute.xlu1 %2634 }
 0x346   : > { %9243 = vst [vmem:[#allocation288_spill] sm:$0xff] %v6255_v44  ;;  %3066 = vperm.xlu1 %4750, %v5896_v35   ;;  %v675_v44 = vsub.f32 %v5279_v41, %v6261_v40  ;;  %v677_v41 = vsub.f32 %v5294_v47, %v6261_v40  ;;  %v684_v47 = vsub.f32 %v5309_v52, %v6261_v40 }
 0x347   : > { %v789_v42 = vsub.f32 %v5330_v60, %v6279_v20  ;;  %v796_v60 = vsub.f32 %v5348_v2, %v6279_v20  ;;  %v799_v2 = vsub.f32 %v5357_v5, %v6279_v20 }
 0x348   : > { %4756 = vset.pattern.permute.xlu0 %v8893_v21  ;;  %v6267_v59 = vpop.permute.xlu0 %2930  ;;  %v676_v21 = vsub.f32 %v5285_v43, %v6261_v40  ;;  %v6297_v43 = vsub.s32 3, %v6239_v30  ;;  %v6314_v49 = vand.u32 2147483647, %v675_v44  ;;  %v695_v44 = vand.u32 2147483647, %v679_v22 }
 0x349   : > { %9245 = vst [vmem:[#allocation290_spill] sm:$0xff] %v6267_v59  ;;  %3394 = vperm.xlu0 %4756, %v5972_v24   ;;  %v674_v59 = vsub.f32 %v5288_v45, %v6261_v40  ;;  %v6288_v24 = vsub.s32 2, %v6239_v30  ;;  %v682_v45 = vsub.f32 %v5303_v50, %v6261_v40  ;;  %v683_v50 = vsub.f32 %v5311_v53, %v6261_v40 }
 0x34a   : > { %3074 = vperm.xlu1 %4750, %v5906_v23   ;;  %v6270_v27 = vpop.permute.xlu1 %2694  ;;  %9248 = vst [vmem:[#allocation293_spill] sm:$0xff] %v6297_v43  ;;  %v692_v52 = vand.u32 2147483647, %v676_v21  ;;  %v6332_v53 = vand.u32 2147483647, %v684_v47  ;;  %v688_v22 = vsub.f32 %v5321_v56, %v6261_v40  ;;  %v790_v21 = vsub.f32 %v5327_v58, %v6279_v20 }
 0x34b   : > { %9246 = vst [vmem:[#allocation291_spill] sm:$0xff] %v6270_v27  ;;  %v678_v27 = vsub.f32 %v5291_v46, %v6261_v40  ;;  %9247 = vst [vmem:[#allocation292_spill] sm:$0xff] %v6288_v24  ;;  %v681_v46 = vsub.f32 %v5305_v51, %v6261_v40  ;;  %v686_v51 = vsub.f32 %v5315_v54, %v6261_v40  ;;  %v690_v33 = vand.u32 2147483647, %v674_v59 }
 0x34c   : > { %v6299_v38 = vpop.permute.xlu0 %2942  ;;  %v6336_v54 = vrot.slane %v6251_v31, %v6288_v24  ;;  %v699_v55 = vand.u32 2147483647, %v683_v50  ;;  %v793_v56 = vsub.f32 %v5339_v63, %v6279_v20  ;;  %v794_v58 = vsub.f32 %v5342_v0, %v6279_v20 }
 0x34d   : > { %9249 = vst [vmem:[#allocation294_spill] sm:$0xff] %v6299_v38  ;;  %3406 = vperm.xlu0 %4756, %v5884_v37   ;;  %v6316_v38 = vand.u32 2147483647, %v673_v39  ;;  %v6322_v28 = vand.u32 2147483647, %v678_v27 }
 0x34e   : > { %3082 = vperm.xlu1 %4750, %v5918_v26   ;;  %v6311_v48 = vpop.permute.xlu1 %2702  ;;  %v6330_v39 = vand.u32 2147483647, %v682_v45  ;;  %v697_v18 = vand.u32 2147483647, %v681_v46  ;;  %v6342_v27 = vand.u32 2147483647, %v686_v51  ;;  %v791_v45 = vsub.f32 %v5333_v61, %v6279_v20 }
 0x34f   : > { %9251 = vst [vmem:[#allocation296_spill] sm:$0xff] %v6311_v48  ;;  %v693_v48 = vand.u32 2147483647, %v677_v41  ;;  %v6348_v41 = vand.u32 2147483647, %v685_v36  ;;  %v687_v46 = vsub.f32 %v5323_v57, %v6261_v40  ;;  %v795_v36 = vsub.f32 %v5345_v1, %v6279_v20 }
 0x350   : > { %v6328_v37 = vpop.permute.xlu0 %2950  ;;  %v797_v61 = vsub.f32 %v5351_v3, %v6279_v20  ;;  %v798_v57 = vsub.f32 %v5353_v4, %v6279_v20  ;;  %v6379_v0 = vand.u32 2147483647, %v688_v22  ;;  %v806_v1 = vand.u32 2147483647, %v790_v21 }
 0x351   : > { %9252 = vst [vmem:[#allocation297_spill] sm:$0xff] %v6328_v37  ;;  %3414 = vperm.xlu0 %4756, %v5896_v35   ;;  %v792_v35 = vsub.f32 %v5336_v62, %v6279_v20  ;;  %v6373_v62 = vsub.s32 5, %v6239_v30  ;;  %v800_v3 = vsub.f32 %v5359_v6, %v6279_v20  ;;  %v805_v40 = vand.u32 2147483647, %v789_v42 }
 0x352   : > { %3090 = vperm.xlu1 %4750, %v5930_v32   ;;  %v6339_v59 = vpop.permute.xlu1 %2706  ;;  %v807_v4 = vand.u32 2147483647, %v791_v45  ;;  %v6387_v51 = vrot.slane %v6251_v31, %v6297_v43  ;;  %v810_v37 = vand.u32 2147483647, %v794_v58  ;;  %v812_v5 = vand.u32 2147483647, %v796_v60 }
 0x353   : > { %9253 = vst [vmem:[#allocation298_spill] sm:$0xff] %v6339_v59  ;;  %9255 = vst [vmem:[#allocation300_spill] sm:$0xff] %v6373_v62  ;;  %v808_v50 = vand.u32 2147483647, %v792_v35  ;;  %v813_v21 = vand.u32 2147483647, %v797_v61  ;;  %v6397_v6 = vrot.slane %v6251_v31, %v6373_v62  ;;  %v821_v60 = vadd.f32 %v805_v40, %v6316_v38 }
 0x354   : > { %v6364_v47 = vpop.permute.xlu0 %2958  ;;  %v814_v59 = vand.u32 2147483647, %v798_v57  ;;  %v9258_v42 = vmov 22   ;;  %v703_v35 = vand.u32 2147483647, %v687_v46  ;;  %v823_v61 = vadd.f32 %v807_v4, %v6314_v49 }
 0x355   : > { %9254 = vst [vmem:[#allocation299_spill] sm:$0xff] %v6364_v47  ;;  %3422 = vperm.xlu0 %4756, %v5906_v23   ;;  %v809_v47 = vand.u32 2147483647, %v793_v56  ;;  %v6391_v23 = vrot.slane %v6251_v31, %v6308_v29  ;;  %v6403_v56 = vadd.f32 %v806_v1, %v690_v33  ;;  %v815_v58 = vand.u32 2147483647, %v799_v2 }
 0x356   : > { %3098 = vperm.xlu1 %4750, %v5942_v25   ;;  %v6376_v63 = vpop.permute.xlu1 %2714  ;;  %v6408_v57 = vadd.f32 %v808_v50, %v692_v52  ;;  %v802_v33 = vsub.f32 %v5365_v8, %v6279_v20  ;;  %v828_v1 = vadd.f32 %v812_v5, %v6326_v19  ;;  %v829_v2 = vadd.f32 %v813_v21, %v697_v18 }
 0x357   : > { %9256 = vst [vmem:[#allocation301_spill] sm:$0xff] %v6376_v63  ;;  %v811_v63 = vand.u32 2147483647, %v795_v36  ;;  %v816_v36 = vand.u32 2147483647, %v800_v3  ;;  %v6419_v38 = vadd.f32 %v814_v59, %v6330_v39  ;;  %v803_v49 = vsub.f32 %v5369_v9, %v6279_v20  ;;  %v9269_v3 = vld [vmem:[#allocation177_spill] sm:$0xff] }
 0x358   : > { %v6393_v22 = vpop.permute.xlu0 %2966  ;;  %v804_v8 = vsub.f32 %v5371_v10, %v6279_v20  ;;  %v905_v18 = vsub.f32 %v5376_v11, %v6336_v54  ;;  %v906_v9 = vsub.f32 %v5378_v12, %v6336_v54  ;;  %v911_v10 = vsub.f32 %v5390_v17, %v6336_v54  ;;  %v9262_v11 = vld [vmem:[#allocation14_spill] sm:$0xff]  ;;  %v9264_v12 = vld [vmem:[#allocation15_spill] sm:$0xff] }
 0x359   : > { %9257 = vst [vmem:[#allocation302_spill] sm:$0xff] %v6393_v22  ;;  %3430 = vperm.xlu0 %4756, %v5918_v26   ;;  %v825_v22 = vadd.f32 %v809_v47, %v693_v48  ;;  %v827_v26 = vadd.f32 %v811_v63, %v695_v44  ;;  %v907_v48 = vsub.f32 %v5382_v14, %v6336_v54  ;;  %v818_v44 = vand.u32 2147483647, %v802_v33  ;;  %v9265_v14 = vld [vmem:[#allocation16_spill] sm:$0xff] }
 0x35a   : > { %4751 = vset.pattern.permute.xlu1 %v9258_v42  ;;  %v6400_v45 = vpop.permute.xlu1 %2722  ;;  %v801_v42 = vsub.f32 %v5363_v7, %v6279_v20  ;;  %v831_v7 = vadd.f32 %v815_v58, %v699_v55  ;;  %v910_v20 = vsub.f32 %v9262_v11, %v6336_v54  ;;  %v819_v39 = vand.u32 2147483647, %v803_v49 }
 0x35b   : > { %9259 = vst [vmem:[#allocation303_spill] sm:$0xff] %v6400_v45  ;;  %3158 = vperm.xlu1 %4751, %v5880_v13   ;;  %v826_v45 = vadd.f32 %v810_v37, %v6322_v28  ;;  %v6427_v28 = vadd.f32 %v816_v36, %v6332_v53  ;;  %v908_v37 = vsub.f32 %v5388_v16, %v6336_v54  ;;  %v820_v16 = vand.u32 2147483647, %v804_v8  ;;  %v9270_v8 = vld [vmem:[#allocation18_spill] sm:$0xff] }
 0x35c   : > { %v6415_v46 = vpop.permute.xlu0 %2974  ;;  %v817_v19 = vand.u32 2147483647, %v801_v42  ;;  %v913_v53 = vsub.f32 %v9264_v12, %v6336_v54  ;;  %v912_v59 = vsub.f32 %v9265_v14, %v6336_v54  ;;  %v921_v17 = vand.u32 2147483647, %v905_v18 }
 0x35d   : > { %9260 = vst [vmem:[#allocation304_spill] sm:$0xff] %v6415_v46  ;;  %3438 = vperm.xlu0 %4756, %v5930_v32   ;;  %v909_v32 = vsub.f32 %v5384_v15, %v6336_v54  ;;  %v9266_v15 = vld [vmem:[#allocation17_spill] sm:$0xff]  ;;  %v6458_v63 = vsub.s32 6, %v6239_v30  ;;  %v922_v4 = vand.u32 2147483647, %v906_v9  ;;  %v6463_v21 = vadd.f32 %v818_v44, %v6342_v27 }
 0x35e   : > { %v6423_v52 = vpop.permute.xlu1 %2730  ;;  %v915_v55 = vsub.f32 %v9266_v15, %v6336_v54  ;;  %v833_v40 = vadd.f32 %v817_v19, %v6348_v41  ;;  %v923_v50 = vand.u32 2147483647, %v907_v48  ;;  %v924_v58 = vand.u32 2147483647, %v908_v37  ;;  %v9273_v48 = vld [vmem:[#allocation179_spill] sm:$0xff] }
 0x35f   : > { %9261 = vst [vmem:[#allocation305_spill] sm:$0xff] %v6423_v52  ;;  %3166 = vperm.xlu1 %4751, %v5871_v34   ;;  %9268 = vst [vmem:[#allocation16_spill] sm:$0xff] %v6458_v63  ;;  %v925_v5 = vand.u32 2147483647, %v909_v32  ;;  %v927_v36 = vand.u32 2147483647, %v911_v10  ;;  %v914_v18 = vsub.f32 %v9270_v8, %v6336_v54  ;;  %v835_v19 = vadd.f32 %v819_v39, %v703_v35 }
 0x360   : > { %v6446_v34 = vpop.permute.xlu0 %2982  ;;  %v926_v42 = vand.u32 2147483647, %v910_v20  ;;  %v929_v33 = vand.u32 2147483647, %v913_v53  ;;  %v931_v49 = vand.u32 2147483647, %v915_v55  ;;  %v6473_v27 = vadd.f32 %v820_v16, %v6379_v0 }
 0x361   : > { %9263 = vst [vmem:[#allocation14_spill] sm:$0xff] %v6446_v34  ;;  %3446 = vperm.xlu0 %4756, %v5942_v25   ;;  %v928_v25 = vand.u32 2147483647, %v912_v59  ;;  %v8907_v12 = vmov 25   ;;  %v6477_v9 = vrot.slane %v6251_v31, %v6458_v63  ;;  %v937_v32 = vadd.f32 %v921_v17, %v821_v60  ;;  %v9274_v10 = vld [vmem:[#allocation19_spill] sm:$0xff]  ;;  %v9282_v17 = vld [vmem:[#allocation24_spill] sm:$0xff] }
 0x362   : > { %v6454_v47 = vpop.permute.xlu1 %2738  ;;  %v938_v44 = vadd.f32 %v922_v4, %v6403_v56  ;;  %v6482_v37 = vadd.f32 %v923_v50, %v823_v61  ;;  %v917_v20 = vsub.f32 %v9274_v10, %v6336_v54  ;;  %v6486_v35 = vadd.f32 %v925_v5, %v825_v22  ;;  %v9277_v61 = vld [vmem:[#allocation20_spill] sm:$0xff]  ;;  %v9278_v22 = vld [vmem:[#allocation21_spill] sm:$0xff]  ;;  %v9289_v10 = vld [vmem:[#allocation30_spill] sm:$0xff] }
 0x363   : > { %9267 = vst [vmem:[#allocation15_spill] sm:$0xff] %v6454_v47  ;;  %3170 = vperm.xlu1 %4751, %v9269_v3   ;;  %v940_v0 = vadd.f32 %v924_v58, %v6408_v57  ;;  %v6489_v39 = vadd.f32 %v927_v36, %v827_v26  ;;  %v942_v53 = vadd.f32 %v926_v42, %v826_v45  ;;  %v9279_v57 = vld [vmem:[#allocation22_spill] sm:$0xff]  ;;  %v9283_v50 = vld [vmem:[#allocation25_spill] sm:$0xff]  ;;  %v9285_v42 = vld [vmem:[#allocation27_spill] sm:$0xff] }
 0x364   : > { %v6491_v14 = vadd.f32 %v929_v33, %v829_v2  ;;  %v944_v59 = vadd.f32 %v928_v25, %v828_v1  ;;  %v6493_v15 = vadd.f32 %v931_v49, %v831_v7  ;;  %v916_v55 = vsub.f32 %v9277_v61, %v6336_v54  ;;  %v9280_v45 = vld [vmem:[#allocation182_spill] sm:$0xff]  ;;  %v9281_v2 = vld [vmem:[#allocation23_spill] sm:$0xff]  ;;  %v9286_v25 = vld [vmem:[#allocation28_spill] sm:$0xff] }
 0x365   : > { %4757 = vset.pattern.permute.xlu0 %v8907_v12  ;;  %v6470_v41 = vpop.permute.xlu0 %3042  ;;  %v919_v16 = vsub.f32 %v9278_v22, %v6336_v54  ;;  %v918_v26 = vsub.f32 %v9279_v57, %v6336_v54  ;;  %v933_v1 = vand.u32 2147483647, %v917_v20  ;;  %v1021_v7 = vsub.f32 %v9281_v2, %v6387_v51  ;;  %v9284_v58 = vld [vmem:[#allocation26_spill] sm:$0xff]  ;;  %v9290_v61 = vld [vmem:[#allocation31_spill] sm:$0xff] }
 0x366   : > { %v6467_v11 = vpop.permute.xlu1 %2746  ;;  %9272 = vst [vmem:[#allocation177_spill] sm:$0xff] %v6470_v41  ;;  %3506 = vperm.xlu0 %4757, %v5880_v13   ;;  %v930_v13 = vand.u32 2147483647, %v914_v18  ;;  %v920_v4 = vsub.f32 %v9282_v17, %v6336_v54  ;;  %v1024_v5 = vsub.f32 %v9283_v50, %v6387_v51  ;;  %v1022_v36 = vsub.f32 %v9284_v58, %v6387_v51  ;;  %v9288_v18 = vld [vmem:[#allocation29_spill] sm:$0xff]  ;;  %v9292_v58 = vld [vmem:[#allocation32_spill] sm:$0xff] }
 0x367   : > { %9271 = vst [vmem:[#allocation17_spill] sm:$0xff] %v6467_v11  ;;  %3178 = vperm.xlu1 %4751, %v9273_v48   ;;  %v1026_v33 = vsub.f32 %v9285_v42, %v6387_v51  ;;  %v1023_v49 = vsub.f32 %v9286_v25, %v6387_v51  ;;  %v1028_v54 = vsub.f32 %v9288_v18, %v6387_v51  ;;  %v932_v2 = vand.u32 2147483647, %v916_v55  ;;  %v9293_v25 = vld [vmem:[#allocation185_spill] sm:$0xff] }
 0x368   : > { %v946_v8 = vadd.f32 %v930_v13, %v6419_v38  ;;  %v1025_v20 = vsub.f32 %v9289_v10, %v6387_v51  ;;  %v1030_v22 = vsub.f32 %v9290_v61, %v6387_v51  ;;  %v935_v17 = vand.u32 2147483647, %v919_v16  ;;  %v9295_v55 = vld [vmem:[#allocation33_spill] sm:$0xff] }
 0x369   : > { %v6497_v56 = vpop.permute.xlu0 %3054  ;;  %v934_v50 = vand.u32 2147483647, %v918_v26  ;;  %v1027_v42 = vsub.f32 %v9292_v58, %v6387_v51  ;;  %v6537_v13 = vadd.f32 %v933_v1, %v833_v40  ;;  %v1037_v18 = vand.u32 2147483647, %v1021_v7 }
 0x36a   : > { %v6495_v60 = vpop.permute.xlu1 %2754  ;;  %9276 = vst [vmem:[#allocation179_spill] sm:$0xff] %v6497_v56  ;;  %3518 = vperm.xlu0 %4757, %v9269_v3   ;;  %v6520_v3 = vsub.s32 7, %v6239_v30  ;;  %v936_v10 = vand.u32 2147483647, %v920_v4  ;;  %v1040_v12 = vand.u32 2147483647, %v1024_v5  ;;  %v1032_v16 = vsub.f32 %v9295_v55, %v6387_v51 }
 0x36b   : > { %9275 = vst [vmem:[#allocation18_spill] sm:$0xff] %v6495_v60  ;;  %3186 = vperm.xlu1 %4751, %v9280_v45   ;;  %v1038_v61 = vand.u32 2147483647, %v1022_v36  ;;  %v1042_v30 = vand.u32 2147483647, %v1026_v33  ;;  %v948_v40 = vadd.f32 %v932_v2, %v6427_v28  ;;  %v950_v1 = vadd.f32 %v934_v50, %v6463_v21  ;;  %v9297_v4 = vld [vmem:[#allocation188_spill] sm:$0xff] }
 0x36c   : > { %9287 = vst [vmem:[#allocation19_spill] sm:$0xff] %v6520_v3  ;;  %v1044_v26 = vand.u32 2147483647, %v1028_v54  ;;  %v1041_v56 = vand.u32 2147483647, %v1025_v20  ;;  %v6543_v41 = vrot.slane %v6251_v31, %v6520_v3  ;;  %v6555_v36 = vadd.f32 %v1037_v18, %v937_v32  ;;  %v9308_v50 = vld [vmem:[#allocation40_spill] sm:$0xff] }
 0x36d   : > { %v6529_v57 = vpop.permute.xlu0 %3062  ;;  %v1046_v58 = vand.u32 2147483647, %v1030_v22  ;;  %v1043_v7 = vand.u32 2147483647, %v1027_v42  ;;  %v952_v31 = vadd.f32 %v936_v10, %v6473_v27  ;;  %v6558_v33 = vadd.f32 %v1040_v12, %v940_v0  ;;  %v9300_v27 = vld [vmem:[#allocation35_spill] sm:$0xff]  ;;  %v9309_v10 = vld [vmem:[#allocation41_spill] sm:$0xff] }
 0x36e   : > { %9291 = vst [vmem:[#allocation20_spill] sm:$0xff] %v6529_v57  ;;  %3526 = vperm.xlu0 %4757, %v9273_v48   ;;  %v1039_v57 = vand.u32 2147483647, %v1023_v49  ;;  %v6548_v48 = vadd.f32 %v935_v17, %v835_v19  ;;  %v9299_v49 = vld [vmem:[#allocation34_spill] sm:$0xff]  ;;  %v1054_v19 = vadd.f32 %v1038_v61, %v938_v44  ;;  %v6562_v54 = vadd.f32 %v1042_v30, %v942_v53  ;;  %v9302_v30 = vld [vmem:[#allocation36_spill] sm:$0xff]  ;;  %v9307_v17 = vld [vmem:[#allocation39_spill] sm:$0xff] }
 0x36f   : > { %3194 = vperm.xlu1 %4751, %v9293_v25   ;;  %v6534_v38 = vpop.permute.xlu1 %2814  ;;  %v1029_v28 = vsub.f32 %v9299_v49, %v6387_v51  ;;  %v1048_v20 = vand.u32 2147483647, %v1032_v16  ;;  %v6567_v22 = vadd.f32 %v1044_v26, %v944_v59  ;;  %v6570_v32 = vadd.f32 %v1046_v58, %v946_v8  ;;  %v9310_v55 = vld [vmem:[#allocation42_spill] sm:$0xff] }
 0x370   : > { %9294 = vst [vmem:[#allocation21_spill] sm:$0xff] %v6534_v38  ;;  %v6565_v21 = vadd.f32 %v1039_v57, %v6482_v37  ;;  %v1034_v12 = vsub.f32 %v9300_v27, %v6387_v51  ;;  %v1059_v2 = vadd.f32 %v1043_v7, %v6489_v39  ;;  %v1031_v44 = vsub.f32 %v9302_v30, %v6387_v51  ;;  %v9303_v37 = vld [vmem:[#allocation37_spill] sm:$0xff]  ;;  %v9304_v57 = vld [vmem:[#allocation191_spill] sm:$0xff]  ;;  %v9312_v7 = vld [vmem:[#allocation44_spill] sm:$0xff] }
 0x371   : > { %v6545_v34 = vpop.permute.xlu0 %3070  ;;  %v1036_v53 = vsub.f32 %v9303_v37, %v6387_v51  ;;  %v1138_v39 = vsub.f32 %v9307_v17, %v6391_v23  ;;  %v1035_v42 = vsub.f32 %v9308_v50, %v6387_v51  ;;  %v6591_v18 = vadd.f32 %v1048_v20, %v948_v40  ;;  %v9317_v50 = vld [vmem:[#allocation48_spill] sm:$0xff] }
 0x372   : > { %9296 = vst [vmem:[#allocation22_spill] sm:$0xff] %v6545_v34  ;;  %3534 = vperm.xlu0 %4757, %v9280_v45   ;;  %v1057_v45 = vadd.f32 %v1041_v56, %v6486_v35  ;;  %v1045_v35 = vand.u32 2147483647, %v1029_v28  ;;  %v9306_v56 = vld [vmem:[#allocation38_spill] sm:$0xff]  ;;  %v1141_v61 = vsub.f32 %v9309_v10, %v6391_v23  ;;  %v1137_v16 = vsub.f32 %v9310_v55, %v6391_v23  ;;  %v9313_v28 = vld [vmem:[#allocation45_spill] sm:$0xff] }
 0x373   : > { %3202 = vperm.xlu1 %4751, %v9297_v4   ;;  %v6552_v5 = vpop.permute.xlu1 %2818  ;;  %v1033_v8 = vsub.f32 %v9306_v56, %v6387_v51  ;;  %v1050_v58 = vand.u32 2147483647, %v1034_v12  ;;  %v1139_v49 = vsub.f32 %v9312_v7, %v6391_v23  ;;  %v1145_v27 = vsub.f32 %v9313_v28, %v6391_v23  ;;  %v9314_v51 = vld [vmem:[#allocation46_spill] sm:$0xff]  ;;  %v9316_v56 = vld [vmem:[#allocation47_spill] sm:$0xff] }
 0x374   : > { %9298 = vst [vmem:[#allocation182_spill] sm:$0xff] %v6552_v5  ;;  %v1140_v40 = vsub.f32 %v9314_v51, %v6391_v23  ;;  %v1047_v30 = vand.u32 2147483647, %v1031_v44  ;;  %v1052_v37 = vand.u32 2147483647, %v1036_v53  ;;  %v1147_v17 = vsub.f32 %v9316_v56, %v6391_v23  ;;  %v6612_v12 = vld [vmem:[%s5167_s16 + $0x8] sm:$0xff] }
 0x375   : > { %v6574_v0 = vpop.permute.xlu0 %3078  ;;  %v1142_v10 = vsub.f32 %v9317_v50, %v6391_v23  ;;  %v9318_v55 = vld [vmem:[#allocation194_spill] sm:$0xff]  ;;  %v1061_v7 = vadd.f32 %v1045_v35, %v6491_v14  ;;  %v1049_v28 = vand.u32 2147483647, %v1033_v8  ;;  %v1154_v51 = vand.u32 2147483647, %v1138_v39  ;;  %v9320_v56 = vld [vmem:[#allocation49_spill] sm:$0xff] }
 0x376   : > { %9301 = vst [vmem:[#allocation23_spill] sm:$0xff] %v6574_v0  ;;  %3542 = vperm.xlu0 %4757, %v9293_v25   ;;  %v9311_v25 = vld [vmem:[#allocation43_spill] sm:$0xff]  ;;  %v1051_v44 = vand.u32 2147483647, %v1035_v42  ;;  %v1157_v53 = vand.u32 2147483647, %v1141_v61  ;;  %v1149_v34 = vsub.f32 %v9320_v56, %v6391_v23  ;;  %v6621_v50 = vadd.f32 %v1050_v58, %v950_v1 }
 0x377   : > { %3210 = vperm.xlu1 %4751, %v9304_v57   ;;  %v6582_v59 = vpop.permute.xlu1 %2826  ;;  %v1143_v26 = vsub.f32 %v9311_v25, %v6391_v23  ;;  %v1155_v5 = vand.u32 2147483647, %v1139_v49  ;;  %v1156_v38 = vand.u32 2147483647, %v1140_v40  ;;  %v1158_v14 = vand.u32 2147483647, %v1142_v10 }
 0x378   : > { %9305 = vst [vmem:[#allocation24_spill] sm:$0xff] %v6582_v59  ;;  %v1161_v59 = vand.u32 2147483647, %v1145_v27  ;;  %v9322_v35 = vld [vmem:[#allocation286_spill] sm:$0xff]  ;;  %v9323_v39 = vmov 23   ;;  %v6634_v1 = vadd.f32 %v1052_v37, %v952_v31  ;;  %v1065_v61 = vadd.f32 %v1049_v28, %v6537_v13  ;;  %v9333_v37 = vld [vmem:[#allocation55_spill] sm:$0xff] }
 0x379   : > { %v6605_v20 = vpop.permute.xlu0 %3086  ;;  %v1159_v0 = vand.u32 2147483647, %v1143_v26  ;;  %v6628_v8 = vrot.slane %v6612_v12, %v9322_v35  ;;  %v9325_v26 = vld [vmem:[#allocation198_spill] sm:$0xff]  ;;  %v6641_v58 = vadd.f32 %v1157_v53, %v1057_v45  ;;  %v1165_v40 = vand.u32 2147483647, %v1149_v34  ;;  %v9329_v34 = vld [vmem:[#allocation52_spill] sm:$0xff] }
 0x37a   : > { %9315 = vst [vmem:[#allocation25_spill] sm:$0xff] %v6605_v20  ;;  %3550 = vperm.xlu0 %4757, %v9297_v4   ;;  %v1153_v20 = vand.u32 2147483647, %v1137_v16  ;;  %v1063_v4 = vadd.f32 %v1047_v30, %v6493_v15  ;;  %v6637_v16 = vadd.f32 %v1154_v51, %v1054_v19  ;;  %v1067_v15 = vadd.f32 %v1051_v44, %v6548_v48  ;;  %v9326_v19 = vld [vmem:[#allocation50_spill] sm:$0xff]  ;;  %v9336_v51 = vld [vmem:[#allocation289_spill] sm:$0xff] }
 0x37b   : > { %3218 = vperm.xlu1 %4751, %v9318_v55   ;;  %v6615_v25 = vpop.permute.xlu1 %2834  ;;  %v6644_v27 = vadd.f32 %v1159_v0, %v1059_v2  ;;  %v6649_v31 = vadd.f32 %v1161_v59, %v1061_v7  ;;  %v1172_v13 = vadd.f32 %v1156_v38, %v6558_v33  ;;  %v1144_v48 = vsub.f32 %v9326_v19, %v6391_v23  ;;  %v9328_v0 = vld [vmem:[#allocation51_spill] sm:$0xff]  ;;  %v9331_v38 = vld [vmem:[#allocation53_spill] sm:$0xff]  ;;  %v9332_v59 = vld [vmem:[#allocation54_spill] sm:$0xff] }
 0x37c   : > { %9319 = vst [vmem:[#allocation26_spill] sm:$0xff] %v6615_v25  ;;  %v1163_v25 = vand.u32 2147483647, %v1147_v17  ;;  %v1169_v49 = vadd.f32 %v1153_v20, %v6555_v36  ;;  %v1174_v36 = vadd.f32 %v1158_v14, %v6562_v54  ;;  %v1151_v2 = vsub.f32 %v9328_v0, %v6391_v23  ;;  %v6673_v54 = vld [vmem:[%s5155_s14 + $0x10] sm:$0xff]  ;;  %v9337_v56 = vld [vmem:[#allocation58_spill] sm:$0xff]  ;;  %v9340_v0 = vld [vmem:[#allocation61_spill] sm:$0xff] }
 0x37d   : > { %v6623_v46 = vpop.permute.xlu0 %3094  ;;  %v1253_v33 = vsub.f32 %v9331_v38, %v6397_v6  ;;  %v1148_v20 = vsub.f32 %v9332_v59, %v6391_v23  ;;  %v1256_v17 = vsub.f32 %v9333_v37, %v6397_v6  ;;  %v6676_v10 = vadd.f32 %v1165_v40, %v1065_v61  ;;  %v9338_v14 = vld [vmem:[#allocation59_spill] sm:$0xff]  ;;  %v9339_v61 = vld [vmem:[#allocation60_spill] sm:$0xff]  ;;  %v9341_v38 = vld [vmem:[#allocation62_spill] sm:$0xff] }
 0x37e   : > { %9321 = vst [vmem:[#allocation27_spill] sm:$0xff] %v6623_v46  ;;  %3558 = vperm.xlu0 %4757, %v9304_v57   ;;  %v6647_v57 = vadd.f32 %v1155_v5, %v6565_v21  ;;  %v6656_v45 = vadd.f32 %v1163_v25, %v1063_v4  ;;  %v1146_v5 = vsub.f32 %v9329_v34, %v6391_v23  ;;  %v9334_v25 = vld [vmem:[#allocation56_spill] sm:$0xff]  ;;  %v1160_v53 = vand.u32 2147483647, %v1144_v48 }
 0x37f   : > { %4754 = vset.pattern.permute.xlu1 %v9323_v39  ;;  %v6631_v42 = vpop.permute.xlu1 %2842  ;;  %v1150_v7 = vsub.f32 %v9334_v25, %v6391_v23  ;;  %v6684_v44 = vrot.slane %v6612_v12, %v9336_v51  ;;  %v1152_v4 = vsub.f32 %v9337_v56, %v6391_v23  ;;  %v1260_v39 = vsub.f32 %v9338_v14, %v6397_v6  ;;  %v9344_v14 = vld [vmem:[#allocation63_spill] sm:$0xff] }
 0x380   : > { %9324 = vst [vmem:[#allocation28_spill] sm:$0xff] %v6631_v42  ;;  %3278 = vperm.xlu1 %4754, %v9325_v26   ;;  %v1254_v26 = vsub.f32 %v9339_v61, %v6397_v6  ;;  %v1167_v40 = vand.u32 2147483647, %v1151_v2  ;;  %v1162_v19 = vand.u32 2147483647, %v1146_v5  ;;  %v1262_v34 = vsub.f32 %v9340_v0, %v6397_v6  ;;  %v6704_v5 = vld [vmem:[%s5155_s14 + $0x20] sm:$0xff] }
 0x381   : > { %v6654_v30 = vpop.permute.xlu0 %3102  ;;  %v1255_v59 = vsub.f32 %v9341_v38, %v6397_v6  ;;  %v8910_v37 = vmov 26   ;;  %v1269_v25 = vand.u32 2147483647, %v1253_v33  ;;  %v1272_v56 = vand.u32 2147483647, %v1256_v17  ;;  %v6708_v61 = vld [vmem:[%s5155_s14 + $0x8] sm:$0xff] }
 0x382   : > { %9327 = vst [vmem:[#allocation29_spill] sm:$0xff] %v6654_v30  ;;  %3566 = vperm.xlu0 %4757, %v9318_v55   ;;  %v9335_v55 = vld [vmem:[#allocation57_spill] sm:$0xff]  ;;  %v1264_v2 = vsub.f32 %v9344_v14, %v6397_v6  ;;  %v1166_v0 = vand.u32 2147483647, %v1150_v7  ;;  %v1176_v17 = vadd.f32 %v1160_v53, %v6567_v22  ;;  %v1168_v14 = vand.u32 2147483647, %v1152_v4 }
 0x383   : > { %v6663_v21 = vpop.permute.xlu1 %2850  ;;  %v1258_v28 = vsub.f32 %v9335_v55, %v6397_v6  ;;  %v1164_v55 = vand.u32 2147483647, %v1148_v20  ;;  %v9346_v33 = vld [vmem:[#allocation65_spill] sm:$0xff]  ;;  %v1270_v46 = vand.u32 2147483647, %v1254_v26  ;;  %v9349_v22 = vld [vmem:[#allocation66_spill] sm:$0xff] }
 0x384   : > { %9330 = vst [vmem:[#allocation30_spill] sm:$0xff] %v6663_v21  ;;  %3282 = vperm.xlu1 %4754, %v6673_v54   ;;  %v1266_v20 = vsub.f32 %v9346_v33, %v6397_v6  ;;  %v1178_v21 = vadd.f32 %v1162_v19, %v6570_v32  ;;  %v1278_v42 = vand.u32 2147483647, %v1262_v34  ;;  %v1271_v60 = vand.u32 2147483647, %v1255_v59  ;;  %v6729_v4 = vld [vmem:[%s5155_s14 + $0x30] sm:$0xff] }
 0x385   : > { %v1274_v38 = vand.u32 2147483647, %v1258_v28  ;;  %v1180_v11 = vadd.f32 %v1164_v55, %v6591_v18  ;;  %v1280_v33 = vand.u32 2147483647, %v1264_v2  ;;  %v1259_v53 = vsub.f32 %v9349_v22, %v6397_v6  ;;  %v9360_v22 = vld [vmem:[#allocation75_spill] sm:$0xff] }
 0x386   : > { %4760 = vset.pattern.permute.xlu0 %v8910_v37  ;;  %v6699_v23 = vpop.permute.xlu0 %3162  ;;  %v9345_v37 = vld [vmem:[#allocation64_spill] sm:$0xff]  ;;  %v6733_v32 = vadd.f32 %v1272_v56, %v1172_v13  ;;  %v1184_v18 = vadd.f32 %v1168_v14, %v6634_v1  ;;  %v1286_v19 = vadd.f32 %v1270_v46, %v6637_v16  ;;  %v6742_v34 = vadd.f32 %v1278_v42, %v1178_v21  ;;  %v9350_v13 = vld [vmem:[#allocation67_spill] sm:$0xff]  ;;  %v9354_v46 = vld [vmem:[#allocation70_spill] sm:$0xff] }
 0x387   : > { %v6696_v48 = vpop.permute.xlu1 %2858  ;;  %9343 = vst [vmem:[#allocation32_spill] sm:$0xff] %v6699_v23  ;;  %3626 = vperm.xlu0 %4760, %v6708_v61   ;;  %v1257_v30 = vsub.f32 %v9345_v37, %v6397_v6  ;;  %v1276_v23 = vand.u32 2147483647, %v1260_v39  ;;  %v6723_v37 = vadd.f32 %v1269_v25, %v1169_v49  ;;  %v1282_v49 = vand.u32 2147483647, %v1266_v20  ;;  %v6760_v16 = vld [vmem:[%s5155_s14 + $0x40] sm:$0xff] }
 0x388   : > { %9342 = vst [vmem:[#allocation31_spill] sm:$0xff] %v6696_v48  ;;  %3290 = vperm.xlu1 %4754, %v6704_v5   ;;  %v6716_v48 = vadd.f32 %v1167_v40, %v1067_v15  ;;  %v1182_v15 = vadd.f32 %v1166_v0, %v6621_v50  ;;  %v6736_v26 = vadd.f32 %v1274_v38, %v1174_v36  ;;  %v9351_v50 = vld [vmem:[#allocation68_spill] sm:$0xff]  ;;  %v1275_v1 = vand.u32 2147483647, %v1259_v53  ;;  %v9358_v20 = vld [vmem:[#allocation73_spill] sm:$0xff]  ;;  %v9359_v14 = vld [vmem:[#allocation74_spill] sm:$0xff] }
 0x389   : > { %v1273_v39 = vand.u32 2147483647, %v1257_v30  ;;  %v6739_v40 = vadd.f32 %v1276_v23, %v1176_v17  ;;  %v6745_v59 = vadd.f32 %v1271_v60, %v6647_v57  ;;  %v1268_v25 = vsub.f32 %v9350_v13, %v6397_v6  ;;  %v9353_v23 = vld [vmem:[#allocation69_spill] sm:$0xff]  ;;  %v9357_v0 = vld [vmem:[#allocation72_spill] sm:$0xff] }
 0x38a   : > { %v6721_v28 = vpop.permute.xlu0 %3174  ;;  %v1261_v30 = vsub.f32 %v9351_v50, %v6397_v6  ;;  %v6753_v36 = vadd.f32 %v1280_v33, %v1180_v11  ;;  %v1370_v56 = vsub.f32 %v9353_v23, %v6477_v9  ;;  %v1263_v42 = vsub.f32 %v9354_v46, %v6397_v6  ;;  %v9356_v11 = vld [vmem:[#allocation71_spill] sm:$0xff]  ;;  %v9362_v50 = vld [vmem:[#allocation77_spill] sm:$0xff] }
 0x38b   : > { %v6719_v7 = vpop.permute.xlu1 %2866  ;;  %9348 = vst [vmem:[#allocation33_spill] sm:$0xff] %v6721_v28  ;;  %3638 = vperm.xlu0 %4760, %v6704_v5   ;;  %v1289_v57 = vadd.f32 %v1273_v39, %v6641_v58  ;;  %v6767_v21 = vadd.f32 %v1282_v49, %v1182_v15  ;;  %v1373_v2 = vsub.f32 %v9356_v11, %v6477_v9  ;;  %v1284_v15 = vand.u32 2147483647, %v1268_v25  ;;  %v9361_v49 = vld [vmem:[#allocation76_spill] sm:$0xff] }
 0x38c   : > { %9347 = vst [vmem:[#allocation185_spill] sm:$0xff] %v6719_v7  ;;  %3298 = vperm.xlu1 %4754, %v6729_v4   ;;  %v1265_v38 = vsub.f32 %v9357_v0, %v6397_v6  ;;  %v1375_v17 = vsub.f32 %v9358_v20, %v6477_v9  ;;  %v1267_v33 = vsub.f32 %v9359_v14, %v6397_v6  ;;  %v1277_v39 = vand.u32 2147483647, %v1261_v30  ;;  %v9364_v20 = vld [vmem:[#allocation78_spill] sm:$0xff] }
 0x38d   : > { %v1377_v53 = vsub.f32 %v9360_v22, %v6477_v9  ;;  %v6781_v58 = vrot.slane %v6612_v12, %v6288_v24  ;;  %v1369_v13 = vsub.f32 %v9361_v49, %v6477_v9  ;;  %v1379_v23 = vsub.f32 %v9362_v50, %v6477_v9  ;;  %v6793_v22 = vld [vmem:[%s5155_s14 + $0x50] sm:$0xff]  ;;  %v6968_v24 = vld [vmem:[%s5155_s14 + $0x28] sm:$0xff] }
 0x38e   : > { %v6751_v55 = vpop.permute.xlu0 %3182  ;;  %v1291_v11 = vadd.f32 %v1275_v1, %v6644_v27  ;;  %v1386_v6 = vand.u32 2147483647, %v1370_v56  ;;  %v1279_v0 = vand.u32 2147483647, %v1263_v42  ;;  %v1371_v14 = vsub.f32 %v9364_v20, %v6477_v9  ;;  %v9366_v50 = vld [vmem:[#allocation79_spill] sm:$0xff]  ;;  %v9367_v27 = vld [vmem:[#allocation80_spill] sm:$0xff] }
 0x38f   : > { %9352 = vst [vmem:[#allocation188_spill] sm:$0xff] %v6751_v55  ;;  %3646 = vperm.xlu0 %4760, %v6729_v4   ;;  %v1389_v30 = vand.u32 2147483647, %v1373_v2  ;;  %v1281_v49 = vand.u32 2147483647, %v1265_v38  ;;  %v1372_v1 = vsub.f32 %v9367_v27, %v6477_v9  ;;  %v9368_v55 = vld [vmem:[#allocation81_spill] sm:$0xff] }
 0x390   : > { %3306 = vperm.xlu1 %4754, %v6760_v16   ;;  %v6763_v60 = vpop.permute.xlu1 %2926  ;;  %v1391_v56 = vand.u32 2147483647, %v1375_v17  ;;  %v1283_v42 = vand.u32 2147483647, %v1267_v33  ;;  %v1393_v20 = vand.u32 2147483647, %v1377_v53  ;;  %v1383_v28 = vsub.f32 %v9368_v55, %v6477_v9 }
 0x391   : > { %9355 = vst [vmem:[#allocation34_spill] sm:$0xff] %v6763_v60  ;;  %v6805_v60 = vadd.f32 %v1284_v15, %v1184_v18  ;;  %v1385_v7 = vand.u32 2147483647, %v1369_v13  ;;  %v1395_v2 = vand.u32 2147483647, %v1379_v23  ;;  %v6810_v47 = vadd.f32 %v1386_v6, %v1286_v19  ;;  %v9370_v17 = vld [vmem:[#allocation82_spill] sm:$0xff] }
 0x392   : > { %v6787_v46 = vpop.permute.xlu0 %3190  ;;  %v1387_v52 = vand.u32 2147483647, %v1371_v14  ;;  %v1374_v33 = vsub.f32 %v9370_v17, %v6477_v9  ;;  %v6816_v53 = vld [vmem:[%s5155_s14 + $0x60] sm:$0xff]  ;;  %v1297_v55 = vadd.f32 %v1281_v49, %v6676_v10  ;;  %v1388_v15 = vand.u32 2147483647, %v1372_v1  ;;  %v9372_v14 = vld [vmem:[#allocation83_spill] sm:$0xff] }
 0x393   : > { %9363 = vst [vmem:[#allocation35_spill] sm:$0xff] %v6787_v46  ;;  %3654 = vperm.xlu0 %4760, %v6760_v16   ;;  %v1381_v46 = vsub.f32 %v9366_v50, %v6477_v9  ;;  %v1295_v50 = vadd.f32 %v1279_v0, %v6656_v45  ;;  %v6825_v45 = vadd.f32 %v1391_v56, %v1291_v11  ;;  %v1399_v23 = vand.u32 2147483647, %v1383_v28  ;;  %v9376_v28 = vld [vmem:[#allocation86_spill] sm:$0xff] }
 0x394   : > { %3314 = vperm.xlu1 %4754, %v6793_v22   ;;  %v6796_v25 = vpop.permute.xlu1 %2934  ;;  %v1401_v6 = vadd.f32 %v1385_v7, %v6723_v37  ;;  %v1390_v11 = vand.u32 2147483647, %v1374_v33  ;;  %v1378_v7 = vsub.f32 %v9376_v28, %v6477_v9  ;;  %v6847_v37 = vld [vmem:[%s5155_s14 + $0x70] sm:$0xff]  ;;  %v9381_v33 = vld [vmem:[#allocation90_spill] sm:$0xff] }
 0x395   : > { %9365 = vst [vmem:[#allocation36_spill] sm:$0xff] %v6796_v25  ;;  %v1293_v25 = vadd.f32 %v1277_v39, %v6649_v31  ;;  %v6822_v31 = vadd.f32 %v1389_v30, %v1289_v57  ;;  %v1397_v19 = vand.u32 2147483647, %v1381_v46  ;;  %v1299_v39 = vadd.f32 %v1283_v42, %v6716_v48  ;;  %v9373_v30 = vld [vmem:[#allocation84_spill] sm:$0xff]  ;;  %v9375_v48 = vld [vmem:[#allocation85_spill] sm:$0xff] }
 0x396   : > { %v6808_v38 = vpop.permute.xlu0 %3198  ;;  %v6831_v0 = vadd.f32 %v1395_v2, %v1295_v50  ;;  %v1485_v57 = vsub.f32 %v9372_v14, %v6543_v41  ;;  %v1376_v10 = vsub.f32 %v9373_v30, %v6477_v9  ;;  %v6840_v46 = vadd.f32 %v1387_v52, %v6745_v59  ;;  %v9378_v59 = vld [vmem:[#allocation87_spill] sm:$0xff]  ;;  %v9379_v42 = vld [vmem:[#allocation88_spill] sm:$0xff]  ;;  %v9380_v50 = vld [vmem:[#allocation89_spill] sm:$0xff] }
 0x397   : > { %9369 = vst [vmem:[#allocation37_spill] sm:$0xff] %v6808_v38  ;;  %3662 = vperm.xlu0 %4760, %v6793_v22   ;;  %v6828_v13 = vadd.f32 %v1393_v20, %v1293_v25  ;;  %v1488_v25 = vsub.f32 %v9375_v48, %v6543_v41  ;;  %v6853_v1 = vadd.f32 %v1397_v19, %v1297_v55  ;;  %v9383_v48 = vld [vmem:[#allocation92_spill] sm:$0xff] }
 0x398   : > { %3322 = vperm.xlu1 %4754, %v6816_v53   ;;  %v6819_v18 = vpop.permute.xlu1 %2938  ;;  %v1404_v52 = vadd.f32 %v1388_v15, %v6733_v32  ;;  %v1490_v56 = vsub.f32 %v9378_v59, %v6543_v41  ;;  %v1380_v20 = vsub.f32 %v9379_v42, %v6477_v9  ;;  %v6860_v2 = vadd.f32 %v1399_v23, %v1299_v39  ;;  %v9382_v15 = vld [vmem:[#allocation91_spill] sm:$0xff] }
 0x399   : > { %9371 = vst [vmem:[#allocation191_spill] sm:$0xff] %v6819_v18  ;;  %v1492_v17 = vsub.f32 %v9380_v50, %v6543_v41  ;;  %v1382_v14 = vsub.f32 %v9381_v33, %v6477_v9  ;;  %v6868_v55 = vrot.slane %v6612_v12, %v6297_v43  ;;  %v1501_v32 = vand.u32 2147483647, %v1485_v57  ;;  %v9385_v50 = vld [vmem:[#allocation93_spill] sm:$0xff] }
 0x39a   : > { %v6837_v49 = vpop.permute.xlu0 %3206  ;;  %v1392_v19 = vand.u32 2147483647, %v1376_v10  ;;  %v1494_v30 = vsub.f32 %v9382_v15, %v6543_v41  ;;  %v1384_v39 = vsub.f32 %v9383_v48, %v6477_v9  ;;  %v1406_v28 = vadd.f32 %v1390_v11, %v6736_v26  ;;  %v9388_v15 = vld [vmem:[#allocation94_spill] sm:$0xff] }
 0x39b   : > { %9374 = vst [vmem:[#allocation38_spill] sm:$0xff] %v6837_v49  ;;  %3670 = vperm.xlu0 %4760, %v6816_v53   ;;  %v1504_v59 = vand.u32 2147483647, %v1488_v25  ;;  %v1394_v42 = vand.u32 2147483647, %v1378_v7  ;;  %v1496_v33 = vsub.f32 %v9385_v50, %v6543_v41  ;;  %v9386_v49 = vmov 24  }
 0x39c   : > { %3330 = vperm.xlu1 %4754, %v6847_v37   ;;  %v6850_v27 = vpop.permute.xlu1 %2946  ;;  %v1506_v57 = vand.u32 2147483647, %v1490_v56  ;;  %v1396_v10 = vand.u32 2147483647, %v1380_v20  ;;  %v1486_v9 = vsub.f32 %v9388_v15, %v6543_v41  ;;  %v6886_v48 = vld [vmem:[%s5155_s14] sm:$0xff]  ;;  %v9389_v25 = vld [vmem:[#allocation95_spill] sm:$0xff]  ;;  %v1408_v56 = vadd.f32 %v1392_v19, %v6739_v40 }
 0x39d   : > { %9377 = vst [vmem:[#allocation39_spill] sm:$0xff] %v6850_v27  ;;  %v1508_v26 = vand.u32 2147483647, %v1492_v17  ;;  %v1398_v11 = vand.u32 2147483647, %v1382_v14  ;;  %v1498_v7 = vsub.f32 %v9389_v25, %v6543_v41  ;;  %v6896_v27 = vadd.f32 %v1504_v59, %v1404_v52  ;;  %v9391_v17 = vld [vmem:[#allocation97_spill] sm:$0xff] }
 0x39e   : > { %v6874_v23 = vpop.permute.xlu0 %3214  ;;  %v1510_v20 = vand.u32 2147483647, %v1494_v30  ;;  %v1410_v15 = vadd.f32 %v1394_v42, %v6742_v34  ;;  %v1512_v18 = vand.u32 2147483647, %v1496_v33  ;;  %v1500_v14 = vsub.f32 %v9391_v17, %v6543_v41  ;;  %v9394_v52 = vld [vmem:[#allocation98_spill] sm:$0xff] }
 0x39f   : > { %9384 = vst [vmem:[#allocation40_spill] sm:$0xff] %v6874_v23  ;;  %3678 = vperm.xlu0 %4760, %v6847_v37   ;;  %v6893_v23 = vadd.f32 %v1501_v32, %v1401_v6  ;;  %v8913_v25 = vmov 27   ;;  %v6906_v6 = vadd.f32 %v1506_v57, %v1406_v28  ;;  %v1412_v40 = vadd.f32 %v1396_v10, %v6753_v36  ;;  %v9395_v36 = vld [vmem:[#allocation99_spill] sm:$0xff]  ;;  %v9396_v57 = vld [vmem:[#allocation100_spill] sm:$0xff] }
 0x3a0   : > { %4755 = vset.pattern.permute.xlu1 %v9386_v49  ;;  %v6880_v38 = vpop.permute.xlu1 %2954  ;;  %v9390_v49 = vld [vmem:[#allocation96_spill] sm:$0xff]  ;;  %v1502_v32 = vand.u32 2147483647, %v1486_v9  ;;  %v1489_v19 = vsub.f32 %v9394_v52, %v6543_v41  ;;  %v6913_v34 = vadd.f32 %v1508_v26, %v1408_v56  ;;  %v1414_v30 = vadd.f32 %v1398_v11, %v6767_v21  ;;  %v9397_v26 = vld [vmem:[#allocation101_spill] sm:$0xff]  ;;  %v9398_v21 = vld [vmem:[#allocation102_spill] sm:$0xff] }
 0x3a1   : > { %9387 = vst [vmem:[#allocation41_spill] sm:$0xff] %v6880_v38  ;;  %3390 = vperm.xlu1 %4755, %v6886_v48   ;;  %v1487_v50 = vsub.f32 %v9390_v49, %v6543_v41  ;;  %v1400_v38 = vand.u32 2147483647, %v1384_v39  ;;  %v1514_v39 = vand.u32 2147483647, %v1498_v7  ;;  %v6916_v42 = vadd.f32 %v1510_v20, %v1410_v15  ;;  %v9401_v20 = vld [vmem:[#allocation103_spill] sm:$0xff] }
 0x3a2   : > { %v1602_v33 = vsub.f32 %v9395_v36, %v6628_v8  ;;  %v1491_v10 = vsub.f32 %v9396_v57, %v6543_v41  ;;  %v6923_v9 = vadd.f32 %v1512_v18, %v1412_v40  ;;  %v1516_v17 = vand.u32 2147483647, %v1500_v14  ;;  %v9402_v18 = vld [vmem:[#allocation104_spill] sm:$0xff] }
 0x3a3   : > { %4761 = vset.pattern.permute.xlu0 %v8913_v25  ;;  %v6904_v49 = vpop.permute.xlu0 %3274  ;;  %v1503_v59 = vand.u32 2147483647, %v1487_v50  ;;  %v1416_v28 = vadd.f32 %v1400_v38, %v6805_v60  ;;  %v1605_v56 = vsub.f32 %v9397_v26, %v6628_v8  ;;  %v1493_v11 = vsub.f32 %v9398_v21, %v6543_v41  ;;  %v6939_v14 = vld [vmem:[%s5155_s14 + $0x18] sm:$0xff] }
 0x3a4   : > { %v6901_v43 = vpop.permute.xlu1 %2962  ;;  %9393 = vst [vmem:[#allocation43_spill] sm:$0xff] %v6904_v49  ;;  %3738 = vperm.xlu0 %4761, %v6886_v48   ;;  %v1518_v60 = vadd.f32 %v1502_v32, %v6810_v47  ;;  %v1505_v38 = vand.u32 2147483647, %v1489_v19  ;;  %v1607_v15 = vsub.f32 %v9401_v20, %v6628_v8  ;;  %v1495_v40 = vsub.f32 %v9402_v18, %v6543_v41  ;;  %v9403_v47 = vld [vmem:[#allocation105_spill] sm:$0xff]  ;;  %v9404_v19 = vld [vmem:[#allocation106_spill] sm:$0xff]  ;;  %v9405_v20 = vld [vmem:[#allocation107_spill] sm:$0xff] }
 0x3a5   : > { %9392 = vst [vmem:[#allocation42_spill] sm:$0xff] %v6901_v43  ;;  %3398 = vperm.xlu1 %4755, %v6673_v54   ;;  %v6943_v52 = vadd.f32 %v1514_v39, %v1414_v30  ;;  %v6946_v36 = vadd.f32 %v1503_v59, %v6840_v46  ;;  %v1609_v32 = vsub.f32 %v9403_v47, %v6628_v8  ;;  %v1618_v26 = vand.u32 2147483647, %v1602_v33  ;;  %v9406_v25 = vld [vmem:[#allocation108_spill] sm:$0xff]  ;;  %v9407_v59 = vld [vmem:[#allocation109_spill] sm:$0xff] }
 0x3a6   : > { %v1497_v57 = vsub.f32 %v9404_v19, %v6543_v41  ;;  %v1507_v21 = vand.u32 2147483647, %v1491_v10  ;;  %v1611_v18 = vsub.f32 %v9405_v20, %v6628_v8  ;;  %v6956_v30 = vadd.f32 %v1516_v17, %v1416_v28  ;;  %v9410_v20 = vld [vmem:[#allocation110_spill] sm:$0xff]  ;;  %v9411_v28 = vld [vmem:[#allocation111_spill] sm:$0xff] }
 0x3a7   : > { %v6931_v50 = vpop.permute.xlu0 %3286  ;;  %v1621_v39 = vand.u32 2147483647, %v1605_v56  ;;  %v1509_v46 = vand.u32 2147483647, %v1493_v11  ;;  %v1613_v49 = vsub.f32 %v9407_v59, %v6628_v8  ;;  %v1521_v33 = vadd.f32 %v1505_v38, %v6822_v31 }
 0x3a8   : > { %v6929_v7 = vpop.permute.xlu1 %2970  ;;  %9400 = vst [vmem:[#allocation45_spill] sm:$0xff] %v6931_v50  ;;  %3750 = vperm.xlu0 %4761, %v6939_v14   ;;  %v1499_v50 = vsub.f32 %v9406_v25, %v6543_v41  ;;  %v1623_v10 = vand.u32 2147483647, %v1607_v15  ;;  %v1511_v19 = vand.u32 2147483647, %v1495_v40  ;;  %v1601_v43 = vsub.f32 %v9410_v20, %v6628_v8 }
 0x3a9   : > { %9399 = vst [vmem:[#allocation44_spill] sm:$0xff] %v6929_v7  ;;  %3402 = vperm.xlu1 %4755, %v6939_v14   ;;  %v1625_v41 = vand.u32 2147483647, %v1609_v32  ;;  %v1513_v25 = vand.u32 2147483647, %v1497_v57  ;;  %v1615_v17 = vsub.f32 %v9411_v28, %v6628_v8  ;;  %v6976_v31 = vrot.slane %v6612_v12, %v6308_v29  ;;  %v9412_v57 = vld [vmem:[#allocation114_spill] sm:$0xff] }
 0x3aa   : > { %v6978_v56 = vadd.f32 %v1618_v26, %v1518_v60  ;;  %v1523_v11 = vadd.f32 %v1507_v21, %v6825_v45  ;;  %v1627_v38 = vand.u32 2147483647, %v1611_v18  ;;  %v1515_v15 = vand.u32 2147483647, %v1499_v50  ;;  %v9415_v45 = vld [vmem:[#allocation116_spill] sm:$0xff] }
 0x3ab   : > { %v6962_v7 = vpop.permute.xlu0 %3294  ;;  %v6981_v40 = vadd.f32 %v1621_v39, %v1521_v33  ;;  %v1525_v59 = vadd.f32 %v1509_v46, %v6828_v13  ;;  %v1629_v32 = vand.u32 2147483647, %v1613_v49  ;;  %v1604_v20 = vsub.f32 %v9412_v57, %v6628_v8  ;;  %v6996_v21 = vld [vmem:[%s5155_s14 + $0x38] sm:$0xff]  ;;  %v9417_v39 = vld [vmem:[#allocation118_spill] sm:$0xff] }
 0x3ac   : > { %v6960_v47 = vpop.permute.xlu1 %2978  ;;  %9409 = vst [vmem:[#allocation47_spill] sm:$0xff] %v6962_v7  ;;  %3758 = vperm.xlu0 %4761, %v6968_v24   ;;  %v1527_v60 = vadd.f32 %v1511_v19, %v6831_v0  ;;  %v1617_v26 = vand.u32 2147483647, %v1601_v43  ;;  %v1606_v50 = vsub.f32 %v9415_v45, %v6628_v8  ;;  %9416 = vst [vmem:[#allocation49_spill] sm:$0xff] %v6996_v21  ;;  %v1631_v18 = vand.u32 2147483647, %v1615_v17 }
 0x3ad   : > { %9408 = vst [vmem:[#allocation46_spill] sm:$0xff] %v6960_v47  ;;  %3410 = vperm.xlu1 %4755, %v6968_v24   ;;  %v6990_v47 = vadd.f32 %v1623_v10, %v1523_v11  ;;  %v7000_v13 = vadd.f32 %v1625_v41, %v1525_v59  ;;  %v1529_v49 = vadd.f32 %v1513_v25, %v6853_v1  ;;  %v9418_v33 = vld [vmem:[#allocation112_spill] sm:$0xff]  ;;  %v9420_v41 = vld [vmem:[#allocation113_spill] sm:$0xff]  ;;  %v1620_v25 = vand.u32 2147483647, %v1604_v20  ;;  %v9421_v17 = vld [vmem:[#allocation115_spill] sm:$0xff] }
 0x3ae   : > { %v1608_v46 = vsub.f32 %v9417_v39, %v6628_v8  ;;  %v7005_v0 = vadd.f32 %v1627_v38, %v1527_v60  ;;  %v1531_v43 = vadd.f32 %v1515_v15, %v6860_v2  ;;  %v1603_v10 = vsub.f32 %v9418_v33, %v6628_v8  ;;  %v9419_v19 = vld [vmem:[#allocation120_spill] sm:$0xff]  ;;  %v9423_v15 = vld [vmem:[#allocation117_spill] sm:$0xff]  ;;  %v9424_v39 = vld [vmem:[#allocation122_spill] sm:$0xff] }
 0x3af   : > { %v6988_v7 = vpop.permute.xlu0 %3302  ;;  %v1610_v11 = vsub.f32 %v9419_v19, %v6628_v8  ;;  %v7012_v57 = vadd.f32 %v1629_v32, %v1529_v49  ;;  %v1717_v1 = vsub.f32 %v9420_v41, %v6684_v44  ;;  %v1720_v59 = vsub.f32 %v9421_v17, %v6684_v44  ;;  %v7026_v32 = vld [vmem:[%s5155_s14 + $0x48] sm:$0xff] }
 0x3b0   : > { %v6986_v28 = vpop.permute.xlu1 %2986  ;;  %9414 = vst [vmem:[#allocation194_spill] sm:$0xff] %v6988_v7  ;;  %3766 = vperm.xlu0 %4761, %v6996_v21   ;;  %v1633_v38 = vadd.f32 %v1617_v26, %v6893_v23  ;;  %v1622_v2 = vand.u32 2147483647, %v1606_v50  ;;  %v1722_v60 = vsub.f32 %v9423_v15, %v6684_v44  ;;  %v1612_v33 = vsub.f32 %v9424_v39, %v6628_v8  ;;  %v9427_v23 = vld [vmem:[#allocation119_spill] sm:$0xff]  ;;  %v9428_v50 = vld [vmem:[#allocation124_spill] sm:$0xff]  ;;  %v9429_v39 = vld [vmem:[#allocation121_spill] sm:$0xff] }
 0x3b1   : > { %9413 = vst [vmem:[#allocation48_spill] sm:$0xff] %v6986_v28  ;;  %3418 = vperm.xlu1 %4755, %v6996_v21   ;;  %9425 = vst [vmem:[#allocation198_spill] sm:$0xff] %v7026_v32  ;;  %v7032_v20 = vadd.f32 %v1631_v18, %v1531_v43  ;;  %v1624_v19 = vand.u32 2147483647, %v1608_v46  ;;  %v1724_v26 = vsub.f32 %v9427_v23, %v6684_v44  ;;  %v1619_v17 = vand.u32 2147483647, %v1603_v10 }
 0x3b2   : > { %v1614_v41 = vsub.f32 %v9428_v50, %v6628_v8  ;;  %v1626_v15 = vand.u32 2147483647, %v1610_v11  ;;  %v9430_v7 = vld [vmem:[#allocation126_spill] sm:$0xff]  ;;  %v1733_v28 = vand.u32 2147483647, %v1717_v1  ;;  %v1636_v18 = vadd.f32 %v1620_v25, %v6896_v27  ;;  %v9431_v46 = vld [vmem:[#allocation128_spill] sm:$0xff] }
 0x3b3   : > { %v7018_v45 = vpop.permute.xlu0 %3310  ;;  %v1736_v43 = vand.u32 2147483647, %v1720_v59  ;;  %v1718_v29 = vsub.f32 %v9431_v46, %v6684_v44  ;;  %v1638_v23 = vadd.f32 %v1622_v2, %v6906_v6  ;;  %v1738_v50 = vand.u32 2147483647, %v1722_v60  ;;  %v9433_v11 = vld [vmem:[#allocation123_spill] sm:$0xff]  ;;  %v9435_v6 = vld [vmem:[#allocation125_spill] sm:$0xff] }
 0x3b4   : > { %9422 = vst [vmem:[#allocation286_spill] sm:$0xff] %v7018_v45  ;;  %3774 = vperm.xlu0 %4761, %v7026_v32   ;;  %v1726_v45 = vsub.f32 %v9429_v39, %v6684_v44  ;;  %v1628_v10 = vand.u32 2147483647, %v1612_v33  ;;  %v1728_v21 = vsub.f32 %v9433_v11, %v6684_v44  ;;  %v7051_v39 = vld [vmem:[%s5155_s14 + $0x58] sm:$0xff]  ;;  %v1640_v27 = vadd.f32 %v1624_v19, %v6913_v34  ;;  %v9436_v11 = vld [vmem:[#allocation127_spill] sm:$0xff] }
 0x3b5   : > { %3426 = vperm.xlu1 %4755, %v7026_v32   ;;  %v7029_v49 = vpop.permute.xlu1 %3046  ;;  %v1630_v1 = vand.u32 2147483647, %v1614_v41  ;;  %v1730_v25 = vsub.f32 %v9435_v6, %v6684_v44  ;;  %v7061_v59 = vadd.f32 %v1619_v17, %v6946_v36  ;;  %v1642_v2 = vadd.f32 %v1626_v15, %v6916_v42  ;;  %v9437_v34 = vld [vmem:[#allocation129_spill] sm:$0xff] }
 0x3b6   : > { %9426 = vst [vmem:[#allocation50_spill] sm:$0xff] %v7029_v49  ;;  %v1616_v49 = vsub.f32 %v9430_v7, %v6628_v8  ;;  %v1740_v7 = vand.u32 2147483647, %v1724_v26  ;;  %v1742_v60 = vand.u32 2147483647, %v1726_v45  ;;  %v7064_v46 = vadd.f32 %v1733_v28, %v1633_v38  ;;  %v7080_v28 = vld [vmem:[%s5155_s14 + $0x68] sm:$0xff] }
 0x3b7   : > { %v7045_v32 = vpop.permute.xlu0 %3318  ;;  %v1834_v19 = vsub.f32 %v9437_v34, %v6781_v58  ;;  %v7072_v41 = vadd.f32 %v1736_v43, %v1636_v18  ;;  %v1644_v36 = vadd.f32 %v1628_v10, %v6923_v9  ;;  %v1744_v17 = vand.u32 2147483647, %v1728_v21  ;;  %v9440_v18 = vld [vmem:[#allocation132_spill] sm:$0xff]  ;;  %v9441_v10 = vld [vmem:[#allocation134_spill] sm:$0xff] }
 0x3b8   : > { %9432 = vst [vmem:[#allocation51_spill] sm:$0xff] %v7045_v32  ;;  %3782 = vperm.xlu0 %4761, %v7051_v39   ;;  %v1632_v33 = vand.u32 2147483647, %v1616_v49  ;;  %v1734_v32 = vand.u32 2147483647, %v1718_v29  ;;  %v7077_v42 = vrot.slane %v6612_v12, %v6373_v62  ;;  %v7086_v29 = vadd.f32 %v1738_v50, %v1638_v23  ;;  %v9442_v50 = vld [vmem:[#allocation130_spill] sm:$0xff] }
 0x3b9   : > { %3434 = vperm.xlu1 %4755, %v7051_v39   ;;  %v7054_v8 = vpop.permute.xlu1 %3050  ;;  %v7088_v38 = vadd.f32 %v1740_v7, %v1640_v27  ;;  %v1646_v9 = vadd.f32 %v1630_v1, %v6943_v52  ;;  %v1746_v21 = vand.u32 2147483647, %v1730_v25  ;;  %v7091_v49 = vadd.f32 %v1742_v60, %v1642_v2  ;;  %v9443_v52 = vld [vmem:[#allocation136_spill] sm:$0xff] }
 0x3ba   : > { %9434 = vst [vmem:[#allocation52_spill] sm:$0xff] %v7054_v8  ;;  %v1732_v8 = vsub.f32 %v9436_v11, %v6684_v44  ;;  %v1648_v15 = vadd.f32 %v1632_v33, %v6956_v30  ;;  %v1721_v43 = vsub.f32 %v9440_v18, %v6684_v44  ;;  %v1723_v6 = vsub.f32 %v9441_v10, %v6684_v44  ;;  %v9444_v30 = vld [vmem:[#allocation138_spill] sm:$0xff]  ;;  %v7108_v2 = vld [vmem:[%s5155_s14 + $0x78] sm:$0xff]  ;;  %v9450_v18 = vld [vmem:[#allocation131_spill] sm:$0xff] }
 0x3bb   : > { %v7070_v26 = vpop.permute.xlu0 %3326  ;;  %v1750_v34 = vadd.f32 %v1734_v32, %v6978_v56  ;;  %v1850_v23 = vand.u32 2147483647, %v1834_v19  ;;  %v1719_v27 = vsub.f32 %v9442_v50, %v6684_v44  ;;  %v7101_v7 = vadd.f32 %v1744_v17, %v1644_v36  ;;  %9445 = vst [vmem:[#allocation55_spill] sm:$0xff] %v7108_v2  ;;  %v9447_v32 = vld [vmem:[#allocation140_spill] sm:$0xff]  ;;  %v9448_v33 = vld [vmem:[#allocation142_spill] sm:$0xff] }
 0x3bc   : > { %9438 = vst [vmem:[#allocation53_spill] sm:$0xff] %v7070_v26  ;;  %3790 = vperm.xlu0 %4761, %v7080_v28   ;;  %v1748_v11 = vand.u32 2147483647, %v1732_v8  ;;  %v1725_v1 = vsub.f32 %v9443_v52, %v6684_v44  ;;  %v1727_v25 = vsub.f32 %v9444_v30, %v6684_v44  ;;  %v7114_v56 = vadd.f32 %v1746_v21, %v1646_v9  ;;  %v9451_v52 = vld [vmem:[#allocation133_spill] sm:$0xff] }
 0x3bd   : > { %3442 = vperm.xlu1 %4755, %v7080_v28   ;;  %v7083_v45 = vpop.permute.xlu1 %3058  ;;  %v1729_v8 = vsub.f32 %v9447_v32, %v6684_v44  ;;  %v1731_v19 = vsub.f32 %v9448_v33, %v6684_v44  ;;  %v1737_v17 = vand.u32 2147483647, %v1721_v43  ;;  %v1837_v10 = vsub.f32 %v9450_v18, %v6781_v58  ;;  %v9452_v32 = vld [vmem:[#allocation144_spill] sm:$0xff]  ;;  %v9453_v44 = vld [vmem:[#allocation135_spill] sm:$0xff] }
 0x3be   : > { %9439 = vst [vmem:[#allocation54_spill] sm:$0xff] %v7083_v45  ;;  %v1739_v50 = vand.u32 2147483647, %v1723_v6  ;;  %v1839_v30 = vsub.f32 %v9451_v52, %v6781_v58  ;;  %v7126_v26 = vadd.f32 %v1748_v11, %v1648_v15  ;;  %v7128_v9 = vadd.f32 %v1850_v23, %v1750_v34  ;;  %v9457_v34 = vld [vmem:[#allocation139_spill] sm:$0xff] }
 0x3bf   : > { %v7120_v36 = vpop.permute.xlu0 %3334  ;;  %v1735_v21 = vand.u32 2147483647, %v1719_v27  ;;  %v1741_v45 = vand.u32 2147483647, %v1725_v1  ;;  %v1841_v33 = vsub.f32 %v9453_v44, %v6781_v58  ;;  %v1743_v43 = vand.u32 2147483647, %v1727_v25 }
 0x3c0   : > { %3798 = vperm.xlu0 %4761, %v7108_v2   ;;  %9449 = vst [vmem:[#allocation57_spill] sm:$0xff] %v7120_v36  ;;  %v9454_v36 = vld [vmem:[#allocation137_spill] sm:$0xff]  ;;  %v9455_v6 = vmov 25   ;;  %v8924_v15 = vmov 28   ;;  %v1745_v11 = vand.u32 2147483647, %v1729_v8  ;;  %v1845_v23 = vsub.f32 %v9457_v34, %v6781_v58 }
 0x3c1   : > { %3450 = vperm.xlu1 %4755, %v7108_v2   ;;  %v7111_v60 = vpop.permute.xlu1 %3066  ;;  %v1843_v18 = vsub.f32 %v9454_v36, %v6781_v58  ;;  %v1747_v27 = vand.u32 2147483647, %v1731_v19  ;;  %v9458_v1 = vld [vmem:[#allocation141_spill] sm:$0xff]  ;;  %v1753_v25 = vadd.f32 %v1737_v17, %v6981_v40  ;;  %v1853_v36 = vand.u32 2147483647, %v1837_v10  ;;  %v9460_v19 = vld [vmem:[#allocation148_spill] sm:$0xff] }
 0x3c2   : > { %9446 = vst [vmem:[#allocation56_spill] sm:$0xff] %v7111_v60  ;;  %v1833_v60 = vsub.f32 %v9452_v32, %v6781_v58  ;;  %v1847_v52 = vsub.f32 %v9458_v1, %v6781_v58  ;;  %v1755_v32 = vadd.f32 %v1739_v50, %v6990_v47  ;;  %v1855_v44 = vand.u32 2147483647, %v1839_v30 }
 0x3c3   : > { %v1757_v2 = vadd.f32 %v1741_v45, %v7000_v13  ;;  %v1759_v40 = vadd.f32 %v1743_v43, %v7005_v0  ;;  %v1859_v17 = vand.u32 2147483647, %v1843_v18  ;;  %v1761_v47 = vadd.f32 %v1745_v11, %v7012_v57  ;;  %v9463_v13 = vld [vmem:[#allocation146_spill] sm:$0xff]  ;;  %v9464_v43 = vld [vmem:[#allocation145_spill] sm:$0xff] }
 0x3c4   : > { %4764 = vset.pattern.permute.xlu0 %v8924_v15  ;;  %v1849_v8 = vand.u32 2147483647, %v1833_v60  ;;  %v9459_v15 = vld [vmem:[#allocation143_spill] sm:$0xff]  ;;  %v7153_v1 = vpop.permute.xlu0 %3394  ;;  %v1763_v60 = vadd.f32 %v1747_v27, %v7032_v20  ;;  %v1863_v50 = vand.u32 2147483647, %v1847_v52  ;;  %v7163_v30 = vadd.f32 %v1853_v36, %v1753_v25  ;;  %v9467_v52 = vld [vmem:[#allocation154_spill] sm:$0xff] }
 0x3c5   : > { %4758 = vset.pattern.permute.xlu1 %v9455_v6  ;;  %v7137_v62 = vpop.permute.xlu1 %3074  ;;  %3858 = vperm.xlu0 %4764, %v6708_v61   ;;  %v1751_v6 = vadd.f32 %v1735_v21, %v7061_v59  ;;  %v1949_v34 = vsub.f32 %v9459_v15, %v6868_v55  ;;  %9461 = vst [vmem:[#allocation58_spill] sm:$0xff] %v7153_v1  ;;  %v1861_v59 = vand.u32 2147483647, %v1845_v23  ;;  %v9465_v15 = vld [vmem:[#allocation150_spill] sm:$0xff]  ;;  %v9466_v23 = vld [vmem:[#allocation152_spill] sm:$0xff] }
 0x3c6   : > { %9456 = vst [vmem:[#allocation289_spill] sm:$0xff] %v7137_v62  ;;  %3510 = vperm.xlu1 %4758, %v6708_v61   ;;  %v1836_v62 = vsub.f32 %v9460_v19, %v6781_v58  ;;  %v1857_v61 = vand.u32 2147483647, %v1841_v33  ;;  %v7165_v21 = vadd.f32 %v1855_v44, %v1755_v32  ;;  %v1835_v0 = vsub.f32 %v9463_v13, %v6781_v58  ;;  %v9471_v19 = vld [vmem:[#allocation156_spill] sm:$0xff] }
 0x3c7   : > { %v7171_v45 = vrot.slane %v6612_v12, %v6458_v63  ;;  %v1865_v57 = vadd.f32 %v1849_v8, %v7064_v46  ;;  %v1965_v33 = vand.u32 2147483647, %v1949_v34  ;;  %v1838_v11 = vsub.f32 %v9465_v15, %v6781_v58  ;;  %v9470_v8 = vld [vmem:[#allocation147_spill] sm:$0xff] }
 0x3c8   : > { %v1852_v20 = vand.u32 2147483647, %v1836_v62  ;;  %v7176_v18 = vadd.f32 %v1857_v61, %v1757_v2  ;;  %v1840_v27 = vsub.f32 %v9466_v23, %v6781_v58  ;;  %v1842_v25 = vsub.f32 %v9467_v52, %v6781_v58  ;;  %v7194_v2 = vpop.permute.xlu0 %3406  ;;  %v9474_v15 = vld [vmem:[#allocation151_spill] sm:$0xff] }
 0x3c9   : > { %v7157_v10 = vpop.permute.xlu1 %3082  ;;  %3870 = vperm.xlu0 %4764, %v6704_v5   ;;  %v7186_v32 = vadd.f32 %v1859_v17, %v1759_v40  ;;  %v7188_v46 = vadd.f32 %v1861_v59, %v1761_v47  ;;  %v7190_v62 = vadd.f32 %v1863_v50, %v1763_v60  ;;  %9469 = vst [vmem:[#allocation61_spill] sm:$0xff] %v7194_v2  ;;  %v1851_v44 = vand.u32 2147483647, %v1835_v0  ;;  %v9472_v40 = vld [vmem:[#allocation158_spill] sm:$0xff] }
 0x3ca   : > { %9462 = vst [vmem:[#allocation59_spill] sm:$0xff] %v7157_v10  ;;  %3514 = vperm.xlu1 %4758, %v6673_v54   ;;  %v1952_v54 = vsub.f32 %v9464_v43, %v6868_v55  ;;  %v1954_v34 = vsub.f32 %v9470_v8, %v6868_v55  ;;  %v1844_v61 = vsub.f32 %v9471_v19, %v6781_v58  ;;  %v1854_v13 = vand.u32 2147483647, %v1838_v11  ;;  %v9476_v8 = vld [vmem:[#allocation153_spill] sm:$0xff] }
 0x3cb   : > { %v1846_v17 = vsub.f32 %v9472_v40, %v6781_v58  ;;  %v7202_v47 = vadd.f32 %v1965_v33, %v1865_v57  ;;  %v1868_v59 = vadd.f32 %v1852_v20, %v7072_v41  ;;  %v1856_v43 = vand.u32 2147483647, %v1840_v27  ;;  %v9477_v57 = vld [vmem:[#allocation155_spill] sm:$0xff]  ;;  %v9478_v41 = vld [vmem:[#allocation160_spill] sm:$0xff] }
 0x3cc   : > { %v1968_v60 = vand.u32 2147483647, %v1952_v54  ;;  %v1858_v0 = vand.u32 2147483647, %v1842_v25  ;;  %v1958_v23 = vsub.f32 %v9474_v15, %v6868_v55  ;;  %v1960_v19 = vsub.f32 %v9476_v8, %v6868_v55  ;;  %v9479_v15 = vld [vmem:[#allocation162_spill] sm:$0xff] }
 0x3cd   : > { %v7184_v36 = vpop.permute.xlu1 %3090  ;;  %3878 = vperm.xlu0 %4764, %v6729_v4   ;;  %v1962_v33 = vsub.f32 %v9477_v57, %v6868_v55  ;;  %v1848_v20 = vsub.f32 %v9478_v41, %v6781_v58  ;;  %v7219_v54 = vadd.f32 %v1851_v44, %v1751_v6  ;;  %v1970_v11 = vand.u32 2147483647, %v1954_v34  ;;  %v7229_v58 = vpop.permute.xlu0 %3414 }
 0x3ce   : > { %9468 = vst [vmem:[#allocation60_spill] sm:$0xff] %v7184_v36  ;;  %3522 = vperm.xlu1 %4758, %v6704_v5   ;;  %v9473_v5 = vld [vmem:[#allocation149_spill] sm:$0xff]  ;;  %v1860_v27 = vand.u32 2147483647, %v1844_v61  ;;  %v1862_v25 = vand.u32 2147483647, %v1846_v17  ;;  %v7221_v40 = vadd.f32 %v1968_v60, %v1868_v59  ;;  %v1950_v8 = vsub.f32 %v9479_v15, %v6868_v55 }
 0x3cf   : > { %v1956_v50 = vsub.f32 %v9473_v5, %v6868_v55  ;;  %v7227_v57 = vrot.slane %v6612_v12, %v6520_v3  ;;  %9480 = vst [vmem:[#allocation63_spill] sm:$0xff] %v7229_v58  ;;  %v1872_v6 = vadd.f32 %v1856_v43, %v7088_v38  ;;  %v1874_v44 = vadd.f32 %v1858_v0, %v7091_v49  ;;  %v9481_v60 = vld [vmem:[#allocation157_spill] sm:$0xff]  ;;  %v9482_v38 = vld [vmem:[#allocation159_spill] sm:$0xff] }
 0x3d0   : > { %v1974_v34 = vand.u32 2147483647, %v1958_v23  ;;  %v1976_v61 = vand.u32 2147483647, %v1960_v19  ;;  %v1978_v17 = vand.u32 2147483647, %v1962_v33  ;;  %v1876_v12 = vadd.f32 %v1860_v27, %v7101_v7 }
 0x3d1   : > { %v7209_v52 = vpop.permute.xlu1 %3098  ;;  %3886 = vperm.xlu0 %4764, %v6760_v16   ;;  %v1972_v5 = vand.u32 2147483647, %v1956_v50  ;;  %v1864_v59 = vand.u32 2147483647, %v1848_v20  ;;  %v1964_v50 = vsub.f32 %v9481_v60, %v6868_v55  ;;  %v2066_v49 = vsub.f32 %v9482_v38, %v6976_v31  ;;  %v9484_v23 = vld [vmem:[#allocation164_spill] sm:$0xff]  ;;  %v9487_v27 = vld [vmem:[#allocation170_spill] sm:$0xff] }
 0x3d2   : > { %9475 = vst [vmem:[#allocation62_spill] sm:$0xff] %v7209_v52  ;;  %3530 = vperm.xlu1 %4758, %v6729_v4   ;;  %v1870_v4 = vadd.f32 %v1854_v13, %v7086_v29  ;;  %v1878_v29 = vadd.f32 %v1862_v25, %v7114_v56  ;;  %v9483_v13 = vld [vmem:[#allocation166_spill] sm:$0xff]  ;;  %v1966_v0 = vand.u32 2147483647, %v1950_v8  ;;  %v1951_v19 = vsub.f32 %v9484_v23, %v6868_v55  ;;  %v9486_v20 = vld [vmem:[#allocation168_spill] sm:$0xff] }
 0x3d3   : > { %v1953_v43 = vsub.f32 %v9483_v13, %v6868_v55  ;;  %v1955_v15 = vsub.f32 %v9486_v20, %v6868_v55  ;;  %v7254_v7 = vadd.f32 %v1972_v5, %v1872_v6  ;;  %v7256_v56 = vadd.f32 %v1974_v34, %v1874_v44  ;;  %v9488_v13 = vld [vmem:[#allocation163_spill] sm:$0xff]  ;;  %v7268_v5 = vpop.permute.xlu0 %3422 }
 0x3d4   : > { %v7252_v60 = vadd.f32 %v1970_v11, %v1870_v4  ;;  %v1957_v25 = vsub.f32 %v9487_v27, %v6868_v55  ;;  %v1880_v8 = vadd.f32 %v1864_v59, %v7126_v26  ;;  %v1980_v38 = vand.u32 2147483647, %v1964_v50  ;;  %9491 = vst [vmem:[#allocation65_spill] sm:$0xff] %v7268_v5 }
 0x3d5   : > { %3894 = vperm.xlu0 %4764, %v6793_v22   ;;  %v2071_v23 = vsub.f32 %v9488_v13, %v6976_v31  ;;  %v7271_v4 = vadd.f32 %v1976_v61, %v1876_v12  ;;  %v7273_v6 = vadd.f32 %v1978_v17, %v1878_v29  ;;  %v2082_v26 = vand.u32 2147483647, %v2066_v49  ;;  %v9494_v61 = vld [vmem:[#allocation174_spill] sm:$0xff] }
 0x3d6   : > { %3538 = vperm.xlu1 %4758, %v6760_v16   ;;  %v7237_v41 = vpop.permute.xlu1 %3158  ;;  %v9485_v16 = vld [vmem:[#allocation161_spill] sm:$0xff]  ;;  %v1969_v44 = vand.u32 2147483647, %v1953_v43  ;;  %v1982_v34 = vadd.f32 %v1966_v0, %v7128_v9  ;;  %v1967_v59 = vand.u32 2147483647, %v1951_v19  ;;  %v1961_v12 = vsub.f32 %v9494_v61, %v6868_v55  ;;  %v9495_v9 = vld [vmem:[#allocation176_spill] sm:$0xff] }
 0x3d7   : > { %v2069_v33 = vsub.f32 %v9485_v16, %v6976_v31  ;;  %v9489_v16 = vld [vmem:[#allocation172_spill] sm:$0xff]  ;;  %v1971_v20 = vand.u32 2147483647, %v1955_v15  ;;  %v1973_v27 = vand.u32 2147483647, %v1957_v25  ;;  %v7282_v17 = vadd.f32 %v1980_v38, %v1880_v8 }
 0x3d8   : > { %v1959_v52 = vsub.f32 %v9489_v16, %v6868_v55  ;;  %v9493_v16 = vld [vmem:[#allocation167_spill] sm:$0xff]  ;;  %v2087_v29 = vand.u32 2147483647, %v2071_v23  ;;  %v1963_v43 = vsub.f32 %v9495_v9, %v6868_v55  ;;  %v1985_v19 = vadd.f32 %v1969_v44, %v7163_v30  ;;  %v9497_v25 = vld [vmem:[#allocation180_spill] sm:$0xff] }
 0x3d9   : > { %3902 = vperm.xlu0 %4764, %v6816_v53   ;;  %v2085_v50 = vand.u32 2147483647, %v2069_v33  ;;  %v9496_v33 = vld [vmem:[#allocation169_spill] sm:$0xff]  ;;  %v2065_v8 = vsub.f32 %v9497_v25, %v6976_v31  ;;  %v7296_v38 = vld [vmem:[%s5167_s16 + $0x10] sm:$0xff]  ;;  %v1983_v55 = vadd.f32 %v1967_v59, %v7219_v54  ;;  %v1989_v30 = vadd.f32 %v1973_v27, %v7176_v18 }
 0x3da   : > { %3546 = vperm.xlu1 %4758, %v6793_v22   ;;  %v7266_v11 = vpop.permute.xlu1 %3166  ;;  %v9492_v22 = vld [vmem:[#allocation165_spill] sm:$0xff]  ;;  %v1975_v49 = vand.u32 2147483647, %v1959_v52  ;;  %v2077_v15 = vsub.f32 %v9496_v33, %v6976_v31  ;;  %v7298_v52 = vadd.f32 %v2082_v26, %v1982_v34  ;;  %v9498_v23 = vld [vmem:[#allocation171_spill] sm:$0xff]  ;;  %v1977_v9 = vand.u32 2147483647, %v1961_v12 }
 0x3db   : > { %9490 = vst [vmem:[#allocation64_spill] sm:$0xff] %v7266_v11  ;;  %v2073_v13 = vsub.f32 %v9492_v22, %v6976_v31  ;;  %v2075_v11 = vsub.f32 %v9493_v16, %v6976_v31  ;;  %v2079_v22 = vsub.f32 %v9498_v23, %v6976_v31  ;;  %v7304_v16 = vpop.permute.xlu0 %3430  ;;  %v1979_v25 = vand.u32 2147483647, %v1963_v43  ;;  %v9500_v26 = vld [vmem:[#allocation186_spill] sm:$0xff]  ;;  %v9504_v43 = vld [vmem:[#allocation175_spill] sm:$0xff] }
 0x3dc   : > { %9499 = vst [vmem:[#allocation66_spill] sm:$0xff] %v7304_v16  ;;  %v1991_v33 = vadd.f32 %v1975_v49, %v7186_v32  ;;  %v2068_v34 = vsub.f32 %v9500_v26, %v6976_v31  ;;  %v7312_v54 = vrot.slane %v7296_v38, %v9322_v35  ;;  %v8927_v59 = vmov 29   ;;  %v9502_v32 = vld [vmem:[#allocation173_spill] sm:$0xff]  ;;  %v9503_v49 = vld [vmem:[#allocation183_spill] sm:$0xff] }
 0x3dd   : > { %3910 = vperm.xlu0 %4764, %v6847_v37   ;;  %v2089_v44 = vand.u32 2147483647, %v2073_v13  ;;  %v2091_v61 = vand.u32 2147483647, %v2075_v11  ;;  %v7318_v18 = vadd.f32 %v2085_v50, %v1985_v19  ;;  %v2093_v11 = vand.u32 2147483647, %v2077_v15 }
 0x3de   : > { %3554 = vperm.xlu1 %4758, %v6816_v53   ;;  %v7287_v0 = vpop.permute.xlu1 %3170  ;;  %v1987_v53 = vadd.f32 %v1971_v20, %v7165_v21  ;;  %v2081_v20 = vand.u32 2147483647, %v2065_v8  ;;  %v2181_v27 = vsub.f32 %v9502_v32, %v7077_v42  ;;  %v2095_v12 = vand.u32 2147483647, %v2079_v22  ;;  %v9505_v19 = vld [vmem:[#allocation189_spill] sm:$0xff]  ;;  %v9506_v8 = vld [vmem:[#allocation178_spill] sm:$0xff] }
 0x3df   : > { %v2184_v23 = vsub.f32 %v9504_v43, %v7077_v42  ;;  %v7329_v26 = vadd.f32 %v2089_v44, %v1989_v30  ;;  %v1993_v50 = vadd.f32 %v1977_v9, %v7188_v46  ;;  %v2070_v15 = vsub.f32 %v9505_v19, %v6976_v31  ;;  %v9507_v22 = vld [vmem:[#allocation192_spill] sm:$0xff]  ;;  %v7344_v44 = vpop.permute.xlu0 %3438  ;;  %v9511_v43 = vld [vmem:[#allocation181_spill] sm:$0xff] }
 0x3e0   : > { %v7323_v13 = vadd.f32 %v2087_v29, %v1987_v53  ;;  %v2186_v32 = vsub.f32 %v9506_v8, %v7077_v42  ;;  %v1995_v29 = vadd.f32 %v1979_v25, %v7190_v62  ;;  %v2084_v53 = vand.u32 2147483647, %v2068_v34  ;;  %9510 = vst [vmem:[#allocation69_spill] sm:$0xff] %v7344_v44  ;;  %v9514_v8 = vld [vmem:[#allocation197_spill] sm:$0xff] }
 0x3e1   : > { %4765 = vset.pattern.permute.xlu0 %v8927_v59  ;;  %v7336_v59 = vadd.f32 %v2091_v61, %v1991_v33  ;;  %v9508_v16 = vmov 26   ;;  %v2097_v46 = vadd.f32 %v2081_v20, %v7202_v47  ;;  %v2197_v9 = vand.u32 2147483647, %v2181_v27  ;;  %v9512_v61 = vld [vmem:[#allocation195_spill] sm:$0xff] }
 0x3e2   : > { %3562 = vperm.xlu1 %4758, %v6847_v37   ;;  %v7315_v21 = vpop.permute.xlu1 %3178  ;;  %3970 = vperm.xlu0 %4765, %v6886_v48   ;;  %v2067_v37 = vsub.f32 %v9503_v49, %v6976_v31  ;;  %v2072_v49 = vsub.f32 %v9507_v22, %v6976_v31  ;;  %v2188_v19 = vsub.f32 %v9511_v43, %v7077_v42  ;;  %v2200_v25 = vand.u32 2147483647, %v2184_v23  ;;  %v9515_v43 = vld [vmem:[#allocation187_spill] sm:$0xff]  ;;  %v9516_v23 = vld [vmem:[#allocation200_spill] sm:$0xff] }
 0x3e3   : > { %9501 = vst [vmem:[#allocation67_spill] sm:$0xff] %v7315_v21  ;;  %v2074_v33 = vsub.f32 %v9512_v61, %v6976_v31  ;;  %v2076_v47 = vsub.f32 %v9514_v8, %v6976_v31  ;;  %v7357_v20 = vadd.f32 %v2093_v11, %v1993_v50  ;;  %v2086_v27 = vand.u32 2147483647, %v2070_v15  ;;  %v9518_v50 = vld [vmem:[#allocation190_spill] sm:$0xff] }
 0x3e4   : > { %v2083_v62 = vand.u32 2147483647, %v2067_v37  ;;  %v2202_v22 = vand.u32 2147483647, %v2186_v32  ;;  %v2192_v61 = vsub.f32 %v9515_v43, %v7077_v42  ;;  %v7361_v44 = vadd.f32 %v2095_v12, %v1995_v29  ;;  %v7373_v32 = vld [vmem:[%s5155_s14 + $0x10] sm:$0xff] }
 0x3e5   : > { %v2088_v37 = vand.u32 2147483647, %v2072_v49  ;;  %v2078_v5 = vsub.f32 %v9516_v23, %v6976_v31  ;;  %v2204_v8 = vand.u32 2147483647, %v2188_v19  ;;  %v2090_v11 = vand.u32 2147483647, %v2074_v33 }
 0x3e6   : > { %4759 = vset.pattern.permute.xlu1 %v9508_v16  ;;  %v7342_v30 = vpop.permute.xlu1 %3186  ;;  %3982 = vperm.xlu0 %4765, %v6939_v14   ;;  %v9513_v16 = vld [vmem:[#allocation184_spill] sm:$0xff]  ;;  %v2194_v15 = vsub.f32 %v9518_v50, %v7077_v42  ;;  %v2092_v29 = vand.u32 2147483647, %v2076_v47  ;;  %v2208_v19 = vand.u32 2147483647, %v2192_v61  ;;  %v9521_v33 = vld [vmem:[#allocation193_spill] sm:$0xff] }
 0x3e7   : > { %9509 = vst [vmem:[#allocation68_spill] sm:$0xff] %v7342_v30  ;;  %3622 = vperm.xlu1 %4759, %v6886_v48   ;;  %v2190_v34 = vsub.f32 %v9513_v16, %v7077_v42  ;;  %v2100_v48 = vadd.f32 %v2084_v53, %v7221_v40  ;;  %v7368_v16 = vadd.f32 %v2197_v9, %v2097_v46  ;;  %v9519_v53 = vld [vmem:[#allocation202_spill] sm:$0xff]  ;;  %v7381_v46 = vpop.permute.xlu0 %3446  ;;  %v9522_v23 = vld [vmem:[#allocation204_spill] sm:$0xff] }
 0x3e8   : > { %v7377_v40 = vadd.f32 %v2083_v62, %v1983_v55  ;;  %v2080_v49 = vsub.f32 %v9519_v53, %v6976_v31  ;;  %9520 = vst [vmem:[#allocation71_spill] sm:$0xff] %v7381_v46  ;;  %v2102_v9 = vadd.f32 %v2086_v27, %v7252_v60  ;;  %v2196_v43 = vsub.f32 %v9521_v33, %v7077_v42  ;;  %v9524_v27 = vld [vmem:[#allocation196_spill] sm:$0xff]  ;;  %v9525_v53 = vld [vmem:[#allocation199_spill] sm:$0xff]  ;;  %v9529_v46 = vld [vmem:[#allocation210_spill] sm:$0xff] }
 0x3e9   : > { %v2206_v12 = vand.u32 2147483647, %v2190_v34  ;;  %v2182_v50 = vsub.f32 %v9522_v23, %v7077_v42  ;;  %v7388_v36 = vadd.f32 %v2200_v25, %v2100_v48  ;;  %v2104_v55 = vadd.f32 %v2088_v37, %v7254_v7  ;;  %v9526_v25 = vld [vmem:[#allocation49_spill] sm:$0xff]  ;;  %v9527_v48 = vld [vmem:[#allocation208_spill] sm:$0xff] }
 0x3ea   : > { %v7366_v58 = vpop.permute.xlu1 %3194  ;;  %3990 = vperm.xlu0 %4765, %v6968_v24   ;;  %v2094_v62 = vand.u32 2147483647, %v2078_v5  ;;  %v7393_v34 = vrot.slane %v7296_v38, %v9336_v51  ;;  %v2106_v60 = vadd.f32 %v2090_v11, %v7256_v56  ;;  %v2210_v47 = vand.u32 2147483647, %v2194_v15  ;;  %v9528_v23 = vld [vmem:[#allocation201_spill] sm:$0xff] }
 0x3eb   : > { %9517 = vst [vmem:[#allocation70_spill] sm:$0xff] %v7366_v58  ;;  %3630 = vperm.xlu1 %4759, %v7373_v32   ;;  %v2298_v61 = vsub.f32 %v9524_v27, %v7171_v45  ;;  %v2301_v33 = vsub.f32 %v9525_v53, %v7171_v45  ;;  %v2108_v7 = vadd.f32 %v2092_v29, %v7271_v4  ;;  %v2096_v5 = vand.u32 2147483647, %v2080_v49  ;;  %v9530_v4 = vld [vmem:[#allocation206_spill] sm:$0xff]  ;;  %v9531_v49 = vld [vmem:[#allocation212_spill] sm:$0xff] }
 0x3ec   : > { %v2185_v37 = vsub.f32 %v9527_v48, %v7077_v42  ;;  %v2303_v56 = vsub.f32 %v9528_v23, %v7171_v45  ;;  %v7409_v11 = vadd.f32 %v2202_v22, %v2102_v9  ;;  %v2212_v15 = vand.u32 2147483647, %v2196_v43  ;;  %v7422_v23 = vpop.permute.xlu0 %3506 }
 0x3ed   : > { %v2198_v27 = vand.u32 2147483647, %v2182_v50  ;;  %v2187_v53 = vsub.f32 %v9529_v46, %v7077_v42  ;;  %v7413_v2 = vadd.f32 %v2204_v8, %v2104_v55  ;;  %v2183_v29 = vsub.f32 %v9530_v4, %v7077_v42  ;;  %9533 = vst [vmem:[#allocation74_spill] sm:$0xff] %v7422_v23  ;;  %v9534_v46 = vld [vmem:[#allocation203_spill] sm:$0xff] }
 0x3ee   : > { %v7395_v31 = vpop.permute.xlu1 %3202  ;;  %3998 = vperm.xlu0 %4765, %v9526_v25   ;;  %v2189_v48 = vsub.f32 %v9531_v49, %v7077_v42  ;;  %v7424_v22 = vadd.f32 %v2206_v12, %v2106_v60  ;;  %v2314_v9 = vand.u32 2147483647, %v2298_v61  ;;  %v2317_v43 = vand.u32 2147483647, %v2301_v33  ;;  %v9536_v12 = vld [vmem:[#allocation214_spill] sm:$0xff]  ;;  %v9537_v61 = vld [vmem:[#allocation205_spill] sm:$0xff] }
 0x3ef   : > { %9523 = vst [vmem:[#allocation72_spill] sm:$0xff] %v7395_v31  ;;  %3634 = vperm.xlu1 %4759, %v6939_v14   ;;  %v2110_v14 = vadd.f32 %v2094_v62, %v7273_v6  ;;  %v2305_v8 = vsub.f32 %v9534_v46, %v7171_v45  ;;  %v9535_v6 = vld [vmem:[#allocation198_spill] sm:$0xff]  ;;  %v7430_v50 = vadd.f32 %v2208_v19, %v2108_v7  ;;  %v2201_v62 = vand.u32 2147483647, %v2185_v37  ;;  %v9538_v19 = vld [vmem:[#allocation216_spill] sm:$0xff] }
 0x3f0   : > { %v2112_v55 = vadd.f32 %v2096_v5, %v7282_v17  ;;  %v2319_v4 = vand.u32 2147483647, %v2303_v56  ;;  %v2214_v49 = vadd.f32 %v2198_v27, %v7298_v52  ;;  %v2191_v60 = vsub.f32 %v9536_v12, %v7077_v42  ;;  %v9540_v5 = vld [vmem:[#allocation207_spill] sm:$0xff]  ;;  %v9541_v37 = vld [vmem:[#allocation218_spill] sm:$0xff]  ;;  %v9542_v27 = vld [vmem:[#allocation209_spill] sm:$0xff] }
 0x3f1   : > { %v2307_v33 = vsub.f32 %v9537_v61, %v7171_v45  ;;  %v7438_v46 = vadd.f32 %v2210_v47, %v2110_v14  ;;  %v2205_v10 = vand.u32 2147483647, %v2189_v48  ;;  %v2193_v7 = vsub.f32 %v9538_v19, %v7077_v42  ;;  %v7459_v61 = vpop.permute.xlu0 %3518 }
 0x3f2   : > { %v7420_v31 = vpop.permute.xlu1 %3210  ;;  %4006 = vperm.xlu0 %4765, %v9535_v6   ;;  %v2321_v17 = vand.u32 2147483647, %v2305_v8  ;;  %v2309_v52 = vsub.f32 %v9540_v5, %v7171_v45  ;;  %v2195_v56 = vsub.f32 %v9541_v37, %v7077_v42  ;;  %v7452_v47 = vadd.f32 %v2212_v15, %v2112_v55  ;;  %v9544_v8 = vld [vmem:[#allocation211_spill] sm:$0xff]  ;;  %9545 = vst [vmem:[#allocation76_spill] sm:$0xff] %v7459_v61 }
 0x3f3   : > { %9532 = vst [vmem:[#allocation73_spill] sm:$0xff] %v7420_v31  ;;  %3642 = vperm.xlu1 %4759, %v6968_v24   ;;  %v2203_v31 = vand.u32 2147483647, %v2187_v53  ;;  %v2199_v24 = vand.u32 2147483647, %v2183_v29  ;;  %v2311_v53 = vsub.f32 %v9542_v27, %v7171_v45  ;;  %v2217_v14 = vadd.f32 %v2201_v62, %v7318_v18  ;;  %v9543_v29 = vld [vmem:[#allocation220_spill] sm:$0xff] }
 0x3f4   : > { %v2297_v48 = vsub.f32 %v9543_v29, %v7171_v45  ;;  %v2413_v12 = vsub.f32 %v9544_v8, %v7227_v57  ;;  %v7461_v42 = vadd.f32 %v2314_v9, %v2214_v49  ;;  %v2207_v5 = vand.u32 2147483647, %v2191_v60  ;;  %v9546_v18 = vld [vmem:[#allocation213_spill] sm:$0xff]  ;;  %v9547_v8 = vld [vmem:[#allocation215_spill] sm:$0xff] }
 0x3f5   : > { %v2219_v19 = vadd.f32 %v2203_v31, %v7323_v13  ;;  %v2323_v37 = vand.u32 2147483647, %v2307_v33  ;;  %v2215_v27 = vadd.f32 %v2199_v24, %v7377_v40  ;;  %v2221_v15 = vadd.f32 %v2205_v10, %v7329_v26  ;;  %v9549_v26 = vld [vmem:[#allocation292_spill] sm:$0xff] }
 0x3f6   : > { %v7442_v58 = vpop.permute.xlu1 %3218  ;;  %4014 = vperm.xlu0 %4765, %v7051_v39   ;;  %v2209_v55 = vand.u32 2147483647, %v2193_v7  ;;  %v2416_v62 = vsub.f32 %v9546_v18, %v7227_v57  ;;  %v2325_v29 = vand.u32 2147483647, %v2309_v52  ;;  %v2327_v1 = vand.u32 2147483647, %v2311_v53 }
 0x3f7   : > { %9539 = vst [vmem:[#allocation75_spill] sm:$0xff] %v7442_v58  ;;  %3650 = vperm.xlu1 %4759, %v9526_v25   ;;  %v2211_v58 = vand.u32 2147483647, %v2195_v56  ;;  %v2418_v61 = vsub.f32 %v9547_v8, %v7227_v57  ;;  %v7474_v13 = vadd.f32 %v2317_v43, %v2217_v14  ;;  %v2313_v40 = vand.u32 2147483647, %v2297_v48  ;;  %v9550_v33 = vld [vmem:[#allocation224_spill] sm:$0xff]  ;;  %v7492_v48 = vpop.permute.xlu0 %3526 }
 0x3f8   : > { %v2429_v10 = vand.u32 2147483647, %v2413_v12  ;;  %v7478_v31 = vrot.slane %v7296_v38, %v9549_v26  ;;  %v7480_v49 = vadd.f32 %v2319_v4, %v2219_v19  ;;  %v2223_v60 = vadd.f32 %v2207_v5, %v7336_v59  ;;  %v9552_v56 = vld [vmem:[#allocation222_spill] sm:$0xff]  ;;  %9553 = vst [vmem:[#allocation78_spill] sm:$0xff] %v7492_v48  ;;  %v9555_v5 = vld [vmem:[#allocation219_spill] sm:$0xff]  ;;  %v9570_v48 = vld [vmem:[#allocation229_spill] sm:$0xff] }
 0x3f9   : > { %v2300_v24 = vsub.f32 %v9550_v33, %v7171_v45  ;;  %v7487_v52 = vadd.f32 %v2321_v17, %v2221_v15  ;;  %v2225_v43 = vadd.f32 %v2209_v55, %v7357_v20  ;;  %v2299_v53 = vsub.f32 %v9552_v56, %v7171_v45  ;;  %v9554_v59 = vld [vmem:[#allocation226_spill] sm:$0xff]  ;;  %v9557_v20 = vld [vmem:[#allocation55_spill] sm:$0xff]  ;;  %v9558_v55 = vld [vmem:[#allocation228_spill] sm:$0xff] }
 0x3fa   : > { %4022 = vperm.xlu0 %4765, %v7080_v28   ;;  %v2432_v14 = vand.u32 2147483647, %v2416_v62  ;;  %v2227_v4 = vadd.f32 %v2211_v58, %v7361_v44  ;;  %v2302_v12 = vsub.f32 %v9554_v59, %v7171_v45  ;;  %v2434_v19 = vand.u32 2147483647, %v2418_v61  ;;  %v9559_v58 = vld [vmem:[#allocation221_spill] sm:$0xff] }
 0x3fb   : > { %3658 = vperm.xlu1 %4759, %v9535_v6   ;;  %v7471_v9 = vpop.permute.xlu1 %3278  ;;  %v9551_v6 = vld [vmem:[#allocation217_spill] sm:$0xff]  ;;  %v2422_v18 = vsub.f32 %v9555_v5, %v7227_v57  ;;  %v2329_v15 = vadd.f32 %v2313_v40, %v7368_v16  ;;  %v2304_v62 = vsub.f32 %v9558_v55, %v7171_v45  ;;  %v2424_v44 = vsub.f32 %v9559_v58, %v7227_v57  ;;  %v9561_v5 = vld [vmem:[#allocation232_spill] sm:$0xff]  ;;  %v9562_v40 = vld [vmem:[#allocation223_spill] sm:$0xff] }
 0x3fc   : > { %9548 = vst [vmem:[#allocation77_spill] sm:$0xff] %v7471_v9  ;;  %v2420_v7 = vsub.f32 %v9551_v6, %v7227_v57  ;;  %v7508_v8 = vadd.f32 %v2323_v37, %v2223_v60  ;;  %v2316_v61 = vand.u32 2147483647, %v2300_v24  ;;  %v9560_v6 = vld [vmem:[#allocation230_spill] sm:$0xff]  ;;  %v2315_v59 = vand.u32 2147483647, %v2299_v53 }
 0x3fd   : > { %v2306_v56 = vsub.f32 %v9560_v6, %v7171_v45  ;;  %v2308_v16 = vsub.f32 %v9561_v5, %v7171_v45  ;;  %v2426_v55 = vsub.f32 %v9562_v40, %v7227_v57  ;;  %v2318_v58 = vand.u32 2147483647, %v2302_v12  ;;  %v9563_v60 = vld [vmem:[#allocation225_spill] sm:$0xff]  ;;  %v9565_v5 = vld [vmem:[#allocation234_spill] sm:$0xff]  ;;  %v9567_v40 = vld [vmem:[#allocation227_spill] sm:$0xff] }
 0x3fe   : > { %4030 = vperm.xlu0 %4765, %v9557_v20   ;;  %v2436_v33 = vand.u32 2147483647, %v2420_v7  ;;  %v2438_v37 = vand.u32 2147483647, %v2422_v18  ;;  %v2428_v24 = vsub.f32 %v9563_v60, %v7227_v57  ;;  %v2320_v53 = vand.u32 2147483647, %v2304_v62 }
 0x3ff   : > { %3666 = vperm.xlu1 %4759, %v7051_v39   ;;  %v7500_v17 = vpop.permute.xlu1 %3282  ;;  %v7512_v39 = vadd.f32 %v2325_v29, %v2225_v43  ;;  %v8928_v29 = vmov 30   ;;  %v7526_v43 = vadd.f32 %v2429_v10, %v2329_v15  ;;  %v2440_v6 = vand.u32 2147483647, %v2424_v44  ;;  %v7533_v12 = vld [vmem:[%s5155_s14 + $0x8] sm:$0xff]  ;;  %v9568_v62 = vld [vmem:[#allocation236_spill] sm:$0xff] }
 0x400   : > { %9556 = vst [vmem:[#allocation79_spill] sm:$0xff] %v7500_v17  ;;  %v7518_v17 = vadd.f32 %v2327_v1, %v2227_v4  ;;  %v2310_v1 = vsub.f32 %v9565_v5, %v7171_v45  ;;  %v7530_v4 = vpop.permute.xlu0 %3534  ;;  %v2322_v18 = vand.u32 2147483647, %v2306_v56  ;;  %v2530_v60 = vsub.f32 %v9567_v40, %v7312_v54  ;;  %v9569_v9 = vld [vmem:[#allocation238_spill] sm:$0xff] }
 0x401   : > { %9566 = vst [vmem:[#allocation81_spill] sm:$0xff] %v7530_v4  ;;  %v2324_v10 = vand.u32 2147483647, %v2308_v16  ;;  %v2442_v15 = vand.u32 2147483647, %v2426_v55  ;;  %v2312_v44 = vsub.f32 %v9568_v62, %v7171_v45  ;;  %v2334_v5 = vadd.f32 %v2318_v58, %v7409_v11  ;;  %v9573_v45 = vld [vmem:[#allocation293_spill] sm:$0xff] }
 0x402   : > { %4768 = vset.pattern.permute.xlu0 %v8928_v29  ;;  %v7539_v29 = vadd.f32 %v2315_v59, %v2215_v27  ;;  %v2414_v4 = vsub.f32 %v9569_v9, %v7227_v57  ;;  %v2336_v27 = vadd.f32 %v2320_v53, %v7413_v2  ;;  %v2326_v56 = vand.u32 2147483647, %v2310_v1  ;;  %v9572_v59 = vld [vmem:[#allocation231_spill] sm:$0xff]  ;;  %v9574_v58 = vld [vmem:[#allocation233_spill] sm:$0xff]  ;;  %v9575_v1 = vld [vmem:[#allocation242_spill] sm:$0xff] }
 0x403   : > { %3674 = vperm.xlu1 %4759, %v7080_v28   ;;  %v7523_v7 = vpop.permute.xlu1 %3290  ;;  %4090 = vperm.xlu0 %4768, %v7533_v12   ;;  %v2332_v28 = vadd.f32 %v2316_v61, %v7388_v36  ;;  %v2533_v36 = vsub.f32 %v9570_v48, %v7312_v54  ;;  %v2535_v16 = vsub.f32 %v9572_v59, %v7312_v54  ;;  %v8930_v55 = vmov 31   ;;  %v9576_v62 = vld [vmem:[#allocation235_spill] sm:$0xff] }
 0x404   : > { %9564 = vst [vmem:[#allocation80_spill] sm:$0xff] %v7523_v7  ;;  %v2444_v7 = vand.u32 2147483647, %v2428_v24  ;;  %v7556_v11 = vrot.slane %v7296_v38, %v9573_v45  ;;  %v2338_v48 = vadd.f32 %v2322_v18, %v7424_v22  ;;  %v2537_v24 = vsub.f32 %v9574_v58, %v7312_v54 }
 0x405   : > { %v7559_v9 = vadd.f32 %v2432_v14, %v2332_v28  ;;  %v2340_v2 = vadd.f32 %v2324_v10, %v7430_v50  ;;  %v2328_v53 = vand.u32 2147483647, %v2312_v44  ;;  %v2417_v40 = vsub.f32 %v9575_v1, %v7227_v57  ;;  %v9578_v28 = vld [vmem:[#allocation240_spill] sm:$0xff] }
 0x406   : > { %v2539_v59 = vsub.f32 %v9576_v62, %v7312_v54  ;;  %v7572_v14 = vadd.f32 %v2434_v19, %v2334_v5  ;;  %v2430_v22 = vand.u32 2147483647, %v2414_v4  ;;  %v2415_v18 = vsub.f32 %v9578_v28, %v7227_v57  ;;  %v9581_v1 = vld [vmem:[#allocation244_spill] sm:$0xff]  ;;  %v9582_v4 = vld [vmem:[#allocation246_spill] sm:$0xff]  ;;  %v9583_v28 = vld [vmem:[#allocation237_spill] sm:$0xff] }
 0x407   : > { %3682 = vperm.xlu1 %4759, %v9557_v20   ;;  %v7549_v61 = vpop.permute.xlu1 %3298  ;;  %4770 = vset.pattern.permute.xlu0 %v8930_v55  ;;  %v2546_v20 = vand.u32 2147483647, %v2530_v60  ;;  %v7570_v55 = vpop.permute.xlu0 %3542  ;;  %v2549_v60 = vand.u32 2147483647, %v2533_v36  ;;  %v9579_v58 = vmov 27   ;;  %v7579_v10 = vadd.f32 %v2436_v33, %v2336_v27 }
 0x408   : > { %9571 = vst [vmem:[#allocation82_spill] sm:$0xff] %v7549_v61  ;;  %4206 = vperm.xlu0 %4770, %v7533_v12   ;;  %9577 = vst [vmem:[#allocation83_spill] sm:$0xff] %v7570_v55  ;;  %v2342_v44 = vadd.f32 %v2326_v56, %v7438_v46  ;;  %v2419_v62 = vsub.f32 %v9581_v1, %v7227_v57  ;;  %v2551_v61 = vand.u32 2147483647, %v2535_v16  ;;  %v2553_v36 = vand.u32 2147483647, %v2537_v24 }
 0x409   : > { %v7585_v19 = vadd.f32 %v2438_v37, %v2338_v48  ;;  %v2421_v5 = vsub.f32 %v9582_v4, %v7227_v57  ;;  %v7595_v46 = vadd.f32 %v2440_v6, %v2340_v2  ;;  %v2344_v33 = vadd.f32 %v2328_v53, %v7452_v47  ;;  %v9584_v48 = vld [vmem:[#allocation248_spill] sm:$0xff]  ;;  %v9585_v1 = vld [vmem:[#allocation239_spill] sm:$0xff]  ;;  %v9587_v2 = vld [vmem:[#allocation250_spill] sm:$0xff] }
 0x40a   : > { %v2433_v27 = vand.u32 2147483647, %v2417_v40  ;;  %v7598_v56 = vand.u32 2147483647, %v2539_v59  ;;  %v2446_v37 = vadd.f32 %v2430_v22, %v7461_v42  ;;  %v2431_v16 = vand.u32 2147483647, %v2415_v18 }
 0x40b   : > { %4762 = vset.pattern.permute.xlu1 %v9579_v58  ;;  %v7577_v50 = vpop.permute.xlu1 %3306  ;;  %v2541_v58 = vsub.f32 %v9583_v28, %v7312_v54  ;;  %v2423_v24 = vsub.f32 %v9584_v48, %v7227_v57  ;;  %v2543_v4 = vsub.f32 %v9585_v1, %v7312_v54  ;;  %v7607_v55 = vadd.f32 %v2442_v15, %v2342_v44  ;;  %v9588_v53 = vld [vmem:[#allocation241_spill] sm:$0xff]  ;;  %v7614_v42 = vpop.permute.xlu0 %3550  ;;  %v9590_v18 = vld [vmem:[#allocation252_spill] sm:$0xff]  ;;  %v9591_v1 = vld [vmem:[#allocation243_spill] sm:$0xff] }
 0x40c   : > { %9580 = vst [vmem:[#allocation84_spill] sm:$0xff] %v7577_v50  ;;  %3742 = vperm.xlu1 %4762, %v7533_v12   ;;  %v7592_v50 = vld [vmem:[%s5155_s14 + $0x20] sm:$0xff]  ;;  %v2435_v6 = vand.u32 2147483647, %v2419_v62  ;;  %v2425_v47 = vsub.f32 %v9587_v2, %v7227_v57  ;;  %v2645_v40 = vsub.f32 %v9588_v53, %v7393_v34  ;;  %9589 = vst [vmem:[#allocation86_spill] sm:$0xff] %v7614_v42  ;;  %v9643_v26 = vmov 31  }
 0x40d   : > { %4218 = vperm.xlu0 %4770, %v7592_v50   ;;  %v2437_v59 = vand.u32 2147483647, %v2421_v5  ;;  %v2557_v22 = vand.u32 2147483647, %v2541_v58  ;;  %v2427_v48 = vsub.f32 %v9590_v18, %v7227_v57  ;;  %v2648_v15 = vsub.f32 %v9591_v1, %v7393_v34  ;;  %v9592_v2 = vld [vmem:[#allocation254_spill] sm:$0xff] }
 0x40e   : > { %v7621_v44 = vadd.f32 %v2444_v7, %v2344_v33  ;;  %v2449_v62 = vadd.f32 %v2433_v27, %v7474_v13  ;;  %v2529_v53 = vsub.f32 %v9592_v2, %v7312_v54  ;;  %v7628_v58 = vadd.f32 %v2546_v20, %v2446_v37  ;;  %v9595_v33 = vld [vmem:[#allocation247_spill] sm:$0xff]  ;;  %v9601_v2 = vld [vmem:[#allocation258_spill] sm:$0xff] }
 0x40f   : > { %v7605_v28 = vpop.permute.xlu1 %3314  ;;  %v7631_v57 = vadd.f32 %v2431_v16, %v7539_v29  ;;  %v2439_v18 = vand.u32 2147483647, %v2423_v24  ;;  %v2559_v1 = vand.u32 2147483647, %v2543_v4  ;;  %v2441_v7 = vand.u32 2147483647, %v2425_v47 }
 0x410   : > { %9586 = vst [vmem:[#allocation85_spill] sm:$0xff] %v7605_v28  ;;  %3746 = vperm.xlu1 %4762, %v7373_v32   ;;  %v9593_v28 = vld [vmem:[#allocation245_spill] sm:$0xff]  ;;  %v2661_v13 = vand.u32 2147483647, %v2645_v40  ;;  %v2652_v27 = vsub.f32 %v9595_v33, %v7393_v34  ;;  %v2443_v20 = vand.u32 2147483647, %v2427_v48  ;;  %v7656_v40 = vpop.permute.xlu0 %3558  ;;  %v2532_v33 = vsub.f32 %v9601_v2, %v7312_v54 }
 0x411   : > { %4230 = vperm.xlu0 %4770, %v9526_v25   ;;  %v2650_v5 = vsub.f32 %v9593_v28, %v7393_v34  ;;  %v2451_v25 = vadd.f32 %v2435_v6, %v7480_v49  ;;  %v2453_v28 = vadd.f32 %v2437_v59, %v7487_v52  ;;  %v7640_v37 = vand.u32 2147483647, %v2648_v15  ;;  %v9596_v29 = vld [vmem:[#allocation295_spill] sm:$0xff]  ;;  %v9598_v47 = vld [vmem:[#allocation249_spill] sm:$0xff]  ;;  %9599 = vst [vmem:[#allocation89_spill] sm:$0xff] %v7656_v40  ;;  %v9600_v48 = vld [vmem:[#allocation256_spill] sm:$0xff] }
 0x412   : > { %v7644_v16 = vrot.slane %v7296_v38, %v9596_v29  ;;  %v7647_v24 = vld [vmem:[%s5155_s14 + $0x50] sm:$0xff]  ;;  %v7650_v49 = vadd.f32 %v2549_v60, %v2449_v62  ;;  %v2545_v4 = vand.u32 2147483647, %v2529_v53  ;;  %v2654_v52 = vsub.f32 %v9598_v47, %v7393_v34 }
 0x413   : > { %v7633_v42 = vpop.permute.xlu1 %3322  ;;  %9597 = vst [vmem:[#allocation88_spill] sm:$0xff] %v7647_v24  ;;  %v7652_v6 = vand.u32 2147483647, %v2650_v5  ;;  %v2455_v59 = vadd.f32 %v2439_v18, %v7508_v8  ;;  %v2531_v15 = vsub.f32 %v9600_v48, %v7312_v54  ;;  %v7667_v53 = vadd.f32 %v2551_v61, %v2451_v25  ;;  %v9604_v47 = vld [vmem:[#allocation260_spill] sm:$0xff]  ;;  %v9607_v61 = vld [vmem:[#allocation253_spill] sm:$0xff] }
 0x414   : > { %9594 = vst [vmem:[#allocation87_spill] sm:$0xff] %v7633_v42  ;;  %3754 = vperm.xlu1 %4762, %v7592_v50   ;;  %v9602_v42 = vld [vmem:[#allocation251_spill] sm:$0xff]  ;;  %v2457_v5 = vadd.f32 %v2441_v7, %v7512_v39  ;;  %v2534_v29 = vsub.f32 %v9604_v47, %v7312_v54  ;;  %v7672_v40 = vand.u32 2147483647, %v2652_v27  ;;  %v7678_v18 = vadd.f32 %v2553_v36, %v2453_v28  ;;  %v9609_v27 = vld [vmem:[#allocation264_spill] sm:$0xff] }
 0x415   : > { %4242 = vperm.xlu0 %4770, %v7647_v24   ;;  %v2656_v60 = vsub.f32 %v9602_v42, %v7393_v34  ;;  %v7675_v8 = vld [vmem:[%s5155_s14 + $0x30] sm:$0xff]  ;;  %v2459_v48 = vadd.f32 %v2443_v20, %v7518_v17  ;;  %v9606_v42 = vld [vmem:[#allocation262_spill] sm:$0xff]  ;;  %v2658_v39 = vsub.f32 %v9607_v61, %v7393_v34  ;;  %v9608_v25 = vmov 30  }
 0x416   : > { %9605 = vst [vmem:[#allocation91_spill] sm:$0xff] %v7675_v8  ;;  %v2536_v2 = vsub.f32 %v9606_v42, %v7312_v54  ;;  %v2561_v7 = vadd.f32 %v2545_v4, %v7526_v43  ;;  %v2538_v47 = vsub.f32 %v9609_v27, %v7312_v54  ;;  %v9610_v36 = vld [vmem:[#allocation255_spill] sm:$0xff]  ;;  %v7693_v17 = vadd.f32 %v7598_v56, %v2455_v59  ;;  %v9611_v4 = vld [vmem:[#allocation266_spill] sm:$0xff]  ;;  %v7709_v59 = vpop.permute.xlu0 %3566 }
 0x417   : > { %v7665_v62 = vpop.permute.xlu1 %3330  ;;  %v2660_v28 = vsub.f32 %v9610_v36, %v7393_v34  ;;  %v2547_v20 = vand.u32 2147483647, %v2531_v15  ;;  %v2548_v42 = vand.u32 2147483647, %v2532_v33  ;;  %v7695_v30 = vand.u32 2147483647, %v2656_v60 }
 0x418   : > { %9603 = vst [vmem:[#allocation90_spill] sm:$0xff] %v7665_v62  ;;  %3762 = vperm.xlu1 %4762, %v7675_v8   ;;  %v2670_v62 = vand.u32 2147483647, %v2654_v52  ;;  %v7697_v61 = vadd.f32 %v2557_v22, %v2457_v5  ;;  %v2550_v43 = vand.u32 2147483647, %v2534_v29  ;;  %v2540_v27 = vsub.f32 %v9611_v4, %v7312_v54  ;;  %v9612_v52 = vld [vmem:[#allocation257_spill] sm:$0xff] }
 0x419   : > { %4778 = vset.pattern.permute.xlu0 %v9608_v25  ;;  %v2762_v25 = vsub.f32 %v9612_v52, %v7478_v31  ;;  %v7704_v36 = vld [vmem:[%s5155_s14 + $0x40] sm:$0xff]  ;;  %9614 = vst [vmem:[#allocation93_spill] sm:$0xff] %v7709_v59  ;;  %v7711_v15 = vadd.f32 %v2559_v1, %v2459_v48  ;;  %v2552_v22 = vand.u32 2147483647, %v2536_v2  ;;  %v7713_v33 = vand.u32 2147483647, %v2658_v39 }
 0x41a   : > { %4102 = vperm.xlu0 %4778, %v7592_v50   ;;  %9613 = vst [vmem:[#allocation92_spill] sm:$0xff] %v7704_v36  ;;  %v9615_v29 = vld [vmem:[#allocation259_spill] sm:$0xff]  ;;  %v7717_v5 = vadd.f32 %v2661_v13, %v2561_v7  ;;  %v2554_v4 = vand.u32 2147483647, %v2538_v47  ;;  %v9616_v52 = vld [vmem:[#allocation268_spill] sm:$0xff]  ;;  %v7728_v1 = vadd.f32 %v2547_v20, %v7631_v57  ;;  %v2564_v48 = vadd.f32 %v2548_v42, %v7559_v9  ;;  %v9617_v2 = vld [vmem:[#allocation270_spill] sm:$0xff] }
 0x41b   : > { %v2765_v60 = vsub.f32 %v9615_v29, %v7478_v31  ;;  %v2542_v21 = vsub.f32 %v9616_v52, %v7312_v54  ;;  %v7721_v8 = vand.u32 2147483647, %v2660_v28  ;;  %v2544_v39 = vsub.f32 %v9617_v2, %v7312_v54  ;;  %v9618_v13 = vld [vmem:[#allocation261_spill] sm:$0xff]  ;;  %v9619_v52 = vld [vmem:[#allocation263_spill] sm:$0xff]  ;;  %v9621_v20 = vld [vmem:[#allocation272_spill] sm:$0xff] }
 0x41c   : > { %3770 = vperm.xlu1 %4762, %v7704_v36   ;;  %v7707_v56 = vpop.permute.xlu1 %3390  ;;  %v7724_v36 = vld [vmem:[%s5155_s14 + $0x38] sm:$0xff]  ;;  %v2767_v7 = vsub.f32 %v9618_v13, %v7478_v31  ;;  %v2566_v47 = vadd.f32 %v2550_v43, %v7572_v14  ;;  %v2556_v29 = vand.u32 2147483647, %v2540_v27  ;;  %v7736_v28 = vand.u32 2147483647, %v2762_v25 }
 0x41d   : > { %v2769_v59 = vsub.f32 %v9619_v52, %v7478_v31  ;;  %v2568_v9 = vadd.f32 %v2552_v22, %v7579_v10  ;;  %v2646_v54 = vsub.f32 %v9621_v20, %v7393_v34  ;;  %v7746_v42 = vand.u32 2147483647, %v2765_v60  ;;  %v9622_v2 = vld [vmem:[#allocation300_spill] sm:$0xff]  ;;  %v9623_v27 = vld [vmem:[#allocation265_spill] sm:$0xff]  ;;  %v9624_v52 = vld [vmem:[#allocation267_spill] sm:$0xff]  ;;  %v7757_v10 = vpop.permute.xlu0 %3626 }
 0x41e   : > { %4114 = vperm.xlu0 %4778, %v7724_v36   ;;  %v7750_v14 = vrot.slane %v7296_v38, %v9622_v2  ;;  %v2570_v25 = vadd.f32 %v2554_v4, %v7585_v19  ;;  %v2558_v43 = vand.u32 2147483647, %v2542_v21  ;;  %v2771_v13 = vsub.f32 %v9623_v27, %v7478_v31  ;;  %9625 = vst [vmem:[#allocation95_spill] sm:$0xff] %v7757_v10  ;;  %v9626_v20 = vld [vmem:[#allocation276_spill] sm:$0xff]  ;;  %v9627_v4 = vld [vmem:[#allocation278_spill] sm:$0xff] }
 0x41f   : > { %v7761_v22 = vadd.f32 %v7640_v37, %v2564_v48  ;;  %v2560_v60 = vand.u32 2147483647, %v2544_v39  ;;  %v2649_v2 = vsub.f32 %v9626_v20, %v7393_v34  ;;  %v7765_v23 = vand.u32 2147483647, %v2767_v7  ;;  %v7776_v10 = vld [vmem:[%s5155_s14 + $0x60] sm:$0xff] }
 0x420   : > { %3778 = vperm.xlu1 %4762, %v7647_v24   ;;  %v7741_v57 = vpop.permute.xlu1 %3398  ;;  %v7768_v21 = vadd.f32 %v7652_v6, %v2566_v47  ;;  %v2572_v19 = vadd.f32 %v2556_v29, %v7595_v46  ;;  %v2651_v27 = vsub.f32 %v9627_v4, %v7393_v34  ;;  %9628 = vst [vmem:[#allocation96_spill] sm:$0xff] %v7776_v10  ;;  %v2662_v39 = vand.u32 2147483647, %v2646_v54  ;;  %v9630_v6 = vld [vmem:[#allocation274_spill] sm:$0xff]  ;;  %v9631_v46 = vld [vmem:[#allocation269_spill] sm:$0xff]  ;;  %v9632_v54 = vld [vmem:[#allocation280_spill] sm:$0xff] }
 0x421   : > { %9620 = vst [vmem:[#allocation94_spill] sm:$0xff] %v7741_v57  ;;  %v2773_v57 = vsub.f32 %v9624_v52, %v7478_v31  ;;  %v7773_v52 = vand.u32 2147483647, %v2769_v59  ;;  %v7782_v48 = vadd.f32 %v7672_v40, %v2568_v9  ;;  %v2647_v7 = vsub.f32 %v9630_v6, %v7393_v34 }
 0x422   : > { %4126 = vperm.xlu0 %4778, %v7647_v24   ;;  %v2775_v47 = vsub.f32 %v9631_v46, %v7478_v31  ;;  %v7788_v29 = vadd.f32 %v2670_v62, %v2570_v25  ;;  %v2574_v59 = vadd.f32 %v2558_v43, %v7607_v55  ;;  %v7791_v20 = vand.u32 2147483647, %v2771_v13  ;;  %v9633_v46 = vld [vmem:[#allocation271_spill] sm:$0xff]  ;;  %v9635_v13 = vld [vmem:[#allocation273_spill] sm:$0xff] }
 0x423   : > { %v7793_v4 = vand.u32 2147483647, %v2773_v57  ;;  %v2576_v40 = vadd.f32 %v2560_v60, %v7621_v44  ;;  %v2665_v9 = vand.u32 2147483647, %v2649_v2  ;;  %v2653_v6 = vsub.f32 %v9632_v54, %v7393_v34  ;;  %v9634_v57 = vld [vmem:[#allocation282_spill] sm:$0xff]  ;;  %v7817_v2 = vpop.permute.xlu0 %3638 }
 0x424   : > { %3786 = vperm.xlu1 %4762, %v7776_v10   ;;  %v7779_v37 = vpop.permute.xlu1 %3402  ;;  %v7796_v10 = vld [vmem:[%s5155_s14 + $0x68] sm:$0xff]  ;;  %v2877_v62 = vsub.f32 %v9633_v46, %v7556_v11  ;;  %v7805_v25 = vadd.f32 %v7695_v30, %v2572_v19  ;;  %v2667_v55 = vand.u32 2147483647, %v2651_v27  ;;  %v2655_v43 = vsub.f32 %v9634_v57, %v7393_v34  ;;  %9638 = vst [vmem:[#allocation100_spill] sm:$0xff] %v7817_v2  ;;  %v9639_v30 = vld [vmem:[#allocation285_spill] sm:$0xff]  ;;  %v9640_v57 = vld [vmem:[#allocation288_spill] sm:$0xff] }
 0x425   : > { %9629 = vst [vmem:[#allocation97_spill] sm:$0xff] %v7779_v37  ;;  %v2880_v24 = vsub.f32 %v9635_v13, %v7556_v11  ;;  %v7812_v37 = vld [vmem:[%s5155_s14 + $0x70] sm:$0xff]  ;;  %v2678_v60 = vadd.f32 %v2662_v39, %v7628_v58  ;;  %v2663_v54 = vand.u32 2147483647, %v2647_v7  ;;  %v2657_v19 = vsub.f32 %v9639_v30, %v7393_v34 }
 0x426   : > { %4138 = vperm.xlu0 %4778, %v7796_v10   ;;  %9636 = vst [vmem:[#allocation98_spill] sm:$0xff] %v7812_v37  ;;  %v7822_v27 = vand.u32 2147483647, %v2775_v47  ;;  %v7825_v46 = vadd.f32 %v7713_v33, %v2574_v59  ;;  %v2659_v13 = vsub.f32 %v9640_v57, %v7393_v34  ;;  %v7835_v58 = vadd.f32 %v7721_v8, %v2576_v40  ;;  %v9644_v59 = vld [vmem:[#allocation279_spill] sm:$0xff] }
 0x427   : > { %v2681_v39 = vadd.f32 %v2665_v9, %v7650_v49  ;;  %v2669_v7 = vand.u32 2147483647, %v2653_v6  ;;  %v7838_v33 = vand.u32 2147483647, %v2877_v62  ;;  %v2683_v34 = vadd.f32 %v2667_v55, %v7667_v53  ;;  %v9646_v53 = vld [vmem:[#allocation291_spill] sm:$0xff] }
 0x428   : > { %3794 = vperm.xlu1 %4762, %v7812_v37   ;;  %v7815_v44 = vpop.permute.xlu1 %3410  ;;  %v9641_v37 = vld [vmem:[#allocation275_spill] sm:$0xff]  ;;  %v2671_v47 = vand.u32 2147483647, %v2655_v43  ;;  %v9645_v30 = vmov 28   ;;  %v7850_v49 = vadd.f32 %v7736_v28, %v2678_v60  ;;  %v7853_v8 = vadd.f32 %v2663_v54, %v7728_v1  ;;  %v9648_v43 = vld [vmem:[#allocation281_spill] sm:$0xff]  ;;  %v7867_v60 = vpop.permute.xlu0 %3646 }
 0x429   : > { %9637 = vst [vmem:[#allocation99_spill] sm:$0xff] %v7815_v44  ;;  %v2882_v45 = vsub.f32 %v9641_v37, %v7556_v11  ;;  %v9642_v44 = vld [vmem:[#allocation277_spill] sm:$0xff]  ;;  %v7842_v37 = vand.u32 2147483647, %v2880_v24  ;;  %v2673_v40 = vand.u32 2147483647, %v2657_v19  ;;  %v2761_v9 = vsub.f32 %v9646_v53, %v7478_v31 }
 0x42a   : > { %v2884_v2 = vsub.f32 %v9642_v44, %v7556_v11  ;;  %4781 = vset.pattern.permute.xlu0 %v9643_v26  ;;  %v2886_v44 = vsub.f32 %v9644_v59, %v7556_v11  ;;  %v7858_v24 = vld [vmem:[%s5155_s14] sm:$0xff]  ;;  %v2675_v6 = vand.u32 2147483647, %v2659_v13  ;;  %v2888_v28 = vsub.f32 %v9648_v43, %v7556_v11  ;;  %9649 = vst [vmem:[#allocation102_spill] sm:$0xff] %v7867_v60  ;;  %v9650_v19 = vld [vmem:[#allocation284_spill] sm:$0xff]  ;;  %v9654_v60 = vld [vmem:[#allocation287_spill] sm:$0xff] }
 0x42b   : > { %4254 = vperm.xlu0 %4781, %v7796_v10   ;;  %9647 = vst [vmem:[#allocation101_spill] sm:$0xff] %v7858_v24  ;;  %v7861_v62 = vand.u32 2147483647, %v2882_v45  ;;  %v7870_v1 = vadd.f32 %v7746_v42, %v2681_v39  ;;  %v2685_v54 = vadd.f32 %v2669_v7, %v7678_v18  ;;  %v2890_v59 = vsub.f32 %v9650_v19, %v7556_v11  ;;  %v7880_v45 = vld [vmem:[%s5155_s14 + $0x78] sm:$0xff]  ;;  %v9651_v42 = vld [vmem:[#allocation298_spill] sm:$0xff] }
 0x42c   : > { %4763 = vset.pattern.permute.xlu1 %v9645_v30  ;;  %v7847_v57 = vpop.permute.xlu1 %3418  ;;  %v7863_v55 = vand.u32 2147483647, %v2884_v2  ;;  %v7877_v13 = vrot.slane %v7296_v38, %v6458_v63  ;;  %v7884_v2 = vadd.f32 %v7765_v23, %v2683_v34  ;;  %v2687_v30 = vadd.f32 %v2671_v47, %v7693_v17  ;;  %v9653_v19 = vld [vmem:[#allocation301_spill] sm:$0xff]  ;;  %v9655_v17 = vld [vmem:[#allocation296_spill] sm:$0xff]  ;;  %v9656_v47 = vld [vmem:[#allocation303_spill] sm:$0xff] }
 0x42d   : > { %3854 = vperm.xlu1 %4763, %v7858_v24   ;;  %v2764_v39 = vsub.f32 %v9651_v42, %v7478_v31  ;;  %v7889_v18 = vand.u32 2147483647, %v2886_v44  ;;  %v2689_v53 = vadd.f32 %v2673_v40, %v7697_v61  ;;  %v2777_v43 = vand.u32 2147483647, %v2761_v9  ;;  %v9657_v9 = vld [vmem:[#allocation290_spill] sm:$0xff] }
 0x42e   : > { %v2766_v63 = vsub.f32 %v9653_v19, %v7478_v31  ;;  %v2892_v26 = vsub.f32 %v9654_v60, %v7556_v11  ;;  %v2691_v23 = vadd.f32 %v2675_v6, %v7711_v15  ;;  %v2763_v34 = vsub.f32 %v9655_v17, %v7478_v31  ;;  %v9659_v17 = vld [vmem:[#allocation305_spill] sm:$0xff] }
 0x42f   : > { %4262 = vperm.xlu0 %4781, %v7880_v45   ;;  %v2768_v44 = vsub.f32 %v9656_v47, %v7478_v31  ;;  %v7904_v42 = vand.u32 2147483647, %v2888_v28  ;;  %v7907_v61 = vadd.f32 %v7773_v52, %v2685_v54  ;;  %v7909_v40 = vand.u32 2147483647, %v2890_v59  ;;  %v9660_v28 = vld [vmem:[#allocation15_spill] sm:$0xff]  ;;  %v7924_v54 = vpop.permute.xlu0 %3654 }
 0x430   : > { %v7891_v7 = vpop.permute.xlu1 %3426  ;;  %v2994_v60 = vsub.f32 %v9657_v9, %v7644_v16  ;;  %v7916_v6 = vadd.f32 %v7791_v20, %v2687_v30  ;;  %v2780_v19 = vand.u32 2147483647, %v2764_v39  ;;  %v2770_v47 = vsub.f32 %v9659_v17, %v7478_v31  ;;  %9662 = vst [vmem:[#allocation105_spill] sm:$0xff] %v7924_v54  ;;  %v7933_v20 = vld [vmem:[%s5155_s14 + $0x18] sm:$0xff] }
 0x431   : > { %9652 = vst [vmem:[#allocation103_spill] sm:$0xff] %v7891_v7  ;;  %3862 = vperm.xlu1 %4763, %v7373_v32   ;;  %v9658_v32 = vld [vmem:[#allocation294_spill] sm:$0xff]  ;;  %v2772_v24 = vsub.f32 %v9660_v28, %v7478_v31  ;;  %v7927_v59 = vadd.f32 %v7793_v4, %v2689_v53  ;;  %v2793_v9 = vadd.f32 %v2777_v43, %v7717_v5  ;;  %v7930_v7 = vand.u32 2147483647, %v2892_v26  ;;  %v9664_v28 = vld [vmem:[#allocation17_spill] sm:$0xff]  ;;  %v9666_v5 = vld [vmem:[#allocation299_spill] sm:$0xff] }
 0x432   : > { %v2997_v15 = vsub.f32 %v9658_v32, %v7644_v16  ;;  %v2782_v32 = vand.u32 2147483647, %v2766_v63  ;;  %9663 = vst [vmem:[#allocation106_spill] sm:$0xff] %v7933_v20  ;;  %v7937_v30 = vadd.f32 %v7822_v27, %v2691_v23  ;;  %v2779_v39 = vand.u32 2147483647, %v2763_v34  ;;  %v9665_v63 = vld [vmem:[#allocation297_spill] sm:$0xff] }
 0x433   : > { %v2784_v17 = vand.u32 2147483647, %v2768_v44  ;;  %v2774_v54 = vsub.f32 %v9664_v28, %v7478_v31  ;;  %v7941_v4 = vand.u32 2147483647, %v2994_v60  ;;  %v2999_v26 = vsub.f32 %v9665_v63, %v7644_v16  ;;  %v9667_v34 = vld [vmem:[#allocation18_spill] sm:$0xff] }
 0x434   : > { %v7922_v52 = vpop.permute.xlu1 %3434  ;;  %v7943_v53 = vand.u32 2147483647, %v2997_v15  ;;  %v3001_v43 = vsub.f32 %v9666_v5, %v7644_v16  ;;  %v2786_v27 = vand.u32 2147483647, %v2770_v47  ;;  %v2788_v23 = vand.u32 2147483647, %v2772_v24  ;;  %v7974_v47 = vpop.permute.xlu0 %3662 }
 0x435   : > { %9661 = vst [vmem:[#allocation104_spill] sm:$0xff] %v7922_v52  ;;  %3866 = vperm.xlu1 %4763, %v7933_v20   ;;  %v2796_v20 = vadd.f32 %v2780_v19, %v7761_v22  ;;  %v2776_v44 = vsub.f32 %v9667_v34, %v7478_v31  ;;  %v7955_v60 = vadd.f32 %v7838_v33, %v2793_v9  ;;  %v9668_v28 = vld [vmem:[#allocation302_spill] sm:$0xff]  ;;  %v2790_v33 = vand.u32 2147483647, %v2774_v54  ;;  %v9670_v19 = vld [vmem:[#allocation304_spill] sm:$0xff]  ;;  %v9672_v9 = vld [vmem:[#allocation21_spill] sm:$0xff] }
 0x436   : > { %v2798_v15 = vadd.f32 %v2782_v32, %v7768_v21  ;;  %v3003_v63 = vsub.f32 %v9668_v28, %v7644_v16  ;;  %v7962_v5 = vrot.slane %v7296_v38, %v6520_v3  ;;  %v7965_v22 = vld [vmem:[%s5155_s14 + $0x28] sm:$0xff]  ;;  %v7969_v31 = vadd.f32 %v2779_v39, %v7853_v8  ;;  %9671 = vst [vmem:[#allocation108_spill] sm:$0xff] %v7974_v47 }
 0x437   : > { %9669 = vst [vmem:[#allocation107_spill] sm:$0xff] %v7965_v22  ;;  %v2800_v24 = vadd.f32 %v2784_v17, %v7782_v48  ;;  %v3005_v21 = vsub.f32 %v9670_v19, %v7644_v16  ;;  %v2878_v32 = vsub.f32 %v9672_v9, %v7556_v11  ;;  %v7978_v38 = vand.u32 2147483647, %v2999_v26  ;;  %v9673_v28 = vld [vmem:[#allocation14_spill] sm:$0xff]  ;;  %v9675_v26 = vld [vmem:[#allocation24_spill] sm:$0xff] }
 0x438   : > { %v7952_v52 = vpop.permute.xlu1 %3442  ;;  %v7980_v34 = vand.u32 2147483647, %v3001_v43  ;;  %v3007_v3 = vsub.f32 %v9673_v28, %v7644_v16  ;;  %v7985_v8 = vadd.f32 %v7842_v37, %v2796_v20  ;;  %v2802_v48 = vadd.f32 %v2786_v27, %v7788_v29  ;;  %v9676_v28 = vld [vmem:[#allocation177_spill] sm:$0xff] }
 0x439   : > { %3874 = vperm.xlu1 %4763, %v7965_v22   ;;  %v2804_v54 = vadd.f32 %v2788_v23, %v7805_v25  ;;  %v2792_v39 = vand.u32 2147483647, %v2776_v44  ;;  %v7992_v19 = vadd.f32 %v7861_v62, %v2798_v15  ;;  %v2881_v43 = vsub.f32 %v9675_v26, %v7556_v11  ;;  %v9677_v62 = vld [vmem:[#allocation179_spill] sm:$0xff]  ;;  %v9678_v23 = vld [vmem:[#allocation182_spill] sm:$0xff]  ;;  %v8051_v22 = vld [vmem:[%s5167_s16 + $0x18] sm:$0xff] }
 0x43a   : > { %v7996_v9 = vand.u32 2147483647, %v3003_v63  ;;  %v3109_v47 = vsub.f32 %v9676_v28, %v7750_v14  ;;  %v8002_v29 = vadd.f32 %v7863_v55, %v2800_v24  ;;  %v2806_v25 = vadd.f32 %v2790_v33, %v7825_v46  ;;  %v9679_v15 = vld [vmem:[#allocation26_spill] sm:$0xff]  ;;  %v9680_v24 = vld [vmem:[#allocation28_spill] sm:$0xff] }
 0x43b   : > { %v8005_v37 = vand.u32 2147483647, %v3005_v21  ;;  %v3112_v20 = vsub.f32 %v9677_v62, %v7750_v14  ;;  %v2894_v27 = vand.u32 2147483647, %v2878_v32  ;;  %v2879_v44 = vsub.f32 %v9678_v23, %v7556_v11  ;;  %v8024_v21 = vpop.permute.xlu0 %3670  ;;  %v9682_v28 = vld [vmem:[#allocation30_spill] sm:$0xff] }
 0x43c   : > { %v7989_v17 = vpop.permute.xlu1 %3450  ;;  %v2883_v63 = vsub.f32 %v9679_v15, %v7556_v11  ;;  %v8013_v26 = vand.u32 2147483647, %v3007_v3  ;;  %v8019_v46 = vadd.f32 %v7904_v42, %v2804_v54  ;;  %v2808_v55 = vadd.f32 %v2792_v39, %v7835_v58  ;;  %9681 = vst [vmem:[#allocation110_spill] sm:$0xff] %v8024_v21  ;;  %v8033_v23 = vld [vmem:[%s5155_s14 + $0x48] sm:$0xff] }
 0x43d   : > { %9674 = vst [vmem:[#allocation109_spill] sm:$0xff] %v7989_v17  ;;  %3882 = vperm.xlu1 %4763, %v7724_v36   ;;  %v8016_v36 = vadd.f32 %v7889_v18, %v2802_v48  ;;  %v2885_v33 = vsub.f32 %v9680_v24, %v7556_v11  ;;  %v2897_v32 = vand.u32 2147483647, %v2881_v43  ;;  %v2887_v62 = vsub.f32 %v9682_v28, %v7556_v11  ;;  %v9683_v18 = vld [vmem:[#allocation20_spill] sm:$0xff]  ;;  %v9686_v54 = vld [vmem:[#allocation31_spill] sm:$0xff] }
 0x43e   : > { %v8028_v3 = vand.u32 2147483647, %v3109_v47  ;;  %v3114_v48 = vsub.f32 %v9683_v18, %v7750_v14  ;;  %9684 = vst [vmem:[#allocation111_spill] sm:$0xff] %v8033_v23  ;;  %v8039_v42 = vadd.f32 %v7909_v40, %v2806_v25  ;;  %v2889_v39 = vsub.f32 %v9686_v54, %v7556_v11  ;;  %v9687_v47 = vld [vmem:[#allocation22_spill] sm:$0xff]  ;;  %v9689_v54 = vld [vmem:[#allocation23_spill] sm:$0xff] }
 0x43f   : > { %v8043_v43 = vand.u32 2147483647, %v3112_v20  ;;  %v3116_v15 = vsub.f32 %v9687_v47, %v7750_v14  ;;  %v2910_v24 = vadd.f32 %v2894_v27, %v7850_v49  ;;  %v2895_v28 = vand.u32 2147483647, %v2879_v44  ;;  %v9691_v44 = vld [vmem:[#allocation27_spill] sm:$0xff] }
 0x440   : > { %v2899_v18 = vand.u32 2147483647, %v2883_v63  ;;  %v8054_v40 = vadd.f32 %v7930_v7, %v2808_v55  ;;  %v2901_v25 = vand.u32 2147483647, %v2885_v33  ;;  %v3118_v20 = vsub.f32 %v9689_v54, %v7750_v14  ;;  %v8066_v63 = vld [vmem:[%s5155_s14 + $0x58] sm:$0xff]  ;;  %v9694_v33 = vld [vmem:[#allocation34_spill] sm:$0xff] }
 0x441   : > { %3890 = vperm.xlu1 %4763, %v8033_v23   ;;  %v8036_v58 = vpop.permute.xlu1 %3510  ;;  %v9688_v23 = vld [vmem:[#allocation185_spill] sm:$0xff]  ;;  %v2913_v47 = vadd.f32 %v2897_v32, %v7870_v1  ;;  %v2903_v49 = vand.u32 2147483647, %v2887_v62  ;;  %v8061_v27 = vand.u32 2147483647, %v3114_v48  ;;  %9692 = vst [vmem:[#allocation116_spill] sm:$0xff] %v8066_v63  ;;  %v8077_v1 = vrot.slane %v8051_v22, %v9322_v35  ;;  %v8079_v32 = vpop.permute.xlu0 %3678 }
 0x442   : > { %9685 = vst [vmem:[#allocation114_spill] sm:$0xff] %v8036_v58  ;;  %v2891_v21 = vsub.f32 %v9688_v23, %v7556_v11  ;;  %v9690_v58 = vld [vmem:[#allocation25_spill] sm:$0xff]  ;;  %v3122_v11 = vsub.f32 %v9691_v44, %v7750_v14  ;;  %v2905_v55 = vand.u32 2147483647, %v2889_v39  ;;  %v2993_v23 = vsub.f32 %v9694_v33, %v7644_v16  ;;  %9695 = vst [vmem:[#allocation112_spill] sm:$0xff] %v8079_v32 }
 0x443   : > { %v3120_v17 = vsub.f32 %v9690_v58, %v7750_v14  ;;  %v8073_v54 = vand.u32 2147483647, %v3116_v15  ;;  %v8082_v62 = vadd.f32 %v7941_v4, %v2910_v24  ;;  %v8085_v48 = vadd.f32 %v2895_v28, %v7969_v31  ;;  %v9697_v35 = vld [vmem:[#allocation29_spill] sm:$0xff]  ;;  %v9698_v31 = vld [vmem:[#allocation32_spill] sm:$0xff]  ;;  %v9699_v28 = vld [vmem:[#allocation191_spill] sm:$0xff] }
 0x444   : > { %v2915_v58 = vadd.f32 %v2899_v18, %v7884_v2  ;;  %v2907_v39 = vand.u32 2147483647, %v2891_v21  ;;  %v2917_v44 = vadd.f32 %v2901_v25, %v7907_v61  ;;  %v8089_v33 = vand.u32 2147483647, %v3118_v20 }
 0x445   : > { %3898 = vperm.xlu1 %4763, %v8066_v63   ;;  %v8069_v7 = vpop.permute.xlu1 %3514  ;;  %9696 = vst [vmem:[#allocation120_spill] sm:$0xff] %v8085_v48  ;;  %v8091_v15 = vand.u32 2147483647, %v3120_v17  ;;  %v3124_v63 = vsub.f32 %v9697_v35, %v7750_v14  ;;  %v2919_v4 = vadd.f32 %v2903_v49, %v7916_v6  ;;  %v8099_v24 = vand.u32 2147483647, %v3122_v11 }
 0x446   : > { %9693 = vst [vmem:[#allocation118_spill] sm:$0xff] %v8069_v7  ;;  %v8096_v7 = vadd.f32 %v7943_v53, %v2913_v47  ;;  %v3226_v2 = vsub.f32 %v9698_v31, %v7877_v13  ;;  %v2921_v17 = vadd.f32 %v2905_v55, %v7927_v59  ;;  %v3009_v21 = vand.u32 2147483647, %v2993_v23  ;;  %v9700_v53 = vld [vmem:[#allocation33_spill] sm:$0xff]  ;;  %v9701_v47 = vld [vmem:[#allocation39_spill] sm:$0xff]  ;;  %v9703_v55 = vld [vmem:[#allocation42_spill] sm:$0xff] }
 0x447   : > { %v2996_v18 = vsub.f32 %v9699_v28, %v7644_v16  ;;  %v3229_v25 = vsub.f32 %v9700_v53, %v7877_v13  ;;  %v8112_v6 = vadd.f32 %v7978_v38, %v2915_v58  ;;  %v2923_v20 = vadd.f32 %v2907_v39, %v7937_v30  ;;  %v9704_v31 = vld [vmem:[#allocation188_spill] sm:$0xff]  ;;  %v8128_v58 = vpop.permute.xlu0 %3738 }
 0x448   : > { %v2998_v49 = vsub.f32 %v9701_v47, %v7644_v16  ;;  %v8120_v59 = vadd.f32 %v7980_v34, %v2917_v44  ;;  %v3002_v23 = vsub.f32 %v9703_v55, %v7644_v16  ;;  %v8124_v35 = vand.u32 2147483647, %v3124_v63  ;;  %v9705_v39 = vld [vmem:[#allocation44_spill] sm:$0xff]  ;;  %v9706_v34 = vld [vmem:[#allocation35_spill] sm:$0xff] }
 0x449   : > { %3906 = vperm.xlu1 %4763, %v7796_v10   ;;  %v8104_v61 = vpop.permute.xlu1 %3522  ;;  %v9702_v10 = vld [vmem:[#allocation41_spill] sm:$0xff]  ;;  %v3231_v38 = vsub.f32 %v9704_v31, %v7877_v13  ;;  %v8131_v30 = vadd.f32 %v7996_v9, %v2919_v4  ;;  %v3004_v28 = vsub.f32 %v9705_v39, %v7644_v16  ;;  %v8135_v53 = vand.u32 2147483647, %v3226_v2 }
 0x44a   : > { %v3000_v11 = vsub.f32 %v9702_v10, %v7644_v16  ;;  %v3233_v44 = vsub.f32 %v9706_v34, %v7877_v13  ;;  %v8143_v47 = vadd.f32 %v8005_v37, %v2921_v17  ;;  %v3025_v10 = vadd.f32 %v3009_v21, %v7955_v60  ;;  %v9709_v37 = vld [vmem:[#allocation46_spill] sm:$0xff] }
 0x44b   : > { %v3012_v55 = vand.u32 2147483647, %v2996_v18  ;;  %v8146_v9 = vand.u32 2147483647, %v3229_v25  ;;  %v8149_v4 = vadd.f32 %v8013_v26, %v2923_v20  ;;  %v3014_v2 = vand.u32 2147483647, %v2998_v49  ;;  %v8176_v32 = vpop.permute.xlu0 %3750 }
 0x44c   : > { %v3016_v31 = vand.u32 2147483647, %v3000_v11  ;;  %v8153_v39 = vrot.slane %v8051_v22, %v9336_v51  ;;  %v3018_v48 = vand.u32 2147483647, %v3002_v23  ;;  %v3006_v17 = vsub.f32 %v9709_v37, %v7644_v16  ;;  %v9710_v26 = vld [vmem:[#allocation37_spill] sm:$0xff]  ;;  %v9711_v20 = vld [vmem:[#allocation38_spill] sm:$0xff] }
 0x44d   : > { %3914 = vperm.xlu1 %4763, %v7880_v45   ;;  %v8140_v63 = vpop.permute.xlu1 %3530  ;;  %9707 = vst [vmem:[#allocation113_spill] sm:$0xff] %v8149_v4  ;;  %v9708_v45 = vld [vmem:[#allocation36_spill] sm:$0xff]  ;;  %v8159_v60 = vand.u32 2147483647, %v3231_v38  ;;  %v3020_v21 = vand.u32 2147483647, %v3004_v28  ;;  %v3235_v25 = vsub.f32 %v9710_v26, %v7877_v13  ;;  %v3237_v49 = vsub.f32 %v9711_v20, %v7877_v13 }
 0x44e   : > { %v2995_v34 = vsub.f32 %v9708_v45, %v7644_v16  ;;  %v8161_v18 = vand.u32 2147483647, %v3233_v44  ;;  %v9712_v51 = vmov 29   ;;  %v3141_v23 = vadd.f32 %v8028_v3, %v3025_v10  ;;  %v9714_v38 = vld [vmem:[#allocation48_spill] sm:$0xff] }
 0x44f   : > { %v3028_v45 = vadd.f32 %v3012_v55, %v7985_v8  ;;  %v3008_v37 = vsub.f32 %v9714_v38, %v7644_v16  ;;  %v9715_v28 = vld [vmem:[#allocation40_spill] sm:$0xff]  ;;  %v3030_v26 = vadd.f32 %v3014_v2, %v7992_v19  ;;  %v3032_v20 = vadd.f32 %v3016_v31, %v8002_v29  ;;  %v9718_v38 = vld [vmem:[#allocation50_spill] sm:$0xff]  ;;  %v9720_v2 = vld [vmem:[#allocation45_spill] sm:$0xff] }
 0x450   : > { %v3239_v44 = vsub.f32 %v9715_v28, %v7877_v13  ;;  %v3225_v8 = vsub.f32 %v7237_v41, %v7877_v13  ;;  %v8185_v10 = vand.u32 2147483647, %v2995_v34  ;;  %v3034_v16 = vadd.f32 %v3018_v48, %v8016_v36  ;;  %v9723_v36 = vld [vmem:[#allocation47_spill] sm:$0xff] }
 0x451   : > { %4766 = vset.pattern.permute.xlu1 %v9712_v51  ;;  %v8168_v11 = vpop.permute.xlu1 %3538  ;;  %v9716_v51 = vld [vmem:[#allocation43_spill] sm:$0xff]  ;;  %v3022_v55 = vand.u32 2147483647, %v3006_v17  ;;  %v3110_v28 = vsub.f32 %v9718_v38, %v7750_v14  ;;  %v8191_v19 = vand.u32 2147483647, %v3235_v25  ;;  %v3344_v31 = vsub.f32 %v9720_v2, %v7962_v5  ;;  %v8220_v2 = vpop.permute.xlu0 %3758 }
 0x452   : > { %9713 = vst [vmem:[#allocation115_spill] sm:$0xff] %v8168_v11  ;;  %3974 = vperm.xlu1 %4766, %v7533_v12   ;;  %v3341_v3 = vsub.f32 %v9716_v51, %v7962_v5  ;;  %9717 = vst [vmem:[#allocation117_spill] sm:$0xff] %v8185_v10  ;;  %v3036_v12 = vadd.f32 %v3020_v21, %v8019_v46  ;;  %v8193_v29 = vand.u32 2147483647, %v3237_v49  ;;  %v3024_v34 = vand.u32 2147483647, %v3008_v37 }
 0x453   : > { %v3144_v41 = vadd.f32 %v8043_v43, %v3028_v45  ;;  %v8200_v10 = vand.u32 2147483647, %v3239_v44  ;;  %v3346_v48 = vsub.f32 %v9723_v36, %v7962_v5  ;;  %v8205_v17 = vld [vmem:[%s5155_s14 + $0x10] sm:$0xff]  ;;  %v8209_v46 = vadd.f32 %v8061_v27, %v3030_v26  ;;  %v9724_v44 = vld [vmem:[#allocation54_spill] sm:$0xff] }
 0x454   : > { %9719 = vst [vmem:[#allocation122_spill] sm:$0xff] %v8193_v29  ;;  %v8212_v21 = vadd.f32 %v8073_v54, %v3032_v20  ;;  %v3357_v25 = vand.u32 2147483647, %v3341_v3  ;;  %v3241_v49 = vand.u32 2147483647, %v3225_v8  ;;  %v8215_v43 = vadd.f32 %v8089_v33, %v3034_v16  ;;  %v9725_v54 = vld [vmem:[#allocation194_spill] sm:$0xff] }
 0x455   : > { %v8197_v51 = vpop.permute.xlu1 %3546  ;;  %9722 = vst [vmem:[#allocation124_spill] sm:$0xff] %v8200_v10  ;;  %v3038_v45 = vadd.f32 %v3022_v55, %v8039_v42  ;;  %v3126_v37 = vand.u32 2147483647, %v3110_v28  ;;  %v3113_v38 = vsub.f32 %v9724_v44, %v7750_v14  ;;  %v8223_v36 = vadd.f32 %v8091_v15, %v3036_v12  ;;  %v9727_v3 = vld [vmem:[#allocation56_spill] sm:$0xff]  ;;  %v9728_v15 = vld [vmem:[#allocation286_spill] sm:$0xff] }
 0x456   : > { %9721 = vst [vmem:[#allocation119_spill] sm:$0xff] %v8197_v51  ;;  %3978 = vperm.xlu1 %4766, %v8205_v17   ;;  %v8225_v27 = vand.u32 2147483647, %v3344_v31  ;;  %v3348_v26 = vsub.f32 %v9725_v54, %v7962_v5  ;;  %v3457_v33 = vsub.f32 %v7707_v56, %v8077_v1  ;;  %v3040_v42 = vadd.f32 %v3024_v34, %v8054_v40  ;;  %v9729_v56 = vld [vmem:[#allocation51_spill] sm:$0xff]  ;;  %v9730_v44 = vld [vmem:[#allocation292_spill] sm:$0xff] }
 0x457   : > { %v3115_v8 = vsub.f32 %v9727_v3, %v7750_v14  ;;  %v8236_v16 = vand.u32 2147483647, %v3346_v48  ;;  %v3350_v55 = vsub.f32 %v9728_v15, %v7962_v5  ;;  %v3257_v28 = vadd.f32 %v3241_v49, %v3141_v23  ;;  %v9731_v3 = vld [vmem:[#allocation293_spill] sm:$0xff]  ;;  %v9733_v15 = vld [vmem:[#allocation74_spill] sm:$0xff]  ;;  %v9737_v51 = vld [vmem:[#allocation67_spill] sm:$0xff] }
 0x458   : > { %v3228_v12 = vsub.f32 %v7287_v0, %v7877_v13  ;;  %v3352_v31 = vsub.f32 %v9729_v56, %v7962_v5  ;;  %v8247_v40 = vrot.slane %v8051_v22, %v9730_v44  ;;  %v8250_v34 = vadd.f32 %v8099_v24, %v3038_v45  ;;  %v9732_v0 = vld [vmem:[#allocation53_spill] sm:$0xff] }
 0x459   : > { %v8231_v20 = vpop.permute.xlu1 %3554  ;;  %v3142_v48 = vadd.f32 %v3126_v37, %v8082_v62  ;;  %v3129_v54 = vand.u32 2147483647, %v3113_v38  ;;  %v8257_v23 = vand.u32 2147483647, %v3348_v26  ;;  %v3354_v49 = vsub.f32 %v9732_v0, %v7962_v5  ;;  %v9735_v37 = vld [vmem:[#allocation57_spill] sm:$0xff]  ;;  %v8272_v26 = vpop.permute.xlu0 %3766 }
 0x45a   : > { %9726 = vst [vmem:[#allocation121_spill] sm:$0xff] %v8231_v20  ;;  %3986 = vperm.xlu1 %4766, %v7592_v50   ;;  %v8255_v50 = vrot.slane %v8051_v22, %v9731_v3  ;;  %v3573_v56 = vsub.f32 %v9733_v15, %v8153_v39  ;;  %v3473_v44 = vand.u32 2147483647, %v3457_v33  ;;  %v8266_v24 = vadd.f32 %v8124_v35, %v3040_v42  ;;  %v9736_v3 = vld [vmem:[#allocation91_spill] sm:$0xff]  ;;  %v9738_v42 = vld [vmem:[#allocation289_spill] sm:$0xff] }
 0x45b   : > { %v3131_v62 = vand.u32 2147483647, %v3115_v8  ;;  %v8268_v45 = vand.u32 2147483647, %v3350_v55  ;;  %v3356_v38 = vsub.f32 %v9735_v37, %v7962_v5  ;;  %v3244_v0 = vand.u32 2147483647, %v3228_v12 }
 0x45c   : > { %v3230_v15 = vsub.f32 %v9737_v51, %v7877_v13  ;;  %v8277_v33 = vand.u32 2147483647, %v3352_v31  ;;  %v3145_v35 = vadd.f32 %v3129_v54, %v8096_v7  ;;  %v3117_v8 = vsub.f32 %v9738_v42, %v7750_v14  ;;  %v9739_v51 = vld [vmem:[#allocation97_spill] sm:$0xff]  ;;  %v9740_v7 = vld [vmem:[#allocation68_spill] sm:$0xff] }
 0x45d   : > { %v8263_v20 = vpop.permute.xlu1 %3562  ;;  %v8283_v55 = vadd.f32 %v8135_v53, %v3142_v48  ;;  %v3805_v37 = vsub.f32 %v8128_v58, %v8255_v50  ;;  %v8287_v10 = vand.u32 2147483647, %v3354_v49  ;;  %v3589_v12 = vand.u32 2147483647, %v3573_v56  ;;  %v9741_v53 = vld [vmem:[#allocation58_spill] sm:$0xff]  ;;  %v9742_v42 = vld [vmem:[#allocation92_spill] sm:$0xff]  ;;  %v8307_v29 = vpop.permute.xlu0 %3774 }
 0x45e   : > { %9734 = vst [vmem:[#allocation126_spill] sm:$0xff] %v8263_v20  ;;  %3994 = vperm.xlu1 %4766, %v9736_v3   ;;  %v3373_v20 = vadd.f32 %v3357_v25, %v3257_v28  ;;  %v3460_v31 = vsub.f32 %v9739_v51, %v8077_v1  ;;  %v3147_v25 = vadd.f32 %v3131_v62, %v8112_v6  ;;  %v8294_v54 = vand.u32 2147483647, %v3356_v38  ;;  %v9744_v62 = vld [vmem:[#allocation76_spill] sm:$0xff] }
 0x45f   : > { %v3232_v28 = vsub.f32 %v9740_v7, %v7877_v13  ;;  %v3458_v48 = vsub.f32 %v9741_v53, %v8077_v1  ;;  %v3260_v49 = vadd.f32 %v3244_v0, %v3144_v41  ;;  %v3246_v11 = vand.u32 2147483647, %v3230_v15 }
 0x460   : > { %v3489_v3 = vadd.f32 %v3473_v44, %v3373_v20  ;;  %v9743_v20 = vld [vmem:[#allocation70_spill] sm:$0xff]  ;;  %v3133_v51 = vand.u32 2147483647, %v3117_v8  ;;  %v8303_v6 = vadd.f32 %v8146_v9, %v3145_v35  ;;  %v3576_v38 = vsub.f32 %v9744_v62, %v8153_v39  ;;  %v9747_v35 = vld [vmem:[#allocation88_spill] sm:$0xff] }
 0x461   : > { %v3234_v56 = vsub.f32 %v9743_v20, %v7877_v13  ;;  %v3821_v7 = vand.u32 2147483647, %v3805_v37  ;;  %v3476_v53 = vand.u32 2147483647, %v3460_v31  ;;  %v9746_v20 = vld [vmem:[#allocation59_spill] sm:$0xff]  ;;  %v8316_v9 = vadd.f32 %v8159_v60, %v3147_v25 }
 0x462   : > { %4002 = vperm.xlu1 %4766, %v9742_v42   ;;  %v3623_v58 = vpop.permute.xlu1 %3622  ;;  %v9745_v42 = vld [vmem:[#allocation99_spill] sm:$0xff]  ;;  %v3605_v0 = vadd.f32 %v3589_v12, %v3489_v3  ;;  %v3119_v4 = vsub.f32 %v9746_v20, %v7750_v14  ;;  %v8313_v8 = vand.u32 2147483647, %v3458_v48  ;;  %v3262_v31 = vadd.f32 %v3246_v11, %v8209_v46 }
 0x463   : > { %v3689_v44 = vsub.f32 %v3623_v58, %v8247_v40  ;;  %v3462_v41 = vsub.f32 %v9745_v42, %v8077_v1  ;;  %v3248_v58 = vand.u32 2147483647, %v3232_v28  ;;  %v3250_v62 = vand.u32 2147483647, %v3234_v56  ;;  %v9748_v28 = vld [vmem:[#allocation78_spill] sm:$0xff] }
 0x464   : > { %v3376_v42 = vadd.f32 %v8225_v27, %v3260_v49  ;;  %v8324_v3 = vadd.f32 %v3133_v51, %v8120_v59  ;;  %v3578_v48 = vsub.f32 %v9748_v28, %v8153_v39  ;;  %v3808_v60 = vsub.f32 %v8176_v32, %v8255_v50  ;;  %v9750_v27 = vld [vmem:[#allocation72_spill] sm:$0xff]  ;;  %v9751_v49 = vld [vmem:[#allocation61_spill] sm:$0xff] }
 0x465   : > { %v3705_v15 = vand.u32 2147483647, %v3689_v44  ;;  %v3592_v44 = vand.u32 2147483647, %v3576_v38  ;;  %v3478_v20 = vand.u32 2147483647, %v3462_v41  ;;  %v3264_v46 = vadd.f32 %v3248_v58, %v8212_v21 }
 0x466   : > { %4010 = vperm.xlu1 %4766, %v9747_v35   ;;  %v8319_v37 = vpop.permute.xlu1 %3630  ;;  %v3492_v25 = vadd.f32 %v3476_v53, %v3376_v42  ;;  %v3464_v35 = vsub.f32 %v7847_v57, %v8077_v1  ;;  %v3236_v59 = vsub.f32 %v9750_v27, %v7877_v13  ;;  %v3461_v56 = vsub.f32 %v9751_v49, %v8077_v1  ;;  %v9752_v51 = vld [vmem:[#allocation81_spill] sm:$0xff]  ;;  %v9753_v32 = vld [vmem:[#allocation96_spill] sm:$0xff]  ;;  %v9754_v58 = vld [vmem:[#allocation103_spill] sm:$0xff] }
 0x467   : > { %v3721_v12 = vadd.f32 %v3705_v15, %v3605_v0  ;;  %v3580_v38 = vsub.f32 %v9752_v51, %v8153_v39  ;;  %v8341_v0 = vpop.permute.xlu0 %3782  ;;  %v8344_v41 = vand.u32 2147483647, %v3119_v4  ;;  %v3266_v57 = vadd.f32 %v3250_v62, %v8215_v43 }
 0x468   : > { %v3378_v21 = vadd.f32 %v8236_v16, %v3262_v31  ;;  %v3594_v15 = vand.u32 2147483647, %v3578_v48  ;;  %v3466_v42 = vsub.f32 %v9754_v58, %v8077_v1  ;;  %v3810_v28 = vsub.f32 %v8220_v2, %v8255_v50  ;;  %v9756_v31 = vld [vmem:[#allocation98_spill] sm:$0xff] }
 0x469   : > { %v8332_v11 = vadd.f32 %v3821_v7, %v3721_v12  ;;  %v3824_v12 = vand.u32 2147483647, %v3808_v60  ;;  %v3480_v49 = vand.u32 2147483647, %v3464_v35  ;;  %v3608_v51 = vadd.f32 %v3592_v44, %v3492_v25  ;;  %v9758_v25 = vld [vmem:[#allocation104_spill] sm:$0xff] }
 0x46a   : > { %4018 = vperm.xlu1 %4766, %v9753_v32   ;;  %v3635_v53 = vpop.permute.xlu1 %3634  ;;  %v3494_v27 = vadd.f32 %v3478_v20, %v3378_v21  ;;  %v3252_v4 = vand.u32 2147483647, %v3236_v59  ;;  %v3596_v62 = vand.u32 2147483647, %v3580_v38  ;;  %v3380_v16 = vadd.f32 %v8257_v23, %v3264_v46 }
 0x46b   : > { %9749 = vst [vmem:[#allocation128_spill] sm:$0xff] %v8332_v11  ;;  %v3692_v7 = vsub.f32 %v3635_v53, %v8247_v40  ;;  %v9755_v11 = vld [vmem:[#allocation73_spill] sm:$0xff]  ;;  %v9757_v53 = vld [vmem:[#allocation83_spill] sm:$0xff]  ;;  %v3382_v58 = vadd.f32 %v8268_v45, %v3266_v57  ;;  %v3482_v44 = vand.u32 2147483647, %v3466_v42  ;;  %v3468_v35 = vsub.f32 %v9758_v25, %v8077_v1  ;;  %v8365_v23 = vpop.permute.xlu0 %3790 }
 0x46c   : > { %v3238_v43 = vsub.f32 %v9755_v11, %v7877_v13  ;;  %v3582_v60 = vsub.f32 %v9757_v53, %v8153_v39  ;;  %v3826_v59 = vand.u32 2147483647, %v3810_v28  ;;  %v3812_v11 = vsub.f32 %v8272_v26, %v8255_v50 }
 0x46d   : > { %v3708_v32 = vand.u32 2147483647, %v3692_v7  ;;  %v3496_v46 = vadd.f32 %v3480_v49, %v3380_v16  ;;  %v3610_v38 = vadd.f32 %v3594_v15, %v3494_v27  ;;  %v3268_v45 = vadd.f32 %v3252_v4, %v8223_v36 }
 0x46e   : > { %4026 = vperm.xlu1 %4766, %v9756_v31   ;;  %v3643_v48 = vpop.permute.xlu1 %3642  ;;  %v3254_v57 = vand.u32 2147483647, %v3238_v43  ;;  %v9761_v28 = vmov 30   ;;  %v8375_v26 = vand.u32 2147483647, %v3461_v56  ;;  %v3498_v27 = vadd.f32 %v3482_v44, %v3382_v58  ;;  %v9763_v44 = vld [vmem:[#allocation77_spill] sm:$0xff] }
 0x46f   : > { %v3724_v2 = vadd.f32 %v3708_v32, %v3608_v51  ;;  %v3694_v20 = vsub.f32 %v3643_v48, %v8247_v40  ;;  %v9759_v51 = vld [vmem:[#allocation75_spill] sm:$0xff]  ;;  %v9760_v32 = vld [vmem:[#allocation86_spill] sm:$0xff]  ;;  %v3598_v53 = vand.u32 2147483647, %v3582_v60  ;;  %v3484_v36 = vand.u32 2147483647, %v3468_v35 }
 0x470   : > { %v3240_v42 = vsub.f32 %v9759_v51, %v7877_v13  ;;  %v3584_v31 = vsub.f32 %v9760_v32, %v8153_v39  ;;  %v3828_v4 = vand.u32 2147483647, %v3812_v11  ;;  %v3814_v43 = vsub.f32 %v8307_v29, %v8255_v50  ;;  %v8387_v51 = vpop.permute.xlu0 %3798  ;;  %v9764_v29 = vld [vmem:[#allocation89_spill] sm:$0xff] }
 0x471   : > { %v3710_v21 = vand.u32 2147483647, %v3694_v20  ;;  %v8367_v7 = vadd.f32 %v3824_v12, %v3724_v2  ;;  %v9762_v12 = vld [vmem:[#allocation101_spill] sm:$0xff]  ;;  %v3470_v16 = vsub.f32 %v7952_v52, %v8077_v1  ;;  %v3612_v2 = vadd.f32 %v3596_v62, %v3496_v46 }
 0x472   : > { %4767 = vset.pattern.permute.xlu1 %v9761_v28  ;;  %v3651_v48 = vpop.permute.xlu1 %3650  ;;  %v3270_v56 = vadd.f32 %v3254_v57, %v8250_v34  ;;  %v3256_v60 = vand.u32 2147483647, %v3240_v42  ;;  %v3342_v35 = vsub.f32 %v9763_v44, %v7962_v5  ;;  %v3586_v11 = vsub.f32 %v9764_v29, %v8153_v39  ;;  %v9765_v57 = vld [vmem:[#allocation109_spill] sm:$0xff]  ;;  %v9769_v44 = vld [vmem:[#allocation63_spill] sm:$0xff]  ;;  %v9770_v29 = vld [vmem:[#allocation114_spill] sm:$0xff] }
 0x473   : > { %v3726_v49 = vadd.f32 %v3710_v21, %v3610_v38  ;;  %v3696_v15 = vsub.f32 %v3651_v48, %v8247_v40  ;;  %4086 = vperm.xlu1 %4767, %v9762_v12   ;;  %v3600_v38 = vand.u32 2147483647, %v3584_v31  ;;  %v3384_v21 = vadd.f32 %v8277_v33, %v3268_v45 }
 0x474   : > { %v3830_v34 = vand.u32 2147483647, %v3814_v43  ;;  %v3816_v46 = vsub.f32 %v8341_v0, %v8255_v50  ;;  %v3614_v33 = vadd.f32 %v3598_v53, %v3498_v27  ;;  %v3486_v45 = vand.u32 2147483647, %v3470_v16 }
 0x475   : > { %v3712_v20 = vand.u32 2147483647, %v3696_v15  ;;  %v8383_v25 = vadd.f32 %v3826_v59, %v3726_v49  ;;  %v3500_v59 = vadd.f32 %v3484_v36, %v3384_v21  ;;  %v3472_v42 = vsub.f32 %v9765_v57, %v8077_v1  ;;  %v9768_v21 = vld [vmem:[#allocation60_spill] sm:$0xff] }
 0x476   : > { %v3659_v58 = vpop.permute.xlu1 %3658  ;;  %v3151_v48 = vadd.f32 %v8344_v41, %v8131_v30  ;;  %v3272_v49 = vadd.f32 %v3256_v60, %v8266_v24  ;;  %v8406_v15 = vadd.f32 %v8161_v18, %v8324_v3  ;;  %v3386_v36 = vadd.f32 %v8287_v10, %v3270_v56  ;;  %v3859_v41 = vpop.permute.xlu0 %3858 }
 0x477   : > { %v3728_v52 = vadd.f32 %v3712_v20, %v3612_v2  ;;  %v3698_v62 = vsub.f32 %v3659_v58, %v8247_v40  ;;  %4094 = vperm.xlu1 %4767, %v8205_v17   ;;  %v3358_v53 = vand.u32 2147483647, %v3342_v35  ;;  %v3602_v27 = vand.u32 2147483647, %v3586_v11 }
 0x478   : > { %v9766_v2 = vmov 31   ;;  %v3832_v30 = vand.u32 2147483647, %v3816_v46  ;;  %v3818_v24 = vsub.f32 %v8365_v23, %v8255_v50  ;;  %v3616_v18 = vadd.f32 %v3600_v38, %v3500_v59  ;;  %v9772_v46 = vld [vmem:[#allocation80_spill] sm:$0xff] }
 0x479   : > { %v3714_v32 = vand.u32 2147483647, %v3698_v62  ;;  %v8399_v31 = vadd.f32 %v3828_v4, %v3728_v52  ;;  %v9767_v4 = vld [vmem:[#allocation93_spill] sm:$0xff]  ;;  %v3502_v10 = vadd.f32 %v3486_v45, %v3386_v36  ;;  %v3488_v3 = vand.u32 2147483647, %v3472_v42  ;;  %v9771_v52 = vld [vmem:[#allocation295_spill] sm:$0xff] }
 0x47a   : > { %v3667_v0 = vpop.permute.xlu1 %3666  ;;  %v3588_v20 = vsub.f32 %v9767_v4, %v8153_v39  ;;  %v3121_v58 = vsub.f32 %v9768_v21, %v7750_v14  ;;  %v3463_v35 = vsub.f32 %v9769_v44, %v8077_v1  ;;  %v3574_v11 = vsub.f32 %v9770_v29, %v8153_v39  ;;  %v8443_v4 = vpop.permute.xlu0 %3870 }
 0x47b   : > { %v3730_v43 = vadd.f32 %v3714_v32, %v3614_v33  ;;  %v3700_v16 = vsub.f32 %v3667_v0, %v8247_v40  ;;  %4769 = vset.pattern.permute.xlu1 %v9766_v2  ;;  %v8426_v23 = vrot.slane %v8051_v22, %v9771_v52  ;;  %v3388_v62 = vadd.f32 %v8294_v54, %v3272_v49  ;;  %v9773_v0 = vld [vmem:[#allocation106_spill] sm:$0xff] }
 0x47c   : > { %4202 = vperm.xlu1 %4769, %v9762_v12   ;;  %v3374_v12 = vadd.f32 %v3358_v53, %v8283_v55  ;;  %v3345_v33 = vsub.f32 %v9772_v46, %v7962_v5  ;;  %v3604_v45 = vand.u32 2147483647, %v3588_v20  ;;  %v3834_v57 = vand.u32 2147483647, %v3818_v24  ;;  %v9774_v53 = vld [vmem:[#allocation95_spill] sm:$0xff] }
 0x47d   : > { %v3716_v56 = vand.u32 2147483647, %v3700_v16  ;;  %v8416_v60 = vadd.f32 %v3830_v34, %v3730_v43  ;;  %v3820_v42 = vsub.f32 %v8387_v51, %v8255_v50  ;;  %v3504_v22 = vadd.f32 %v3488_v3, %v3388_v62  ;;  %v9775_v51 = vld [vmem:[#allocation62_spill] sm:$0xff] }
 0x47e   : > { %v3675_v38 = vpop.permute.xlu1 %3674  ;;  %v3618_v32 = vadd.f32 %v3602_v27, %v3502_v10  ;;  %v3137_v54 = vand.u32 2147483647, %v3121_v58  ;;  %v8439_v49 = vand.u32 2147483647, %v3463_v35  ;;  %v3690_v43 = vsub.f32 %v9774_v53, %v8247_v40  ;;  %v9776_v27 = vld [vmem:[#allocation65_spill] sm:$0xff] }
 0x47f   : > { %v3732_v59 = vadd.f32 %v3716_v56, %v3616_v18  ;;  %v3702_v34 = vsub.f32 %v3675_v38, %v8247_v40  ;;  %v3590_v16 = vand.u32 2147483647, %v3574_v11  ;;  %v3123_v24 = vsub.f32 %v9775_v51, %v7750_v14  ;;  %v9777_v56 = vld [vmem:[#allocation82_spill] sm:$0xff] }
 0x480   : > { %4771 = vset.pattern.permute.xlu1 %v9761_v28  ;;  %v3465_v18 = vsub.f32 %v9776_v27, %v8077_v1  ;;  %v3361_v3 = vand.u32 2147483647, %v3345_v33  ;;  %v3347_v21 = vsub.f32 %v9777_v56, %v7962_v5  ;;  %v3490_v58 = vadd.f32 %v8313_v8, %v3374_v12  ;;  %v9782_v27 = vld [vmem:[#allocation85_spill] sm:$0xff] }
 0x481   : > { %v3718_v36 = vand.u32 2147483647, %v3702_v34  ;;  %4098 = vperm.xlu1 %4771, %v9773_v0   ;;  %v8437_v55 = vadd.f32 %v3832_v30, %v3732_v59  ;;  %v3836_v44 = vand.u32 2147483647, %v3820_v42  ;;  %v3922_v35 = vsub.f32 %v3859_v41, %v8426_v23  ;;  %v9778_v41 = vld [vmem:[#allocation84_spill] sm:$0xff]  ;;  %v9784_v56 = vld [vmem:[#allocation69_spill] sm:$0xff] }
 0x482   : > { %v3683_v20 = vpop.permute.xlu1 %3682  ;;  %v3620_v29 = vadd.f32 %v3604_v45, %v3504_v22  ;;  %v3267_v38 = vadd.f32 %v8191_v19, %v3151_v48  ;;  %v3706_v62 = vand.u32 2147483647, %v3690_v43  ;;  %v3606_v59 = vadd.f32 %v3590_v16, %v3490_v58  ;;  %v3879_v19 = vpop.permute.xlu0 %3878 }
 0x483   : > { %v3734_v10 = vadd.f32 %v3718_v36, %v3618_v32  ;;  %v3704_v30 = vsub.f32 %v3683_v20, %v8247_v40  ;;  %v3577_v34 = vsub.f32 %v8104_v61, %v8153_v39  ;;  %v3153_v8 = vadd.f32 %v3137_v54, %v8143_v47  ;;  %v9779_v32 = vld [vmem:[#allocation66_spill] sm:$0xff] }
 0x484   : > { %v3139_v12 = vand.u32 2147483647, %v3123_v24  ;;  %v3349_v46 = vsub.f32 %v9778_v41, %v7962_v5  ;;  %v3481_v42 = vand.u32 2147483647, %v3465_v18  ;;  %v3363_v22 = vand.u32 2147483647, %v3347_v21 }
 0x485   : > { %v3720_v11 = vand.u32 2147483647, %v3704_v30  ;;  %4772 = vset.pattern.permute.xlu1 %v9766_v2  ;;  %v8455_v52 = vadd.f32 %v3834_v57, %v3734_v10  ;;  %v3377_v57 = vadd.f32 %v3361_v3, %v8303_v6  ;;  %v3467_v61 = vsub.f32 %v9779_v32, %v8077_v1  ;;  %v9781_v6 = vld [vmem:[#allocation113_spill] sm:$0xff]  ;;  %v9783_v10 = vld [vmem:[#allocation122_spill] sm:$0xff] }
 0x486   : > { %4210 = vperm.xlu1 %4772, %v8205_v17   ;;  %v9780_v17 = vld [vmem:[#allocation100_spill] sm:$0xff]  ;;  %v3938_v47 = vand.u32 2147483647, %v3922_v35  ;;  %v3593_v53 = vand.u32 2147483647, %v3577_v34  ;;  %v3579_v43 = vsub.f32 %v8140_v63, %v8153_v39  ;;  %v3722_v16 = vadd.f32 %v3706_v62, %v3606_v59  ;;  %v9786_v62 = vld [vmem:[#allocation115_spill] sm:$0xff]  ;;  %v3887_v41 = vpop.permute.xlu0 %3886 }
 0x487   : > { %v3736_v33 = vadd.f32 %v3720_v11, %v3620_v29  ;;  %v3743_v45 = vpop.permute.xlu1 %3742  ;;  %v3693_v36 = vsub.f32 %v9780_v17, %v8247_v40  ;;  %v3155_v51 = vadd.f32 %v3139_v12, %v9781_v6  ;;  %v3365_v24 = vand.u32 2147483647, %v3349_v46  ;;  %v9785_v29 = vld [vmem:[#allocation102_spill] sm:$0xff]  ;;  %v9790_v17 = vld [vmem:[#allocation87_spill] sm:$0xff] }
 0x488   : > { %v3806_v48 = vsub.f32 %v3743_v45, %v8255_v50  ;;  %v3351_v18 = vsub.f32 %v9782_v27, %v7962_v5  ;;  %v3269_v30 = vadd.f32 %v9783_v10, %v3153_v8  ;;  %v3469_v21 = vsub.f32 %v9784_v56, %v8077_v1  ;;  %v9792_v56 = vld [vmem:[#allocation108_spill] sm:$0xff] }
 0x489   : > { %v8470_v54 = vadd.f32 %v3836_v44, %v3736_v33  ;;  %v3379_v58 = vadd.f32 %v3363_v22, %v8316_v9  ;;  %v3493_v63 = vadd.f32 %v8375_v26, %v3377_v57  ;;  %v3483_v35 = vand.u32 2147483647, %v3467_v61  ;;  %v9787_v33 = vld [vmem:[#allocation124_spill] sm:$0xff]  ;;  %v9788_v57 = vld [vmem:[#allocation105_spill] sm:$0xff] }
 0x48a   : > { %v3822_v20 = vand.u32 2147483647, %v3806_v48  ;;  %4214 = vperm.xlu1 %4772, %v9773_v0   ;;  %v3709_v0 = vand.u32 2147483647, %v3693_v36  ;;  %v3695_v11 = vsub.f32 %v9785_v29, %v8247_v40  ;;  %v3581_v59 = vsub.f32 %v9786_v62, %v8153_v39  ;;  %v9789_v48 = vld [vmem:[#allocation107_spill] sm:$0xff]  ;;  %v9793_v29 = vld [vmem:[#allocation90_spill] sm:$0xff]  ;;  %v3895_v62 = vpop.permute.xlu0 %3894 }
 0x48b   : > { %v8479_v3 = vpop.permute.xlu1 %3746  ;;  %v3609_v34 = vadd.f32 %v3593_v53, %v3493_v63  ;;  %v3595_v8 = vand.u32 2147483647, %v3579_v43  ;;  %v3925_v12 = vsub.f32 %v8443_v4, %v8426_v23  ;;  %v3381_v26 = vadd.f32 %v3365_v24, %v8406_v15  ;;  %v9791_v43 = vld [vmem:[#allocation119_spill] sm:$0xff] }
 0x48c   : > { %v3838_v44 = vadd.f32 %v3822_v20, %v3722_v16  ;;  %v3367_v46 = vand.u32 2147483647, %v3351_v18  ;;  %v3271_v45 = vadd.f32 %v9787_v33, %v3155_v51  ;;  %v3697_v22 = vsub.f32 %v9788_v57, %v8247_v40  ;;  %v9795_v57 = vld [vmem:[#allocation71_spill] sm:$0xff] }
 0x48d   : > { %v3485_v61 = vand.u32 2147483647, %v3469_v21  ;;  %v3353_v4 = vsub.f32 %v9790_v17, %v7962_v5  ;;  %v3495_v36 = vadd.f32 %v8439_v49, %v3379_v58  ;;  %v3711_v53 = vand.u32 2147483647, %v3695_v11  ;;  %v4832_v49 = vld [vmem:[%s5155_s14 + $0x30] sm:$0xff]  ;;  %v9796_v17 = vld [vmem:[#allocation110_spill] sm:$0xff] }
 0x48e   : > { %4773 = vset.pattern.permute.xlu1 %v9761_v28  ;;  %v8492_v9 = vadd.f32 %v3938_v47, %v3838_v44  ;;  %v3597_v15 = vand.u32 2147483647, %v3581_v59  ;;  %v3583_v16 = vsub.f32 %v9791_v43, %v8153_v39  ;;  %v3927_v20 = vsub.f32 %v3879_v19, %v8426_v23 }
 0x48f   : > { %4106 = vperm.xlu1 %4773, %v9789_v48   ;;  %v3755_v32 = vpop.permute.xlu1 %3754  ;;  %v3611_v6 = vadd.f32 %v3595_v8, %v3495_v36  ;;  %v3941_v51 = vand.u32 2147483647, %v3925_v12  ;;  %v3725_v24 = vadd.f32 %v3709_v0, %v3609_v34  ;;  %v3383_v18 = vadd.f32 %v3367_v46, %v3267_v38  ;;  %v9794_v12 = vld [vmem:[#allocation121_spill] sm:$0xff] }
 0x490   : > { %v3809_v47 = vsub.f32 %v3755_v32, %v8255_v50  ;;  %v3713_v10 = vand.u32 2147483647, %v3697_v22  ;;  %v3699_v21 = vsub.f32 %v9792_v56, %v8247_v40  ;;  %v3497_v63 = vadd.f32 %v3481_v42, %v3381_v26 }
 0x491   : > { %v3369_v44 = vand.u32 2147483647, %v3353_v4  ;;  %v3355_v11 = vsub.f32 %v9793_v29, %v7962_v5  ;;  %v3599_v0 = vand.u32 2147483647, %v3583_v16  ;;  %v3943_v34 = vand.u32 2147483647, %v3927_v20 }
 0x492   : > { %v3825_v27 = vand.u32 2147483647, %v3809_v47  ;;  %v3613_v8 = vadd.f32 %v3597_v15, %v3497_v63  ;;  %v3929_v38 = vsub.f32 %v3887_v41, %v8426_v23  ;;  %v3585_v46 = vsub.f32 %v9794_v12, %v8153_v39 }
 0x493   : > { %4110 = vperm.xlu1 %4773, %v4832_v49   ;;  %v3763_v58 = vpop.permute.xlu1 %3762  ;;  %v3727_v42 = vadd.f32 %v3711_v53, %v3611_v6  ;;  %v3471_v22 = vsub.f32 %v9795_v57, %v8077_v1  ;;  %v3715_v32 = vand.u32 2147483647, %v3699_v21  ;;  %v3701_v4 = vsub.f32 %v9796_v17, %v8247_v40 }
 0x494   : > { %v3841_v59 = vadd.f32 %v3825_v27, %v3725_v24  ;;  %v3811_v19 = vsub.f32 %v3763_v58, %v8255_v50  ;;  %v3499_v36 = vadd.f32 %v3483_v35, %v3383_v18  ;;  %v3385_v15 = vadd.f32 %v3369_v44, %v3269_v30  ;;  %v9797_v27 = vld [vmem:[#allocation126_spill] sm:$0xff]  ;;  %v3903_v35 = vpop.permute.xlu0 %3902  ;;  %v9798_v30 = vld [vmem:[#allocation52_spill] sm:$0xff] }
 0x495   : > { %v3371_v41 = vand.u32 2147483647, %v3355_v11  ;;  %v3945_v20 = vand.u32 2147483647, %v3929_v38  ;;  %v3931_v6 = vsub.f32 %v3895_v62, %v8426_v23  ;;  %v3601_v24 = vand.u32 2147483647, %v3585_v46 }
 0x496   : > { %v3827_v26 = vand.u32 2147483647, %v3811_v19  ;;  %v8515_v33 = vadd.f32 %v3941_v51, %v3841_v59  ;;  %v3615_v53 = vadd.f32 %v3599_v0, %v3499_v36  ;;  %v3729_v51 = vadd.f32 %v3713_v10, %v3613_v8  ;;  %v9799_v58 = vld [vmem:[#allocation64_spill] sm:$0xff] }
 0x497   : > { %4774 = vset.pattern.permute.xlu1 %v9766_v2  ;;  %v3771_v47 = vpop.permute.xlu1 %3770  ;;  %v3587_v56 = vsub.f32 %v9797_v27, %v8153_v39  ;;  %v3111_v63 = vsub.f32 %v9798_v30, %v7750_v14  ;;  %v3227_v44 = vsub.f32 %v9799_v58, %v7877_v13  ;;  %v3717_v29 = vand.u32 2147483647, %v3701_v4  ;;  %v9800_v8 = vld [vmem:[#allocation112_spill] sm:$0xff] }
 0x498   : > { %v3843_v43 = vadd.f32 %v3827_v26, %v3727_v42  ;;  %v3813_v16 = vsub.f32 %v3771_v47, %v8255_v50  ;;  %4222 = vperm.xlu1 %4774, %v9789_v48   ;;  %v3487_v48 = vand.u32 2147483647, %v3471_v22  ;;  %v3387_v59 = vadd.f32 %v3371_v41, %v3271_v45  ;;  %v9801_v26 = vld [vmem:[#allocation120_spill] sm:$0xff]  ;;  %v9802_v45 = vld [vmem:[#allocation117_spill] sm:$0xff]  ;;  %v9803_v22 = vld [vmem:[#allocation79_spill] sm:$0xff]  ;;  %v3911_v47 = vpop.permute.xlu0 %3910 }
 0x499   : > { %v3501_v62 = vadd.f32 %v3485_v61, %v3385_v15  ;;  %v3703_v0 = vsub.f32 %v9800_v8, %v8247_v40  ;;  %v3933_v38 = vsub.f32 %v3903_v35, %v8426_v23  ;;  %v3731_v12 = vadd.f32 %v3715_v32, %v3615_v53  ;;  %v9804_v41 = vld [vmem:[#allocation94_spill] sm:$0xff] }
 0x49a   : > { %v3829_v18 = vand.u32 2147483647, %v3813_v16  ;;  %v8527_v21 = vadd.f32 %v3943_v34, %v3843_v43  ;;  %v3947_v34 = vand.u32 2147483647, %v3931_v6  ;;  %v3603_v46 = vand.u32 2147483647, %v3587_v56 }
 0x49b   : > { %v3779_v11 = vpop.permute.xlu1 %3778  ;;  %v3617_v14 = vadd.f32 %v3601_v24, %v3501_v62  ;;  %v3027_v61 = vadd.f32 %v9802_v45, %v9801_v26  ;;  %v3127_v57 = vand.u32 2147483647, %v3111_v63  ;;  %v3243_v4 = vand.u32 2147483647, %v3227_v44  ;;  %v4833_v6 = vld [vmem:[%s5155_s14 + $0x40] sm:$0xff] }
 0x49c   : > { %v3845_v10 = vadd.f32 %v3829_v18, %v3729_v51  ;;  %v3815_v19 = vsub.f32 %v3779_v11, %v8255_v50  ;;  %4226 = vperm.xlu1 %4774, %v4832_v49   ;;  %v3343_v49 = vsub.f32 %v9803_v22, %v7962_v5  ;;  %v3503_v36 = vadd.f32 %v3487_v48, %v3387_v59  ;;  %v9805_v18 = vld [vmem:[#allocation118_spill] sm:$0xff]  ;;  %v9806_v59 = vld [vmem:[#allocation111_spill] sm:$0xff] }
 0x49d   : > { %v3459_v43 = vsub.f32 %v9804_v41, %v8077_v1  ;;  %v3719_v16 = vand.u32 2147483647, %v3703_v0  ;;  %v3949_v53 = vand.u32 2147483647, %v3933_v38  ;;  %v3733_v5 = vadd.f32 %v3717_v29, %v3617_v14 }
 0x49e   : > { %v3831_v42 = vand.u32 2147483647, %v3815_v19  ;;  %v8537_v13 = vadd.f32 %v3945_v20, %v3845_v10  ;;  %v3935_v20 = vsub.f32 %v3911_v47, %v8426_v23  ;;  %v3619_v51 = vadd.f32 %v3603_v46, %v3503_v36 }
 0x49f   : > { %v3787_v17 = vpop.permute.xlu1 %3786  ;;  %v3143_v56 = vadd.f32 %v3127_v57, %v3027_v61  ;;  %v3359_v35 = vand.u32 2147483647, %v3343_v49  ;;  %v3575_v30 = vsub.f32 %v9805_v18, %v8153_v39  ;;  %v3475_v48 = vand.u32 2147483647, %v3459_v43  ;;  %v9807_v57 = vld [vmem:[#allocation128_spill] sm:$0xff] }
 0x4a0   : > { %v3847_v15 = vadd.f32 %v3831_v42, %v3731_v12  ;;  %v3817_v32 = vsub.f32 %v3787_v17, %v8255_v50  ;;  %4775 = vset.pattern.permute.xlu1 %v9761_v28  ;;  %v3691_v11 = vsub.f32 %v8319_v37, %v8247_v40  ;;  %v3951_v29 = vand.u32 2147483647, %v3935_v20 }
 0x4a1   : > { %4118 = vperm.xlu1 %4775, %v4833_v6   ;;  %v3259_v44 = vadd.f32 %v3243_v4, %v3143_v56  ;;  %v3735_v62 = vadd.f32 %v3719_v16, %v3619_v51  ;;  %v3591_v0 = vand.u32 2147483647, %v3575_v30  ;;  %v3807_v39 = vsub.f32 %v8479_v3, %v8255_v50  ;;  %v8570_v3 = vpop.permute.xlu0 %3970 }
 0x4a2   : > { %v3833_v24 = vand.u32 2147483647, %v3817_v32  ;;  %v8549_v27 = vadd.f32 %v3947_v34, %v3847_v15  ;;  %v3707_v14 = vand.u32 2147483647, %v3691_v11  ;;  %v9808_v32 = vld [vmem:[#allocation116_spill] sm:$0xff] }
 0x4a3   : > { %v3795_v63 = vpop.permute.xlu1 %3794  ;;  %v3375_v8 = vadd.f32 %v3359_v35, %v3259_v44  ;;  %v3823_v42 = vand.u32 2147483647, %v3807_v39  ;;  %v4836_v39 = vld [vmem:[%s5155_s14 + $0x78] sm:$0xff] }
 0x4a4   : > { %v3849_v58 = vadd.f32 %v3833_v24, %v3733_v5  ;;  %v3819_v1 = vsub.f32 %v3795_v63, %v8255_v50 }
 0x4a5   : > { %4122 = vperm.xlu1 %4775, %v9806_v59   ;;  %v3491_v12 = vadd.f32 %v3475_v48, %v3375_v8  ;;  %v8575_v43 = vpop.permute.xlu0 %3982 }
 0x4a6   : > { %v3835_v10 = vand.u32 2147483647, %v3819_v1  ;;  %v8557_v19 = vadd.f32 %v3949_v53, %v3849_v58 }
 0x4a7   : > { %v3607_v37 = vadd.f32 %v3591_v0, %v3491_v12 }
 0x4a8   : > { %v3851_v34 = vadd.f32 %v3835_v10, %v3735_v62  ;;  %v3855_v38 = vpop.permute.xlu1 %3854 }
 0x4a9   : > { %v3921_v46 = vsub.f32 %v3855_v38, %v8426_v23  ;;  %4776 = vset.pattern.permute.xlu1 %v9766_v2  ;;  %v3723_v61 = vadd.f32 %v3707_v14, %v3607_v37  ;;  %v8586_v56 = vpop.permute.xlu0 %3990  ;;  %v9809_v38 = vld [vmem:[#allocation300_spill] sm:$0xff] }
 0x4aa   : > { %4234 = vperm.xlu1 %4776, %v4833_v6   ;;  %v8563_v40 = vadd.f32 %v3951_v29, %v3851_v34  ;;  %v4834_v6 = vld [vmem:[%s5155_s14 + $0x60] sm:$0xff]  ;;  %v4835_v29 = vld [vmem:[%s5155_s14 + $0x70] sm:$0xff] }
 0x4ab   : > { %v3937_v26 = vand.u32 2147483647, %v3921_v46  ;;  %v3839_v49 = vadd.f32 %v3823_v42, %v3723_v61  ;;  %v4837_v34 = vld [vmem:[%s5167_s16 + $0x18] sm:$0xff] }
 0x4ac   : > { %v3863_v45 = vpop.permute.xlu1 %3862 }
 0x4ad   : > { %v8566_v22 = vadd.f32 %v3937_v26, %v9807_v57  ;;  %v3923_v50 = vsub.f32 %v3863_v45, %v8426_v23  ;;  %v8594_v58 = vpop.permute.xlu0 %3998 }
 0x4ae   : > { %4238 = vperm.xlu1 %4776, %v9806_v59  }
 0x4af   : > { %v3939_v17 = vand.u32 2147483647, %v3923_v50 }
 0x4b0   : > { %v3867_v4 = vpop.permute.xlu1 %3866 }
 0x4b1   : > { %v3955_v36 = vadd.f32 %v3939_v17, %v3839_v49  ;;  %v3924_v47 = vsub.f32 %v3867_v4, %v8426_v23  ;;  %v8606_v62 = vpop.permute.xlu0 %4006 }
 0x4b2   : > { %4777 = vset.pattern.permute.xlu1 %v9761_v28 }
 0x4b3   : > { %v3940_v15 = vand.u32 2147483647, %v3924_v47  ;;  %4130 = vperm.xlu1 %4777, %v9808_v32  }
 0x4b4   : > { %v3875_v41 = vpop.permute.xlu1 %3874 }
 0x4b5   : > { %v8578_v16 = vadd.f32 %v3940_v15, %v8367_v7  ;;  %v3926_v53 = vsub.f32 %v3875_v41, %v8426_v23  ;;  %v8617_v12 = vpop.permute.xlu0 %4014 }
 0x4b7   : > { %v3942_v20 = vand.u32 2147483647, %v3926_v53  ;;  %4134 = vperm.xlu1 %4777, %v4834_v6  }
 0x4b8   : > { %v3883_v51 = vpop.permute.xlu1 %3882 }
 0x4b9   : > { %v8583_v5 = vadd.f32 %v3942_v20, %v8383_v25  ;;  %v3928_v24 = vsub.f32 %v3883_v51, %v8426_v23  ;;  %v8626_v45 = vpop.permute.xlu0 %4022 }
 0x4bb   : > { %v3944_v35 = vand.u32 2147483647, %v3928_v24  ;;  %4779 = vset.pattern.permute.xlu1 %v9766_v2 }
 0x4bc   : > { %4246 = vperm.xlu1 %4779, %v9808_v32   ;;  %v3891_v7 = vpop.permute.xlu1 %3890 }
 0x4bd   : > { %v8591_v18 = vadd.f32 %v3944_v35, %v8399_v31  ;;  %v3930_v30 = vsub.f32 %v3891_v7, %v8426_v23 }
 0x4bf   : > { %v3946_v63 = vand.u32 2147483647, %v3930_v30 }
 0x4c0   : > { %4250 = vperm.xlu1 %4779, %v4834_v6   ;;  %v3899_v25 = vpop.permute.xlu1 %3898 }
 0x4c1   : > { %v8597_v1 = vadd.f32 %v3946_v63, %v8416_v60  ;;  %v3932_v44 = vsub.f32 %v3899_v25, %v8426_v23 }
 0x4c3   : > { %v3948_v48 = vand.u32 2147483647, %v3932_v44 }
 0x4c4   : > { %4780 = vset.pattern.permute.xlu1 %v9761_v28  ;;  %v3907_v11 = vpop.permute.xlu1 %3906 }
 0x4c5   : > { %v8602_v31 = vadd.f32 %v3948_v48, %v8437_v55  ;;  %v3934_v59 = vsub.f32 %v3907_v11, %v8426_v23  ;;  %4142 = vperm.xlu1 %4780, %v4835_v29   ;;  %v8615_v55 = vrot.slane %v4837_v34, %v9809_v38  ;;  %v9810_v48 = vld [vmem:[#allocation16_spill] sm:$0xff] }
 0x4c6   : > { %v8656_v11 = vrot.slane %v4837_v34, %v9810_v48 }
 0x4c7   : > { %v3950_v10 = vand.u32 2147483647, %v3934_v59 }
 0x4c8   : > { %v3915_v8 = vpop.permute.xlu1 %3914 }
 0x4c9   : > { %v8609_v60 = vadd.f32 %v3950_v10, %v8455_v52  ;;  %v3936_v0 = vsub.f32 %v3915_v8, %v8426_v23  ;;  %4146 = vperm.xlu1 %4780, %v4836_v39   ;;  %v4037_v8 = vsub.f32 %v8570_v3, %v8615_v55  ;;  %v9812_v39 = vld [vmem:[#allocation283_spill] sm:$0xff]  ;;  %v535_v3 = vstv %s4542_s30 }
 0x4cb   : > { %v3952_v28 = vand.u32 2147483647, %v3936_v0 }
 0x4cd   : > { %v8620_v14 = vadd.f32 %v3952_v28, %v8470_v54  ;;  %4782 = vset.pattern.permute.xlu1 %v9766_v2  ;;  %v3975_v46 = vpop.permute.xlu1 %3974  ;;  %v8631_v2 = vpop.permute.xlu0 %4030  ;;  %v499_v28 = vadd.s32 8, %v9812_v39 }
 0x4ce   : > { %v4038_v52 = vsub.f32 %v3975_v46, %v8615_v55  ;;  %4258 = vperm.xlu1 %4782, %v4835_v29  }
 0x4d0   : > { %v4054_v37 = vand.u32 2147483647, %v4038_v52 }
 0x4d1   : > { %v3979_v23 = vpop.permute.xlu1 %3978 }
 0x4d2   : > { %v4070_v42 = vadd.f32 %v4054_v37, %v8492_v9  ;;  %v4039_v26 = vsub.f32 %v3979_v23, %v8615_v55  ;;  %v9813_v37 = vlaneseq }
 0x4d4   : > { %v4055_v61 = vand.u32 2147483647, %v4039_v26 }
 0x4d5   : > { %v3987_v57 = vpop.permute.xlu1 %3986 }
 0x4d6   : > { %v8628_v50 = vadd.f32 %v4055_v61, %v3955_v36  ;;  %v4041_v54 = vsub.f32 %v3987_v57, %v8615_v55  ;;  %v4091_v36 = vpop.permute.xlu0 %4090  ;;  %v8675_v61 = vstv %s4541_s0  ;;  %v4053_v57 = vand.u32 2147483647, %v4037_v8 }
 0x4d7   : > { %v4154_v29 = vsub.f32 %v4091_v36, %v8656_v11 }
 0x4d8   : > { %v4057_v49 = vand.u32 2147483647, %v4041_v54  ;;  %v516_v54 = vadd.s32 %v8675_v61, %v9812_v39 }
 0x4d9   : > { %v3995_v17 = vpop.permute.xlu1 %3994  ;;  %v4170_v46 = vand.u32 2147483647, %v4154_v29 }
 0x4da   : > { %v8634_v4 = vadd.f32 %v4057_v49, %v8515_v33  ;;  %v4043_v47 = vsub.f32 %v3995_v17, %v8615_v55  ;;  %v4207_v33 = vpop.permute.xlu0 %4206  ;;  %v517_v49 = vadd.s32 %v8675_v61, %v499_v28 }
 0x4dc   : > { %v4059_v9 = vand.u32 2147483647, %v4043_v47 }
 0x4dd   : > { %v4003_v15 = vpop.permute.xlu1 %4002 }
 0x4de   : > { %v8638_v32 = vadd.f32 %v4059_v9, %v8527_v21  ;;  %v4045_v41 = vsub.f32 %v4003_v15, %v8615_v55  ;;  %v8653_v44 = vpop.permute.xlu0 %4218  ;;  %v4186_v9 = vadd.f32 %v4170_v46, %v4070_v42  ;;  %v500_v42 = vadd.s32 16, %v9812_v39  ;;  %v4580_v46 = vld [vmem:[%s5165_s25 + $0x8] sm:$0xff]  }
 0x4e0   : > { %v4061_v53 = vand.u32 2147483647, %v4045_v41 }
 0x4e1   : > { %v4011_v20 = vpop.permute.xlu1 %4010 }
 0x4e2   : > { %v8642_v6 = vadd.f32 %v4061_v53, %v8537_v13  ;;  %v4047_v51 = vsub.f32 %v4011_v20, %v8615_v55  ;;  %v8670_v38 = vpop.permute.xlu0 %4230 }
 0x4e4   : > { %v4063_v24 = vand.u32 2147483647, %v4047_v51  ;;  %v4069_v51 = vadd.f32 %v4053_v57, %v8566_v22  ;;  %v4040_v22 = vsub.f32 %v8575_v43, %v8615_v55  ;;  %v4554_v57 = vunpack.c.l.bf16 %v4580_v46 }
 0x4e5   : > { %v4019_v35 = vpop.permute.xlu1 %4018 }
 0x4e6   : > { %v8646_v7 = vadd.f32 %v4063_v24, %v8549_v27  ;;  %v4049_v21 = vsub.f32 %v4019_v35, %v8615_v55  ;;  %v8683_v41 = vpop.permute.xlu0 %4242 }
 0x4e8   : > { %v4065_v30 = vand.u32 2147483647, %v4049_v21 }
 0x4e9   : > { %v4027_v63 = vpop.permute.xlu1 %4026 }
 0x4ea   : > { %v8650_v25 = vadd.f32 %v4065_v30, %v8557_v19  ;;  %v4051_v13 = vsub.f32 %v4027_v63, %v8615_v55  ;;  %v9811_v19 = vld [vmem:[#allocation19_spill] sm:$0xff]  ;;  %v4103_v29 = vpop.permute.xlu0 %4102 }
 0x4eb   : > { %v8665_v0 = vrot.slane %v4837_v34, %v9811_v19  ;;  %v4549_v34 = vld [vmem:[%s5165_s25] sm:$0xff]   ;;  %v4157_v8 = vsub.f32 %v4103_v29, %v8656_v11 }
 0x4ec   : > { %v4067_v59 = vand.u32 2147483647, %v4051_v13  ;;  %v4550_v53 = vunpack.c.l.bf16 %v4549_v34  ;;  %v4551_v20 = vunpack.c.h.bf16 %v4549_v34 }
 0x4ed   : > { %v4270_v52 = vsub.f32 %v4207_v33, %v8665_v0  ;;  %v4273_v43 = vsub.f32 %v8653_v44, %v8665_v0 }
 0x4ee   : > { %v8660_v27 = vadd.f32 %v4067_v59, %v8563_v40  ;;  %v4087_v10 = vpop.permute.xlu1 %4086  ;;  %v533_v40 = vand.u32 127, %v9813_v37  ;;  %v502_v37 = vadd.s32 32, %v9812_v39 }
 0x4ef   : > { %v4153_v23 = vsub.f32 %v4087_v10, %v8656_v11  ;;  %v4286_v17 = vand.u32 2147483647, %v4270_v52  ;;  %v501_v10 = vadd.s32 24, %v9812_v39  ;;  %v518_v52 = vadd.s32 %v8675_v61, %v500_v42 }
 0x4f0   : > { %v8681_v47 = vadd.s32 %v535_v3, %v533_v40 }
 0x4f1   : > { %v4169_v15 = vand.u32 2147483647, %v4153_v23  ;;  %v4302_v33 = vadd.f32 %v4286_v17, %v4186_v9  ;;  %v519_v34 = vadd.s32 %v8675_v61, %v501_v10  ;;  %v8705_v9 = vld [vmem:[%s5165_s25 + $0x10] sm:$0xff]  }
 0x4f2   : > { %v4095_v26 = vpop.permute.xlu1 %4094  ;;  %vm537_vm0 = vcmp.eq.s32.totalorder %v516_v54, %v8681_v47  ;;  %vm538_vm1 = vcmp.eq.s32.totalorder %v517_v49, %v8681_v47  ;;  %v4056_v54 = vand.u32 2147483647, %v4040_v22  ;;  %v4173_v49 = vand.u32 2147483647, %v4157_v8 }
 0x4f3   : > { %v4185_v35 = vadd.f32 %v4169_v15, %v4069_v51  ;;  %v553_v30 = vsel %vm537_vm0, 0.0, %v4550_v53  ;;  %v554_v63 = vsel %vm538_vm1, 0.0, %v4551_v20  ;;  %v4155_v13 = vsub.f32 %v4095_v26, %v8656_v11 }
 0x4f4   : > { %v4339_v28 = vmul.f32 %v4302_v33, %v554_v63  ;;  %vm539_vm2 = vcmp.eq.s32.totalorder %v518_v52, %v8681_v47  ;;  %v520_v15 = vadd.s32 %v8675_v61, %v502_v37  ;;  %v4289_v51 = vand.u32 2147483647, %v4273_v43 }
 0x4f5   : > { %v4171_v40 = vand.u32 2147483647, %v4155_v13  ;;  %v555_v44 = vsel %vm539_vm2, 0.0, %v4554_v57  ;;  %v4555_v33 = vunpack.c.h.bf16 %v4580_v46  ;;  %vm540_vm3 = vcmp.eq.s32.totalorder %v519_v34, %v8681_v47 }
 0x4f6   : > { %vm541_vm4 = vcmp.eq.s32.totalorder %v520_v15, %v8681_v47  ;;  %v4317_v29 = vadd.f32 %v554_v63, %v553_v30  ;;  %v4044_v37 = vsub.f32 %v8594_v58, %v8615_v55  ;;  %v504_v34 = vadd.s32 48, %v9812_v39 }
 0x4f7   : > { %v4203_v36 = vpop.permute.xlu1 %4202  ;;  %v556_v10 = vsel %vm540_vm3, 0.0, %v4555_v33  ;;  %v505_v58 = vadd.s32 56, %v9812_v39 }
 0x4f8   : > { %v4269_v24 = vsub.f32 %v4203_v36, %v8665_v0  ;;  %v4187_v36 = vadd.f32 %v4171_v40, %v8628_v50  ;;  %v4318_v43 = vadd.f32 %v4317_v29, %v555_v44 }
 0x4fa   : > { %v4285_v21 = vand.u32 2147483647, %v4269_v24  ;;  %v4319_v15 = vadd.f32 %v4318_v43, %v556_v10 }
 0x4fc   : > { %v4301_v48 = vadd.f32 %v4285_v21, %v4185_v35  ;;  %v4099_v59 = vpop.permute.xlu1 %4098  ;;  %v4189_v35 = vadd.f32 %v4173_v49, %v8634_v4  ;;  %v4072_v21 = vadd.f32 %v4056_v54, %v8578_v16  ;;  %v503_v4 = vadd.s32 40, %v9812_v39 }
 0x4fd   : > { %v4156_v26 = vsub.f32 %v4099_v59, %v8656_v11  ;;  %v4042_v16 = vsub.f32 %v8586_v56, %v8615_v55  ;;  %v4060_v49 = vand.u32 2147483647, %v4044_v37 }
 0x4fe   : > { %v4338_v19 = vmul.f32 %v4301_v48, %v553_v30  ;;  %v4558_v48 = vunpack.c.l.bf16 %v8705_v9  ;;  %v4305_v8 = vadd.f32 %v4289_v51, %v4189_v35 }
 0x4ff   : > { %v4172_v53 = vand.u32 2147483647, %v4156_v26  ;;  %v4115_v26 = vpop.permute.xlu0 %4114  ;;  %v4058_v54 = vand.u32 2147483647, %v4042_v16  ;;  %v4076_v33 = vadd.f32 %v4060_v49, %v8591_v18 }
 0x500   : > { %v4354_v23 = vadd.f32 %v4339_v28, %v4338_v19  ;;  %v557_v52 = vsel %vm541_vm4, 0.0, %v4558_v48  ;;  %v4582_v48 = vld [vmem:[%s5165_s25 + $0x18] sm:$0xff]  }
 0x501   : > { %v4211_v3 = vpop.permute.xlu1 %4210  ;;  %v4188_v50 = vadd.f32 %v4172_v53, %v4072_v21  ;;  %v4074_v21 = vadd.f32 %v4058_v54, %v8583_v5  ;;  %v4563_v18 = vunpack.c.h.bf16 %v4582_v48  ;;  %v507_v54 = vadd.s32 72, %v9812_v39 }
 0x502   : > { %v4271_v17 = vsub.f32 %v4211_v3, %v8665_v0  ;;  %v4342_v3 = vmul.f32 %v4305_v8, %v557_v52  ;;  %v4562_v8 = vunpack.c.l.bf16 %v4582_v48 }
 0x504   : > { %v4287_v20 = vand.u32 2147483647, %v4271_v17  ;;  %v4160_v17 = vsub.f32 %v4115_v26, %v8656_v11 }
 0x505   : > { %v4215_v24 = vpop.permute.xlu1 %4214 }
 0x506   : > { %v4303_v42 = vadd.f32 %v4287_v20, %v4187_v36  ;;  %v4272_v13 = vsub.f32 %v4215_v24, %v8665_v0  ;;  %v4276_v20 = vsub.f32 %v8670_v38, %v8665_v0  ;;  %v522_v24 = vadd.s32 %v8675_v61, %v504_v34 }
 0x507   : > { %v4176_v35 = vand.u32 2147483647, %v4160_v17  ;;  %v508_v17 = vadd.s32 80, %v9812_v39 }
 0x508   : > { %v4340_v59 = vmul.f32 %v4303_v42, %v555_v44  ;;  %v4288_v22 = vand.u32 2147483647, %v4272_v13  ;;  %v4559_v44 = vunpack.c.h.bf16 %v8705_v9  ;;  %v4320_v13 = vadd.f32 %v4319_v15, %v557_v52 }
 0x509   : > { %v4292_v29 = vand.u32 2147483647, %v4276_v20  ;;  %vm543_vm6 = vcmp.eq.s32.totalorder %v522_v24, %v8681_v47  ;;  %v506_v52 = vadd.s32 64, %v9812_v39 }
 0x50a   : > { %v4355_v19 = vadd.f32 %v4354_v23, %v4340_v59  ;;  %v4304_v28 = vadd.f32 %v4288_v22, %v4188_v50  ;;  %v4107_v46 = vpop.permute.xlu1 %4106  ;;  %v521_v23 = vadd.s32 %v8675_v61, %v503_v4  ;;  %v523_v50 = vadd.s32 %v8675_v61, %v505_v58 }
 0x50b   : > { %v4158_v30 = vsub.f32 %v4107_v46, %v8656_v11  ;;  %v524_v34 = vadd.s32 %v8675_v61, %v506_v52 }
 0x50c   : > { %v4341_v40 = vmul.f32 %v4304_v28, %v556_v10  ;;  %vm542_vm5 = vcmp.eq.s32.totalorder %v521_v23, %v8681_v47  ;;  %vm544_vm7 = vcmp.eq.s32.totalorder %v523_v50, %v8681_v47  ;;  %v4583_v23 = vld [vmem:[%s5165_s25 + $0x20] sm:$0xff]  }
 0x50d   : > { %v4174_v36 = vand.u32 2147483647, %v4158_v30  ;;  %v558_v9 = vsel %vm542_vm5, 0.0, %v4559_v44  ;;  %v560_v30 = vsel %vm544_vm7, 0.0, %v4563_v18  ;;  %vm545_vm8 = vcmp.eq.s32.totalorder %v524_v34, %v8681_v47 }
 0x50e   : > { %v4356_v57 = vadd.f32 %v4355_v19, %v4341_v40  ;;  %v4111_v63 = vpop.permute.xlu1 %4110  ;;  %v4192_v19 = vadd.f32 %v4176_v35, %v4076_v33  ;;  %v4321_v46 = vadd.f32 %v4320_v13, %v558_v9  ;;  %v559_v40 = vsel %vm543_vm6, 0.0, %v4562_v8 }
 0x50f   : > { %v4159_v53 = vsub.f32 %v4111_v63, %v8656_v11  ;;  %v4190_v59 = vadd.f32 %v4174_v36, %v4074_v21  ;;  %v4046_v44 = vsub.f32 %v8606_v62, %v8615_v55  ;;  %v526_v35 = vadd.s32 %v8675_v61, %v508_v17  ;;  %v4584_v21 = vld [vmem:[%s5165_s25 + $0x28] sm:$0xff]  }
 0x510   : > { %v4357_v56 = vadd.f32 %v4356_v57, %v4342_v3  ;;  %v4308_v26 = vadd.f32 %v4292_v29, %v4192_v19  ;;  %v4322_v63 = vadd.f32 %v4321_v46, %v559_v40  ;;  %v4567_v50 = vunpack.c.h.bf16 %v4583_v23 }
 0x511   : > { %v4175_v38 = vand.u32 2147483647, %v4159_v53  ;;  %v4566_v53 = vunpack.c.l.bf16 %v4583_v23  ;;  %v509_v62 = vadd.s32 88, %v9812_v39  ;;  %v4062_v29 = vand.u32 2147483647, %v4046_v44 }
 0x512   : > { %v4345_v15 = vmul.f32 %v4308_v26, %v560_v30  ;;  %v4323_v20 = vadd.f32 %v4322_v63, %v560_v30  ;;  %v4570_v8 = vunpack.c.l.bf16 %v4584_v21  ;;  %vm547_vm10 = vcmp.eq.s32.totalorder %v526_v35, %v8681_v47 }
 0x513   : > { %v4223_v51 = vpop.permute.xlu1 %4222  ;;  %v4191_v4 = vadd.f32 %v4175_v38, %v8638_v32  ;;  %v561_v48 = vsel %vm545_vm8, 0.0, %v4566_v53  ;;  %v4571_v63 = vunpack.c.h.bf16 %v4584_v21  ;;  %v511_v23 = vadd.s32 104, %v9812_v39 }
 0x514   : > { %v4274_v42 = vsub.f32 %v4223_v51, %v8665_v0  ;;  %v525_v51 = vadd.s32 %v8675_v61, %v507_v54 }
 0x516   : > { %v4290_v22 = vand.u32 2147483647, %v4274_v42  ;;  %vm546_vm9 = vcmp.eq.s32.totalorder %v525_v51, %v8681_v47  ;;  %v529_v51 = vadd.s32 %v8675_v61, %v511_v23 }
 0x517   : > { %v4227_v10 = vpop.permute.xlu1 %4226  ;;  %v562_v18 = vsel %vm546_vm9, 0.0, %v4567_v50 }
 0x518   : > { %v4306_v28 = vadd.f32 %v4290_v22, %v4190_v59  ;;  %v4275_v5 = vsub.f32 %v4227_v10, %v8665_v0  ;;  %v4279_v59 = vsub.f32 %v8683_v41, %v8665_v0  ;;  %v4324_v22 = vadd.f32 %v4323_v20, %v561_v48 }
 0x519   : > { %v512_v20 = vadd.s32 112, %v9812_v39  ;;  %vm550_vm13 = vcmp.eq.s32.totalorder %v529_v51, %v8681_v47 }
 0x51a   : > { %v4343_v16 = vmul.f32 %v4306_v28, %v558_v9  ;;  %v4291_v37 = vand.u32 2147483647, %v4275_v5  ;;  %v4295_v46 = vand.u32 2147483647, %v4279_v59  ;;  %v4325_v52 = vadd.f32 %v4324_v22, %v562_v18 }
 0x51b   : > { %v530_v59 = vadd.s32 %v8675_v61, %v512_v20 }
 0x51c   : > { %v4358_v43 = vadd.f32 %v4357_v56, %v4343_v16  ;;  %v4307_v3 = vadd.f32 %v4291_v37, %v4191_v4  ;;  %v4119_v57 = vpop.permute.xlu1 %4118  ;;  %v4127_v56 = vpop.permute.xlu0 %4126  ;;  %v527_v4 = vadd.s32 %v8675_v61, %v509_v62  ;;  %v510_v16 = vadd.s32 96, %v9812_v39 }
 0x51d   : > { %v4161_v58 = vsub.f32 %v4119_v57, %v8656_v11  ;;  %v4163_v24 = vsub.f32 %v4127_v56, %v8656_v11  ;;  %v513_v62 = vadd.s32 120, %v9812_v39  ;;  %vm551_vm14 = vcmp.eq.s32.totalorder %v530_v59, %v8681_v47 }
 0x51e   : > { %v4344_v49 = vmul.f32 %v4307_v3, %v559_v40  ;;  %v4078_v40 = vadd.f32 %v4062_v29, %v8597_v1  ;;  %v563_v3 = vsel %vm547_vm10, 0.0, %v4570_v8  ;;  %vm548_vm11 = vcmp.eq.s32.totalorder %v527_v4, %v8681_v47  ;;  %v4586_v8 = vld [vmem:[%s5165_s25 + $0x38] sm:$0xff]  }
 0x51f   : > { %v4177_v42 = vand.u32 2147483647, %v4161_v58  ;;  %v4179_v9 = vand.u32 2147483647, %v4163_v24  ;;  %v4326_v34 = vadd.f32 %v4325_v52, %v563_v3  ;;  %v528_v1 = vadd.s32 %v8675_v61, %v510_v16 }
 0x520   : > { %v4359_v32 = vadd.f32 %v4358_v43, %v4344_v49  ;;  %v4123_v36 = vpop.permute.xlu1 %4122  ;;  %v4139_v54 = vpop.permute.xlu0 %4138  ;;  %v4050_v58 = vsub.f32 %v8626_v45, %v8615_v55  ;;  %v564_v56 = vsel %vm548_vm11, 0.0, %v4571_v63  ;;  %v531_v4 = vadd.s32 %v8675_v61, %v513_v62 }
 0x521   : > { %v4162_v13 = vsub.f32 %v4123_v36, %v8656_v11  ;;  %v4193_v19 = vadd.f32 %v4177_v42, %v8642_v6  ;;  %v4195_v37 = vadd.f32 %v4179_v9, %v8646_v7  ;;  %v4585_v36 = vld [vmem:[%s5165_s25 + $0x30] sm:$0xff]   ;;  %v4327_v44 = vadd.f32 %v4326_v34, %v564_v56 }
 0x522   : > { %v4360_v33 = vadd.f32 %v4359_v32, %v4345_v15  ;;  %v4048_v32 = vsub.f32 %v8617_v12, %v8615_v55  ;;  %v4574_v24 = vunpack.c.l.bf16 %v4585_v36  ;;  %vm549_vm12 = vcmp.eq.s32.totalorder %v528_v1, %v8681_v47 }
 0x523   : > { %v4178_v28 = vand.u32 2147483647, %v4162_v13  ;;  %v4311_v49 = vadd.f32 %v4295_v46, %v4195_v37  ;;  %v4166_v12 = vsub.f32 %v4139_v54, %v8656_v11  ;;  %v4066_v13 = vand.u32 2147483647, %v4050_v58 }
 0x524   : > { %v4064_v45 = vand.u32 2147483647, %v4048_v32  ;;  %v565_v22 = vsel %vm549_vm12, 0.0, %v4574_v24  ;;  %v4579_v63 = vunpack.c.h.bf16 %v4586_v8  ;;  %vm552_vm15 = vcmp.eq.s32.totalorder %v531_v4, %v8681_v47 }
 0x525   : > { %v4235_v38 = vpop.permute.xlu1 %4234  ;;  %v4194_v6 = vadd.f32 %v4178_v28, %v4078_v40  ;;  %v4082_v46 = vadd.f32 %v4066_v13, %v8609_v60  ;;  %v4052_v61 = vsub.f32 %v8631_v2, %v8615_v55 }
 0x526   : > { %v4277_v10 = vsub.f32 %v4235_v38, %v8665_v0  ;;  %v4575_v38 = vunpack.c.h.bf16 %v4585_v36  ;;  %v568_v1 = vsel %vm552_vm15, 0.0, %v4579_v63 }
 0x528   : > { %v4293_v5 = vand.u32 2147483647, %v4277_v10  ;;  %v4328_v10 = vadd.f32 %v4327_v44, %v565_v22  ;;  %v566_v39 = vsel %vm550_vm13, 0.0, %v4575_v38 }
 0x529   : > { %v4239_v41 = vpop.permute.xlu1 %4238 }
 0x52a   : > { %v4309_v26 = vadd.f32 %v4293_v5, %v4193_v19  ;;  %v4278_v43 = vsub.f32 %v4239_v41, %v8665_v0  ;;  %v4182_v19 = vand.u32 2147483647, %v4166_v12  ;;  %v4080_v41 = vadd.f32 %v4064_v45, %v8602_v31 }
 0x52c   : > { %v4346_v57 = vmul.f32 %v4309_v26, %v561_v48  ;;  %v4294_v30 = vand.u32 2147483647, %v4278_v43  ;;  %v4255_v48 = vpop.permute.xlu0 %4254  ;;  %v4329_v26 = vadd.f32 %v4328_v10, %v566_v39 }
 0x52d   : > { %v4282_v28 = vsub.f32 %v4255_v48, %v8665_v0 }
 0x52e   : > { %v4361_v17 = vadd.f32 %v4360_v33, %v4346_v57  ;;  %v4310_v7 = vadd.f32 %v4294_v30, %v4194_v6  ;;  %v4131_v15 = vpop.permute.xlu1 %4130  ;;  %v4348_v33 = vmul.f32 %v4311_v49, %v563_v3  ;;  %v4198_v6 = vadd.f32 %v4182_v19, %v4082_v46 }
 0x52f   : > { %v4164_v21 = vsub.f32 %v4131_v15, %v8656_v11  ;;  %v4298_v57 = vand.u32 2147483647, %v4282_v28 }
 0x530   : > { %v4347_v53 = vmul.f32 %v4310_v7, %v562_v18  ;;  %v4578_v18 = vunpack.c.l.bf16 %v4586_v8  ;;  %v4263_v36 = vpop.permute.xlu0 %4262 }
 0x531   : > { %v4180_v29 = vand.u32 2147483647, %v4164_v21  ;;  %v4314_v49 = vadd.f32 %v4298_v57, %v4198_v6  ;;  %v4284_v44 = vsub.f32 %v4263_v36, %v8665_v0 }
 0x532   : > { %v4362_v35 = vadd.f32 %v4361_v17, %v4347_v53  ;;  %v4135_v42 = vpop.permute.xlu1 %4134  ;;  %v567_v3 = vsel %vm551_vm14, 0.0, %v4578_v18  ;;  %v4068_v53 = vand.u32 2147483647, %v4052_v61 }
 0x533   : > { %v4165_v9 = vsub.f32 %v4135_v42, %v8656_v11  ;;  %v4196_v16 = vadd.f32 %v4180_v29, %v4080_v41  ;;  %v4330_v54 = vadd.f32 %v4329_v26, %v567_v3  ;;  %v4351_v20 = vmul.f32 %v4314_v49, %v566_v39 }
 0x534   : > { %v4363_v50 = vadd.f32 %v4362_v35, %v4348_v33  ;;  %v4084_v35 = vadd.f32 %v4068_v53, %v8620_v14  ;;  %v4300_v12 = vand.u32 2147483647, %v4284_v44 }
 0x535   : > { %v4181_v37 = vand.u32 2147483647, %v4165_v9  ;;  %v4331_v58 = vadd.f32 %v4330_v54, %v568_v1 }
 0x537   : > { %v4247_v5 = vpop.permute.xlu1 %4246  ;;  %v4197_v31 = vadd.f32 %v4181_v37, %v8650_v25  ;;  %v4332_v24 = vrot.slane %v4331_v58, 4 }
 0x538   : > { %v4280_v52 = vsub.f32 %v4247_v5, %v8665_v0 }
 0x539   : > { %v4333_v13 = vadd.f32 %v4332_v24, %v4331_v58 }
 0x53a   : > { %v4296_v40 = vand.u32 2147483647, %v4280_v52  ;;  %v4375_v52 = vld [vmem:[#allocation2] sm:$0x1] }
 0x53b   : > { %v4251_v43 = vpop.permute.xlu1 %4250  ;;  %v4334_v38 = vrot.slane %v4333_v13, 2 }
 0x53c   : > { %v4312_v30 = vadd.f32 %v4296_v40, %v4196_v16  ;;  %v4281_v60 = vsub.f32 %v4251_v43, %v8665_v0 }
 0x53d   : > { %v4335_v29 = vadd.f32 %v4334_v38, %v4333_v13 }
 0x53e   : > { %v4349_v23 = vmul.f32 %v4312_v30, %v564_v56  ;;  %v4297_v34 = vand.u32 2147483647, %v4281_v60 }
 0x53f   : > { %v4336_v8 = vrot.slane %v4335_v29, 1 }
 0x540   : > { %v4364_v17 = vadd.f32 %v4363_v50, %v4349_v23  ;;  %v4313_v7 = vadd.f32 %v4297_v34, %v4197_v31  ;;  %v4143_v15 = vpop.permute.xlu1 %4142 }
 0x541   : > { %v4167_v47 = vsub.f32 %v4143_v15, %v8656_v11  ;;  %v4337_v28 = vadd.f32 %v4336_v8, %v4335_v29 }
 0x542   : > { %v4350_v32 = vmul.f32 %v4313_v7, %v565_v22 }
 0x543   : > { %v4183_v33 = vand.u32 2147483647, %v4167_v47 }
 0x544   : > { %v4365_v51 = vadd.f32 %v4364_v17, %v4350_v32  ;;  %v4147_v25 = vpop.permute.xlu1 %4146 }
 0x545   : > { %v4168_v56 = vsub.f32 %v4147_v25, %v8656_v11  ;;  %v4199_v48 = vadd.f32 %v4183_v33, %v8660_v27 }
 0x546   : > { %v4366_v55 = vadd.f32 %v4365_v51, %v4351_v20 }
 0x547   : > { %v4184_v2 = vand.u32 2147483647, %v4168_v56 }
 0x549   : > { %v4259_v21 = vpop.permute.xlu1 %4258  ;;  %v4200_v42 = vadd.f32 %v4184_v2, %v4084_v35 }
 0x54a   : > { %v4283_v45 = vsub.f32 %v4259_v21, %v8665_v0  ;;  %v4376_v0 = vld [vmem:[%s456_s2] sm:$0x1] }
 0x54b   : > { %v4316_v59 = vadd.f32 %v4300_v12, %v4200_v42  ;;  %v4377_v46 = vmul.f32 %v4376_v0, %v4337_v28 }
 0x54c   : > { %v4299_v50 = vand.u32 2147483647, %v4283_v45 }
 0x54d   : > { %v4353_v62 = vmul.f32 %v4316_v59, %v568_v1 }
 0x54e   : > { %v4315_v11 = vadd.f32 %v4299_v50, %v4199_v48 }
 0x550   : > { %v4352_v22 = vmul.f32 %v4315_v11, %v567_v3 }
 0x552   : > { %v4367_v9 = vadd.f32 %v4366_v55, %v4352_v22 }
 0x554   : > { %v4368_v10 = vadd.f32 %v4367_v9, %v4353_v62 }
 0x556   : > { %v4369_v14 = vrot.slane %v4368_v10, 4 }
 0x558   : > { %v4370_v19 = vadd.f32 %v4369_v14, %v4368_v10 }
 0x55a   : > { %v4371_v5 = vrot.slane %v4370_v19, 2 }
 0x55c   : > { %v4372_v27 = vadd.f32 %v4371_v5, %v4370_v19 }
 0x55e   : > { %v4373_v18 = vrot.slane %v4372_v27, 1 }
 0x560   : > { %v4374_v41 = vadd.f32 %v4373_v18, %v4372_v27 }
 0x562   : > { %v4378_v39 = vsub.f32 %v4377_v46, %v4374_v41  ;;  %4384 = sbr.rel (%p4543_p7) target bundleno = 1395 (0x573), region = 127 }
 0x564   : > { %v4379_v4 = vadd.f32 %v4378_v39, %v4375_v52 }
 0x566   : > { %4380 = vst [vmem:[#allocation2] sm:$0x1] %v4379_v4 }
 0x567   : > { %v4385_v16 = vld [vmem:[%s459_s26] sm:$0x1] }
 0x56d   : > { %v4386_v37 = vld [vmem:[#allocation2] sm:$0x1] }
 0x56e   : > { %v4387_v40 = vmul.f32 0.1, %v4386_v37 }
 0x570   : > { %v4388_v26 = vsub.f32 %v4385_v16, %v4387_v40 }
 0x572   : > { %4389 = vst [vmem:[%s446_s22] sm:$0x1] %v4388_v26 }
 0x573 PF: > { %s4544_s2 = sshll.u32 %s4934_s24, 4  ;;  %s4403_s13 = sshll.u32 %s446_s22, 4  ;;  %s4404_s13 = int_to_ptr.vmem [resolvable:$true] %s4403_s13 }
 0x574   : > { %s4401_s10 = scalar_lea.hbm %s8872_s5, %s4544_s2  ;;  %s4391_s29 = scalar_lea.sflag [#allocation6], %s5144_s11 }
 0x575   : > { %s4838_s26 = scalar_lea.vmem %s4404_s13, 16  ;;  %s4981_s7 = smov [#allocation5]  }
 0x576   : > { %p4839_p9 = scmp.ne.s32.totalorder %s4404_s13, %s4838_s26  ;;  %s4842_s14 = sshll.u32 %s4981_s7, 4  ;;  %s4843_s14 = int_to_ptr.vmem [resolvable:$false] %s4842_s14 }
 0x577   : > { %s4844_s21 = scalar_lea.vmem %s4843_s14, 32  ;;  %p4845_p12 = scmp.lt.s32.totalorder %s4404_s13, %s4843_s14 }
 0x578   : > { %p4840_p10 = pnand %p4839_p9, %p5088_p8  ;;  %p4846_p0 = scmp.lt.s32.totalorder %s4844_s21, %s4838_s26 }
 0x57a   : > { %p4841_p11 = pneg %p4840_p10  ;;  %p4847_p1 = por %p4846_p0, %p4845_p12 }
 0x57c   : > { %p4848_p2 = pnand %p4847_p1, %p4841_p11 }
 0x57e   : > { %4851 = shalt.err (!%p4848_p2)
}
 0x57f   : > { %s4852_s24 = scalar_lea.hbm %s4401_s10, 16  ;;  %s4856_s6 = scalar_lea.hbm %s8872_s5, 32 }
 0x580   : > { %p4853_p3 = scmp.ne.s32.totalorder %s4401_s10, %s4852_s24  ;;  %p4857_p6 = scmp.lt.s32.totalorder %s4401_s10, %s8872_s5 }
 0x581   : > { %p4858_p7 = scmp.lt.s32.totalorder %s4856_s6, %s4852_s24 }
 0x582   : > { %p4854_p4 = pnand %p4853_p3, %p5088_p8 }
 0x583   : > { %p4859_p9 = por %p4858_p7, %p4857_p6 }
 0x584   : > { %p4855_p5 = pneg %p4854_p4 }
 0x586   : > { %p4860_p10 = pnand %p4859_p9, %p4855_p5 }
 0x588   : > { %4863 = shalt.err (!%p4860_p10)
}
 0x589   : > { %4587 = dma.vmem_to_hbm [thread:$0]  (%p5088_p8), %s4404_s13, 16, %s4401_s10, %s4391_s29  }
 0x58a PF: > { %p4593_p11 = scmp.ge.s32.totalorder %s4946_s27, 2  ;;  %s4415_s25 = sand.u32 1, %s4910_s18  }
 0x58b   : > { %s4416_s16 = scalar_lea.sflag [#allocation6], %s4415_s25 }
 0x58c   : > { %p4590_p12 = pnand %p4593_p11, %p5102_p13 }
 0x58e   : > { %p4591_p0 = pneg %p4590_p12 }
 0x590   : > { %4905 = dma.done.wait (%p4591_p0), %s4416_s16, 16  }
 0x591   : > { %4907 = vsyncadd (%p4591_p0), %s4416_s16, 4294967280  ;;  %s18_s27 = sadd.s32 1, %s4946_s27   ;;  %s9814_s21 = sld [smem:[#allocation8_spill]] }
 0x592   : > { %p15_p1 = scmp.ge.s32.totalorder %s18_s27, 6   ;;  %s9815_s22 = sld [smem:[#allocation13_spill]] }
 0x593   : > { %s9816_s23 = sld [smem:[#allocation9_spill]]  ;;  %s9820_s18 = smov %s4914_s19 }
 0x594   : > { %s9817_s24 = sld [smem:[#allocation10_spill]]  ;;  %s9821_s19 = smov %s4918_s20 }
 0x595   : > { %s9818_s25 = sld [smem:[#allocation11_spill]]  ;;  %s9822_s20 = smov %s5097_s15 }
 0x596   : > { %s9819_s26 = sld [smem:[#allocation12_spill]]  ;;  %17 = sbr.rel (!%p15_p1) target bundleno = 9 (0x9), region = 184 }
 0x59b   :  { %4420 = vsyncpa [#allocation6], 1 }
 0x59c   :  { %4422 = vsyncpa [#allocation6 + $0x1], 1 }

</bundles_post_ra>
